<compile_context>
chip_gen: v6e
topology: v6e:2x2x1
jax: 0.10.0
libtpu: 0.0.40
codegen_flags: <defaults>
</compile_context>

<pallas_src>
import functools

import jax
import jax.numpy as jnp
from jax.experimental import pallas as pl
from jax.experimental.pallas import tpu as pltpu


# ----------------------------------------------------------------------------
# Pallas kernels
# ----------------------------------------------------------------------------
def _matmul_bias_act_kernel(a_ref, b_ref, bias_ref, o_ref, *, activation):
    """o = act(a @ b + bias); bias broadcasts as (rows, 1) or (1, cols)."""
    y = jnp.dot(a_ref[...], b_ref[...], preferred_element_type=jnp.float32)
    y = y + bias_ref[...]
    if activation == "relu":
        y = jnp.maximum(y, 0.0)
    elif activation == "sigmoid":
        y = jax.nn.sigmoid(y)
    o_ref[...] = y


def matmul_bias(a, b, bias, activation=None):
    """Single-block MXU matmul + bias + optional activation (whole arrays in VMEM)."""
    M, K = a.shape
    _, N = b.shape
    return pl.pallas_call(
        functools.partial(_matmul_bias_act_kernel, activation=activation),
        out_shape=jax.ShapeDtypeStruct((M, N), jnp.float32),
    )(a.astype(jnp.float32), b.astype(jnp.float32), bias.astype(jnp.float32))


def _matmul_bn_relu_kernel(w_ref, x_ref, b_ref, g_ref, beta_ref, o_ref):
    """o = relu(batch_norm(w @ x + b)); rows = channels, cols = N*H*W (training BN)."""
    y = jnp.dot(w_ref[...], x_ref[...], preferred_element_type=jnp.float32)
    y = y + b_ref[...]
    mean = jnp.mean(y, axis=1, keepdims=True)
    var = jnp.mean((y - mean) ** 2, axis=1, keepdims=True)     # biased var
    yn = (y - mean) * jax.lax.rsqrt(var + 1e-5)
    o_ref[...] = jnp.maximum(yn * g_ref[...] + beta_ref[...], 0.0)


def matmul_bias_bn_relu(w, x, bias, gamma, beta):
    OC, _ = w.shape
    _, M = x.shape
    return pl.pallas_call(
        _matmul_bn_relu_kernel,
        out_shape=jax.ShapeDtypeStruct((OC, M), jnp.float32),
    )(w, x, bias, gamma, beta)


def _bn_relu_kernel(x_ref, g_ref, b_ref, o_ref):
    x = x_ref[...]
    mean = jnp.mean(x, axis=1, keepdims=True)
    var = jnp.mean((x - mean) ** 2, axis=1, keepdims=True)
    xn = (x - mean) * jax.lax.rsqrt(var + 1e-5)
    o_ref[...] = jnp.maximum(xn * g_ref[...] + b_ref[...], 0.0)


def bn_relu(x_cm, gamma, beta):
    """relu(batch_norm(x)) on a channel-major (C, N*H*W) slab (no transposes)."""
    C, M = x_cm.shape
    return pl.pallas_call(
        _bn_relu_kernel,
        out_shape=jax.ShapeDtypeStruct((C, M), jnp.float32),
    )(x_cm, gamma, beta)


def _stn_conv2_kernel(w_ref, x_ref, b_ref, o_ref):
    y = jnp.dot(w_ref[0], x_ref[0], preferred_element_type=jnp.float32) + b_ref[0]
    o_ref[0] = jnp.maximum(y, 0.0)


def stn_conv2(w, patches, bias):
    """Per-STN conv matmul (+relu), batched over a 'parallel' grid=(S,) STN axis."""
    S, OC, K = w.shape
    _, _, M = patches.shape
    return pl.pallas_call(
        _stn_conv2_kernel,
        out_shape=jax.ShapeDtypeStruct((S, OC, M), jnp.float32),
        grid=(S,),
        in_specs=[
            pl.BlockSpec((1, OC, K), lambda s: (s, 0, 0)),
            pl.BlockSpec((1, K, M), lambda s: (s, 0, 0)),
            pl.BlockSpec((1, OC, 1), lambda s: (s, 0, 0)),
        ],
        out_specs=pl.BlockSpec((1, OC, M), lambda s: (s, 0, 0)),
        compiler_params=pltpu.CompilerParams(dimension_semantics=("parallel",)),
    )(w, patches, bias)


def _stn_fc_kernel(x_ref, w1_ref, b1_ref, w2_ref, b2_ref, o_ref):
    h = jnp.dot(x_ref[0], w1_ref[0], preferred_element_type=jnp.float32) + b1_ref[0]
    h = jnp.maximum(h, 0.0)
    o_ref[0] = jnp.dot(h, w2_ref[0], preferred_element_type=jnp.float32) + b2_ref[0]


def stn_fc(x, w1t, b1, w2t, b2):
    """Fused fc1 + relu + fc2 for all STNs in one launch, grid over STN index."""
    S, N, K1 = x.shape
    H = w1t.shape[2]
    O = w2t.shape[2]
    return pl.pallas_call(
        _stn_fc_kernel,
        out_shape=jax.ShapeDtypeStruct((S, N, O), jnp.float32),
        grid=(S,),
        in_specs=[
            pl.BlockSpec((1, N, K1), lambda s: (s, 0, 0)),
            pl.BlockSpec((1, K1, H), lambda s: (s, 0, 0)),
            pl.BlockSpec((1, 1, H), lambda s: (s, 0, 0)),
            pl.BlockSpec((1, H, O), lambda s: (s, 0, 0)),
            pl.BlockSpec((1, 1, O), lambda s: (s, 0, 0)),
        ],
        out_specs=pl.BlockSpec((1, N, O), lambda s: (s, 0, 0)),
        compiler_params=pltpu.CompilerParams(dimension_semantics=("parallel",)),
    )(x, w1t, b1, w2t, b2)


def _bilinear_sample_kernel(wx_ref, wy_ref, x_ref, o_ref, *, n_img):
    # out[n, p] = sum_{y,x} Wy_t[n, y, p] * img[n, y, x] * Wx_t[n, x, p]
    rows = []
    for n in range(n_img):
        t = jnp.dot(x_ref[n], wx_ref[0, n],
                    preferred_element_type=jnp.float32)            # (Hin, P) on the MXU
        rows.append(jnp.sum(wy_ref[0, n] * t, axis=0, keepdims=True))  # (1, P)
    o_ref[0] = jnp.concatenate(rows, axis=0)


def bilinear_sample(wx_t, wy_t, x_img):
    """grid_sample(bilinear, zeros padding) as MXU contractions; grid over STN index."""
    S, N, Hin, P = wx_t.shape
    _, _, Win = x_img.shape
    return pl.pallas_call(
        functools.partial(_bilinear_sample_kernel, n_img=N),
        out_shape=jax.ShapeDtypeStruct((S, N, P), jnp.float32),
        grid=(S,),
        in_specs=[
            pl.BlockSpec((1, N, Hin, P), lambda s: (s, 0, 0, 0)),
            pl.BlockSpec((1, N, Hin, P), lambda s: (s, 0, 0, 0)),
            pl.BlockSpec((N, Hin, Win), lambda s: (0, 0, 0)),
        ],
        out_specs=pl.BlockSpec((1, N, P), lambda s: (s, 0, 0)),
        compiler_params=pltpu.CompilerParams(dimension_semantics=("parallel",)),
    )(wx_t, wy_t, x_img)


# ----------------------------------------------------------------------------
# XLA-side glue.  All tensors stay channel-major (C, N, H, W) so the (OC, M) matmul
# outputs feed the next layer with zero transposes.
# TODO(synk): patch extraction (im2col), reflection pad and 2x2 maxpool remain thin
# XLA slicing/reshape glue; moving them in-kernel (VMEM shifted slices) is possible
# but there is no single clean Pallas primitive for them.
# ----------------------------------------------------------------------------
def im2col_cnhw(x, kh, kw):
    """(..., C, N, H, W) -> (..., C*kh*kw, N*OH*OW); tap ordering (c, ki, kj)."""
    *lead, C, N, H, W = x.shape
    OH, OW = H - kh + 1, W - kw + 1
    cols = []
    for i in range(kh):
        for j in range(kw):
            cols.append(x[..., i:i + OH, j:j + OW])
    p = jnp.stack(cols, axis=-4)                      # (..., C, kh*kw, N, OH, OW)
    return p.reshape(*lead, C * kh * kw, N * OH * OW), (N, OH, OW)


def reflect_pad_cnhw(x, p):
    pad = [(0, 0)] * (x.ndim - 2) + [(p, p), (p, p)]
    return jnp.pad(x, pad, mode="reflect")


def maxpool2_cnhw(x):
    *lead, H, W = x.shape
    return x.reshape(*lead, H // 2, 2, W // 2, 2).max(axis=(-3, -1))


def affine_grid(theta, H, W):
    """F.affine_grid(theta, (N, C, H, W), align_corners=False); theta (S, N, 2, 3)."""
    xs = (jnp.arange(W, dtype=jnp.float32) + 0.5) * 2.0 / W - 1.0
    ys = (jnp.arange(H, dtype=jnp.float32) + 0.5) * 2.0 / H - 1.0
    gx, gy = jnp.meshgrid(xs, ys)
    base = jnp.stack([gx, gy, jnp.ones_like(gx)], -1)             # (H, W, 3)
    return jnp.einsum("hwk,snck->snhwc", base, theta)             # (S, N, H, W, 2)


def bilinear_weights(grid, hin, win):
    """Separable one-hot bilinear weights (zeros padding, align_corners=False).

    grid: (S, N, Ho, Wo, 2) -> (Wx_t, Wy_t) each (S, N, win|hin, Ho*Wo) such that
    out[s,n,p] = sum_{y,x} Wy_t[s,n,y,p] * img[n,y,x] * Wx_t[s,n,x,p] reproduces
    F.grid_sample(img, grid, mode='bilinear', padding_mode='zeros').
    """
    S, N, Ho, Wo, _ = grid.shape
    P = Ho * Wo
    gx = grid[..., 0].reshape(S, N, P)
    gy = grid[..., 1].reshape(S, N, P)
    ix = ((gx + 1.0) * win - 1.0) / 2.0
    iy = ((gy + 1.0) * hin - 1.0) / 2.0

    def axis_weights(coord, size):
        c0 = jnp.floor(coord)
        w1 = coord - c0
        w0 = 1.0 - w1
        c1 = c0 + 1.0
        r = jnp.arange(size, dtype=jnp.float32)[None, None, :, None]   # (1,1,size,1)

        def one_hot(c, w):
            valid = (c >= 0.0) & (c <= size - 1.0)
            cc = jnp.clip(c, 0.0, size - 1.0)
            return (w * valid)[:, :, None, :] * (r == cc[:, :, None, :])

        return one_hot(c0, w0) + one_hot(c1, w1)                   # (S, N, size, P)

    return axis_weights(ix, win), axis_weights(iy, hin)


# ----------------------------------------------------------------------------
# Model forward (channel-major internally; NCHW only at the module boundary)
# ----------------------------------------------------------------------------
def stn_forward(sp, x_img, z_img_c, out_hw=(42, 42)):
    """All 5 spatial transformers at once.

    x_img:   (N, 28, 28)  single-channel image to be resampled.
    z_img_c: (1, N, 42, 42) localization input (identical for all 5 STNs).
    Returns torch.cat([stn_i(x, z)], dim=1) in channel-major layout: (5, N, 42, 42).
    """
    S = 5
    # localization conv1 (1->8, k7) + relu, fused across the 5 STNs (OC = 40)
    patches, (N, OH, OW) = im2col_cnhw(z_img_c, 7, 7)              # (49, N*36*36)
    h = matmul_bias(sp["c1_wm"], patches, sp["c1_b"], activation="relu")
    h = maxpool2_cnhw(h.reshape(S, 8, N, OH, OW))                  # (5, 8, N, 18, 18)
    # localization conv2 (8->10, k5) + relu, per-STN weights, grid over STN
    patches, (_, OH, OW) = im2col_cnhw(h, 5, 5)                    # (5, 200, N*14*14)
    h = stn_conv2(sp["c2_wm"], patches, sp["c2_b"])                # (5, 10, N*14*14)
    h = maxpool2_cnhw(h.reshape(S, 10, N, OH, OW))                 # (5, 10, N, 7, 7)
    # flatten per-sample in PyTorch (c, h, w) order, then fused fc1+relu+fc2
    hf = h.transpose(0, 2, 1, 3, 4).reshape(S, N, 10 * 7 * 7)      # (5, N, 490)
    theta = stn_fc(hf, sp["fc1_wt"], sp["fc1_b"], sp["fc2_wt"], sp["fc2_b"])
    theta = theta.reshape(S, N, 2, 3)
    # sampling grid + bilinear resample of x (zeros padding) via MXU contractions
    Ho, Wo = out_hw
    grid = affine_grid(theta, Ho, Wo)                              # (5, N, Ho, Wo, 2)
    Hin, Win = x_img.shape[1:]
    wx_t, wy_t = bilinear_weights(grid, Hin, Win)                  # (5, N, 28, Ho*Wo)
    samples = bilinear_sample(wx_t, wy_t, x_img)                   # (5, N, Ho*Wo)
    return samples.reshape(S, N, Ho, Wo)


def block_forward(bp, xz_c):
    """Block(5): h2 = conv2(pad(relu(bn2(conv1(pad(relu(bn1(x)))))))); CNHW layout."""
    C, N, H, W = xz_c.shape
    h = bn_relu(xz_c.reshape(C, N * H * W), bp["bn1_g"], bp["bn1_b"])
    h = reflect_pad_cnhw(h.reshape(C, N, H, W), 2)
    patches, _ = im2col_cnhw(h, 5, 5)                              # (125, N*H*W)
    # conv1 with bn2 + relu fused into the matmul epilogue
    h = matmul_bias_bn_relu(bp["conv1_wm"], patches, bp["conv1_b"],
                            bp["bn2_g"], bp["bn2_b"])              # (5, N*H*W)
    h = reflect_pad_cnhw(h.reshape(C, N, H, W), 2)
    patches, _ = im2col_cnhw(h, 5, 5)
    h = matmul_bias(bp["conv2_wm"], patches, bp["conv2_b"])        # (5, N*H*W)
    return h.reshape(C, N, H, W)


def generator_forward(params, x, z):
    N = z.shape[0]
    # fc: (N,128) @ (128,1764) -> (N,1764); lane-dense output, reshapes to C=1 CNHW for free
    zf = matmul_bias(z, params["fc_wt"], params["fc_b"])           # (N, 1764)
    z_img_c = zf.reshape(N, 42, 42)[None]                          # (1, N, 42, 42)
    x_img = x[:, 0].astype(jnp.float32)                            # (N, 28, 28)
    xz_c = stn_forward(params["stn"], x_img, z_img_c)              # (5, N, 42, 42)
    h = block_forward(params["block"], xz_c)                       # (5, N, 42, 42)
    h = reflect_pad_cnhw(h, 2)
    patches, _ = im2col_cnhw(h, 5, 5)                              # (125, N*1764)
    y = matmul_bias(params["conv_wm"], patches, params["conv_b"],
                    activation="sigmoid")                          # (1, N*1764)
    return jnp.moveaxis(y.reshape(1, N, 42, 42), 0, 1)             # (N, 1, 42, 42)


# ----------------------------------------------------------------------------
# Deterministic parameter init (PyTorch layouts) + one-time kernel-layout repack
# ----------------------------------------------------------------------------
def init_params(key):
    keys = iter(jax.random.split(key, 64))

    def nrm(shape, scale=0.05):
        return scale * jax.random.normal(next(keys), shape, dtype=jnp.float32)

    params = {
        "fc_w": nrm((42 * 42, 128)),
        "fc_b": nrm((42 * 42,)),
        "stn": [],
        "block": {
            "bn1_g": jnp.ones((5,), jnp.float32),
            "bn1_b": jnp.zeros((5,), jnp.float32),
            "bn2_g": jnp.ones((5,), jnp.float32),
            "bn2_b": jnp.zeros((5,), jnp.float32),
            "conv1_w": nrm((5, 5, 5, 5)),
            "conv1_b": nrm((5,)),
            "conv2_w": nrm((5, 5, 5, 5)),
            "conv2_b": nrm((5,)),
        },
        "conv_w": nrm((1, 5, 5, 5)),
        "conv_b": nrm((1,)),
    }
    for _ in range(5):
        params["stn"].append({
            "c1_w": nrm((8, 1, 7, 7)),
            "c1_b": nrm((8,)),
            "c2_w": nrm((10, 8, 5, 5)),
            "c2_b": nrm((10,)),
            "fc1_w": nrm((32, 10 * 7 * 7)),
            "fc1_b": nrm((32,)),
            "fc2_w": nrm((6, 32), scale=0.01),
            "fc2_b": jnp.array([1, 0, 0, 0, 1, 0], dtype=jnp.float32),  # identity affine
        })
    return params


def prepare_params(p):
    """One-time repack: pre-reshape / pre-transpose / pre-stack all weights so the
    forward pass contains zero per-layer weight transposes (review feedback)."""
    stn = p["stn"]
    blk = p["block"]
    return {
        "fc_wt": p["fc_w"].T,                                              # (128, 1764)
        "fc_b": p["fc_b"].reshape(1, -1),                                  # (1, 1764)
        "stn": {
            "c1_wm": jnp.concatenate(
                [s["c1_w"].reshape(8, 1 * 7 * 7) for s in stn], axis=0),   # (40, 49)
            "c1_b": jnp.concatenate(
                [s["c1_b"] for s in stn], axis=0).reshape(40, 1),          # (40, 1)
            "c2_wm": jnp.stack([s["c2_w"].reshape(10, 8 * 5 * 5) for s in stn]),  # (5,10,200)
            "c2_b": jnp.stack([s["c2_b"].reshape(10, 1) for s in stn]),           # (5,10,1)
            "fc1_wt": jnp.stack([s["fc1_w"].T for s in stn]),                     # (5,490,32)
            "fc1_b": jnp.stack([s["fc1_b"].reshape(1, 32) for s in stn]),         # (5,1,32)
            "fc2_wt": jnp.stack([s["fc2_w"].T for s in stn]),                     # (5,32,6)
            "fc2_b": jnp.stack([s["fc2_b"].reshape(1, 6) for s in stn]),          # (5,1,6)
        },
        "block": {
            "conv1_wm": blk["conv1_w"].reshape(5, 5 * 5 * 5),              # (5, 125)
            "conv1_b": blk["conv1_b"].reshape(5, 1),
            "conv2_wm": blk["conv2_w"].reshape(5, 5 * 5 * 5),
            "conv2_b": blk["conv2_b"].reshape(5, 1),
            "bn1_g": blk["bn1_g"].reshape(5, 1),
            "bn1_b": blk["bn1_b"].reshape(5, 1),
            "bn2_g": blk["bn2_g"].reshape(5, 1),
            "bn2_b": blk["bn2_b"].reshape(5, 1),
        },
        "conv_wm": p["conv_w"].reshape(1, 5 * 5 * 5),                      # (1, 125)
        "conv_b": p["conv_b"].reshape(1, 1),
    }


if __name__ == "__main__":
    key = jax.random.PRNGKey(0)
    kp, kx, kz = jax.random.split(key, 3)
    params = prepare_params(init_params(kp))

    # forward(x, z): x is an MNIST-style image batch, z a latent code of dim 128
    x = jax.random.uniform(kx, (2, 1, 28, 28), dtype=jnp.float32)
    z = jax.random.normal(kz, (2, 128), dtype=jnp.float32)

    fwd = jax.jit(generator_forward)
    out = jax.block_until_ready(fwd(params, x, z))

    assert out.shape == (2, 1, 42, 42), out.shape
    assert bool(jnp.all(jnp.isfinite(out)))
    assert bool(jnp.all((out >= 0.0) & (out <= 1.0)))  # sigmoid output
    print("KERNEL_OK")
</pallas_src>

<mosaic_0001>
module attributes {stable_mosaic.version = 11 : i64} {
  func.func @_matmul_bias_act_kernel(%arg0: memref<2x128xf32, #tpu.memory_space<vmem>>, %arg1: memref<128x1764xf32, #tpu.memory_space<vmem>>, %arg2: memref<1x1764xf32, #tpu.memory_space<vmem>>, %arg3: memref<2x1764xf32, #tpu.memory_space<vmem>>) attributes {dimension_semantics = [], scalar_prefetch = 0 : i64, scratch_operands = 0 : i64, tpu.core_type = #tpu.core_type<tc>} {
    %c0 = arith.constant 0 : index
    %c0_0 = arith.constant 0 : index
    %0 = vector.load %arg0[%c0, %c0_0] : memref<2x128xf32, #tpu.memory_space<vmem>>, vector<2x128xf32>
    %c0_1 = arith.constant 0 : index
    %c0_2 = arith.constant 0 : index
    %1 = vector.load %arg1[%c0_1, %c0_2] : memref<128x1764xf32, #tpu.memory_space<vmem>>, vector<128x1764xf32>
    %cst = arith.constant dense<0.000000e+00> : vector<2x1764xf32>
    %2 = tpu.matmul %0, %1, %cst {dimension_numbers = #tpu.dot_dimension_numbers<[1], [0], [0], [1], [0, 0, 1, 1], [], []>} : vector<2x128xf32>, vector<128x1764xf32>, vector<2x1764xf32> -> vector<2x1764xf32>
    %c0_3 = arith.constant 0 : index
    %c0_4 = arith.constant 0 : index
    %3 = vector.load %arg2[%c0_3, %c0_4] : memref<1x1764xf32, #tpu.memory_space<vmem>>, vector<1x1764xf32>
    %4 = vector.broadcast %3 : vector<1x1764xf32> to vector<2x1764xf32>
    %5 = arith.addf %2, %4 : vector<2x1764xf32>
    %c0_5 = arith.constant 0 : index
    %c0_6 = arith.constant 0 : index
    %6 = vector.load %arg3[%c0_5, %c0_6] : memref<2x1764xf32, #tpu.memory_space<vmem>>, vector<2x1764xf32>
    tpu.vector_store %arg3[%c0_5, %c0_6], %5 {strides = array<i32>} : memref<2x1764xf32, #tpu.memory_space<vmem>>, vector<2x1764xf32>,
    return
  }
}

module attributes {stable_mosaic.version = 11 : i64} {
  func.func @_matmul_bias_act_kernel(%arg0: memref<40x49xf32, #tpu.memory_space<vmem>>, %arg1: memref<49x2592xf32, #tpu.memory_space<vmem>>, %arg2: memref<40x1xf32, #tpu.memory_space<vmem>>, %arg3: memref<40x2592xf32, #tpu.memory_space<vmem>>) attributes {dimension_semantics = [], scalar_prefetch = 0 : i64, scratch_operands = 0 : i64, tpu.core_type = #tpu.core_type<tc>} {
    %c0 = arith.constant 0 : index
    %c0_0 = arith.constant 0 : index
    %0 = vector.load %arg0[%c0, %c0_0] : memref<40x49xf32, #tpu.memory_space<vmem>>, vector<40x49xf32>
    %c0_1 = arith.constant 0 : index
    %c0_2 = arith.constant 0 : index
    %1 = vector.load %arg1[%c0_1, %c0_2] : memref<49x2592xf32, #tpu.memory_space<vmem>>, vector<49x2592xf32>
    %cst = arith.constant dense<0.000000e+00> : vector<40x2592xf32>
    %2 = tpu.matmul %0, %1, %cst {dimension_numbers = #tpu.dot_dimension_numbers<[1], [0], [0], [1], [0, 0, 1, 1], [], []>} : vector<40x49xf32>, vector<49x2592xf32>, vector<40x2592xf32> -> vector<40x2592xf32>
    %c0_3 = arith.constant 0 : index
    %c0_4 = arith.constant 0 : index
    %3 = vector.load %arg2[%c0_3, %c0_4] : memref<40x1xf32, #tpu.memory_space<vmem>>, vector<40x1xf32>
    %4 = vector.broadcast %3 : vector<40x1xf32> to vector<40x2592xf32>
    %5 = arith.addf %2, %4 : vector<40x2592xf32>
    %cst_5 = arith.constant 0.000000e+00 : f32
    %6 = vector.broadcast %cst_5 : f32 to vector<40x2592xf32>
    %7 = arith.maximumf %5, %6 : vector<40x2592xf32>
    %c0_6 = arith.constant 0 : index
    %c0_7 = arith.constant 0 : index
    %8 = vector.load %arg3[%c0_6, %c0_7] : memref<40x2592xf32, #tpu.memory_space<vmem>>, vector<40x2592xf32>
    tpu.vector_store %arg3[%c0_6, %c0_7], %7 {strides = array<i32>} : memref<40x2592xf32, #tpu.memory_space<vmem>>, vector<40x2592xf32>,
    return
  }
}

module attributes {stable_mosaic.version = 11 : i64} {
  func.func @_stn_conv2_kernel(%arg0: i32, %arg1: memref<1x10x200xf32, #tpu.memory_space<vmem>>, %arg2: memref<1x200x392xf32, #tpu.memory_space<vmem>>, %arg3: memref<1x10x1xf32, #tpu.memory_space<vmem>>, %arg4: memref<1x10x392xf32, #tpu.memory_space<vmem>>) attributes {dimension_semantics = [#tpu.dimension_semantics<parallel>], iteration_bounds = array<i64: 5>, scalar_prefetch = 0 : i64, scratch_operands = 0 : i64, tpu.core_type = #tpu.core_type<tc>, window_params = [{transform_indices = @transform_0, window_bounds = array<i64: 1, 10, 200>}, {transform_indices = @transform_1, window_bounds = array<i64: 1, 200, 392>}, {transform_indices = @transform_2, window_bounds = array<i64: 1, 10, 1>}, {transform_indices = @transform_3, window_bounds = array<i64: 1, 10, 392>}]} {
    %c0 = arith.constant 0 : index
    %c0_0 = arith.constant 0 : index
    %c0_1 = arith.constant 0 : index
    %0 = vector.load %arg1[%c0, %c0_0, %c0_1] : memref<1x10x200xf32, #tpu.memory_space<vmem>>, vector<1x10x200xf32>
    %1 = vector.shape_cast %0 : vector<1x10x200xf32> to vector<10x200xf32>
    %c0_2 = arith.constant 0 : index
    %c0_3 = arith.constant 0 : index
    %c0_4 = arith.constant 0 : index
    %2 = vector.load %arg2[%c0_2, %c0_3, %c0_4] : memref<1x200x392xf32, #tpu.memory_space<vmem>>, vector<1x200x392xf32>
    %3 = vector.shape_cast %2 : vector<1x200x392xf32> to vector<200x392xf32>
    %cst = arith.constant dense<0.000000e+00> : vector<10x392xf32>
    %4 = tpu.matmul %1, %3, %cst {dimension_numbers = #tpu.dot_dimension_numbers<[1], [0], [0], [1], [0, 0, 1, 1], [], []>} : vector<10x200xf32>, vector<200x392xf32>, vector<10x392xf32> -> vector<10x392xf32>
    %c0_5 = arith.constant 0 : index
    %c0_6 = arith.constant 0 : index
    %c0_7 = arith.constant 0 : index
    %5 = vector.load %arg3[%c0_5, %c0_6, %c0_7] : memref<1x10x1xf32, #tpu.memory_space<vmem>>, vector<1x10x1xf32>
    %6 = vector.shape_cast %5 : vector<1x10x1xf32> to vector<10x1xf32>
    %7 = vector.broadcast %6 : vector<10x1xf32> to vector<10x392xf32>
    %8 = arith.addf %4, %7 : vector<10x392xf32>
    %cst_8 = arith.constant 0.000000e+00 : f32
    %9 = vector.broadcast %cst_8 : f32 to vector<10x392xf32>
    %10 = arith.maximumf %8, %9 : vector<10x392xf32>
    %c0_9 = arith.constant 0 : index
    %c0_10 = arith.constant 0 : index
    %c0_11 = arith.constant 0 : index
    %11 = vector.load %arg4[%c0_9, %c0_10, %c0_11] : memref<1x10x392xf32, #tpu.memory_space<vmem>>, vector<1x10x392xf32>
    %12 = vector.shape_cast %11 : vector<1x10x392xf32> to vector<10x392xf32>
    %13 = vector.shape_cast %10 : vector<10x392xf32> to vector<1x10x392xf32>
    tpu.vector_store %arg4[%c0_9, %c0_10, %c0_11], %13 {strides = array<i32>} : memref<1x10x392xf32, #tpu.memory_space<vmem>>, vector<1x10x392xf32>,
    return
  }
  func.func @transform_0(%arg0: i32) -> (i32, i32, i32) {
    %c0_i32 = arith.constant 0 : i32
    %c0_i32_0 = arith.constant 0 : i32
    %c0_i32_1 = arith.constant 0 : i32
    return %arg0, %c0_i32, %c0_i32_0 : i32, i32, i32
  }
  func.func @transform_1(%arg0: i32) -> (i32, i32, i32) {
    %c0_i32 = arith.constant 0 : i32
    %c0_i32_0 = arith.constant 0 : i32
    %c0_i32_1 = arith.constant 0 : i32
    return %arg0, %c0_i32, %c0_i32_0 : i32, i32, i32
  }
  func.func @transform_2(%arg0: i32) -> (i32, i32, i32) {
    %c0_i32 = arith.constant 0 : i32
    %c0_i32_0 = arith.constant 0 : i32
    %c0_i32_1 = arith.constant 0 : i32
    return %arg0, %c0_i32, %c0_i32_0 : i32, i32, i32
  }
  func.func @transform_3(%arg0: i32) -> (i32, i32, i32) {
    %c0_i32 = arith.constant 0 : i32
    %c0_i32_0 = arith.constant 0 : i32
    %c0_i32_1 = arith.constant 0 : i32
    return %arg0, %c0_i32, %c0_i32_0 : i32, i32, i32
  }
}

module attributes {stable_mosaic.version = 11 : i64} {
  func.func @_stn_fc_kernel(%arg0: i32, %arg1: memref<1x2x490xf32, #tpu.memory_space<vmem>>, %arg2: memref<1x490x32xf32, #tpu.memory_space<vmem>>, %arg3: memref<1x1x32xf32, #tpu.memory_space<vmem>>, %arg4: memref<1x32x6xf32, #tpu.memory_space<vmem>>, %arg5: memref<1x1x6xf32, #tpu.memory_space<vmem>>, %arg6: memref<1x2x6xf32, #tpu.memory_space<vmem>>) attributes {dimension_semantics = [#tpu.dimension_semantics<parallel>], iteration_bounds = array<i64: 5>, scalar_prefetch = 0 : i64, scratch_operands = 0 : i64, tpu.core_type = #tpu.core_type<tc>, window_params = [{transform_indices = @transform_0, window_bounds = array<i64: 1, 2, 490>}, {transform_indices = @transform_1, window_bounds = array<i64: 1, 490, 32>}, {transform_indices = @transform_2, window_bounds = array<i64: 1, 1, 32>}, {transform_indices = @transform_3, window_bounds = array<i64: 1, 32, 6>}, {transform_indices = @transform_4, window_bounds = array<i64: 1, 1, 6>}, {transform_indices = @transform_5, window_bounds = array<i64: 1, 2, 6>}]} {
    %c0 = arith.constant 0 : index
    %c0_0 = arith.constant 0 : index
    %c0_1 = arith.constant 0 : index
    %0 = vector.load %arg1[%c0, %c0_0, %c0_1] : memref<1x2x490xf32, #tpu.memory_space<vmem>>, vector<1x2x490xf32>
    %1 = vector.shape_cast %0 : vector<1x2x490xf32> to vector<2x490xf32>
    %c0_2 = arith.constant 0 : index
    %c0_3 = arith.constant 0 : index
    %c0_4 = arith.constant 0 : index
    %2 = vector.load %arg2[%c0_2, %c0_3, %c0_4] : memref<1x490x32xf32, #tpu.memory_space<vmem>>, vector<1x490x32xf32>
    %3 = vector.shape_cast %2 : vector<1x490x32xf32> to vector<490x32xf32>
    %cst = arith.constant dense<0.000000e+00> : vector<2x32xf32>
    %4 = tpu.matmul %1, %3, %cst {dimension_numbers = #tpu.dot_dimension_numbers<[1], [0], [0], [1], [0, 0, 1, 1], [], []>} : vector<2x490xf32>, vector<490x32xf32>, vector<2x32xf32> -> vector<2x32xf32>
    %c0_5 = arith.constant 0 : index
    %c0_6 = arith.constant 0 : index
    %c0_7 = arith.constant 0 : index
    %5 = vector.load %arg3[%c0_5, %c0_6, %c0_7] : memref<1x1x32xf32, #tpu.memory_space<vmem>>, vector<1x1x32xf32>
    %6 = vector.shape_cast %5 : vector<1x1x32xf32> to vector<1x32xf32>
    %7 = vector.broadcast %6 : vector<1x32xf32> to vector<2x32xf32>
    %8 = arith.addf %4, %7 : vector<2x32xf32>
    %cst_8 = arith.constant 0.000000e+00 : f32
    %9 = vector.broadcast %cst_8 : f32 to vector<2x32xf32>
    %10 = arith.maximumf %8, %9 : vector<2x32xf32>
    %c0_9 = arith.constant 0 : index
    %c0_10 = arith.constant 0 : index
    %c0_11 = arith.constant 0 : index
    %11 = vector.load %arg4[%c0_9, %c0_10, %c0_11] : memref<1x32x6xf32, #tpu.memory_space<vmem>>, vector<1x32x6xf32>
    %12 = vector.shape_cast %11 : vector<1x32x6xf32> to vector<32x6xf32>
    %cst_12 = arith.constant dense<0.000000e+00> : vector<2x6xf32>
    %13 = tpu.matmul %10, %12, %cst_12 {dimension_numbers = #tpu.dot_dimension_numbers<[1], [0], [0], [1], [0, 0, 1, 1], [], []>} : vector<2x32xf32>, vector<32x6xf32>, vector<2x6xf32> -> vector<2x6xf32>
    %c0_13 = arith.constant 0 : index
    %c0_14 = arith.constant 0 : index
    %c0_15 = arith.constant 0 : index
    %14 = vector.load %arg5[%c0_13, %c0_14, %c0_15] : memref<1x1x6xf32, #tpu.memory_space<vmem>>, vector<1x1x6xf32>
    %15 = vector.shape_cast %14 : vector<1x1x6xf32> to vector<1x6xf32>
    %16 = vector.broadcast %15 : vector<1x6xf32> to vector<2x6xf32>
    %17 = arith.addf %13, %16 : vector<2x6xf32>
    %c0_16 = arith.constant 0 : index
    %c0_17 = arith.constant 0 : index
    %c0_18 = arith.constant 0 : index
    %18 = vector.load %arg6[%c0_16, %c0_17, %c0_18] : memref<1x2x6xf32, #tpu.memory_space<vmem>>, vector<1x2x6xf32>
    %19 = vector.shape_cast %18 : vector<1x2x6xf32> to vector<2x6xf32>
    %20 = vector.shape_cast %17 : vector<2x6xf32> to vector<1x2x6xf32>
    tpu.vector_store %arg6[%c0_16, %c0_17, %c0_18], %20 {strides = array<i32>} : memref<1x2x6xf32, #tpu.memory_space<vmem>>, vector<1x2x6xf32>,
    return
  }
  func.func @transform_0(%arg0: i32) -> (i32, i32, i32) {
    %c0_i32 = arith.constant 0 : i32
    %c0_i32_0 = arith.constant 0 : i32
    %c0_i32_1 = arith.constant 0 : i32
    return %arg0, %c0_i32, %c0_i32_0 : i32, i32, i32
  }
  func.func @transform_1(%arg0: i32) -> (i32, i32, i32) {
    %c0_i32 = arith.constant 0 : i32
    %c0_i32_0 = arith.constant 0 : i32
    %c0_i32_1 = arith.constant 0 : i32
    return %arg0, %c0_i32, %c0_i32_0 : i32, i32, i32
  }
  func.func @transform_2(%arg0: i32) -> (i32, i32, i32) {
    %c0_i32 = arith.constant 0 : i32
    %c0_i32_0 = arith.constant 0 : i32
    %c0_i32_1 = arith.constant 0 : i32
    return %arg0, %c0_i32, %c0_i32_0 : i32, i32, i32
  }
  func.func @transform_3(%arg0: i32) -> (i32, i32, i32) {
    %c0_i32 = arith.constant 0 : i32
    %c0_i32_0 = arith.constant 0 : i32
    %c0_i32_1 = arith.constant 0 : i32
    return %arg0, %c0_i32, %c0_i32_0 : i32, i32, i32
  }
  func.func @transform_4(%arg0: i32) -> (i32, i32, i32) {
    %c0_i32 = arith.constant 0 : i32
    %c0_i32_0 = arith.constant 0 : i32
    %c0_i32_1 = arith.constant 0 : i32
    return %arg0, %c0_i32, %c0_i32_0 : i32, i32, i32
  }
  func.func @transform_5(%arg0: i32) -> (i32, i32, i32) {
    %c0_i32 = arith.constant 0 : i32
    %c0_i32_0 = arith.constant 0 : i32
    %c0_i32_1 = arith.constant 0 : i32
    return %arg0, %c0_i32, %c0_i32_0 : i32, i32, i32
  }
}

module attributes {stable_mosaic.version = 11 : i64} {
  func.func @_bilinear_sample_kernel(%arg0: i32, %arg1: memref<1x2x28x1764xf32, #tpu.memory_space<vmem>>, %arg2: memref<1x2x28x1764xf32, #tpu.memory_space<vmem>>, %arg3: memref<2x28x28xf32, #tpu.memory_space<vmem>>, %arg4: memref<1x2x1764xf32, #tpu.memory_space<vmem>>) attributes {dimension_semantics = [#tpu.dimension_semantics<parallel>], iteration_bounds = array<i64: 5>, scalar_prefetch = 0 : i64, scratch_operands = 0 : i64, tpu.core_type = #tpu.core_type<tc>, window_params = [{transform_indices = @transform_0, window_bounds = array<i64: 1, 2, 28, 1764>}, {transform_indices = @transform_1, window_bounds = array<i64: 1, 2, 28, 1764>}, {pipeline_mode = #tpu.pipeline_mode<synchronous>, transform_indices = @transform_2, window_bounds = array<i64: 2, 28, 28>}, {transform_indices = @transform_3, window_bounds = array<i64: 1, 2, 1764>}]} {
    %c0 = arith.constant 0 : index
    %c0_0 = arith.constant 0 : index
    %c0_1 = arith.constant 0 : index
    %0 = vector.load %arg3[%c0, %c0_0, %c0_1] : memref<2x28x28xf32, #tpu.memory_space<vmem>>, vector<1x28x28xf32>
    %1 = vector.shape_cast %0 : vector<1x28x28xf32> to vector<28x28xf32>
    %c0_2 = arith.constant 0 : index
    %c0_3 = arith.constant 0 : index
    %c0_4 = arith.constant 0 : index
    %c0_5 = arith.constant 0 : index
    %2 = vector.load %arg1[%c0_2, %c0_3, %c0_4, %c0_5] : memref<1x2x28x1764xf32, #tpu.memory_space<vmem>>, vector<1x1x28x1764xf32>
    %3 = vector.shape_cast %2 : vector<1x1x28x1764xf32> to vector<28x1764xf32>
    %cst = arith.constant dense<0.000000e+00> : vector<28x1764xf32>
    %4 = tpu.matmul %1, %3, %cst {dimension_numbers = #tpu.dot_dimension_numbers<[1], [0], [0], [1], [0, 0, 1, 1], [], []>} : vector<28x28xf32>, vector<28x1764xf32>, vector<28x1764xf32> -> vector<28x1764xf32>
    %c0_6 = arith.constant 0 : index
    %c0_7 = arith.constant 0 : index
    %c0_8 = arith.constant 0 : index
    %c0_9 = arith.constant 0 : index
    %5 = vector.load %arg2[%c0_6, %c0_7, %c0_8, %c0_9] : memref<1x2x28x1764xf32, #tpu.memory_space<vmem>>, vector<1x1x28x1764xf32>
    %6 = vector.shape_cast %5 : vector<1x1x28x1764xf32> to vector<28x1764xf32>
    %7 = arith.mulf %6, %4 : vector<28x1764xf32>
    %cst_10 = arith.constant dense<0.000000e+00> : vector<1764xf32>
    %8 = vector.multi_reduction <add>, %7, %cst_10 [0] : vector<28x1764xf32> to vector<1764xf32>
    %9 = vector.shape_cast %8 : vector<1764xf32> to vector<1x1764xf32>
    %c1 = arith.constant 1 : index
    %c0_11 = arith.constant 0 : index
    %c0_12 = arith.constant 0 : index
    %10 = vector.load %arg3[%c1, %c0_11, %c0_12] : memref<2x28x28xf32, #tpu.memory_space<vmem>>, vector<1x28x28xf32>
    %11 = vector.shape_cast %10 : vector<1x28x28xf32> to vector<28x28xf32>
    %c0_13 = arith.constant 0 : index
    %c1_14 = arith.constant 1 : index
    %c0_15 = arith.constant 0 : index
    %c0_16 = arith.constant 0 : index
    %12 = vector.load %arg1[%c0_13, %c1_14, %c0_15, %c0_16] : memref<1x2x28x1764xf32, #tpu.memory_space<vmem>>, vector<1x1x28x1764xf32>
    %13 = vector.shape_cast %12 : vector<1x1x28x1764xf32> to vector<28x1764xf32>
    %cst_17 = arith.constant dense<0.000000e+00> : vector<28x1764xf32>
    %14 = tpu.matmul %11, %13, %cst_17 {dimension_numbers = #tpu.dot_dimension_numbers<[1], [0], [0], [1], [0, 0, 1, 1], [], []>} : vector<28x28xf32>, vector<28x1764xf32>, vector<28x1764xf32> -> vector<28x1764xf32>
    %c0_18 = arith.constant 0 : index
    %c1_19 = arith.constant 1 : index
    %c0_20 = arith.constant 0 : index
    %c0_21 = arith.constant 0 : index
    %15 = vector.load %arg2[%c0_18, %c1_19, %c0_20, %c0_21] : memref<1x2x28x1764xf32, #tpu.memory_space<vmem>>, vector<1x1x28x1764xf32>
    %16 = vector.shape_cast %15 : vector<1x1x28x1764xf32> to vector<28x1764xf32>
    %17 = arith.mulf %16, %14 : vector<28x1764xf32>
    %cst_22 = arith.constant dense<0.000000e+00> : vector<1764xf32>
    %18 = vector.multi_reduction <add>, %17, %cst_22 [0] : vector<28x1764xf32> to vector<1764xf32>
    %19 = vector.shape_cast %18 : vector<1764xf32> to vector<1x1764xf32>
    %20 = tpu.concatenate %9, %19 in 0 : vector<1x1764xf32>, vector<1x1764xf32> -> vector<2x1764xf32>
    %c0_23 = arith.constant 0 : index
    %c0_24 = arith.constant 0 : index
    %c0_25 = arith.constant 0 : index
    %21 = vector.load %arg4[%c0_23, %c0_24, %c0_25] : memref<1x2x1764xf32, #tpu.memory_space<vmem>>, vector<1x2x1764xf32>
    %22 = vector.shape_cast %21 : vector<1x2x1764xf32> to vector<2x1764xf32>
    %23 = vector.shape_cast %20 : vector<2x1764xf32> to vector<1x2x1764xf32>
    tpu.vector_store %arg4[%c0_23, %c0_24, %c0_25], %23 {strides = array<i32>} : memref<1x2x1764xf32, #tpu.memory_space<vmem>>, vector<1x2x1764xf32>,
    return
  }
  func.func @transform_0(%arg0: i32) -> (i32, i32, i32, i32) {
    %c0_i32 = arith.constant 0 : i32
    %c0_i32_0 = arith.constant 0 : i32
    %c0_i32_1 = arith.constant 0 : i32
    %c0_i32_2 = arith.constant 0 : i32
    return %arg0, %c0_i32, %c0_i32_0, %c0_i32_1 : i32, i32, i32, i32
  }
  func.func @transform_1(%arg0: i32) -> (i32, i32, i32, i32) {
    %c0_i32 = arith.constant 0 : i32
    %c0_i32_0 = arith.constant 0 : i32
    %c0_i32_1 = arith.constant 0 : i32
    %c0_i32_2 = arith.constant 0 : i32
    return %arg0, %c0_i32, %c0_i32_0, %c0_i32_1 : i32, i32, i32, i32
  }
  func.func @transform_2(%arg0: i32) -> (i32, i32, i32) {
    %c0_i32 = arith.constant 0 : i32
    %c0_i32_0 = arith.constant 0 : i32
    %c0_i32_1 = arith.constant 0 : i32
    %c0_i32_2 = arith.constant 0 : i32
    return %c0_i32, %c0_i32_0, %c0_i32_1 : i32, i32, i32
  }
  func.func @transform_3(%arg0: i32) -> (i32, i32, i32) {
    %c0_i32 = arith.constant 0 : i32
    %c0_i32_0 = arith.constant 0 : i32
    %c0_i32_1 = arith.constant 0 : i32
    return %arg0, %c0_i32, %c0_i32_0 : i32, i32, i32
  }
}

module attributes {stable_mosaic.version = 11 : i64} {
  func.func @_bn_relu_kernel(%arg0: memref<5x3528xf32, #tpu.memory_space<vmem>>, %arg1: memref<5x1xf32, #tpu.memory_space<vmem>>, %arg2: memref<5x1xf32, #tpu.memory_space<vmem>>, %arg3: memref<5x3528xf32, #tpu.memory_space<vmem>>) attributes {dimension_semantics = [], scalar_prefetch = 0 : i64, scratch_operands = 0 : i64, tpu.core_type = #tpu.core_type<tc>} {
    %c0 = arith.constant 0 : index
    %c0_0 = arith.constant 0 : index
    %0 = vector.load %arg0[%c0, %c0_0] : memref<5x3528xf32, #tpu.memory_space<vmem>>, vector<5x3528xf32>
    %cst = arith.constant dense<0.000000e+00> : vector<5xf32>
    %1 = vector.multi_reduction <add>, %0, %cst [1] : vector<5x3528xf32> to vector<5xf32>
    %2 = vector.shape_cast %1 : vector<5xf32> to vector<5x1xf32>
    %cst_1 = arith.constant 3.528000e+03 : f32
    %3 = vector.broadcast %cst_1 : f32 to vector<5x1xf32>
    %4 = arith.divf %2, %3 : vector<5x1xf32>
    %5 = vector.broadcast %4 : vector<5x1xf32> to vector<5x3528xf32>
    %6 = arith.subf %0, %5 : vector<5x3528xf32>
    %7 = arith.mulf %6, %6 : vector<5x3528xf32>
    %cst_2 = arith.constant dense<0.000000e+00> : vector<5xf32>
    %8 = vector.multi_reduction <add>, %7, %cst_2 [1] : vector<5x3528xf32> to vector<5xf32>
    %9 = vector.shape_cast %8 : vector<5xf32> to vector<5x1xf32>
    %cst_3 = arith.constant 3.528000e+03 : f32
    %10 = vector.broadcast %cst_3 : f32 to vector<5x1xf32>
    %11 = arith.divf %9, %10 : vector<5x1xf32>
    %12 = vector.broadcast %4 : vector<5x1xf32> to vector<5x3528xf32>
    %13 = arith.subf %0, %12 : vector<5x3528xf32>
    %cst_4 = arith.constant 9.99999974E-6 : f32
    %14 = vector.broadcast %cst_4 : f32 to vector<5x1xf32>
    %15 = arith.addf %11, %14 : vector<5x1xf32>
    %16 = math.rsqrt %15 : vector<5x1xf32>
    %17 = vector.broadcast %16 : vector<5x1xf32> to vector<5x3528xf32>
    %18 = arith.mulf %13, %17 : vector<5x3528xf32>
    %c0_5 = arith.constant 0 : index
    %c0_6 = arith.constant 0 : index
    %19 = vector.load %arg1[%c0_5, %c0_6] : memref<5x1xf32, #tpu.memory_space<vmem>>, vector<5x1xf32>
    %20 = vector.broadcast %19 : vector<5x1xf32> to vector<5x3528xf32>
    %21 = arith.mulf %18, %20 : vector<5x3528xf32>
    %c0_7 = arith.constant 0 : index
    %c0_8 = arith.constant 0 : index
    %22 = vector.load %arg2[%c0_7, %c0_8] : memref<5x1xf32, #tpu.memory_space<vmem>>, vector<5x1xf32>
    %23 = vector.broadcast %22 : vector<5x1xf32> to vector<5x3528xf32>
    %24 = arith.addf %21, %23 : vector<5x3528xf32>
    %cst_9 = arith.constant 0.000000e+00 : f32
    %25 = vector.broadcast %cst_9 : f32 to vector<5x3528xf32>
    %26 = arith.maximumf %24, %25 : vector<5x3528xf32>
    %c0_10 = arith.constant 0 : index
    %c0_11 = arith.constant 0 : index
    %27 = vector.load %arg3[%c0_10, %c0_11] : memref<5x3528xf32, #tpu.memory_space<vmem>>, vector<5x3528xf32>
    tpu.vector_store %arg3[%c0_10, %c0_11], %26 {strides = array<i32>} : memref<5x3528xf32, #tpu.memory_space<vmem>>, vector<5x3528xf32>,
    return
  }
}

module attributes {stable_mosaic.version = 11 : i64} {
  func.func @_matmul_bn_relu_kernel(%arg0: memref<5x125xf32, #tpu.memory_space<vmem>>, %arg1: memref<125x3528xf32, #tpu.memory_space<vmem>>, %arg2: memref<5x1xf32, #tpu.memory_space<vmem>>, %arg3: memref<5x1xf32, #tpu.memory_space<vmem>>, %arg4: memref<5x1xf32, #tpu.memory_space<vmem>>, %arg5: memref<5x3528xf32, #tpu.memory_space<vmem>>) attributes {dimension_semantics = [], scalar_prefetch = 0 : i64, scratch_operands = 0 : i64, tpu.core_type = #tpu.core_type<tc>} {
    %c0 = arith.constant 0 : index
    %c0_0 = arith.constant 0 : index
    %0 = vector.load %arg0[%c0, %c0_0] : memref<5x125xf32, #tpu.memory_space<vmem>>, vector<5x125xf32>
    %c0_1 = arith.constant 0 : index
    %c0_2 = arith.constant 0 : index
    %1 = vector.load %arg1[%c0_1, %c0_2] : memref<125x3528xf32, #tpu.memory_space<vmem>>, vector<125x3528xf32>
    %cst = arith.constant dense<0.000000e+00> : vector<5x3528xf32>
    %2 = tpu.matmul %0, %1, %cst {dimension_numbers = #tpu.dot_dimension_numbers<[1], [0], [0], [1], [0, 0, 1, 1], [], []>} : vector<5x125xf32>, vector<125x3528xf32>, vector<5x3528xf32> -> vector<5x3528xf32>
    %c0_3 = arith.constant 0 : index
    %c0_4 = arith.constant 0 : index
    %3 = vector.load %arg2[%c0_3, %c0_4] : memref<5x1xf32, #tpu.memory_space<vmem>>, vector<5x1xf32>
    %4 = vector.broadcast %3 : vector<5x1xf32> to vector<5x3528xf32>
    %5 = arith.addf %2, %4 : vector<5x3528xf32>
    %cst_5 = arith.constant dense<0.000000e+00> : vector<5xf32>
    %6 = vector.multi_reduction <add>, %5, %cst_5 [1] : vector<5x3528xf32> to vector<5xf32>
    %7 = vector.shape_cast %6 : vector<5xf32> to vector<5x1xf32>
    %cst_6 = arith.constant 3.528000e+03 : f32
    %8 = vector.broadcast %cst_6 : f32 to vector<5x1xf32>
    %9 = arith.divf %7, %8 : vector<5x1xf32>
    %10 = vector.broadcast %9 : vector<5x1xf32> to vector<5x3528xf32>
    %11 = arith.subf %5, %10 : vector<5x3528xf32>
    %12 = arith.mulf %11, %11 : vector<5x3528xf32>
    %cst_7 = arith.constant dense<0.000000e+00> : vector<5xf32>
    %13 = vector.multi_reduction <add>, %12, %cst_7 [1] : vector<5x3528xf32> to vector<5xf32>
    %14 = vector.shape_cast %13 : vector<5xf32> to vector<5x1xf32>
    %cst_8 = arith.constant 3.528000e+03 : f32
    %15 = vector.broadcast %cst_8 : f32 to vector<5x1xf32>
    %16 = arith.divf %14, %15 : vector<5x1xf32>
    %17 = vector.broadcast %9 : vector<5x1xf32> to vector<5x3528xf32>
    %18 = arith.subf %5, %17 : vector<5x3528xf32>
    %cst_9 = arith.constant 9.99999974E-6 : f32
    %19 = vector.broadcast %cst_9 : f32 to vector<5x1xf32>
    %20 = arith.addf %16, %19 : vector<5x1xf32>
    %21 = math.rsqrt %20 : vector<5x1xf32>
    %22 = vector.broadcast %21 : vector<5x1xf32> to vector<5x3528xf32>
    %23 = arith.mulf %18, %22 : vector<5x3528xf32>
    %c0_10 = arith.constant 0 : index
    %c0_11 = arith.constant 0 : index
    %24 = vector.load %arg3[%c0_10, %c0_11] : memref<5x1xf32, #tpu.memory_space<vmem>>, vector<5x1xf32>
    %25 = vector.broadcast %24 : vector<5x1xf32> to vector<5x3528xf32>
    %26 = arith.mulf %23, %25 : vector<5x3528xf32>
    %c0_12 = arith.constant 0 : index
    %c0_13 = arith.constant 0 : index
    %27 = vector.load %arg4[%c0_12, %c0_13] : memref<5x1xf32, #tpu.memory_space<vmem>>, vector<5x1xf32>
    %28 = vector.broadcast %27 : vector<5x1xf32> to vector<5x3528xf32>
    %29 = arith.addf %26, %28 : vector<5x3528xf32>
    %cst_14 = arith.constant 0.000000e+00 : f32
    %30 = vector.broadcast %cst_14 : f32 to vector<5x3528xf32>
    %31 = arith.maximumf %29, %30 : vector<5x3528xf32>
    %c0_15 = arith.constant 0 : index
    %c0_16 = arith.constant 0 : index
    %32 = vector.load %arg5[%c0_15, %c0_16] : memref<5x3528xf32, #tpu.memory_space<vmem>>, vector<5x3528xf32>
    tpu.vector_store %arg5[%c0_15, %c0_16], %31 {strides = array<i32>} : memref<5x3528xf32, #tpu.memory_space<vmem>>, vector<5x3528xf32>,
    return
  }
}

module attributes {stable_mosaic.version = 11 : i64} {
  func.func @_matmul_bias_act_kernel(%arg0: memref<5x125xf32, #tpu.memory_space<vmem>>, %arg1: memref<125x3528xf32, #tpu.memory_space<vmem>>, %arg2: memref<5x1xf32, #tpu.memory_space<vmem>>, %arg3: memref<5x3528xf32, #tpu.memory_space<vmem>>) attributes {dimension_semantics = [], scalar_prefetch = 0 : i64, scratch_operands = 0 : i64, tpu.core_type = #tpu.core_type<tc>} {
    %c0 = arith.constant 0 : index
    %c0_0 = arith.constant 0 : index
    %0 = vector.load %arg0[%c0, %c0_0] : memref<5x125xf32, #tpu.memory_space<vmem>>, vector<5x125xf32>
    %c0_1 = arith.constant 0 : index
    %c0_2 = arith.constant 0 : index
    %1 = vector.load %arg1[%c0_1, %c0_2] : memref<125x3528xf32, #tpu.memory_space<vmem>>, vector<125x3528xf32>
    %cst = arith.constant dense<0.000000e+00> : vector<5x3528xf32>
    %2 = tpu.matmul %0, %1, %cst {dimension_numbers = #tpu.dot_dimension_numbers<[1], [0], [0], [1], [0, 0, 1, 1], [], []>} : vector<5x125xf32>, vector<125x3528xf32>, vector<5x3528xf32> -> vector<5x3528xf32>
    %c0_3 = arith.constant 0 : index
    %c0_4 = arith.constant 0 : index
    %3 = vector.load %arg2[%c0_3, %c0_4] : memref<5x1xf32, #tpu.memory_space<vmem>>, vector<5x1xf32>
    %4 = vector.broadcast %3 : vector<5x1xf32> to vector<5x3528xf32>
    %5 = arith.addf %2, %4 : vector<5x3528xf32>
    %c0_5 = arith.constant 0 : index
    %c0_6 = arith.constant 0 : index
    %6 = vector.load %arg3[%c0_5, %c0_6] : memref<5x3528xf32, #tpu.memory_space<vmem>>, vector<5x3528xf32>
    tpu.vector_store %arg3[%c0_5, %c0_6], %5 {strides = array<i32>} : memref<5x3528xf32, #tpu.memory_space<vmem>>, vector<5x3528xf32>,
    return
  }
}

module attributes {stable_mosaic.version = 11 : i64} {
  func.func @_matmul_bias_act_kernel(%arg0: memref<1x125xf32, #tpu.memory_space<vmem>>, %arg1: memref<125x3528xf32, #tpu.memory_space<vmem>>, %arg2: memref<1x1xf32, #tpu.memory_space<vmem>>, %arg3: memref<1x3528xf32, #tpu.memory_space<vmem>>) attributes {dimension_semantics = [], scalar_prefetch = 0 : i64, scratch_operands = 0 : i64, tpu.core_type = #tpu.core_type<tc>} {
    %c0 = arith.constant 0 : index
    %c0_0 = arith.constant 0 : index
    %0 = vector.load %arg0[%c0, %c0_0] : memref<1x125xf32, #tpu.memory_space<vmem>>, vector<1x125xf32>
    %c0_1 = arith.constant 0 : index
    %c0_2 = arith.constant 0 : index
    %1 = vector.load %arg1[%c0_1, %c0_2] : memref<125x3528xf32, #tpu.memory_space<vmem>>, vector<125x3528xf32>
    %cst = arith.constant dense<0.000000e+00> : vector<1x3528xf32>
    %2 = tpu.matmul %0, %1, %cst {dimension_numbers = #tpu.dot_dimension_numbers<[1], [0], [0], [1], [0, 0, 1, 1], [], []>} : vector<1x125xf32>, vector<125x3528xf32>, vector<1x3528xf32> -> vector<1x3528xf32>
    %c0_3 = arith.constant 0 : index
    %c0_4 = arith.constant 0 : index
    %3 = vector.load %arg2[%c0_3, %c0_4] : memref<1x1xf32, #tpu.memory_space<vmem>>, vector<1x1xf32>
    %4 = vector.broadcast %3 : vector<1x1xf32> to vector<1x3528xf32>
    %5 = arith.addf %2, %4 : vector<1x3528xf32>
    %6 = arith.negf %5 : vector<1x3528xf32>
    %7 = math.exp %6 : vector<1x3528xf32>
    %cst_5 = arith.constant 1.000000e+00 : f32
    %8 = vector.broadcast %cst_5 : f32 to vector<1x3528xf32>
    %9 = arith.addf %8, %7 : vector<1x3528xf32>
    %10 = arith.divf %8, %9 : vector<1x3528xf32>
    %c0_6 = arith.constant 0 : index
    %c0_7 = arith.constant 0 : index
    %11 = vector.load %arg3[%c0_6, %c0_7] : memref<1x3528xf32, #tpu.memory_space<vmem>>, vector<1x3528xf32>
    tpu.vector_store %arg3[%c0_6, %c0_7], %10 {strides = array<i32>} : memref<1x3528xf32, #tpu.memory_space<vmem>>, vector<1x3528xf32>,
    return
  }
}

</mosaic_0001>

<bundles_post_ra>
// kernel: generator_forward.9
= control target key start
LH: loop header
LB: loop body
LE: loop exit
PB: predicated region body
PF: predicated region fallthrough
CT: control target
= control target key end

     0   :  { %8 = vsyncpa [#allocation3], 0  ;;  %s1713_s0 = inlined_call_operand.hbm [shape: f32[2,128], index: 0, kind: input, shape index: {}]   ;;  %s1714_s1 = inlined_call_operand.vmem [shape: f32[128,1764], index: 1, kind: input, shape index: {}]   ;;  %s1715_s2 = inlined_call_operand.hbm [shape: f32[1,1764], index: 2, kind: input, shape index: {}]   ;;  %s1716_s3 = inlined_call_operand.vmem [shape: f32[2,1764], index: 3, kind: output, shape index: {}]  }
   0x1   :  { %9 = vsyncpa [#allocation5], 0  ;;  %s972_s12 = smov [#allocation2]   ;;  %s973_s14 = smov [#allocation4]  }
   0x2   :  { %s16_s13 = sshll.u32 %s972_s12, 4  ;;  %s28_s15 = sshll.u32 %s973_s14, 4  ;;  %s17_s13 = int_to_ptr.vmem [resolvable:$true] %s16_s13  ;;  %s29_s15 = int_to_ptr.vmem [resolvable:$true] %s28_s15 }
   0x3   :  { %s936_s16 = scalar_lea.vmem %s17_s13, 32  ;;  %p941_p1 = scmp.lt.s32.totalorder %s17_s13, %s17_s13 }
   0x4   :  { %p937_p0 = scmp.ne.s32.totalorder %s17_s13, %s936_s16  ;;  %p942_p2 = scmp.lt.s32.totalorder %s936_s16, %s936_s16 }
   0x6   :  { %p943_p3 = por %p942_p2, %p941_p1 }
   0x8   :  { %p944_p4 = pnand %p943_p3, %p937_p0 }
   0xa   :  { %947 = shalt.err (!%p944_p4)
}
   0xb   :  { %19 = dma.hbm_to_vmem [thread:$0]  %s1713_s0, 32, %s17_s13, [#allocation3]  }
   0xc   :  { %s956_s19 = scalar_lea.vmem %s29_s15, 224  ;;  %p961_p6 = scmp.lt.s32.totalorder %s29_s15, %s29_s15 }
   0xd   :  { %p957_p5 = scmp.ne.s32.totalorder %s29_s15, %s956_s19  ;;  %p962_p7 = scmp.lt.s32.totalorder %s956_s19, %s956_s19 }
   0xf   :  { %p963_p8 = por %p962_p7, %p961_p6 }
  0x11   :  { %p964_p9 = pnand %p963_p8, %p957_p5 }
  0x13   :  { %967 = shalt.err (!%p964_p9)
}
  0x14   :  { %31 = dma.hbm_to_vmem [thread:$0]  %s1715_s2, 224, %s29_s15, [#allocation5]  }
  0x15   :  { %968 = dma.done.wait [#allocation3], 32  }
  0x16   :  { %969 = vsyncadd [#allocation3], 4294967264 }
  0x17   :  { %970 = dma.done.wait [#allocation5], 224  }
  0x18   :  { %971 = vsyncadd [#allocation5], 4294967072  ;;  %v974_v0 = vmov 0.0   ;;  %v250_v1 = vld [vmem:[%s1714_s1 + $0x698] sm:$0xff]  ;;  %v252_v2 = vld [vmem:[%s1714_s1 + $0x6a8] sm:$0xff]  ;;  %vm914_vm0 = vcmask 1041408  }
  0x19   :  { %401 = vmatprep.mubr.f32.mxu0 %v974_v0  ;;  %472 = vmatprep.mubr.f32.mxu1 %v974_v0  ;;  %v249_v3 = vld [vmem:[%s1714_s1 + $0x690] sm:$0xff]  ;;  %v251_v4 = vld [vmem:[%s1714_s1 + $0x6a0] sm:$0xff]  ;;  %v236_v5 = vld [vmem:[%s1714_s1 + $0x628] sm:$0xff]  ;;  %vm915_vm1 = vcmask 814082  }
  0x1a   :  { %337 = vmatprep.subr.mxu0 %v250_v1  ;;  %408 = vmatprep.subr.mxu1 %v252_v2  ;;  %v238_v6 = vld [vmem:[%s1714_s1 + $0x638] sm:$0xff]  ;;  %v235_v7 = vld [vmem:[%s1714_s1 + $0x620] sm:$0xff]  ;;  %v237_v8 = vld [vmem:[%s1714_s1 + $0x630] sm:$0xff] }
  0x1b   :  { %338 = vmatpush1.msra.mxu0 %v249_v3  ;;  %409 = vmatpush1.msra.mxu1 %v251_v4  ;;  %v222_v9 = vld [vmem:[%s1714_s1 + $0x5b8] sm:$0xff]  ;;  %v224_v10 = vld [vmem:[%s1714_s1 + $0x5c8] sm:$0xff]  ;;  %v221_v11 = vld [vmem:[%s1714_s1 + $0x5b0] sm:$0xff] }
  0x1c   :  { %339 = vmatprep.subr.mxu0 %v236_v5  ;;  %410 = vmatprep.subr.mxu1 %v238_v6  ;;  %v223_v12 = vld [vmem:[%s1714_s1 + $0x5c0] sm:$0xff]  ;;  %v208_v13 = vld [vmem:[%s1714_s1 + $0x548] sm:$0xff]  ;;  %v210_v14 = vld [vmem:[%s1714_s1 + $0x558] sm:$0xff] }
  0x1d   :  { %340 = vmatpush1.msra.mxu0 %v235_v7  ;;  %411 = vmatpush1.msra.mxu1 %v237_v8  ;;  %v207_v15 = vld [vmem:[%s1714_s1 + $0x540] sm:$0xff]  ;;  %v209_v16 = vld [vmem:[%s1714_s1 + $0x550] sm:$0xff]  ;;  %v194_v17 = vld [vmem:[%s1714_s1 + $0x4d8] sm:$0xff] }
  0x1e   :  { %341 = vmatprep.subr.mxu0 %v222_v9  ;;  %412 = vmatprep.subr.mxu1 %v224_v10  ;;  %v196_v18 = vld [vmem:[%s1714_s1 + $0x4e8] sm:$0xff]  ;;  %v193_v19 = vld [vmem:[%s1714_s1 + $0x4d0] sm:$0xff]  ;;  %v195_v20 = vld [vmem:[%s1714_s1 + $0x4e0] sm:$0xff] }
  0x1f   :  { %342 = vmatpush1.msra.mxu0 %v221_v11  ;;  %413 = vmatpush1.msra.mxu1 %v223_v12  ;;  %v180_v21 = vld [vmem:[%s1714_s1 + $0x468] sm:$0xff]  ;;  %v182_v22 = vld [vmem:[%s1714_s1 + $0x478] sm:$0xff]  ;;  %v179_v23 = vld [vmem:[%s1714_s1 + $0x460] sm:$0xff] }
  0x20   :  { %343 = vmatprep.subr.mxu0 %v208_v13  ;;  %414 = vmatprep.subr.mxu1 %v210_v14  ;;  %v181_v24 = vld [vmem:[%s1714_s1 + $0x470] sm:$0xff]  ;;  %v166_v25 = vld [vmem:[%s1714_s1 + $0x3f8] sm:$0xff]  ;;  %v168_v26 = vld [vmem:[%s1714_s1 + $0x408] sm:$0xff] }
  0x21   :  { %344 = vmatpush1.msra.mxu0 %v207_v15  ;;  %415 = vmatpush1.msra.mxu1 %v209_v16  ;;  %v165_v27 = vld [vmem:[%s1714_s1 + $0x3f0] sm:$0xff]  ;;  %v167_v28 = vld [vmem:[%s1714_s1 + $0x400] sm:$0xff]  ;;  %v152_v29 = vld [vmem:[%s1714_s1 + $0x388] sm:$0xff] }
  0x22   :  { %345 = vmatprep.subr.mxu0 %v194_v17  ;;  %416 = vmatprep.subr.mxu1 %v196_v18  ;;  %v154_v30 = vld [vmem:[%s1714_s1 + $0x398] sm:$0xff]  ;;  %v151_v31 = vld [vmem:[%s1714_s1 + $0x380] sm:$0xff]  ;;  %v153_v32 = vld [vmem:[%s1714_s1 + $0x390] sm:$0xff] }
  0x23   :  { %346 = vmatpush1.msra.mxu0 %v193_v19  ;;  %417 = vmatpush1.msra.mxu1 %v195_v20  ;;  %v138_v33 = vld [vmem:[%s1714_s1 + $0x318] sm:$0xff]  ;;  %v140_v34 = vld [vmem:[%s1714_s1 + $0x328] sm:$0xff]  ;;  %v137_v35 = vld [vmem:[%s1714_s1 + $0x310] sm:$0xff] }
  0x24   :  { %347 = vmatprep.subr.mxu0 %v180_v21  ;;  %418 = vmatprep.subr.mxu1 %v182_v22  ;;  %v139_v36 = vld [vmem:[%s1714_s1 + $0x320] sm:$0xff]  ;;  %v124_v37 = vld [vmem:[%s1714_s1 + $0x2a8] sm:$0xff]  ;;  %v126_v38 = vld [vmem:[%s1714_s1 + $0x2b8] sm:$0xff] }
  0x25   :  { %348 = vmatpush1.msra.mxu0 %v179_v23  ;;  %419 = vmatpush1.msra.mxu1 %v181_v24  ;;  %v123_v39 = vld [vmem:[%s1714_s1 + $0x2a0] sm:$0xff]  ;;  %v125_v40 = vld [vmem:[%s1714_s1 + $0x2b0] sm:$0xff]  ;;  %v110_v41 = vld [vmem:[%s1714_s1 + $0x238] sm:$0xff] }
  0x26   :  { %349 = vmatprep.subr.mxu0 %v166_v25  ;;  %420 = vmatprep.subr.mxu1 %v168_v26  ;;  %v112_v42 = vld [vmem:[%s1714_s1 + $0x248] sm:$0xff]  ;;  %v109_v43 = vld [vmem:[%s1714_s1 + $0x230] sm:$0xff]  ;;  %v111_v44 = vld [vmem:[%s1714_s1 + $0x240] sm:$0xff] }
  0x27   :  { %350 = vmatpush1.msra.mxu0 %v165_v27  ;;  %421 = vmatpush1.msra.mxu1 %v167_v28  ;;  %v96_v45 = vld [vmem:[%s1714_s1 + $0x1c8] sm:$0xff]  ;;  %v98_v46 = vld [vmem:[%s1714_s1 + $0x1d8] sm:$0xff]  ;;  %v95_v47 = vld [vmem:[%s1714_s1 + $0x1c0] sm:$0xff] }
  0x28   :  { %351 = vmatprep.subr.mxu0 %v152_v29  ;;  %422 = vmatprep.subr.mxu1 %v154_v30  ;;  %v97_v48 = vld [vmem:[%s1714_s1 + $0x1d0] sm:$0xff]  ;;  %v82_v49 = vld [vmem:[%s1714_s1 + $0x158] sm:$0xff]  ;;  %v84_v50 = vld [vmem:[%s1714_s1 + $0x168] sm:$0xff] }
  0x29   :  { %352 = vmatpush1.msra.mxu0 %v151_v31  ;;  %423 = vmatpush1.msra.mxu1 %v153_v32  ;;  %v81_v51 = vld [vmem:[%s1714_s1 + $0x150] sm:$0xff]  ;;  %v83_v52 = vld [vmem:[%s1714_s1 + $0x160] sm:$0xff]  ;;  %v68_v53 = vld [vmem:[%s1714_s1 + $0xe8] sm:$0xff] }
  0x2a   :  { %353 = vmatprep.subr.mxu0 %v138_v33  ;;  %424 = vmatprep.subr.mxu1 %v140_v34  ;;  %v70_v54 = vld [vmem:[%s1714_s1 + $0xf8] sm:$0xff]  ;;  %v67_v55 = vld [vmem:[%s1714_s1 + $0xe0] sm:$0xff]  ;;  %v69_v56 = vld [vmem:[%s1714_s1 + $0xf0] sm:$0xff] }
  0x2b   :  { %354 = vmatpush1.msra.mxu0 %v137_v35  ;;  %425 = vmatpush1.msra.mxu1 %v139_v36  ;;  %v54_v57 = vld [vmem:[%s1714_s1 + $0x78] sm:$0xff]  ;;  %v56_v58 = vld [vmem:[%s1714_s1 + $0x88] sm:$0xff]  ;;  %v53_v59 = vld [vmem:[%s1714_s1 + $0x70] sm:$0xff] }
  0x2c   :  { %355 = vmatprep.subr.mxu0 %v124_v37  ;;  %426 = vmatprep.subr.mxu1 %v126_v38  ;;  %v55_v60 = vld [vmem:[%s1714_s1 + $0x80] sm:$0xff]  ;;  %v40_v61 = vld [vmem:[%s1714_s1 + $0x8] sm:$0xff]  ;;  %v42_v62 = vld [vmem:[%s1714_s1 + $0x18] sm:$0xff] }
  0x2d   :  { %356 = vmatpush1.msra.mxu0 %v123_v39  ;;  %427 = vmatpush1.msra.mxu1 %v125_v40  ;;  %v39_v63 = vld [vmem:[%s1714_s1] sm:$0xff]  ;;  %v41_v1 = vld [vmem:[%s1714_s1 + $0x10] sm:$0xff]  ;;  %v254_v3 = vld [vmem:[%s1714_s1 + $0x6b8] sm:$0xff] }
  0x2e   :  { %357 = vmatprep.subr.mxu0 %v110_v41  ;;  %428 = vmatprep.subr.mxu1 %v112_v42  ;;  %v1196_v2 = vld [vmem:[#allocation2] sm:$0x3]  ;;  %v256_v4 = vld [vmem:[%s1714_s1 + $0x6c8] sm:$0xff]  ;;  %v253_v5 = vld [vmem:[%s1714_s1 + $0x6b0] sm:$0xff] }
  0x2f   :  { %358 = vmatpush1.msra.mxu0 %v109_v43  ;;  %429 = vmatpush1.msra.mxu1 %v111_v44  ;;  %v255_v6 = vld [vmem:[%s1714_s1 + $0x6c0] sm:$0xff]  ;;  %v240_v7 = vld [vmem:[%s1714_s1 + $0x648] sm:$0xff]  ;;  %v242_v8 = vld [vmem:[%s1714_s1 + $0x658] sm:$0xff] }
  0x30   :  { %359 = vmatprep.subr.mxu0 %v96_v45  ;;  %430 = vmatprep.subr.mxu1 %v98_v46  ;;  %v239_v9 = vld [vmem:[%s1714_s1 + $0x640] sm:$0xff]  ;;  %v241_v10 = vld [vmem:[%s1714_s1 + $0x650] sm:$0xff]  ;;  %v226_v11 = vld [vmem:[%s1714_s1 + $0x5d8] sm:$0xff] }
  0x31   :  { %360 = vmatpush1.msra.mxu0 %v95_v47  ;;  %431 = vmatpush1.msra.mxu1 %v97_v48  ;;  %v228_v12 = vld [vmem:[%s1714_s1 + $0x5e8] sm:$0xff]  ;;  %v225_v13 = vld [vmem:[%s1714_s1 + $0x5d0] sm:$0xff]  ;;  %v227_v14 = vld [vmem:[%s1714_s1 + $0x5e0] sm:$0xff] }
  0x32   :  { %361 = vmatprep.subr.mxu0 %v82_v49  ;;  %432 = vmatprep.subr.mxu1 %v84_v50  ;;  %v212_v15 = vld [vmem:[%s1714_s1 + $0x568] sm:$0xff]  ;;  %v214_v16 = vld [vmem:[%s1714_s1 + $0x578] sm:$0xff]  ;;  %v211_v17 = vld [vmem:[%s1714_s1 + $0x560] sm:$0xff] }
  0x33   :  { %362 = vmatpush1.msra.mxu0 %v81_v51  ;;  %433 = vmatpush1.msra.mxu1 %v83_v52  ;;  %v213_v18 = vld [vmem:[%s1714_s1 + $0x570] sm:$0xff]  ;;  %v198_v19 = vld [vmem:[%s1714_s1 + $0x4f8] sm:$0xff]  ;;  %v200_v20 = vld [vmem:[%s1714_s1 + $0x508] sm:$0xff] }
  0x34   :  { %363 = vmatprep.subr.mxu0 %v68_v53  ;;  %434 = vmatprep.subr.mxu1 %v70_v54  ;;  %v197_v21 = vld [vmem:[%s1714_s1 + $0x4f0] sm:$0xff]  ;;  %v199_v22 = vld [vmem:[%s1714_s1 + $0x500] sm:$0xff]  ;;  %v184_v23 = vld [vmem:[%s1714_s1 + $0x488] sm:$0xff] }
  0x35   :  { %364 = vmatpush1.msra.mxu0 %v67_v55  ;;  %435 = vmatpush1.msra.mxu1 %v69_v56  ;;  %v186_v24 = vld [vmem:[%s1714_s1 + $0x498] sm:$0xff]  ;;  %v183_v25 = vld [vmem:[%s1714_s1 + $0x480] sm:$0xff]  ;;  %v185_v26 = vld [vmem:[%s1714_s1 + $0x490] sm:$0xff] }
  0x36   :  { %365 = vmatprep.subr.mxu0 %v54_v57  ;;  %436 = vmatprep.subr.mxu1 %v56_v58  ;;  %v170_v27 = vld [vmem:[%s1714_s1 + $0x418] sm:$0xff]  ;;  %v172_v28 = vld [vmem:[%s1714_s1 + $0x428] sm:$0xff]  ;;  %v169_v29 = vld [vmem:[%s1714_s1 + $0x410] sm:$0xff] }
  0x37   :  { %366 = vmatpush1.msra.mxu0 %v53_v59  ;;  %437 = vmatpush1.msra.mxu1 %v55_v60  ;;  %v171_v30 = vld [vmem:[%s1714_s1 + $0x420] sm:$0xff]  ;;  %v156_v31 = vld [vmem:[%s1714_s1 + $0x3a8] sm:$0xff]  ;;  %v158_v32 = vld [vmem:[%s1714_s1 + $0x3b8] sm:$0xff] }
  0x38   :  { %367 = vmatprep.subr.mxu0 %v40_v61  ;;  %438 = vmatprep.subr.mxu1 %v42_v62  ;;  %v155_v33 = vld [vmem:[%s1714_s1 + $0x3a0] sm:$0xff]  ;;  %v157_v34 = vld [vmem:[%s1714_s1 + $0x3b0] sm:$0xff]  ;;  %v142_v35 = vld [vmem:[%s1714_s1 + $0x338] sm:$0xff] }
  0x39   :  { %368 = vmatpush1.msra.mxu0 %v39_v63  ;;  %439 = vmatpush1.msra.mxu1 %v41_v1  ;;  %v144_v36 = vld [vmem:[%s1714_s1 + $0x348] sm:$0xff]  ;;  %v141_v37 = vld [vmem:[%s1714_s1 + $0x330] sm:$0xff]  ;;  %v143_v38 = vld [vmem:[%s1714_s1 + $0x340] sm:$0xff] }
  0x3a   :  { %402 = vmatmul.mubr.f32.vlgmr.msra.gmra.mxu0 %v1196_v2  ;;  %473 = vmatmul.mubr.f32.vlgmr.msra.gmra.mxu1 %v1196_v2  ;;  %v128_v39 = vld [vmem:[%s1714_s1 + $0x2c8] sm:$0xff]  ;;  %v130_v40 = vld [vmem:[%s1714_s1 + $0x2d8] sm:$0xff]  ;;  %v127_v41 = vld [vmem:[%s1714_s1 + $0x2c0] sm:$0xff] }
  0x3b   :  { %479 = vmatprep.subr.mxu0 %v254_v3  ;;  %550 = vmatprep.subr.mxu1 %v256_v4  ;;  %v129_v42 = vld [vmem:[%s1714_s1 + $0x2d0] sm:$0xff]  ;;  %v114_v43 = vld [vmem:[%s1714_s1 + $0x258] sm:$0xff]  ;;  %v116_v44 = vld [vmem:[%s1714_s1 + $0x268] sm:$0xff] }
  0x3c   :  { %480 = vmatpush1.msra.mxu0 %v253_v5  ;;  %551 = vmatpush1.msra.mxu1 %v255_v6  ;;  %v113_v45 = vld [vmem:[%s1714_s1 + $0x250] sm:$0xff]  ;;  %v115_v46 = vld [vmem:[%s1714_s1 + $0x260] sm:$0xff]  ;;  %v100_v47 = vld [vmem:[%s1714_s1 + $0x1e8] sm:$0xff] }
  0x3d   :  { %481 = vmatprep.subr.mxu0 %v240_v7  ;;  %552 = vmatprep.subr.mxu1 %v242_v8  ;;  %v102_v48 = vld [vmem:[%s1714_s1 + $0x1f8] sm:$0xff]  ;;  %v99_v49 = vld [vmem:[%s1714_s1 + $0x1e0] sm:$0xff]  ;;  %v101_v50 = vld [vmem:[%s1714_s1 + $0x1f0] sm:$0xff] }
  0x3e   :  { %482 = vmatpush1.msra.mxu0 %v239_v9  ;;  %553 = vmatpush1.msra.mxu1 %v241_v10  ;;  %v86_v51 = vld [vmem:[%s1714_s1 + $0x178] sm:$0xff]  ;;  %v88_v52 = vld [vmem:[%s1714_s1 + $0x188] sm:$0xff]  ;;  %v85_v53 = vld [vmem:[%s1714_s1 + $0x170] sm:$0xff] }
  0x3f   :  { %483 = vmatprep.subr.mxu0 %v226_v11  ;;  %554 = vmatprep.subr.mxu1 %v228_v12  ;;  %v87_v54 = vld [vmem:[%s1714_s1 + $0x180] sm:$0xff]  ;;  %v72_v55 = vld [vmem:[%s1714_s1 + $0x108] sm:$0xff]  ;;  %v74_v56 = vld [vmem:[%s1714_s1 + $0x118] sm:$0xff] }
  0x40   :  { %484 = vmatpush1.msra.mxu0 %v225_v13  ;;  %555 = vmatpush1.msra.mxu1 %v227_v14  ;;  %v71_v57 = vld [vmem:[%s1714_s1 + $0x100] sm:$0xff]  ;;  %v73_v58 = vld [vmem:[%s1714_s1 + $0x110] sm:$0xff]  ;;  %v58_v59 = vld [vmem:[%s1714_s1 + $0x98] sm:$0xff] }
  0x41   :  { %485 = vmatprep.subr.mxu0 %v212_v15  ;;  %556 = vmatprep.subr.mxu1 %v214_v16  ;;  %v60_v60 = vld [vmem:[%s1714_s1 + $0xa8] sm:$0xff]  ;;  %v57_v61 = vld [vmem:[%s1714_s1 + $0x90] sm:$0xff]  ;;  %v59_v62 = vld [vmem:[%s1714_s1 + $0xa0] sm:$0xff] }
  0x42   :  { %486 = vmatpush1.msra.mxu0 %v211_v17  ;;  %557 = vmatpush1.msra.mxu1 %v213_v18  ;;  %v44_v63 = vld [vmem:[%s1714_s1 + $0x28] sm:$0xff]  ;;  %v46_v1 = vld [vmem:[%s1714_s1 + $0x38] sm:$0xff]  ;;  %v43_v3 = vld [vmem:[%s1714_s1 + $0x20] sm:$0xff] }
  0x43   :  { %487 = vmatprep.subr.mxu0 %v198_v19  ;;  %558 = vmatprep.subr.mxu1 %v200_v20  ;;  %v45_v4 = vld [vmem:[%s1714_s1 + $0x30] sm:$0xff]  ;;  %v258_v5 = vld [vmem:[%s1714_s1 + $0x6d8] sm:$0xff]  ;;  %v260_v6 = vld [vmem:[%s1714_s1 + $0x6e8] sm:$0xff] }
  0x44   :  { %488 = vmatpush1.msra.mxu0 %v197_v21  ;;  %559 = vmatpush1.msra.mxu1 %v199_v22  ;;  %v257_v7 = vld [vmem:[%s1714_s1 + $0x6d0] sm:$0xff]  ;;  %v259_v8 = vld [vmem:[%s1714_s1 + $0x6e0] sm:$0xff]  ;;  %v244_v9 = vld [vmem:[%s1714_s1 + $0x668] sm:$0xff] }
  0x45   :  { %489 = vmatprep.subr.mxu0 %v184_v23  ;;  %560 = vmatprep.subr.mxu1 %v186_v24  ;;  %v246_v10 = vld [vmem:[%s1714_s1 + $0x678] sm:$0xff]  ;;  %v243_v11 = vld [vmem:[%s1714_s1 + $0x660] sm:$0xff]  ;;  %v245_v12 = vld [vmem:[%s1714_s1 + $0x670] sm:$0xff] }
  0x46   :  { %490 = vmatpush1.msra.mxu0 %v183_v25  ;;  %561 = vmatpush1.msra.mxu1 %v185_v26  ;;  %v230_v13 = vld [vmem:[%s1714_s1 + $0x5f8] sm:$0xff]  ;;  %v232_v14 = vld [vmem:[%s1714_s1 + $0x608] sm:$0xff]  ;;  %v229_v15 = vld [vmem:[%s1714_s1 + $0x5f0] sm:$0xff] }
  0x47   :  { %491 = vmatprep.subr.mxu0 %v170_v27  ;;  %562 = vmatprep.subr.mxu1 %v172_v28  ;;  %v231_v16 = vld [vmem:[%s1714_s1 + $0x600] sm:$0xff]  ;;  %v216_v17 = vld [vmem:[%s1714_s1 + $0x588] sm:$0xff]  ;;  %v218_v18 = vld [vmem:[%s1714_s1 + $0x598] sm:$0xff] }
  0x48   :  { %492 = vmatpush1.msra.mxu0 %v169_v29  ;;  %563 = vmatpush1.msra.mxu1 %v171_v30  ;;  %v215_v19 = vld [vmem:[%s1714_s1 + $0x580] sm:$0xff]  ;;  %v217_v20 = vld [vmem:[%s1714_s1 + $0x590] sm:$0xff]  ;;  %v202_v21 = vld [vmem:[%s1714_s1 + $0x518] sm:$0xff] }
  0x49   :  { %493 = vmatprep.subr.mxu0 %v156_v31  ;;  %564 = vmatprep.subr.mxu1 %v158_v32  ;;  %v204_v22 = vld [vmem:[%s1714_s1 + $0x528] sm:$0xff]  ;;  %v201_v23 = vld [vmem:[%s1714_s1 + $0x510] sm:$0xff]  ;;  %v203_v24 = vld [vmem:[%s1714_s1 + $0x520] sm:$0xff] }
  0x4a   :  { %494 = vmatpush1.msra.mxu0 %v155_v33  ;;  %565 = vmatpush1.msra.mxu1 %v157_v34  ;;  %v188_v25 = vld [vmem:[%s1714_s1 + $0x4a8] sm:$0xff]  ;;  %v190_v26 = vld [vmem:[%s1714_s1 + $0x4b8] sm:$0xff]  ;;  %v187_v27 = vld [vmem:[%s1714_s1 + $0x4a0] sm:$0xff] }
  0x4b   :  { %495 = vmatprep.subr.mxu0 %v142_v35  ;;  %566 = vmatprep.subr.mxu1 %v144_v36  ;;  %v189_v28 = vld [vmem:[%s1714_s1 + $0x4b0] sm:$0xff]  ;;  %v174_v29 = vld [vmem:[%s1714_s1 + $0x438] sm:$0xff]  ;;  %v176_v30 = vld [vmem:[%s1714_s1 + $0x448] sm:$0xff] }
  0x4c   :  { %496 = vmatpush1.msra.mxu0 %v141_v37  ;;  %567 = vmatpush1.msra.mxu1 %v143_v38  ;;  %v173_v31 = vld [vmem:[%s1714_s1 + $0x430] sm:$0xff]  ;;  %v175_v32 = vld [vmem:[%s1714_s1 + $0x440] sm:$0xff]  ;;  %v160_v33 = vld [vmem:[%s1714_s1 + $0x3c8] sm:$0xff] }
  0x4d   :  { %497 = vmatprep.subr.mxu0 %v128_v39  ;;  %568 = vmatprep.subr.mxu1 %v130_v40  ;;  %v162_v34 = vld [vmem:[%s1714_s1 + $0x3d8] sm:$0xff]  ;;  %v159_v35 = vld [vmem:[%s1714_s1 + $0x3c0] sm:$0xff]  ;;  %v161_v36 = vld [vmem:[%s1714_s1 + $0x3d0] sm:$0xff] }
  0x4e   :  { %498 = vmatpush1.msra.mxu0 %v127_v41  ;;  %569 = vmatpush1.msra.mxu1 %v129_v42  ;;  %v146_v37 = vld [vmem:[%s1714_s1 + $0x358] sm:$0xff]  ;;  %v148_v38 = vld [vmem:[%s1714_s1 + $0x368] sm:$0xff]  ;;  %v145_v39 = vld [vmem:[%s1714_s1 + $0x350] sm:$0xff] }
  0x4f   :  { %499 = vmatprep.subr.mxu0 %v114_v43  ;;  %570 = vmatprep.subr.mxu1 %v116_v44  ;;  %v147_v40 = vld [vmem:[%s1714_s1 + $0x360] sm:$0xff]  ;;  %v132_v41 = vld [vmem:[%s1714_s1 + $0x2e8] sm:$0xff]  ;;  %v134_v42 = vld [vmem:[%s1714_s1 + $0x2f8] sm:$0xff] }
  0x50   :  { %500 = vmatpush1.msra.mxu0 %v113_v45  ;;  %571 = vmatpush1.msra.mxu1 %v115_v46  ;;  %v131_v43 = vld [vmem:[%s1714_s1 + $0x2e0] sm:$0xff]  ;;  %v133_v44 = vld [vmem:[%s1714_s1 + $0x2f0] sm:$0xff]  ;;  %v118_v45 = vld [vmem:[%s1714_s1 + $0x278] sm:$0xff] }
  0x51   :  { %501 = vmatprep.subr.mxu0 %v100_v47  ;;  %572 = vmatprep.subr.mxu1 %v102_v48  ;;  %v120_v46 = vld [vmem:[%s1714_s1 + $0x288] sm:$0xff]  ;;  %v117_v47 = vld [vmem:[%s1714_s1 + $0x270] sm:$0xff]  ;;  %v119_v48 = vld [vmem:[%s1714_s1 + $0x280] sm:$0xff] }
  0x52   :  { %502 = vmatpush1.msra.mxu0 %v99_v49  ;;  %573 = vmatpush1.msra.mxu1 %v101_v50  ;;  %v104_v49 = vld [vmem:[%s1714_s1 + $0x208] sm:$0xff]  ;;  %v106_v50 = vld [vmem:[%s1714_s1 + $0x218] sm:$0xff]  ;;  %vm916_vm2 = vmor %vm915_vm1, %vm914_vm0 }
  0x53   :  { %503 = vmatprep.subr.mxu0 %v86_v51  ;;  %574 = vmatprep.subr.mxu1 %v88_v52  ;;  %v103_v51 = vld [vmem:[%s1714_s1 + $0x200] sm:$0xff]  ;;  %v105_v52 = vld [vmem:[%s1714_s1 + $0x210] sm:$0xff] }
  0x54   :  { %504 = vmatpush1.msra.mxu0 %v85_v53  ;;  %575 = vmatpush1.msra.mxu1 %v87_v54  ;;  %v90_v53 = vld [vmem:[%s1714_s1 + $0x198] sm:$0xff]  ;;  %v92_v54 = vld [vmem:[%s1714_s1 + $0x1a8] sm:$0xff] }
  0x55   :  { %505 = vmatprep.subr.mxu0 %v72_v55  ;;  %576 = vmatprep.subr.mxu1 %v74_v56  ;;  %v89_v55 = vld [vmem:[%s1714_s1 + $0x190] sm:$0xff]  ;;  %v91_v56 = vld [vmem:[%s1714_s1 + $0x1a0] sm:$0xff] }
  0x56   :  { %506 = vmatpush1.msra.mxu0 %v71_v57  ;;  %577 = vmatpush1.msra.mxu1 %v73_v58  ;;  %v76_v57 = vld [vmem:[%s1714_s1 + $0x128] sm:$0xff]  ;;  %v78_v58 = vld [vmem:[%s1714_s1 + $0x138] sm:$0xff] }
  0x57   :  { %507 = vmatprep.subr.mxu0 %v58_v59  ;;  %578 = vmatprep.subr.mxu1 %v60_v60  ;;  %v75_v59 = vld [vmem:[%s1714_s1 + $0x120] sm:$0xff]  ;;  %v77_v60 = vld [vmem:[%s1714_s1 + $0x130] sm:$0xff] }
  0x58   :  { %508 = vmatpush1.msra.mxu0 %v57_v61  ;;  %579 = vmatpush1.msra.mxu1 %v59_v62  ;;  %v62_v61 = vld [vmem:[%s1714_s1 + $0xb8] sm:$0xff]  ;;  %v64_v62 = vld [vmem:[%s1714_s1 + $0xc8] sm:$0xff] }
  0x59   :  { %509 = vmatprep.subr.mxu0 %v44_v63  ;;  %580 = vmatprep.subr.mxu1 %v46_v1  ;;  %v61_v63 = vld [vmem:[%s1714_s1 + $0xb0] sm:$0xff]  ;;  %v63_v1 = vld [vmem:[%s1714_s1 + $0xc0] sm:$0xff] }
  0x5a   :  { %510 = vmatpush1.msra.mxu0 %v43_v3  ;;  %543 = vmatprep.mubr.f32.mxu0 %v974_v0  ;;  %v48_v3 = vld [vmem:[%s1714_s1 + $0x48] sm:$0xff] }
  0x5b   :  { %581 = vmatpush1.msra.mxu1 %v45_v4  ;;  %614 = vmatprep.mubr.f32.mxu1 %v974_v0  ;;  %v50_v4 = vld [vmem:[%s1714_s1 + $0x58] sm:$0xff] }
  0x5c   :  { %544 = vmatmul.mubr.f32.vlgmr.msra.gmra.mxu0 %v1196_v2  ;;  %615 = vmatmul.mubr.f32.vlgmr.msra.gmra.mxu1 %v1196_v2 }
  0x5d   :  { %621 = vmatprep.subr.mxu0 %v258_v5  ;;  %692 = vmatprep.subr.mxu1 %v260_v6  ;;  %v47_v5 = vld [vmem:[%s1714_s1 + $0x40] sm:$0xff]  ;;  %v49_v6 = vld [vmem:[%s1714_s1 + $0x50] sm:$0xff] }
  0x5e   :  { %622 = vmatpush1.msra.mxu0 %v257_v7  ;;  %693 = vmatpush1.msra.mxu1 %v259_v8  ;;  %v262_v7 = vld [vmem:[%s1714_s1 + $0x6f8] sm:$0xff]  ;;  %v261_v8 = vld [vmem:[%s1714_s1 + $0x6f0] sm:$0xff] }
  0x5f   :  { %623 = vmatprep.subr.mxu0 %v244_v9  ;;  %694 = vmatprep.subr.mxu1 %v246_v10  ;;  %v248_v9 = vld [vmem:[%s1714_s1 + $0x688] sm:$0xff]  ;;  %v247_v10 = vld [vmem:[%s1714_s1 + $0x680] sm:$0xff] }
  0x60   :  { %624 = vmatpush1.msra.mxu0 %v243_v11  ;;  %695 = vmatpush1.msra.mxu1 %v245_v12  ;;  %v234_v11 = vld [vmem:[%s1714_s1 + $0x618] sm:$0xff]  ;;  %v233_v12 = vld [vmem:[%s1714_s1 + $0x610] sm:$0xff] }
  0x61   :  { %625 = vmatprep.subr.mxu0 %v230_v13  ;;  %696 = vmatprep.subr.mxu1 %v232_v14  ;;  %v220_v13 = vld [vmem:[%s1714_s1 + $0x5a8] sm:$0xff]  ;;  %v206_v14 = vld [vmem:[%s1714_s1 + $0x538] sm:$0xff] }
  0x62   :  { %626 = vmatpush1.msra.mxu0 %v229_v15  ;;  %697 = vmatpush1.msra.mxu1 %v231_v16  ;;  %v205_v15 = vld [vmem:[%s1714_s1 + $0x530] sm:$0xff]  ;;  %v192_v16 = vld [vmem:[%s1714_s1 + $0x4c8] sm:$0xff] }
  0x63   :  { %627 = vmatprep.subr.mxu0 %v216_v17  ;;  %698 = vmatprep.subr.mxu1 %v218_v18  ;;  %v191_v17 = vld [vmem:[%s1714_s1 + $0x4c0] sm:$0xff]  ;;  %v178_v18 = vld [vmem:[%s1714_s1 + $0x458] sm:$0xff] }
  0x64   :  { %628 = vmatpush1.msra.mxu0 %v215_v19  ;;  %699 = vmatpush1.msra.mxu1 %v217_v20  ;;  %v177_v19 = vld [vmem:[%s1714_s1 + $0x450] sm:$0xff]  ;;  %v164_v20 = vld [vmem:[%s1714_s1 + $0x3e8] sm:$0xff] }
  0x65   :  { %629 = vmatprep.subr.mxu0 %v202_v21  ;;  %700 = vmatprep.subr.mxu1 %v204_v22  ;;  %v163_v21 = vld [vmem:[%s1714_s1 + $0x3e0] sm:$0xff]  ;;  %v150_v22 = vld [vmem:[%s1714_s1 + $0x378] sm:$0xff] }
  0x66   :  { %630 = vmatpush1.msra.mxu0 %v201_v23  ;;  %701 = vmatpush1.msra.mxu1 %v203_v24  ;;  %v149_v23 = vld [vmem:[%s1714_s1 + $0x370] sm:$0xff]  ;;  %v136_v24 = vld [vmem:[%s1714_s1 + $0x308] sm:$0xff] }
  0x67   :  { %631 = vmatprep.subr.mxu0 %v188_v25  ;;  %702 = vmatprep.subr.mxu1 %v190_v26  ;;  %v135_v25 = vld [vmem:[%s1714_s1 + $0x300] sm:$0xff]  ;;  %v122_v26 = vld [vmem:[%s1714_s1 + $0x298] sm:$0xff] }
  0x68   :  { %632 = vmatpush1.msra.mxu0 %v187_v27  ;;  %703 = vmatpush1.msra.mxu1 %v189_v28  ;;  %v121_v27 = vld [vmem:[%s1714_s1 + $0x290] sm:$0xff]  ;;  %v108_v28 = vld [vmem:[%s1714_s1 + $0x228] sm:$0xff] }
  0x69   :  { %633 = vmatprep.subr.mxu0 %v174_v29  ;;  %704 = vmatprep.subr.mxu1 %v176_v30  ;;  %v107_v29 = vld [vmem:[%s1714_s1 + $0x220] sm:$0xff]  ;;  %v94_v30 = vld [vmem:[%s1714_s1 + $0x1b8] sm:$0xff] }
  0x6a   :  { %634 = vmatpush1.msra.mxu0 %v173_v31  ;;  %705 = vmatpush1.msra.mxu1 %v175_v32  ;;  %v93_v31 = vld [vmem:[%s1714_s1 + $0x1b0] sm:$0xff]  ;;  %v80_v32 = vld [vmem:[%s1714_s1 + $0x148] sm:$0xff] }
  0x6b   :  { %635 = vmatprep.subr.mxu0 %v160_v33  ;;  %706 = vmatprep.subr.mxu1 %v162_v34  ;;  %v79_v33 = vld [vmem:[%s1714_s1 + $0x140] sm:$0xff]  ;;  %v66_v34 = vld [vmem:[%s1714_s1 + $0xd8] sm:$0xff] }
  0x6c   :  { %636 = vmatpush1.msra.mxu0 %v159_v35  ;;  %707 = vmatpush1.msra.mxu1 %v161_v36  ;;  %v65_v35 = vld [vmem:[%s1714_s1 + $0xd0] sm:$0xff]  ;;  %v52_v36 = vld [vmem:[%s1714_s1 + $0x68] sm:$0xff] }
  0x6d   :  { %637 = vmatprep.subr.mxu0 %v146_v37  ;;  %708 = vmatprep.subr.mxu1 %v148_v38  ;;  %v51_v37 = vld [vmem:[%s1714_s1 + $0x60] sm:$0xff]  ;;  %v267_v38 = vlaneseq }
  0x6e   :  { %638 = vmatpush1.msra.mxu0 %v145_v39  ;;  %709 = vmatpush1.msra.mxu1 %v147_v40 }
  0x6f   :  { %639 = vmatprep.subr.mxu0 %v132_v41  ;;  %710 = vmatprep.subr.mxu1 %v134_v42  ;;  %v1690_v39 = vshrl.u32 %v267_v38, 7  ;;  %v263_v42 = vld [vmem:[#allocation4] sm:$0xff] }
  0x70   :  { %640 = vmatpush1.msra.mxu0 %v131_v43  ;;  %711 = vmatpush1.msra.mxu1 %v133_v44  ;;  %v975_v44 = vmov 1983009808  }
  0x71   :  { %641 = vmatprep.subr.mxu0 %v118_v45  ;;  %712 = vmatprep.subr.mxu1 %v120_v46  ;;  %v269_v40 = vsub.s32 0, %v1690_v39  ;;  %v277_v41 = vsub.s32 2, %v1690_v39  ;;  %v273_v43 = vsub.s32 1, %v1690_v39  ;;  %v851_v45 = vunpack.c.l.s4 %v975_v44 }
  0x72   :  { %642 = vmatpush1.msra.mxu0 %v117_v47  ;;  %713 = vmatpush1.msra.mxu1 %v119_v48  ;;  %v281_v46 = vsub.s32 3, %v1690_v39 }
  0x73   :  { %643 = vmatprep.subr.mxu0 %v104_v49  ;;  %714 = vmatprep.subr.mxu1 %v106_v50  ;;  %v270_v47 = vrot.slane %v263_v42, %v269_v40  ;;  %v278_v48 = vrot.slane %v263_v42, %v277_v41  ;;  %v274_v49 = vrot.slane %v263_v42, %v273_v43  ;;  %v852_v50 = vunpack.c.0.s8 %v851_v45 }
  0x74   :  { %644 = vmatpush1.msra.mxu0 %v103_v51  ;;  %715 = vmatpush1.msra.mxu1 %v105_v52  ;;  %v282_v51 = vrot.slane %v263_v42, %v281_v46 }
  0x75   :  { %645 = vmatprep.subr.mxu0 %v90_v53  ;;  %716 = vmatprep.subr.mxu1 %v92_v54 }
  0x76   :  { %646 = vmatpush1.msra.mxu0 %v89_v55  ;;  %717 = vmatpush1.msra.mxu1 %v91_v56 }
  0x77   :  { %647 = vmatprep.subr.mxu0 %v76_v57  ;;  %718 = vmatprep.subr.mxu1 %v78_v58  ;;  %v855_v58 = vsub.s32 %v852_v50, %v1690_v39 }
  0x78   :  { %648 = vmatpush1.msra.mxu0 %v75_v59  ;;  %719 = vmatpush1.msra.mxu1 %v77_v60 }
  0x79   :  { %649 = vmatprep.subr.mxu0 %v62_v61  ;;  %720 = vmatprep.subr.mxu1 %v64_v62 }
  0x7a   :  { %650 = vmatpush1.msra.mxu0 %v61_v63  ;;  %721 = vmatpush1.msra.mxu1 %v63_v1 }
  0x7b   :  { %651 = vmatprep.subr.mxu0 %v48_v3  ;;  %722 = vmatprep.subr.mxu1 %v50_v4  ;;  %v285_v3 = vsub.s32 4, %v1690_v39  ;;  %v293_v4 = vsub.s32 6, %v1690_v39 }
  0x7c   :  { %652 = vmatpush1.msra.mxu0 %v47_v5  ;;  %685 = vmatprep.mubr.f32.mxu0 %v974_v0  ;;  %v289_v5 = vsub.s32 5, %v1690_v39 }
  0x7d   :  { %723 = vmatpush1.msra.mxu1 %v49_v6  ;;  %756 = vmatprep.mubr.f32.mxu1 %v974_v0  ;;  %v297_v6 = vsub.s32 7, %v1690_v39 }
  0x7e   :  { %686 = vmatmul.mubr.f32.vlgmr.msra.gmra.mxu0 %v1196_v2  ;;  %757 = vmatmul.mubr.f32.vlgmr.msra.gmra.mxu1 %v1196_v2 }
  0x7f   :  { %763 = vmatprep.subr.mxu0 %v262_v7  ;;  %827 = vmatprep.mubr.f32.mxu0 %v974_v0  ;;  %v219_v0 = vld [vmem:[%s1714_s1 + $0x5a0] sm:$0xff]  ;;  %v286_v7 = vrot.slane %v263_v42, %v285_v3 }
  0x80   :  { %764 = vmatpush1.msra.mxu0 %v261_v8  ;;  %v294_v8 = vrot.slane %v263_v42, %v293_v4 }
  0x81   :  { %765 = vmatprep.subr.mxu0 %v248_v9  ;;  %v290_v9 = vrot.slane %v263_v42, %v289_v5 }
  0x82   :  { %766 = vmatpush1.msra.mxu0 %v247_v10  ;;  %v298_v10 = vrot.slane %v263_v42, %v297_v6 }
  0x83   :  { %767 = vmatprep.subr.mxu0 %v234_v11 }
  0x84   :  { %768 = vmatpush1.msra.mxu0 %v233_v12 }
  0x85   :  { %769 = vmatprep.subr.mxu0 %v220_v13 }
  0x86   :  { %770 = vmatpush1.msra.mxu0 %v219_v0 }
  0x87   :  { %771 = vmatprep.subr.mxu0 %v206_v14 }
  0x88   :  { %772 = vmatpush1.msra.mxu0 %v205_v15 }
  0x89   :  { %773 = vmatprep.subr.mxu0 %v192_v16 }
  0x8a   :  { %774 = vmatpush1.msra.mxu0 %v191_v17 }
  0x8b   :  { %775 = vmatprep.subr.mxu0 %v178_v18 }
  0x8c   :  { %776 = vmatpush1.msra.mxu0 %v177_v19 }
  0x8d   :  { %777 = vmatprep.subr.mxu0 %v164_v20 }
  0x8e   :  { %778 = vmatpush1.msra.mxu0 %v163_v21 }
  0x8f   :  { %779 = vmatprep.subr.mxu0 %v150_v22 }
  0x90   :  { %780 = vmatpush1.msra.mxu0 %v149_v23  ;;  %v264_v23 = vld [vmem:[#allocation4 + $0x8] sm:$0x3f] }
  0x91   :  { %781 = vmatprep.subr.mxu0 %v136_v24  ;;  %v302_v24 = vrot.slane %v264_v23, %v269_v40  ;;  %v318_v40 = vrot.slane %v264_v23, %v285_v3 }
  0x92   :  { %782 = vmatpush1.msra.mxu0 %v135_v25  ;;  %v310_v25 = vrot.slane %v264_v23, %v277_v41  ;;  %v322_v41 = vrot.slane %v264_v23, %v289_v5 }
  0x93   :  { %783 = vmatprep.subr.mxu0 %v122_v26  ;;  %v306_v26 = vrot.slane %v264_v23, %v273_v43 }
  0x94   :  { %784 = vmatpush1.msra.mxu0 %v121_v27  ;;  %v314_v27 = vrot.slane %v264_v23, %v281_v46 }
  0x95   :  { %785 = vmatprep.subr.mxu0 %v108_v28 }
  0x96   :  { %786 = vmatpush1.msra.mxu0 %v107_v29 }
  0x97   :  { %787 = vmatprep.subr.mxu0 %v94_v30 }
  0x98   :  { %788 = vmatpush1.msra.mxu0 %v93_v31 }
  0x99   :  { %789 = vmatprep.subr.mxu0 %v80_v32 }
  0x9a   :  { %790 = vmatpush1.msra.mxu0 %v79_v33 }
  0x9b   :  { %791 = vmatprep.subr.mxu0 %v66_v34 }
  0x9c   :  { %792 = vmatpush1.msra.mxu0 %v65_v35 }
  0x9d   :  { %793 = vmatprep.subr.mxu0 %v52_v36 }
  0x9e   :  { %794 = vmatpush1.msra.mxu0 %v51_v37 }
  0x9f   :  { %828 = vmatmul.mubr.f32.vlgmr.msra.gmra.mxu0 %v1196_v2 }
  0xfa   :  { %v403_v2 = vpop.f32.mrf.mxu0  ;;  %v474_v52 = vpop.f32.mrf.mxu1 }
  0xfb   :  { %v404_v53 = vadd.f32 %v403_v2, %v270_v47  ;;  %v475_v54 = vadd.f32 %v474_v52, %v278_v48 }
  0xfc   :  { %v405_v55 = vpop.f32.mrf.mxu0  ;;  %v476_v56 = vpop.f32.mrf.mxu1 }
  0xfd   :  { %v406_v57 = vadd.f32 %v405_v55, %v274_v49  ;;  %v477_v59 = vadd.f32 %v476_v56, %v282_v51 }
  0xff   :  { %v848_v60 = vcombine.low %v404_v53, %v406_v57  ;;  %v849_v61 = vcombine.low %v475_v54, %v477_v59 }
 0x101   :  { %v856_v62 = vrot.slane %v848_v60, %v855_v58  ;;  %v863_v63 = vrot.slane %v849_v61, %v855_v58 }
 0x103   :  { %v864_v1 = vcombine.low %v856_v62, %v863_v63 }
 0x105   :  { %911 = vst [vmem:[%s1716_s3] sm:$0xff] %v864_v1 }
 0x11c   :  { %v545_v11 = vpop.f32.mrf.mxu0  ;;  %v616_v12 = vpop.f32.mrf.mxu1 }
 0x11d   :  { %v546_v13 = vadd.f32 %v545_v11, %v286_v7  ;;  %v617_v0 = vadd.f32 %v616_v12, %v294_v8 }
 0x11e   :  { %v547_v14 = vpop.f32.mrf.mxu0  ;;  %v618_v15 = vpop.f32.mrf.mxu1 }
 0x11f   :  { %v548_v16 = vadd.f32 %v547_v14, %v290_v9  ;;  %v619_v17 = vadd.f32 %v618_v15, %v298_v10 }
 0x121   :  { %v865_v18 = vcombine.low %v546_v13, %v548_v16  ;;  %v866_v19 = vcombine.low %v617_v0, %v619_v17 }
 0x123   :  { %v873_v20 = vrot.slane %v865_v18, %v855_v58  ;;  %v880_v21 = vrot.slane %v866_v19, %v855_v58 }
 0x125   :  { %v881_v22 = vcombine.low %v873_v20, %v880_v21 }
 0x127   :  { %912 = vst [vmem:[%s1716_s3 + $0x8] sm:$0xff] %v881_v22 }
 0x13e   :  { %v687_v28 = vpop.f32.mrf.mxu0  ;;  %v758_v29 = vpop.f32.mrf.mxu1 }
 0x13f   :  { %v688_v30 = vadd.f32 %v687_v28, %v302_v24  ;;  %v759_v31 = vadd.f32 %v758_v29, %v310_v25 }
 0x140   :  { %v689_v32 = vpop.f32.mrf.mxu0  ;;  %v760_v33 = vpop.f32.mrf.mxu1 }
 0x141   :  { %v690_v34 = vadd.f32 %v689_v32, %v306_v26  ;;  %v761_v35 = vadd.f32 %v760_v33, %v314_v27 }
 0x143   :  { %v882_v36 = vcombine.low %v688_v30, %v690_v34  ;;  %v883_v37 = vcombine.low %v759_v31, %v761_v35 }
 0x145   :  { %v890_v38 = vrot.slane %v882_v36, %v855_v58  ;;  %v897_v39 = vrot.slane %v883_v37, %v855_v58 }
 0x147   :  { %v898_v42 = vcombine.low %v890_v38, %v897_v39 }
 0x149   :  { %913 = vst [vmem:[%s1716_s3 + $0x10] sm:$0xff] %v898_v42 }
 0x15f   :  { %v829_v43 = vpop.f32.mrf.mxu0 }
 0x160   :  { %v830_v45 = vadd.f32 %v829_v43, %v318_v40 }
 0x161   :  { %v831_v44 = vpop.f32.mrf.mxu0 }
 0x162   :  { %v832_v46 = vadd.f32 %v831_v44, %v322_v41 }
 0x164   :  { %v899_v47 = vcombine.low %v830_v45, %v832_v46 }
 0x166   :  { %v906_v48 = vrot.slane %v899_v47, %v855_v58 }
 0x168   :  { %917 = vst.msk [vmem:[%s1716_s3 + $0x18] sm:$0xf] %vm916_vm2, %v906_v48 }
 0x169   :  { %922 = vsyncpa [#allocation3], 1 }
 0x16a   :  { %923 = vsyncpa [#allocation5], 1 }

// kernel: generator_forward.10
= control target key start
LH: loop header
LB: loop body
LE: loop exit
PB: predicated region body
PF: predicated region fallthrough
CT: control target
= control target key end

     0   :  { %vm212_vm0 = vcmask 1040384   ;;  %v1667_v3 = vmov 0.0   ;;  %vm196_vm1 = vcmask 400384   ;;  %vm1669_vm2 = vmmov 0   ;;  %s2831_s1 = inlined_call_operand.vmem [shape: f32[49,2592], index: 1, kind: input, shape index: {}]   ;;  %s2832_s0 = inlined_call_operand.vmem [shape: f32[40,49], index: 0, kind: input, shape index: {}]   ;;  %s2833_s2 = inlined_call_operand.vmem [shape: f32[40,1], index: 2, kind: input, shape index: {}]   ;;  %s2834_s3 = inlined_call_operand.vmem [shape: f32[40,2592], index: 3, kind: output, shape index: {}]  }
   0x1   :  { %v146_v0 = vld [vmem:[%s2831_s1 + $0x3f8] sm:$0x1]  ;;  %v148_v1 = vld [vmem:[%s2831_s1 + $0x408] sm:$0x1]  ;;  %v145_v2 = vld [vmem:[%s2831_s1 + $0x3f0] sm:$0x1]  ;;  %340 = vmatprep.mubr.f32.mxu0 %v1667_v3  ;;  %435 = vmatprep.mubr.f32.mxu1 %v1667_v3 }
   0x2   :  { %1531 = vmatprep.subr.msk.mxu0 %vm212_vm0, %v146_v0  ;;  %1538 = vmatprep.subr.msk.mxu1 %vm212_vm0, %v148_v1  ;;  %v147_v4 = vld [vmem:[%s2831_s1 + $0x400] sm:$0x1]  ;;  %v125_v5 = vld [vmem:[%s2831_s1 + $0x350] sm:$0xff]  ;;  %v124_v7 = vld [vmem:[%s2831_s1 + $0x348] sm:$0xff]  ;;  %vm1441_vm3 = vcmask 261120  }
   0x3   :  { %v127_v6 = vld [vmem:[%s2831_s1 + $0x360] sm:$0xff]  ;;  %1532 = vmatpush1.msk.msra.mxu0 %vm212_vm0, %v145_v2  ;;  %1539 = vmatpush1.msk.msra.mxu1 %vm212_vm0, %v147_v4  ;;  %v126_v8 = vld [vmem:[%s2831_s1 + $0x358] sm:$0xff]  ;;  %v104_v9 = vld [vmem:[%s2831_s1 + $0x2a8] sm:$0xff] }
   0x4   :  { %296 = vmatprep.subr.mxu0 %v125_v5  ;;  %391 = vmatprep.subr.mxu1 %v127_v6  ;;  %v106_v10 = vld [vmem:[%s2831_s1 + $0x2b8] sm:$0xff]  ;;  %v103_v11 = vld [vmem:[%s2831_s1 + $0x2a0] sm:$0xff]  ;;  %v105_v12 = vld [vmem:[%s2831_s1 + $0x2b0] sm:$0xff] }
   0x5   :  { %297 = vmatpush1.msra.mxu0 %v124_v7  ;;  %392 = vmatpush1.msra.mxu1 %v126_v8  ;;  %v83_v13 = vld [vmem:[%s2831_s1 + $0x200] sm:$0xff]  ;;  %v85_v14 = vld [vmem:[%s2831_s1 + $0x210] sm:$0xff]  ;;  %v82_v15 = vld [vmem:[%s2831_s1 + $0x1f8] sm:$0xff] }
   0x6   :  { %298 = vmatprep.subr.mxu0 %v104_v9  ;;  %393 = vmatprep.subr.mxu1 %v106_v10  ;;  %v84_v16 = vld [vmem:[%s2831_s1 + $0x208] sm:$0xff]  ;;  %v62_v17 = vld [vmem:[%s2831_s1 + $0x158] sm:$0xff]  ;;  %v61_v19 = vld [vmem:[%s2831_s1 + $0x150] sm:$0xff] }
   0x7   :  { %299 = vmatpush1.msra.mxu0 %v103_v11  ;;  %394 = vmatpush1.msra.mxu1 %v105_v12  ;;  %v64_v18 = vld [vmem:[%s2831_s1 + $0x168] sm:$0xff]  ;;  %v63_v20 = vld [vmem:[%s2831_s1 + $0x160] sm:$0xff]  ;;  %v41_v21 = vld [vmem:[%s2831_s1 + $0xb0] sm:$0xff] }
   0x8   :  { %300 = vmatprep.subr.mxu0 %v83_v13  ;;  %395 = vmatprep.subr.mxu1 %v85_v14  ;;  %v43_v22 = vld [vmem:[%s2831_s1 + $0xc0] sm:$0xff]  ;;  %v40_v23 = vld [vmem:[%s2831_s1 + $0xa8] sm:$0xff]  ;;  %v42_v24 = vld [vmem:[%s2831_s1 + $0xb8] sm:$0xff] }
   0x9   :  { %301 = vmatpush1.msra.mxu0 %v82_v15  ;;  %396 = vmatpush1.msra.mxu1 %v84_v16  ;;  %v20_v25 = vld [vmem:[%s2831_s1 + $0x8] sm:$0xff]  ;;  %v22_v26 = vld [vmem:[%s2831_s1 + $0x18] sm:$0xff]  ;;  %v19_v27 = vld [vmem:[%s2831_s1] sm:$0xff] }
   0xa   :  { %302 = vmatprep.subr.mxu0 %v62_v17  ;;  %397 = vmatprep.subr.mxu1 %v64_v18  ;;  %v21_v28 = vld [vmem:[%s2831_s1 + $0x10] sm:$0xff]  ;;  %v1783_v29 = vld [vmem:[%s2832_s0] sm:$0xff]  ;;  %v150_v30 = vld [vmem:[%s2831_s1 + $0x418] sm:$0x1] }
   0xb   :  { %303 = vmatpush1.msra.mxu0 %v61_v19  ;;  %398 = vmatpush1.msra.mxu1 %v63_v20  ;;  %v149_v31 = vld [vmem:[%s2831_s1 + $0x410] sm:$0x1]  ;;  %v152_v33 = vld [vmem:[%s2831_s1 + $0x428] sm:$0x1]  ;;  %v151_v36 = vld [vmem:[%s2831_s1 + $0x420] sm:$0x1] }
   0xc   :  { %304 = vmatprep.subr.mxu0 %v41_v21  ;;  %399 = vmatprep.subr.mxu1 %v43_v22  ;;  %v129_v32 = vld [vmem:[%s2831_s1 + $0x370] sm:$0xff]  ;;  %v1806_v34 = vld [vmem:[%s2832_s0 + $0x8] sm:$0xff]  ;;  %v107_v38 = vld [vmem:[%s2831_s1 + $0x2c0] sm:$0xff] }
   0xd   :  { %305 = vmatpush1.msra.mxu0 %v40_v23  ;;  %400 = vmatpush1.msra.mxu1 %v42_v24  ;;  %v128_v35 = vld [vmem:[%s2831_s1 + $0x368] sm:$0xff]  ;;  %v131_v39 = vld [vmem:[%s2831_s1 + $0x380] sm:$0xff]  ;;  %v1834_v40 = vld [vmem:[%s2832_s0 + $0x10] sm:$0xff] }
   0xe   :  { %306 = vmatprep.subr.mxu0 %v20_v25  ;;  %401 = vmatprep.subr.mxu1 %v22_v26  ;;  %v108_v37 = vld [vmem:[%s2831_s1 + $0x2c8] sm:$0xff]  ;;  %v87_v41 = vld [vmem:[%s2831_s1 + $0x220] sm:$0xff]  ;;  %v130_v42 = vld [vmem:[%s2831_s1 + $0x378] sm:$0xff] }
   0xf   :  { %307 = vmatpush1.msra.mxu0 %v19_v27  ;;  %402 = vmatpush1.msra.mxu1 %v21_v28  ;;  %v86_v43 = vld [vmem:[%s2831_s1 + $0x218] sm:$0xff]  ;;  %v109_v45 = vld [vmem:[%s2831_s1 + $0x2d0] sm:$0xff]  ;;  %v88_v50 = vld [vmem:[%s2831_s1 + $0x228] sm:$0xff] }
  0x10   :  { %1533 = vmatmul.mubr.msk.f32.vlgmr.msra.gmra.mxu0 %vm196_vm1, %v1783_v29  ;;  %1540 = vmatmul.mubr.msk.f32.vlgmr.msra.gmra.mxu1 %vm196_vm1, %v1783_v29  ;;  %v110_v44 = vld [vmem:[%s2831_s1 + $0x2d8] sm:$0xff]  ;;  %v89_v48 = vld [vmem:[%s2831_s1 + $0x230] sm:$0xff]  ;;  %v68_v51 = vld [vmem:[%s2831_s1 + $0x188] sm:$0xff] }
  0x11   :  { %1545 = vmatprep.subr.msk.mxu0 %vm212_vm0, %v150_v30  ;;  %346 = vmatprep.mubr.f32.mxu0 %v1667_v3  ;;  %v1860_v46 = vld [vmem:[%s2832_s0 + $0x18] sm:$0xff]  ;;  %v65_v49 = vld [vmem:[%s2831_s1 + $0x170] sm:$0xff]  ;;  %v67_v53 = vld [vmem:[%s2831_s1 + $0x180] sm:$0xff] }
  0x12   :  { %1546 = vmatpush1.msk.msra.mxu0 %vm212_vm0, %v149_v31  ;;  %441 = vmatprep.mubr.f32.mxu1 %v1667_v3  ;;  %v66_v47 = vld [vmem:[%s2831_s1 + $0x178] sm:$0xff]  ;;  %v45_v52 = vld [vmem:[%s2831_s1 + $0xd0] sm:$0xff]  ;;  %v1892_v54 = vld [vmem:[%s2832_s0 + $0x20] sm:$0xff] }
  0x13   :  { %486 = vmatprep.subr.mxu0 %v129_v32  ;;  %1552 = vmatprep.subr.msk.mxu1 %vm212_vm0, %v152_v33  ;;  %v44_v55 = vld [vmem:[%s2831_s1 + $0xc8] sm:$0xff]  ;;  %v47_v56 = vld [vmem:[%s2831_s1 + $0xe0] sm:$0xff]  ;;  %v46_v58 = vld [vmem:[%s2831_s1 + $0xd8] sm:$0xff] }
  0x14   :  { %1534 = vmatmul.mubr.msk.f32.gmra.mxu0 %vm196_vm1, %v1806_v34  ;;  %1541 = vmatmul.mubr.msk.f32.gmra.mxu1 %vm196_vm1, %v1806_v34  ;;  %v24_v57 = vld [vmem:[%s2831_s1 + $0x28] sm:$0xff]  ;;  %v23_v59 = vld [vmem:[%s2831_s1 + $0x20] sm:$0xff]  ;;  %v26_v60 = vld [vmem:[%s2831_s1 + $0x38] sm:$0xff] }
  0x15   :  { %487 = vmatpush1.msra.mxu0 %v128_v35  ;;  %1553 = vmatpush1.msk.msra.mxu1 %vm212_vm0, %v151_v36  ;;  %v25_v61 = vld [vmem:[%s2831_s1 + $0x30] sm:$0xff]  ;;  %v154_v62 = vld [vmem:[%s2831_s1 + $0x438] sm:$0x1]  ;;  %v156_v1 = vld [vmem:[%s2831_s1 + $0x448] sm:$0x1] }
  0x16   :  { %488 = vmatprep.subr.mxu0 %v108_v37  ;;  %352 = vmatprep.mubr.f32.mxu0 %v1667_v3  ;;  %v153_v63 = vld [vmem:[%s2831_s1 + $0x430] sm:$0x1]  ;;  %v132_v2 = vld [vmem:[%s2831_s1 + $0x388] sm:$0xff]  ;;  %v155_v4 = vld [vmem:[%s2831_s1 + $0x440] sm:$0x1] }
  0x17   :  { %447 = vmatprep.mubr.f32.mxu1 %v1667_v3  ;;  %489 = vmatpush1.msra.mxu0 %v107_v38  ;;  %v133_v0 = vld [vmem:[%s2831_s1 + $0x390] sm:$0xff]  ;;  %v112_v5 = vld [vmem:[%s2831_s1 + $0x2e8] sm:$0xff]  ;;  %v111_v6 = vld [vmem:[%s2831_s1 + $0x2e0] sm:$0xff] }
  0x18   :  { %581 = vmatprep.subr.mxu1 %v131_v39  ;;  %1535 = vmatmul.mubr.msk.f32.gmra.mxu0 %vm196_vm1, %v1834_v40  ;;  %v135_v7 = vld [vmem:[%s2831_s1 + $0x3a0] sm:$0xff]  ;;  %v134_v9 = vld [vmem:[%s2831_s1 + $0x398] sm:$0xff]  ;;  %v113_v12 = vld [vmem:[%s2831_s1 + $0x2f0] sm:$0xff] }
  0x19   :  { %1542 = vmatmul.mubr.msk.f32.gmra.mxu1 %vm196_vm1, %v1834_v40  ;;  %490 = vmatprep.subr.mxu0 %v87_v41  ;;  %v91_v8 = vld [vmem:[%s2831_s1 + $0x240] sm:$0xff]  ;;  %v90_v10 = vld [vmem:[%s2831_s1 + $0x238] sm:$0xff]  ;;  %v93_v14 = vld [vmem:[%s2831_s1 + $0x250] sm:$0xff] }
  0x1a   :  { %582 = vmatpush1.msra.mxu1 %v130_v42  ;;  %491 = vmatpush1.msra.mxu0 %v86_v43  ;;  %v114_v11 = vld [vmem:[%s2831_s1 + $0x2f8] sm:$0xff]  ;;  %v69_v15 = vld [vmem:[%s2831_s1 + $0x190] sm:$0xff]  ;;  %v92_v16 = vld [vmem:[%s2831_s1 + $0x248] sm:$0xff] }
  0x1b   :  { %583 = vmatprep.subr.mxu1 %v110_v44  ;;  %358 = vmatprep.mubr.f32.mxu0 %v1667_v3  ;;  %v70_v13 = vld [vmem:[%s2831_s1 + $0x198] sm:$0xff]  ;;  %v72_v17 = vld [vmem:[%s2831_s1 + $0x1a8] sm:$0xff]  ;;  %v49_v18 = vld [vmem:[%s2831_s1 + $0xf0] sm:$0xff] }
  0x1c   :  { %453 = vmatprep.mubr.f32.mxu1 %v1667_v3  ;;  %584 = vmatpush1.msra.mxu1 %v109_v45  ;;  %v71_v19 = vld [vmem:[%s2831_s1 + $0x1a0] sm:$0xff]  ;;  %v48_v20 = vld [vmem:[%s2831_s1 + $0xe8] sm:$0xff]  ;;  %v50_v23 = vld [vmem:[%s2831_s1 + $0xf8] sm:$0xff] }
  0x1d   :  { %1536 = vmatmul.mubr.msk.f32.gmra.mxu0 %vm196_vm1, %v1860_v46  ;;  %1543 = vmatmul.mubr.msk.f32.gmra.mxu1 %vm196_vm1, %v1860_v46  ;;  %v51_v21 = vld [vmem:[%s2831_s1 + $0x100] sm:$0xff]  ;;  %v28_v22 = vld [vmem:[%s2831_s1 + $0x48] sm:$0xff]  ;;  %v30_v25 = vld [vmem:[%s2831_s1 + $0x58] sm:$0xff] }
  0x1e   :  { %492 = vmatprep.subr.mxu0 %v66_v47  ;;  %585 = vmatprep.subr.mxu1 %v89_v48  ;;  %v27_v24 = vld [vmem:[%s2831_s1 + $0x40] sm:$0xff]  ;;  %v29_v26 = vld [vmem:[%s2831_s1 + $0x50] sm:$0xff]  ;;  %v158_v27 = vld [vmem:[%s2831_s1 + $0x458] sm:$0x1] }
  0x1f   :  { %493 = vmatpush1.msra.mxu0 %v65_v49  ;;  %586 = vmatpush1.msra.mxu1 %v88_v50  ;;  %v157_v28 = vld [vmem:[%s2831_s1 + $0x450] sm:$0x1]  ;;  %v160_v31 = vld [vmem:[%s2831_s1 + $0x468] sm:$0x1]  ;;  %v159_v33 = vld [vmem:[%s2831_s1 + $0x460] sm:$0x1] }
  0x20   :  { %587 = vmatprep.subr.mxu1 %v68_v51  ;;  %364 = vmatprep.mubr.f32.mxu0 %v1667_v3  ;;  %v137_v30 = vld [vmem:[%s2831_s1 + $0x3b0] sm:$0xff]  ;;  %v136_v32 = vld [vmem:[%s2831_s1 + $0x3a8] sm:$0xff]  ;;  %v115_v36 = vld [vmem:[%s2831_s1 + $0x300] sm:$0xff] }
  0x21   :  { %459 = vmatprep.mubr.f32.mxu1 %v1667_v3  ;;  %494 = vmatprep.subr.mxu0 %v45_v52  ;;  %v116_v35 = vld [vmem:[%s2831_s1 + $0x308] sm:$0xff]  ;;  %v139_v37 = vld [vmem:[%s2831_s1 + $0x3c0] sm:$0xff]  ;;  %v138_v39 = vld [vmem:[%s2831_s1 + $0x3b8] sm:$0xff] }
  0x22   :  { %588 = vmatpush1.msra.mxu1 %v67_v53  ;;  %1537 = vmatmul.mubr.msk.f32.gmra.mxu0 %vm196_vm1, %v1892_v54  ;;  %v95_v38 = vld [vmem:[%s2831_s1 + $0x260] sm:$0xff]  ;;  %v94_v41 = vld [vmem:[%s2831_s1 + $0x258] sm:$0xff]  ;;  %v117_v43 = vld [vmem:[%s2831_s1 + $0x310] sm:$0xff] }
  0x23   :  { %1544 = vmatmul.mubr.msk.f32.gmra.mxu1 %vm196_vm1, %v1892_v54  ;;  %495 = vmatpush1.msra.mxu0 %v44_v55  ;;  %v118_v42 = vld [vmem:[%s2831_s1 + $0x318] sm:$0xff]  ;;  %v97_v45 = vld [vmem:[%s2831_s1 + $0x270] sm:$0xff]  ;;  %v96_v48 = vld [vmem:[%s2831_s1 + $0x268] sm:$0xff] }
  0x24   :  { %589 = vmatprep.subr.mxu1 %v47_v56  ;;  %496 = vmatprep.subr.mxu0 %v24_v57  ;;  %v74_v44 = vld [vmem:[%s2831_s1 + $0x1b8] sm:$0xff]  ;;  %v73_v47 = vld [vmem:[%s2831_s1 + $0x1b0] sm:$0xff]  ;;  %v76_v49 = vld [vmem:[%s2831_s1 + $0x1c8] sm:$0xff] }
  0x25   :  { %590 = vmatpush1.msra.mxu1 %v46_v58  ;;  %497 = vmatpush1.msra.mxu0 %v23_v59  ;;  %v53_v50 = vld [vmem:[%s2831_s1 + $0x110] sm:$0xff]  ;;  %v75_v51 = vld [vmem:[%s2831_s1 + $0x1c0] sm:$0xff]  ;;  %v52_v52 = vld [vmem:[%s2831_s1 + $0x108] sm:$0xff] }
  0x26   :  { %591 = vmatprep.subr.mxu1 %v26_v60  ;;  %530 = vmatprep.mubr.f32.mxu0 %v1667_v3  ;;  %v55_v53 = vld [vmem:[%s2831_s1 + $0x120] sm:$0xff]  ;;  %v32_v55 = vld [vmem:[%s2831_s1 + $0x68] sm:$0xff]  ;;  %v54_v56 = vld [vmem:[%s2831_s1 + $0x118] sm:$0xff] }
  0x27   :  { %592 = vmatpush1.msra.mxu1 %v25_v61  ;;  %625 = vmatprep.mubr.f32.mxu1 %v1667_v3  ;;  %v31_v57 = vld [vmem:[%s2831_s1 + $0x60] sm:$0xff]  ;;  %v34_v58 = vld [vmem:[%s2831_s1 + $0x78] sm:$0xff]  ;;  %v33_v59 = vld [vmem:[%s2831_s1 + $0x70] sm:$0xff] }
  0x28   :  { %1547 = vmatmul.mubr.msk.f32.vlgmr.msra.gmra.mxu0 %vm196_vm1, %v1783_v29  ;;  %1554 = vmatmul.mubr.msk.f32.vlgmr.msra.gmra.mxu1 %vm196_vm1, %v1783_v29  ;;  %v162_v60 = vld [vmem:[%s2831_s1 + $0x478] sm:$0x1]  ;;  %v161_v61 = vld [vmem:[%s2831_s1 + $0x470] sm:$0x1] }
  0x29   :  { %1559 = vmatprep.subr.msk.mxu0 %vm212_vm0, %v154_v62  ;;  %536 = vmatprep.mubr.f32.mxu0 %v1667_v3  ;;  %v141_v62 = vld [vmem:[%s2831_s1 + $0x3d0] sm:$0xff] }
  0x2a   :  { %1560 = vmatpush1.msk.msra.mxu0 %vm212_vm0, %v153_v63  ;;  %631 = vmatprep.mubr.f32.mxu1 %v1667_v3  ;;  %v164_v63 = vld [vmem:[%s2831_s1 + $0x488] sm:$0x1] }
  0x2b   :  { %676 = vmatprep.subr.mxu0 %v133_v0  ;;  %1566 = vmatprep.subr.msk.mxu1 %vm212_vm0, %v156_v1  ;;  %v140_v0 = vld [vmem:[%s2831_s1 + $0x3c8] sm:$0xff]  ;;  %v163_v1 = vld [vmem:[%s2831_s1 + $0x480] sm:$0x1] }
  0x2c   :  { %1548 = vmatmul.mubr.msk.f32.gmra.mxu0 %vm196_vm1, %v1806_v34  ;;  %1555 = vmatmul.mubr.msk.f32.gmra.mxu1 %vm196_vm1, %v1806_v34 }
  0x2d   :  { %677 = vmatpush1.msra.mxu0 %v132_v2  ;;  %1567 = vmatpush1.msk.msra.mxu1 %vm212_vm0, %v155_v4  ;;  %v120_v2 = vld [vmem:[%s2831_s1 + $0x328] sm:$0xff]  ;;  %v119_v4 = vld [vmem:[%s2831_s1 + $0x320] sm:$0xff] }
  0x2e   :  { %678 = vmatprep.subr.mxu0 %v112_v5  ;;  %542 = vmatprep.mubr.f32.mxu0 %v1667_v3  ;;  %v143_v5 = vld [vmem:[%s2831_s1 + $0x3e0] sm:$0xff] }
  0x2f   :  { %637 = vmatprep.mubr.f32.mxu1 %v1667_v3  ;;  %679 = vmatpush1.msra.mxu0 %v111_v6  ;;  %v142_v6 = vld [vmem:[%s2831_s1 + $0x3d8] sm:$0xff] }
  0x30   :  { %771 = vmatprep.subr.mxu1 %v135_v7  ;;  %1549 = vmatmul.mubr.msk.f32.gmra.mxu0 %vm196_vm1, %v1834_v40  ;;  %v99_v7 = vld [vmem:[%s2831_s1 + $0x280] sm:$0xff] }
  0x31   :  { %1556 = vmatmul.mubr.msk.f32.gmra.mxu1 %vm196_vm1, %v1834_v40  ;;  %680 = vmatprep.subr.mxu0 %v91_v8  ;;  %v166_v8 = vld [vmem:[%s2833_s2] sm:$0xff] }
  0x32   :  { %772 = vmatpush1.msra.mxu1 %v134_v9  ;;  %681 = vmatpush1.msra.mxu0 %v90_v10  ;;  %v98_v9 = vld [vmem:[%s2831_s1 + $0x278] sm:$0xff]  ;;  %v1668_v10 = vmov 0  }
  0x33   :  { %773 = vmatprep.subr.mxu1 %v114_v11  ;;  %548 = vmatprep.mubr.f32.mxu0 %v1667_v3  ;;  %v122_v11 = vld [vmem:[%s2831_s1 + $0x338] sm:$0xff] }
  0x34   :  { %643 = vmatprep.mubr.f32.mxu1 %v1667_v3  ;;  %774 = vmatpush1.msra.mxu1 %v113_v12  ;;  %v121_v12 = vld [vmem:[%s2831_s1 + $0x330] sm:$0xff] }
  0x35   :  { %1550 = vmatmul.mubr.msk.f32.gmra.mxu0 %vm196_vm1, %v1860_v46  ;;  %1557 = vmatmul.mubr.msk.f32.gmra.mxu1 %vm196_vm1, %v1860_v46 }
  0x36   :  { %682 = vmatprep.subr.mxu0 %v70_v13  ;;  %775 = vmatprep.subr.mxu1 %v93_v14  ;;  %v78_v13 = vld [vmem:[%s2831_s1 + $0x1d8] sm:$0xff]  ;;  %v101_v14 = vld [vmem:[%s2831_s1 + $0x290] sm:$0xff] }
  0x37   :  { %683 = vmatpush1.msra.mxu0 %v69_v15  ;;  %776 = vmatpush1.msra.mxu1 %v92_v16  ;;  %v77_v15 = vld [vmem:[%s2831_s1 + $0x1d0] sm:$0xff]  ;;  %v100_v16 = vld [vmem:[%s2831_s1 + $0x288] sm:$0xff] }
  0x38   :  { %777 = vmatprep.subr.mxu1 %v72_v17  ;;  %554 = vmatprep.mubr.f32.mxu0 %v1667_v3  ;;  %v167_v17 = vld [vmem:[%s2833_s2 + $0x8] sm:$0xff] }
  0x39   :  { %649 = vmatprep.mubr.f32.mxu1 %v1667_v3  ;;  %684 = vmatprep.subr.mxu0 %v49_v18  ;;  %v80_v18 = vld [vmem:[%s2831_s1 + $0x1e8] sm:$0xff] }
  0x3a   :  { %778 = vmatpush1.msra.mxu1 %v71_v19  ;;  %1551 = vmatmul.mubr.msk.f32.gmra.mxu0 %vm196_vm1, %v1892_v54  ;;  %v57_v19 = vld [vmem:[%s2831_s1 + $0x130] sm:$0xff] }
  0x3b   :  { %1558 = vmatmul.mubr.msk.f32.gmra.mxu1 %vm196_vm1, %v1892_v54  ;;  %685 = vmatpush1.msra.mxu0 %v48_v20  ;;  %v79_v20 = vld [vmem:[%s2831_s1 + $0x1e0] sm:$0xff] }
  0x3c   :  { %779 = vmatprep.subr.mxu1 %v51_v21  ;;  %686 = vmatprep.subr.mxu0 %v28_v22  ;;  %v56_v21 = vld [vmem:[%s2831_s1 + $0x128] sm:$0xff]  ;;  %v59_v22 = vld [vmem:[%s2831_s1 + $0x140] sm:$0xff] }
  0x3d   :  { %780 = vmatpush1.msra.mxu1 %v50_v23  ;;  %687 = vmatpush1.msra.mxu0 %v27_v24  ;;  %v58_v23 = vld [vmem:[%s2831_s1 + $0x138] sm:$0xff]  ;;  %v168_v24 = vld [vmem:[%s2833_s2 + $0x10] sm:$0xff] }
  0x3e   :  { %781 = vmatprep.subr.mxu1 %v30_v25  ;;  %720 = vmatprep.mubr.f32.mxu0 %v1667_v3  ;;  %v36_v25 = vld [vmem:[%s2831_s1 + $0x88] sm:$0xff] }
  0x3f   :  { %782 = vmatpush1.msra.mxu1 %v29_v26  ;;  %815 = vmatprep.mubr.f32.mxu1 %v1667_v3  ;;  %v38_v26 = vld [vmem:[%s2831_s1 + $0x98] sm:$0xff] }
  0x40   :  { %1561 = vmatmul.mubr.msk.f32.vlgmr.msra.gmra.mxu0 %vm196_vm1, %v1783_v29  ;;  %1568 = vmatmul.mubr.msk.f32.vlgmr.msra.gmra.mxu1 %vm196_vm1, %v1783_v29 }
  0x41   :  { %1573 = vmatprep.subr.msk.mxu0 %vm212_vm0, %v158_v27  ;;  %726 = vmatprep.mubr.f32.mxu0 %v1667_v3  ;;  %v35_v27 = vld [vmem:[%s2831_s1 + $0x80] sm:$0xff] }
  0x42   :  { %1574 = vmatpush1.msk.msra.mxu0 %vm212_vm0, %v157_v28  ;;  %821 = vmatprep.mubr.f32.mxu1 %v1667_v3  ;;  %v37_v28 = vld [vmem:[%s2831_s1 + $0x90] sm:$0xff] }
  0x43   :  { %866 = vmatprep.subr.mxu0 %v137_v30  ;;  %1580 = vmatprep.subr.msk.mxu1 %vm212_vm0, %v160_v31  ;;  %v165_v30 = vld [vmem:[%s2831_s1 + $0x490] sm:$0x1]  ;;  %v169_v31 = vld [vmem:[%s2833_s2 + $0x18] sm:$0xff] }
  0x44   :  { %1562 = vmatmul.mubr.msk.f32.gmra.mxu0 %vm196_vm1, %v1806_v34  ;;  %1569 = vmatmul.mubr.msk.f32.gmra.mxu1 %vm196_vm1, %v1806_v34 }
  0x45   :  { %867 = vmatpush1.msra.mxu0 %v136_v32  ;;  %1581 = vmatpush1.msk.msra.mxu1 %vm212_vm0, %v159_v33  ;;  %v144_v32 = vld [vmem:[%s2831_s1 + $0x3e8] sm:$0xff]  ;;  %v170_v33 = vld [vmem:[%s2833_s2 + $0x20] sm:$0xff] }
  0x46   :  { %868 = vmatprep.subr.mxu0 %v116_v35  ;;  %732 = vmatprep.mubr.f32.mxu0 %v1667_v3  ;;  %v123_v35 = vld [vmem:[%s2831_s1 + $0x340] sm:$0xff] }
  0x47   :  { %827 = vmatprep.mubr.f32.mxu1 %v1667_v3  ;;  %869 = vmatpush1.msra.mxu0 %v115_v36  ;;  %v102_v36 = vld [vmem:[%s2831_s1 + $0x298] sm:$0xff] }
  0x48   :  { %961 = vmatprep.subr.mxu1 %v139_v37  ;;  %1563 = vmatmul.mubr.msk.f32.gmra.mxu0 %vm196_vm1, %v1834_v40  ;;  %v81_v37 = vld [vmem:[%s2831_s1 + $0x1f0] sm:$0xff] }
  0x49   :  { %1570 = vmatmul.mubr.msk.f32.gmra.mxu1 %vm196_vm1, %v1834_v40  ;;  %870 = vmatprep.subr.mxu0 %v95_v38  ;;  %v60_v38 = vld [vmem:[%s2831_s1 + $0x148] sm:$0xff] }
  0x4a   :  { %962 = vmatpush1.msra.mxu1 %v138_v39  ;;  %871 = vmatpush1.msra.mxu0 %v94_v41  ;;  %v39_v39 = vld [vmem:[%s2831_s1 + $0xa0] sm:$0xff] }
  0x4b   :  { %963 = vmatprep.subr.mxu1 %v118_v42  ;;  %738 = vmatprep.mubr.f32.mxu0 %v1667_v3 }
  0x4c   :  { %833 = vmatprep.mubr.f32.mxu1 %v1667_v3  ;;  %964 = vmatpush1.msra.mxu1 %v117_v43 }
  0x4d   :  { %1564 = vmatmul.mubr.msk.f32.gmra.mxu0 %vm196_vm1, %v1860_v46  ;;  %1571 = vmatmul.mubr.msk.f32.gmra.mxu1 %vm196_vm1, %v1860_v46 }
  0x4e   :  { %872 = vmatprep.subr.mxu0 %v74_v44  ;;  %965 = vmatprep.subr.mxu1 %v97_v45 }
  0x4f   :  { %873 = vmatpush1.msra.mxu0 %v73_v47  ;;  %966 = vmatpush1.msra.mxu1 %v96_v48 }
  0x50   :  { %967 = vmatprep.subr.mxu1 %v76_v49  ;;  %744 = vmatprep.mubr.f32.mxu0 %v1667_v3 }
  0x51   :  { %839 = vmatprep.mubr.f32.mxu1 %v1667_v3  ;;  %874 = vmatprep.subr.mxu0 %v53_v50 }
  0x52   :  { %968 = vmatpush1.msra.mxu1 %v75_v51  ;;  %1565 = vmatmul.mubr.msk.f32.gmra.mxu0 %vm196_vm1, %v1892_v54 }
  0x53   :  { %1572 = vmatmul.mubr.msk.f32.gmra.mxu1 %vm196_vm1, %v1892_v54  ;;  %875 = vmatpush1.msra.mxu0 %v52_v52 }
  0x54   :  { %969 = vmatprep.subr.mxu1 %v55_v53  ;;  %876 = vmatprep.subr.mxu0 %v32_v55 }
  0x55   :  { %970 = vmatpush1.msra.mxu1 %v54_v56  ;;  %877 = vmatpush1.msra.mxu0 %v31_v57 }
  0x56   :  { %971 = vmatprep.subr.mxu1 %v34_v58  ;;  %910 = vmatprep.mubr.f32.mxu0 %v1667_v3 }
  0x57   :  { %972 = vmatpush1.msra.mxu1 %v33_v59  ;;  %1005 = vmatprep.mubr.f32.mxu1 %v1667_v3 }
  0x58   :  { %1575 = vmatmul.mubr.msk.f32.vlgmr.msra.gmra.mxu0 %vm196_vm1, %v1783_v29  ;;  %1582 = vmatmul.mubr.msk.f32.vlgmr.msra.gmra.mxu1 %vm196_vm1, %v1783_v29 }
  0x59   :  { %1587 = vmatprep.subr.msk.mxu0 %vm212_vm0, %v162_v60  ;;  %916 = vmatprep.mubr.f32.mxu0 %v1667_v3 }
  0x5a   :  { %1588 = vmatpush1.msk.msra.mxu0 %vm212_vm0, %v161_v61  ;;  %1011 = vmatprep.mubr.f32.mxu1 %v1667_v3 }
  0x5b   :  { %1056 = vmatprep.subr.mxu0 %v141_v62  ;;  %1594 = vmatprep.subr.msk.mxu1 %vm212_vm0, %v164_v63 }
  0x5c   :  { %1576 = vmatmul.mubr.msk.f32.gmra.mxu0 %vm196_vm1, %v1806_v34  ;;  %1583 = vmatmul.mubr.msk.f32.gmra.mxu1 %vm196_vm1, %v1806_v34 }
  0x5d   :  { %1057 = vmatpush1.msra.mxu0 %v140_v0  ;;  %1595 = vmatpush1.msk.msra.mxu1 %vm212_vm0, %v163_v1 }
  0x5e   :  { %1058 = vmatprep.subr.mxu0 %v120_v2  ;;  %922 = vmatprep.mubr.f32.mxu0 %v1667_v3 }
  0x5f   :  { %1017 = vmatprep.mubr.f32.mxu1 %v1667_v3  ;;  %1059 = vmatpush1.msra.mxu0 %v119_v4 }
  0x60   :  { %1151 = vmatprep.subr.mxu1 %v143_v5  ;;  %1577 = vmatmul.mubr.msk.f32.gmra.mxu0 %vm196_vm1, %v1834_v40 }
  0x61   :  { %1584 = vmatmul.mubr.msk.f32.gmra.mxu1 %vm196_vm1, %v1834_v40  ;;  %1665 = vset.pattern.permute.xlu0 %v1668_v10 }
  0x62   :  { %1152 = vmatpush1.msra.mxu1 %v142_v6  ;;  %1060 = vmatprep.subr.mxu0 %v99_v7 }
  0x63   :  { %173 = vperm.xlu0 %1665, %v166_v8   ;;  %1061 = vmatpush1.msra.mxu0 %v98_v9 }
  0x64   :  { %1153 = vmatprep.subr.mxu1 %v122_v11  ;;  %928 = vmatprep.mubr.f32.mxu0 %v1667_v3 }
  0x65   :  { %1023 = vmatprep.mubr.f32.mxu1 %v1667_v3  ;;  %1154 = vmatpush1.msra.mxu1 %v121_v12 }
  0x66   :  { %1578 = vmatmul.mubr.msk.f32.gmra.mxu0 %vm196_vm1, %v1860_v46  ;;  %1585 = vmatmul.mubr.msk.f32.gmra.mxu1 %vm196_vm1, %v1860_v46 }
  0x67   :  { %1062 = vmatprep.subr.mxu0 %v78_v13  ;;  %1155 = vmatprep.subr.mxu1 %v101_v14 }
  0x68   :  { %1063 = vmatpush1.msra.mxu0 %v77_v15  ;;  %1156 = vmatpush1.msra.mxu1 %v100_v16 }
  0x69   :  { %178 = vperm.xlu0 %1665, %v167_v17   ;;  %1157 = vmatprep.subr.mxu1 %v80_v18 }
  0x6a   :  { %934 = vmatprep.mubr.f32.mxu0 %v1667_v3  ;;  %1029 = vmatprep.mubr.f32.mxu1 %v1667_v3 }
  0x6b   :  { %1064 = vmatprep.subr.mxu0 %v57_v19  ;;  %1158 = vmatpush1.msra.mxu1 %v79_v20 }
  0x6c   :  { %1579 = vmatmul.mubr.msk.f32.gmra.mxu0 %vm196_vm1, %v1892_v54  ;;  %1586 = vmatmul.mubr.msk.f32.gmra.mxu1 %vm196_vm1, %v1892_v54 }
  0x6d   :  { %1065 = vmatpush1.msra.mxu0 %v56_v21  ;;  %1159 = vmatprep.subr.mxu1 %v59_v22 }
  0x6e   :  { %1666 = vset.pattern.permute.xlu1 %v1668_v10  ;;  %1160 = vmatpush1.msra.mxu1 %v58_v23 }
  0x6f   :  { %183 = vperm.xlu1 %1666, %v168_v24   ;;  %1066 = vmatprep.subr.mxu0 %v36_v25 }
  0x70   :  { %1161 = vmatprep.subr.mxu1 %v38_v26  ;;  %1067 = vmatpush1.msra.mxu0 %v35_v27 }
  0x71   :  { %1100 = vmatprep.mubr.f32.mxu0 %v1667_v3  ;;  %1162 = vmatpush1.msra.mxu1 %v37_v28 }
  0x72   :  { %1195 = vmatprep.mubr.f32.mxu1 %v1667_v3  ;;  %1589 = vmatmul.mubr.msk.f32.vlgmr.msra.gmra.mxu0 %vm196_vm1, %v1783_v29 }
  0x73   :  { %1596 = vmatmul.mubr.msk.f32.vlgmr.msra.gmra.mxu1 %vm196_vm1, %v1783_v29  ;;  %1619 = vmatprep.subr.mxu0 %v1667_v3 }
  0x74   :  { %1620 = vmatpush3.msk.msra.mxu0 %vm212_vm0, %v165_v30  ;;  %188 = vperm.xlu1 %1666, %v169_v31  }
  0x75   :  { %1106 = vmatprep.mubr.f32.mxu0 %v1667_v3  ;;  %1201 = vmatprep.mubr.f32.mxu1 %v1667_v3 }
  0x76   :  { %1621 = vmatprep.subr.mxu0 %v1667_v3  ;;  %1590 = vmatmul.mubr.msk.f32.gmra.mxu0 %vm196_vm1, %v1806_v34 }
  0x77   :  { %1597 = vmatmul.mubr.msk.f32.gmra.mxu1 %vm196_vm1, %v1806_v34  ;;  %1648 = vmatprep.subr.mxu1 %v1667_v3 }
  0x78   :  { %1622 = vmatpush3.msra.mxu0 %v144_v32  ;;  %1655 = vmatpush3.msk.msra.mxu1 %vm212_vm0, %v165_v30 }
  0x79   :  { %193 = vperm.xlu0 %1665, %v170_v33   ;;  %1623 = vmatprep.subr.mxu0 %v1667_v3 }
  0x7a   :  { %1112 = vmatprep.mubr.f32.mxu0 %v1667_v3  ;;  %1207 = vmatprep.mubr.f32.mxu1 %v1667_v3 }
  0x7b   :  { %1649 = vmatprep.subr.mxu1 %v1667_v3  ;;  %1624 = vmatpush3.msra.mxu0 %v123_v35 }
  0x7c   :  { %1591 = vmatmul.mubr.msk.f32.gmra.mxu0 %vm196_vm1, %v1834_v40  ;;  %1598 = vmatmul.mubr.msk.f32.gmra.mxu1 %vm196_vm1, %v1834_v40 }
  0x7d   :  { %1656 = vmatpush3.msra.mxu1 %v144_v32  ;;  %1625 = vmatprep.subr.mxu0 %v1667_v3 }
  0x7e   :  { %1650 = vmatprep.subr.mxu1 %v1667_v3  ;;  %1626 = vmatpush3.msra.mxu0 %v102_v36 }
  0x7f   :  { %1118 = vmatprep.mubr.f32.mxu0 %v1667_v3  ;;  %1213 = vmatprep.mubr.f32.mxu1 %v1667_v3 }
  0x80   :  { %1657 = vmatpush3.msra.mxu1 %v123_v35  ;;  %1592 = vmatmul.mubr.msk.f32.gmra.mxu0 %vm196_vm1, %v1860_v46 }
  0x81   :  { %1599 = vmatmul.mubr.msk.f32.gmra.mxu1 %vm196_vm1, %v1860_v46  ;;  %1651 = vmatprep.subr.mxu1 %v1667_v3 }
  0x82   :  { %1627 = vmatprep.subr.mxu0 %v1667_v3  ;;  %1658 = vmatpush3.msra.mxu1 %v102_v36 }
  0x83   :  { %1628 = vmatpush3.msra.mxu0 %v81_v37  ;;  %1652 = vmatprep.subr.mxu1 %v1667_v3 }
  0x84   :  { %1124 = vmatprep.mubr.f32.mxu0 %v1667_v3  ;;  %1219 = vmatprep.mubr.f32.mxu1 %v1667_v3 }
  0x85   :  { %1659 = vmatpush3.msra.mxu1 %v81_v37  ;;  %1629 = vmatprep.subr.mxu0 %v1667_v3 }
  0x86   :  { %1593 = vmatmul.mubr.msk.f32.gmra.mxu0 %vm196_vm1, %v1892_v54  ;;  %1600 = vmatmul.mubr.msk.f32.gmra.mxu1 %vm196_vm1, %v1892_v54 }
  0x87   :  { %1653 = vmatprep.subr.mxu1 %v1667_v3  ;;  %1630 = vmatpush3.msra.mxu0 %v60_v38 }
  0x88   :  { %1660 = vmatpush3.msra.mxu1 %v60_v38  ;;  %1631 = vmatprep.subr.mxu0 %v1667_v3 }
  0x89   :  { %1654 = vmatprep.subr.mxu1 %v1667_v3  ;;  %1632 = vmatpush3.msra.mxu0 %v39_v39 }
  0x8a   :  { %1661 = vmatpush3.msra.mxu1 %v39_v39  ;;  %1633 = vmatprep.mubr.msk.f32.mxu0 %vm1669_vm2, %v1667_v3 }
  0x8b   :  { %1642 = vmatprep.mubr.msk.f32.mxu1 %vm1669_vm2, %v1667_v3  ;;  %1634 = vmatmul.mubr.msk.f32.vlgmr.msra.gmra.mxu0 %vm196_vm1, %v1783_v29 }
  0x8c   :  { %1643 = vmatmul.mubr.msk.f32.vlgmr.msra.gmra.mxu1 %vm196_vm1, %v1860_v46  ;;  %1636 = vmatprep.mubr.msk.f32.mxu0 %vm1669_vm2, %v1667_v3 }
  0x8d   :  { %1645 = vmatprep.mubr.msk.f32.mxu1 %vm1669_vm2, %v1667_v3 }
  0x8f   :  { %1637 = vmatmul.mubr.msk.f32.gmra.mxu0 %vm196_vm1, %v1806_v34 }
  0x90   :  { %1646 = vmatmul.mubr.msk.f32.gmra.mxu1 %vm196_vm1, %v1892_v54  ;;  %1639 = vmatprep.mubr.msk.f32.mxu0 %vm1669_vm2, %v1667_v3 }
  0x93   :  { %1640 = vmatmul.mubr.msk.f32.gmra.mxu0 %vm196_vm1, %v1834_v40 }
  0xd0   :  { %v342_v41 = vpop.f32.mrf.mxu0  ;;  %v437_v29 = vpop.f32.mrf.mxu1 }
  0xd2   :  { %v344_v42 = vpop.f32.mrf.mxu0  ;;  %v439_v43 = vpop.f32.mrf.mxu1 }
  0xd4   :  { %v348_v46 = vpop.f32.mrf.mxu0  ;;  %v443_v44 = vpop.f32.mrf.mxu1 }
  0xd6   :  { %v350_v45 = vpop.f32.mrf.mxu0  ;;  %v445_v47 = vpop.f32.mrf.mxu1 }
  0xd8   :  { %v354_v48 = vpop.f32.mrf.mxu0 }
  0xd9   :  { %v449_v49 = vpop.f32.mrf.mxu1 }
  0xda   :  { %v356_v50 = vpop.f32.mrf.mxu0 }
  0xdb   :  { %v451_v34 = vpop.f32.mrf.mxu1 }
  0xdd   :  { %v2372_v51 = vpop.f32.mrf.mxu0  ;;  %v2374_v54 = vpop.f32.mrf.mxu1 }
  0xde   :  { %v2376_v3 = vpop.permute.xlu0 %173 }
  0xdf   :  { %v343_v40 = vadd.f32 %v342_v41, %v2376_v3  ;;  %v438_v52 = vadd.f32 %v437_v29, %v2376_v3  ;;  %v345_v53 = vadd.f32 %v344_v42, %v2376_v3  ;;  %v440_v55 = vadd.f32 %v439_v43, %v2376_v3  ;;  %v2382_v56 = vpop.f32.mrf.mxu0  ;;  %v2384_v57 = vpop.f32.mrf.mxu1 }
  0xe1   :  { %v1316_v58 = vmax.f32 %v343_v40, 0.0  ;;  %v1318_v59 = vmax.f32 %v438_v52, 0.0  ;;  %v1317_v60 = vmax.f32 %v345_v53, 0.0  ;;  %v1319_v61 = vmax.f32 %v440_v55, 0.0 }
  0xe2   :  { %v2386_v62 = vpop.f32.mrf.mxu0 }
  0xe3   :  { %1421 = vst [vmem:[%s2834_s3] sm:$0xff] %v1316_v58  ;;  %1423 = vst [vmem:[%s2834_s3 + $0x10] sm:$0xff] %v1318_v59  ;;  %v2400_v63 = vpop.f32.mrf.mxu1 }
  0xe4   :  { %1422 = vst [vmem:[%s2834_s3 + $0x8] sm:$0xff] %v1317_v60  ;;  %1424 = vst [vmem:[%s2834_s3 + $0x18] sm:$0xff] %v1319_v61  ;;  %v2402_v0 = vpop.permute.xlu0 %178  ;;  %v2404_v1 = vpop.f32.mrf.mxu0 }
  0xe5   :  { %v349_v2 = vadd.f32 %v348_v46, %v2402_v0  ;;  %v444_v4 = vadd.f32 %v443_v44, %v2402_v0  ;;  %v351_v5 = vadd.f32 %v350_v45, %v2402_v0  ;;  %v446_v6 = vadd.f32 %v445_v47, %v2402_v0  ;;  %v2410_v7 = vpop.f32.mrf.mxu1 }
  0xe7   :  { %v1337_v8 = vmax.f32 %v349_v2, 0.0  ;;  %v1339_v9 = vmax.f32 %v444_v4, 0.0  ;;  %v1338_v10 = vmax.f32 %v351_v5, 0.0  ;;  %v1340_v11 = vmax.f32 %v446_v6, 0.0 }
  0xe8   :  { %v532_v12 = vpop.f32.mrf.mxu0  ;;  %v627_v13 = vpop.f32.mrf.mxu1 }
  0xe9   :  { %1443 = vst [vmem:[%s2834_s3 + $0xa8] sm:$0xff] %v1337_v8  ;;  %1445 = vst [vmem:[%s2834_s3 + $0xb8] sm:$0xff] %v1339_v9  ;;  %v533_v14 = vadd.f32 %v532_v12, %v2376_v3  ;;  %v628_v15 = vadd.f32 %v627_v13, %v2376_v3 }
  0xea   :  { %1444 = vst [vmem:[%s2834_s3 + $0xb0] sm:$0xff] %v1338_v10  ;;  %1446 = vst [vmem:[%s2834_s3 + $0xc0] sm:$0xff] %v1340_v11  ;;  %v2426_v16 = vpop.permute.xlu1 %183  ;;  %v534_v17 = vpop.f32.mrf.mxu0 }
  0xeb   :  { %v355_v18 = vadd.f32 %v354_v48, %v2426_v16  ;;  %v450_v19 = vadd.f32 %v449_v49, %v2426_v16  ;;  %v357_v20 = vadd.f32 %v356_v50, %v2426_v16  ;;  %v452_v21 = vadd.f32 %v451_v34, %v2426_v16  ;;  %v629_v22 = vpop.f32.mrf.mxu1 }
  0xec   :  { %v1320_v23 = vmax.f32 %v533_v14, 0.0  ;;  %v1322_v24 = vmax.f32 %v628_v15, 0.0  ;;  %v535_v25 = vadd.f32 %v534_v17, %v2376_v3  ;;  %v630_v26 = vadd.f32 %v629_v22, %v2376_v3  ;;  %v538_v27 = vpop.f32.mrf.mxu0 }
  0xed   :  { %v1358_v28 = vmax.f32 %v355_v18, 0.0  ;;  %v1360_v30 = vmax.f32 %v450_v19, 0.0  ;;  %v1359_v31 = vmax.f32 %v357_v20, 0.0  ;;  %v1361_v32 = vmax.f32 %v452_v21, 0.0  ;;  %v633_v33 = vpop.f32.mrf.mxu1 }
  0xee   :  { %1425 = vst [vmem:[%s2834_s3 + $0x20] sm:$0xff] %v1320_v23  ;;  %1427 = vst [vmem:[%s2834_s3 + $0x30] sm:$0xff] %v1322_v24  ;;  %v1321_v35 = vmax.f32 %v535_v25, 0.0  ;;  %v1323_v36 = vmax.f32 %v630_v26, 0.0  ;;  %v539_v37 = vadd.f32 %v538_v27, %v2402_v0  ;;  %v634_v38 = vadd.f32 %v633_v33, %v2402_v0  ;;  %v540_v39 = vpop.f32.mrf.mxu0 }
  0xef   :  { %1464 = vst [vmem:[%s2834_s3 + $0x150] sm:$0xff] %v1358_v28  ;;  %1466 = vst [vmem:[%s2834_s3 + $0x160] sm:$0xff] %v1360_v30  ;;  %v2454_v41 = vpop.permute.xlu1 %188  ;;  %v541_v29 = vadd.f32 %v540_v39, %v2402_v0  ;;  %v635_v42 = vpop.f32.mrf.mxu1 }
  0xf0   :  { %1465 = vst [vmem:[%s2834_s3 + $0x158] sm:$0xff] %v1359_v31  ;;  %1467 = vst [vmem:[%s2834_s3 + $0x168] sm:$0xff] %v1361_v32  ;;  %v361_v43 = vadd.f32 %v2372_v51, %v2454_v41  ;;  %v456_v46 = vadd.f32 %v2374_v54, %v2454_v41  ;;  %v363_v44 = vadd.f32 %v2382_v56, %v2454_v41  ;;  %v544_v47 = vpop.f32.mrf.mxu0  ;;  %v1341_v48 = vmax.f32 %v539_v37, 0.0 }
  0xf1   :  { %v458_v45 = vadd.f32 %v2384_v57, %v2454_v41  ;;  %1426 = vst [vmem:[%s2834_s3 + $0x28] sm:$0xff] %v1321_v35  ;;  %1428 = vst [vmem:[%s2834_s3 + $0x38] sm:$0xff] %v1323_v36  ;;  %v1343_v49 = vmax.f32 %v634_v38, 0.0  ;;  %v1342_v50 = vmax.f32 %v541_v29, 0.0  ;;  %v636_v34 = vadd.f32 %v635_v42, %v2402_v0  ;;  %v639_v51 = vpop.f32.mrf.mxu1 }
  0xf2   :  { %v1379_v54 = vmax.f32 %v361_v43, 0.0  ;;  %v1381_v40 = vmax.f32 %v456_v46, 0.0  ;;  %v1380_v52 = vmax.f32 %v363_v44, 0.0  ;;  %v546_v55 = vpop.f32.mrf.mxu0  ;;  %1447 = vst [vmem:[%s2834_s3 + $0xc8] sm:$0xff] %v1341_v48  ;;  %v545_v57 = vadd.f32 %v544_v47, %v2426_v16 }
  0xf3   :  { %v1382_v53 = vmax.f32 %v458_v45, 0.0  ;;  %1449 = vst [vmem:[%s2834_s3 + $0xd8] sm:$0xff] %v1343_v49  ;;  %1448 = vst [vmem:[%s2834_s3 + $0xd0] sm:$0xff] %v1342_v50  ;;  %v1344_v56 = vmax.f32 %v636_v34, 0.0  ;;  %v640_v58 = vadd.f32 %v639_v51, %v2426_v16  ;;  %v547_v59 = vadd.f32 %v546_v55, %v2426_v16  ;;  %v641_v60 = vpop.f32.mrf.mxu1 }
  0xf4   :  { %1485 = vst [vmem:[%s2834_s3 + $0x1f8] sm:$0xff] %v1379_v54  ;;  %1487 = vst [vmem:[%s2834_s3 + $0x208] sm:$0xff] %v1381_v40  ;;  %v2496_v61 = vpop.permute.xlu0 %193  ;;  %v642_v2 = vadd.f32 %v641_v60, %v2426_v16  ;;  %v1362_v11 = vmax.f32 %v545_v57, 0.0 }
  0xf5   :  { %1486 = vst [vmem:[%s2834_s3 + $0x200] sm:$0xff] %v1380_v52  ;;  %1488 = vst [vmem:[%s2834_s3 + $0x210] sm:$0xff] %v1382_v53  ;;  %v367_v4 = vadd.f32 %v2386_v62, %v2496_v61  ;;  %v462_v5 = vadd.f32 %v2400_v63, %v2496_v61  ;;  %v369_v6 = vadd.f32 %v2404_v1, %v2496_v61  ;;  %v550_v9 = vpop.f32.mrf.mxu0  ;;  %v645_v10 = vpop.f32.mrf.mxu1  ;;  %v1364_v12 = vmax.f32 %v640_v58, 0.0 }
  0xf6   :  { %v464_v8 = vadd.f32 %v2410_v7, %v2496_v61  ;;  %1450 = vst [vmem:[%s2834_s3 + $0xe0] sm:$0xff] %v1344_v56  ;;  %v1363_v13 = vmax.f32 %v547_v59, 0.0  ;;  %v1365_v14 = vmax.f32 %v642_v2, 0.0  ;;  %1468 = vst [vmem:[%s2834_s3 + $0x170] sm:$0xff] %v1362_v11  ;;  %v551_v1 = vadd.f32 %v550_v9, %v2454_v41 }
  0xf7   :  { %v1400_v62 = vmax.f32 %v367_v4, 0.0  ;;  %v1402_v15 = vmax.f32 %v462_v5, 0.0  ;;  %v1401_v17 = vmax.f32 %v369_v6, 0.0  ;;  %v552_v18 = vpop.f32.mrf.mxu0  ;;  %v647_v19 = vpop.f32.mrf.mxu1  ;;  %1470 = vst [vmem:[%s2834_s3 + $0x180] sm:$0xff] %v1364_v12  ;;  %v646_v7 = vadd.f32 %v645_v10, %v2454_v41 }
  0xf8   :  { %v1403_v63 = vmax.f32 %v464_v8, 0.0  ;;  %1469 = vst [vmem:[%s2834_s3 + $0x178] sm:$0xff] %v1363_v13  ;;  %1471 = vst [vmem:[%s2834_s3 + $0x188] sm:$0xff] %v1365_v14  ;;  %v553_v20 = vadd.f32 %v552_v18, %v2454_v41  ;;  %v648_v21 = vadd.f32 %v647_v19, %v2454_v41  ;;  %v1383_v22 = vmax.f32 %v551_v1, 0.0 }
  0xf9   :  { %1506 = vst [vmem:[%s2834_s3 + $0x2a0] sm:$0xff] %v1400_v62  ;;  %1508 = vst [vmem:[%s2834_s3 + $0x2b0] sm:$0xff] %v1402_v15  ;;  %v1385_v23 = vmax.f32 %v646_v7, 0.0 }
  0xfa   :  { %1507 = vst [vmem:[%s2834_s3 + $0x2a8] sm:$0xff] %v1401_v17  ;;  %1509 = vst [vmem:[%s2834_s3 + $0x2b8] sm:$0xff] %v1403_v63  ;;  %v1384_v24 = vmax.f32 %v553_v20, 0.0  ;;  %v1386_v25 = vmax.f32 %v648_v21, 0.0  ;;  %v556_v26 = vpop.f32.mrf.mxu0 }
  0xfb   :  { %v557_v27 = vadd.f32 %v556_v26, %v2496_v61  ;;  %v651_v28 = vpop.f32.mrf.mxu1  ;;  %1489 = vst [vmem:[%s2834_s3 + $0x218] sm:$0xff] %v1383_v22  ;;  %1491 = vst [vmem:[%s2834_s3 + $0x228] sm:$0xff] %v1385_v23 }
  0xfc   :  { %1490 = vst [vmem:[%s2834_s3 + $0x220] sm:$0xff] %v1384_v24  ;;  %1492 = vst [vmem:[%s2834_s3 + $0x230] sm:$0xff] %v1386_v25  ;;  %v652_v30 = vadd.f32 %v651_v28, %v2496_v61  ;;  %v558_v31 = vpop.f32.mrf.mxu0 }
  0xfd   :  { %v1404_v32 = vmax.f32 %v557_v27, 0.0  ;;  %v559_v33 = vadd.f32 %v558_v31, %v2496_v61  ;;  %v653_v35 = vpop.f32.mrf.mxu1 }
  0xfe   :  { %v1406_v36 = vmax.f32 %v652_v30, 0.0  ;;  %v654_v37 = vadd.f32 %v653_v35, %v2496_v61 }
  0xff   :  { %1510 = vst [vmem:[%s2834_s3 + $0x2c0] sm:$0xff] %v1404_v32  ;;  %v1405_v38 = vmax.f32 %v559_v33, 0.0 }
 0x100   :  { %1512 = vst [vmem:[%s2834_s3 + $0x2d0] sm:$0xff] %v1406_v36  ;;  %v1407_v39 = vmax.f32 %v654_v37, 0.0  ;;  %v722_v29 = vpop.f32.mrf.mxu0  ;;  %v817_v42 = vpop.f32.mrf.mxu1 }
 0x101   :  { %1511 = vst [vmem:[%s2834_s3 + $0x2c8] sm:$0xff] %v1405_v38  ;;  %v723_v43 = vadd.f32 %v722_v29, %v2376_v3  ;;  %v818_v46 = vadd.f32 %v817_v42, %v2376_v3 }
 0x102   :  { %1513 = vst [vmem:[%s2834_s3 + $0x2d8] sm:$0xff] %v1407_v39  ;;  %v724_v44 = vpop.f32.mrf.mxu0  ;;  %v819_v45 = vpop.f32.mrf.mxu1 }
 0x103   :  { %v1324_v47 = vmax.f32 %v723_v43, 0.0  ;;  %v1326_v48 = vmax.f32 %v818_v46, 0.0  ;;  %v725_v49 = vadd.f32 %v724_v44, %v2376_v3  ;;  %v820_v50 = vadd.f32 %v819_v45, %v2376_v3 }
 0x104   :  { %v728_v34 = vpop.f32.mrf.mxu0  ;;  %v823_v51 = vpop.f32.mrf.mxu1 }
 0x105   :  { %1429 = vst [vmem:[%s2834_s3 + $0x40] sm:$0xff] %v1324_v47  ;;  %1431 = vst [vmem:[%s2834_s3 + $0x50] sm:$0xff] %v1326_v48  ;;  %v1325_v54 = vmax.f32 %v725_v49, 0.0  ;;  %v1327_v40 = vmax.f32 %v820_v50, 0.0  ;;  %v729_v52 = vadd.f32 %v728_v34, %v2402_v0  ;;  %v824_v53 = vadd.f32 %v823_v51, %v2402_v0 }
 0x106   :  { %v730_v55 = vpop.f32.mrf.mxu0  ;;  %v825_v56 = vpop.f32.mrf.mxu1 }
 0x107   :  { %1430 = vst [vmem:[%s2834_s3 + $0x48] sm:$0xff] %v1325_v54  ;;  %1432 = vst [vmem:[%s2834_s3 + $0x58] sm:$0xff] %v1327_v40  ;;  %v1345_v57 = vmax.f32 %v729_v52, 0.0  ;;  %v1347_v58 = vmax.f32 %v824_v53, 0.0  ;;  %v731_v59 = vadd.f32 %v730_v55, %v2402_v0  ;;  %v826_v60 = vadd.f32 %v825_v56, %v2402_v0 }
 0x108   :  { %v734_v2 = vpop.f32.mrf.mxu0 }
 0x109   :  { %1451 = vst [vmem:[%s2834_s3 + $0xe8] sm:$0xff] %v1345_v57  ;;  %1453 = vst [vmem:[%s2834_s3 + $0xf8] sm:$0xff] %v1347_v58  ;;  %v1346_v4 = vmax.f32 %v731_v59, 0.0  ;;  %v1348_v5 = vmax.f32 %v826_v60, 0.0  ;;  %v735_v6 = vadd.f32 %v734_v2, %v2426_v16  ;;  %v829_v8 = vpop.f32.mrf.mxu1 }
 0x10a   :  { %v830_v9 = vadd.f32 %v829_v8, %v2426_v16  ;;  %v736_v10 = vpop.f32.mrf.mxu0 }
 0x10b   :  { %1452 = vst [vmem:[%s2834_s3 + $0xf0] sm:$0xff] %v1346_v4  ;;  %1454 = vst [vmem:[%s2834_s3 + $0x100] sm:$0xff] %v1348_v5  ;;  %v1366_v11 = vmax.f32 %v735_v6, 0.0  ;;  %v737_v12 = vadd.f32 %v736_v10, %v2426_v16  ;;  %v831_v13 = vpop.f32.mrf.mxu1 }
 0x10c   :  { %v1368_v14 = vmax.f32 %v830_v9, 0.0  ;;  %v832_v62 = vadd.f32 %v831_v13, %v2426_v16 }
 0x10d   :  { %1472 = vst [vmem:[%s2834_s3 + $0x190] sm:$0xff] %v1366_v11  ;;  %v1367_v15 = vmax.f32 %v737_v12, 0.0  ;;  %v740_v17 = vpop.f32.mrf.mxu0  ;;  %v835_v63 = vpop.f32.mrf.mxu1 }
 0x10e   :  { %1474 = vst [vmem:[%s2834_s3 + $0x1a0] sm:$0xff] %v1368_v14  ;;  %v1369_v18 = vmax.f32 %v832_v62, 0.0  ;;  %v741_v19 = vadd.f32 %v740_v17, %v2454_v41  ;;  %v836_v1 = vadd.f32 %v835_v63, %v2454_v41 }
 0x10f   :  { %1473 = vst [vmem:[%s2834_s3 + $0x198] sm:$0xff] %v1367_v15  ;;  %v742_v7 = vpop.f32.mrf.mxu0  ;;  %v837_v20 = vpop.f32.mrf.mxu1 }
 0x110   :  { %1475 = vst [vmem:[%s2834_s3 + $0x1a8] sm:$0xff] %v1369_v18  ;;  %v1387_v21 = vmax.f32 %v741_v19, 0.0  ;;  %v1389_v22 = vmax.f32 %v836_v1, 0.0  ;;  %v743_v23 = vadd.f32 %v742_v7, %v2454_v41  ;;  %v838_v24 = vadd.f32 %v837_v20, %v2454_v41 }
 0x112   :  { %1493 = vst [vmem:[%s2834_s3 + $0x238] sm:$0xff] %v1387_v21  ;;  %1495 = vst [vmem:[%s2834_s3 + $0x248] sm:$0xff] %v1389_v22  ;;  %v1388_v25 = vmax.f32 %v743_v23, 0.0  ;;  %v1390_v26 = vmax.f32 %v838_v24, 0.0  ;;  %v746_v27 = vpop.f32.mrf.mxu0 }
 0x113   :  { %v747_v28 = vadd.f32 %v746_v27, %v2496_v61  ;;  %v841_v30 = vpop.f32.mrf.mxu1 }
 0x114   :  { %1494 = vst [vmem:[%s2834_s3 + $0x240] sm:$0xff] %v1388_v25  ;;  %1496 = vst [vmem:[%s2834_s3 + $0x250] sm:$0xff] %v1390_v26  ;;  %v842_v31 = vadd.f32 %v841_v30, %v2496_v61  ;;  %v748_v32 = vpop.f32.mrf.mxu0 }
 0x115   :  { %v1408_v33 = vmax.f32 %v747_v28, 0.0  ;;  %v749_v35 = vadd.f32 %v748_v32, %v2496_v61  ;;  %v843_v36 = vpop.f32.mrf.mxu1 }
 0x116   :  { %v1410_v37 = vmax.f32 %v842_v31, 0.0  ;;  %v844_v38 = vadd.f32 %v843_v36, %v2496_v61 }
 0x117   :  { %1514 = vst [vmem:[%s2834_s3 + $0x2e0] sm:$0xff] %v1408_v33  ;;  %v1409_v39 = vmax.f32 %v749_v35, 0.0 }
 0x118   :  { %1516 = vst [vmem:[%s2834_s3 + $0x2f0] sm:$0xff] %v1410_v37  ;;  %v1411_v29 = vmax.f32 %v844_v38, 0.0  ;;  %v912_v42 = vpop.f32.mrf.mxu0  ;;  %v1007_v43 = vpop.f32.mrf.mxu1 }
 0x119   :  { %1515 = vst [vmem:[%s2834_s3 + $0x2e8] sm:$0xff] %v1409_v39  ;;  %v913_v46 = vadd.f32 %v912_v42, %v2376_v3  ;;  %v1008_v44 = vadd.f32 %v1007_v43, %v2376_v3 }
 0x11a   :  { %1517 = vst [vmem:[%s2834_s3 + $0x2f8] sm:$0xff] %v1411_v29  ;;  %v914_v45 = vpop.f32.mrf.mxu0  ;;  %v1009_v47 = vpop.f32.mrf.mxu1 }
 0x11b   :  { %v1328_v48 = vmax.f32 %v913_v46, 0.0  ;;  %v1330_v49 = vmax.f32 %v1008_v44, 0.0  ;;  %v915_v50 = vadd.f32 %v914_v45, %v2376_v3  ;;  %v1010_v34 = vadd.f32 %v1009_v47, %v2376_v3 }
 0x11c   :  { %v918_v51 = vpop.f32.mrf.mxu0  ;;  %v1013_v54 = vpop.f32.mrf.mxu1 }
 0x11d   :  { %1433 = vst [vmem:[%s2834_s3 + $0x60] sm:$0xff] %v1328_v48  ;;  %1435 = vst [vmem:[%s2834_s3 + $0x70] sm:$0xff] %v1330_v49  ;;  %v1329_v40 = vmax.f32 %v915_v50, 0.0  ;;  %v1331_v52 = vmax.f32 %v1010_v34, 0.0  ;;  %v919_v53 = vadd.f32 %v918_v51, %v2402_v0  ;;  %v1014_v55 = vadd.f32 %v1013_v54, %v2402_v0 }
 0x11e   :  { %v920_v56 = vpop.f32.mrf.mxu0  ;;  %v1015_v57 = vpop.f32.mrf.mxu1 }
 0x11f   :  { %1434 = vst [vmem:[%s2834_s3 + $0x68] sm:$0xff] %v1329_v40  ;;  %1436 = vst [vmem:[%s2834_s3 + $0x78] sm:$0xff] %v1331_v52  ;;  %v1349_v58 = vmax.f32 %v919_v53, 0.0  ;;  %v1351_v59 = vmax.f32 %v1014_v55, 0.0  ;;  %v921_v60 = vadd.f32 %v920_v56, %v2402_v0  ;;  %v1016_v2 = vadd.f32 %v1015_v57, %v2402_v0 }
 0x120   :  { %v924_v4 = vpop.f32.mrf.mxu0 }
 0x121   :  { %1455 = vst [vmem:[%s2834_s3 + $0x108] sm:$0xff] %v1349_v58  ;;  %1457 = vst [vmem:[%s2834_s3 + $0x118] sm:$0xff] %v1351_v59  ;;  %v1350_v5 = vmax.f32 %v921_v60, 0.0  ;;  %v1352_v6 = vmax.f32 %v1016_v2, 0.0  ;;  %v925_v8 = vadd.f32 %v924_v4, %v2426_v16  ;;  %v1019_v9 = vpop.f32.mrf.mxu1 }
 0x122   :  { %v1020_v10 = vadd.f32 %v1019_v9, %v2426_v16  ;;  %v926_v11 = vpop.f32.mrf.mxu0 }
 0x123   :  { %1456 = vst [vmem:[%s2834_s3 + $0x110] sm:$0xff] %v1350_v5  ;;  %1458 = vst [vmem:[%s2834_s3 + $0x120] sm:$0xff] %v1352_v6  ;;  %v1370_v12 = vmax.f32 %v925_v8, 0.0  ;;  %v927_v13 = vadd.f32 %v926_v11, %v2426_v16  ;;  %v1021_v14 = vpop.f32.mrf.mxu1 }
 0x124   :  { %v1372_v62 = vmax.f32 %v1020_v10, 0.0  ;;  %v1022_v15 = vadd.f32 %v1021_v14, %v2426_v16 }
 0x125   :  { %1476 = vst [vmem:[%s2834_s3 + $0x1b0] sm:$0xff] %v1370_v12  ;;  %v1371_v17 = vmax.f32 %v927_v13, 0.0 }
 0x126   :  { %1478 = vst [vmem:[%s2834_s3 + $0x1c0] sm:$0xff] %v1372_v62  ;;  %v1373_v63 = vmax.f32 %v1022_v15, 0.0  ;;  %v930_v18 = vpop.f32.mrf.mxu0  ;;  %v1025_v19 = vpop.f32.mrf.mxu1 }
 0x127   :  { %1477 = vst [vmem:[%s2834_s3 + $0x1b8] sm:$0xff] %v1371_v17  ;;  %v931_v1 = vadd.f32 %v930_v18, %v2454_v41  ;;  %v1026_v7 = vadd.f32 %v1025_v19, %v2454_v41 }
 0x128   :  { %1479 = vst [vmem:[%s2834_s3 + $0x1c8] sm:$0xff] %v1373_v63  ;;  %v932_v20 = vpop.f32.mrf.mxu0  ;;  %v1027_v21 = vpop.f32.mrf.mxu1 }
 0x129   :  { %v1391_v22 = vmax.f32 %v931_v1, 0.0  ;;  %v1393_v23 = vmax.f32 %v1026_v7, 0.0  ;;  %v933_v24 = vadd.f32 %v932_v20, %v2454_v41  ;;  %v1028_v25 = vadd.f32 %v1027_v21, %v2454_v41 }
 0x12b   :  { %1497 = vst [vmem:[%s2834_s3 + $0x258] sm:$0xff] %v1391_v22  ;;  %1499 = vst [vmem:[%s2834_s3 + $0x268] sm:$0xff] %v1393_v23  ;;  %v1392_v26 = vmax.f32 %v933_v24, 0.0  ;;  %v1394_v27 = vmax.f32 %v1028_v25, 0.0 }
 0x12c   :  { %v936_v28 = vpop.f32.mrf.mxu0  ;;  %v1031_v30 = vpop.f32.mrf.mxu1 }
 0x12d   :  { %1498 = vst [vmem:[%s2834_s3 + $0x260] sm:$0xff] %v1392_v26  ;;  %1500 = vst [vmem:[%s2834_s3 + $0x270] sm:$0xff] %v1394_v27  ;;  %v937_v31 = vadd.f32 %v936_v28, %v2496_v61  ;;  %v1032_v32 = vadd.f32 %v1031_v30, %v2496_v61 }
 0x12e   :  { %v938_v33 = vpop.f32.mrf.mxu0  ;;  %v1033_v35 = vpop.f32.mrf.mxu1 }
 0x12f   :  { %v1412_v36 = vmax.f32 %v937_v31, 0.0  ;;  %v1414_v37 = vmax.f32 %v1032_v32, 0.0  ;;  %v939_v38 = vadd.f32 %v938_v33, %v2496_v61  ;;  %v1034_v39 = vadd.f32 %v1033_v35, %v2496_v61 }
 0x131   :  { %1518 = vst [vmem:[%s2834_s3 + $0x300] sm:$0xff] %v1412_v36  ;;  %1520 = vst [vmem:[%s2834_s3 + $0x310] sm:$0xff] %v1414_v37  ;;  %v1413_v29 = vmax.f32 %v939_v38, 0.0  ;;  %v1415_v42 = vmax.f32 %v1034_v39, 0.0 }
 0x132   :  { %v1102_v43 = vpop.f32.mrf.mxu0 }
 0x133   :  { %1519 = vst [vmem:[%s2834_s3 + $0x308] sm:$0xff] %v1413_v29  ;;  %1521 = vst [vmem:[%s2834_s3 + $0x318] sm:$0xff] %v1415_v42  ;;  %v1103_v46 = vadd.f32 %v1102_v43, %v2376_v3  ;;  %v1197_v44 = vpop.f32.mrf.mxu1 }
 0x134   :  { %v1198_v45 = vadd.f32 %v1197_v44, %v2376_v3  ;;  %v1104_v47 = vpop.f32.mrf.mxu0 }
 0x135   :  { %v1332_v48 = vmax.f32 %v1103_v46, 0.0  ;;  %v1105_v49 = vadd.f32 %v1104_v47, %v2376_v3  ;;  %v1199_v50 = vpop.f32.mrf.mxu1 }
 0x136   :  { %v1334_v34 = vmax.f32 %v1198_v45, 0.0  ;;  %v1200_v51 = vadd.f32 %v1199_v50, %v2376_v3  ;;  %v1108_v54 = vpop.f32.mrf.mxu0 }
 0x137   :  { %1437 = vst [vmem:[%s2834_s3 + $0x80] sm:$0xff] %v1332_v48  ;;  %v1333_v40 = vmax.f32 %v1105_v49, 0.0  ;;  %v1109_v52 = vadd.f32 %v1108_v54, %v2402_v0  ;;  %v1203_v53 = vpop.f32.mrf.mxu1 }
 0x138   :  { %1439 = vst [vmem:[%s2834_s3 + $0x90] sm:$0xff] %v1334_v34  ;;  %v1335_v55 = vmax.f32 %v1200_v51, 0.0  ;;  %v1204_v56 = vadd.f32 %v1203_v53, %v2402_v0  ;;  %v1110_v57 = vpop.f32.mrf.mxu0 }
 0x139   :  { %1438 = vst [vmem:[%s2834_s3 + $0x88] sm:$0xff] %v1333_v40  ;;  %v1353_v58 = vmax.f32 %v1109_v52, 0.0  ;;  %v1111_v59 = vadd.f32 %v1110_v57, %v2402_v0  ;;  %v1205_v60 = vpop.f32.mrf.mxu1 }
 0x13a   :  { %1440 = vst [vmem:[%s2834_s3 + $0x98] sm:$0xff] %v1335_v55  ;;  %v1355_v2 = vmax.f32 %v1204_v56, 0.0  ;;  %v1206_v4 = vadd.f32 %v1205_v60, %v2402_v0 }
 0x13b   :  { %1459 = vst [vmem:[%s2834_s3 + $0x128] sm:$0xff] %v1353_v58  ;;  %v1354_v5 = vmax.f32 %v1111_v59, 0.0 }
 0x13c   :  { %1461 = vst [vmem:[%s2834_s3 + $0x138] sm:$0xff] %v1355_v2  ;;  %v1356_v6 = vmax.f32 %v1206_v4, 0.0  ;;  %v1114_v8 = vpop.f32.mrf.mxu0  ;;  %v1209_v9 = vpop.f32.mrf.mxu1 }
 0x13d   :  { %1460 = vst [vmem:[%s2834_s3 + $0x130] sm:$0xff] %v1354_v5  ;;  %v1115_v10 = vadd.f32 %v1114_v8, %v2426_v16  ;;  %v1210_v11 = vadd.f32 %v1209_v9, %v2426_v16 }
 0x13e   :  { %1462 = vst [vmem:[%s2834_s3 + $0x140] sm:$0xff] %v1356_v6  ;;  %v1116_v12 = vpop.f32.mrf.mxu0  ;;  %v1211_v13 = vpop.f32.mrf.mxu1 }
 0x13f   :  { %v1374_v14 = vmax.f32 %v1115_v10, 0.0  ;;  %v1376_v62 = vmax.f32 %v1210_v11, 0.0  ;;  %v1117_v15 = vadd.f32 %v1116_v12, %v2426_v16  ;;  %v1212_v17 = vadd.f32 %v1211_v13, %v2426_v16 }
 0x140   :  { %v1120_v63 = vpop.f32.mrf.mxu0 }
 0x141   :  { %1480 = vst [vmem:[%s2834_s3 + $0x1d0] sm:$0xff] %v1374_v14  ;;  %1482 = vst [vmem:[%s2834_s3 + $0x1e0] sm:$0xff] %v1376_v62  ;;  %v1375_v18 = vmax.f32 %v1117_v15, 0.0  ;;  %v1377_v19 = vmax.f32 %v1212_v17, 0.0  ;;  %v1121_v1 = vadd.f32 %v1120_v63, %v2454_v41  ;;  %v1215_v7 = vpop.f32.mrf.mxu1 }
 0x142   :  { %v1216_v20 = vadd.f32 %v1215_v7, %v2454_v41  ;;  %v1122_v21 = vpop.f32.mrf.mxu0 }
 0x143   :  { %1481 = vst [vmem:[%s2834_s3 + $0x1d8] sm:$0xff] %v1375_v18  ;;  %1483 = vst [vmem:[%s2834_s3 + $0x1e8] sm:$0xff] %v1377_v19  ;;  %v1395_v22 = vmax.f32 %v1121_v1, 0.0  ;;  %v1123_v23 = vadd.f32 %v1122_v21, %v2454_v41  ;;  %v1217_v24 = vpop.f32.mrf.mxu1 }
 0x144   :  { %v1397_v25 = vmax.f32 %v1216_v20, 0.0  ;;  %v1218_v26 = vadd.f32 %v1217_v24, %v2454_v41 }
 0x145   :  { %1501 = vst [vmem:[%s2834_s3 + $0x278] sm:$0xff] %v1395_v22  ;;  %v1396_v27 = vmax.f32 %v1123_v23, 0.0 }
 0x146   :  { %1503 = vst [vmem:[%s2834_s3 + $0x288] sm:$0xff] %v1397_v25  ;;  %v1398_v28 = vmax.f32 %v1218_v26, 0.0  ;;  %v1126_v30 = vpop.f32.mrf.mxu0  ;;  %v1221_v31 = vpop.f32.mrf.mxu1 }
 0x147   :  { %1502 = vst [vmem:[%s2834_s3 + $0x280] sm:$0xff] %v1396_v27  ;;  %v1127_v32 = vadd.f32 %v1126_v30, %v2496_v61  ;;  %v1222_v33 = vadd.f32 %v1221_v31, %v2496_v61 }
 0x148   :  { %1504 = vst [vmem:[%s2834_s3 + $0x290] sm:$0xff] %v1398_v28  ;;  %v1128_v35 = vpop.f32.mrf.mxu0  ;;  %v1223_v36 = vpop.f32.mrf.mxu1 }
 0x149   :  { %v1416_v37 = vmax.f32 %v1127_v32, 0.0  ;;  %v1418_v38 = vmax.f32 %v1222_v33, 0.0  ;;  %v1129_v39 = vadd.f32 %v1128_v35, %v2496_v61  ;;  %v1224_v29 = vadd.f32 %v1223_v36, %v2496_v61 }
 0x14b   :  { %1522 = vst [vmem:[%s2834_s3 + $0x320] sm:$0xff] %v1416_v37  ;;  %1524 = vst [vmem:[%s2834_s3 + $0x330] sm:$0xff] %v1418_v38  ;;  %v1417_v42 = vmax.f32 %v1129_v39, 0.0  ;;  %v1419_v43 = vmax.f32 %v1224_v29, 0.0  ;;  %v1292_v46 = vpop.f32.mrf.mxu0 }
 0x14c   :  { %v1293_v44 = vadd.f32 %v1292_v46, %v2376_v3  ;;  %v1307_v45 = vpop.f32.mrf.mxu1 }
 0x14d   :  { %1523 = vst [vmem:[%s2834_s3 + $0x328] sm:$0xff] %v1417_v42  ;;  %1525 = vst [vmem:[%s2834_s3 + $0x338] sm:$0xff] %v1419_v43  ;;  %v1308_v47 = vadd.f32 %v1307_v45, %v2454_v41  ;;  %v1635_v48 = vpop.f32.mrf.mxu0 }
 0x14e   :  { %v1336_v49 = vmax.f32 %v1293_v44, 0.0  ;;  %v1644_v50 = vpop.f32.mrf.mxu1 }
 0x14f   :  { %v1399_v34 = vmax.f32 %v1308_v47, 0.0  ;;  %v1297_v51 = vpop.f32.mrf.mxu0 }
 0x150   :  { %1442 = vst.msk [vmem:[%s2834_s3 + $0xa0] sm:$0xff] %vm1441_vm3, %v1336_v49  ;;  %v1298_v3 = vadd.f32 %v1297_v51, %v2402_v0  ;;  %v1312_v54 = vpop.f32.mrf.mxu1 }
 0x151   :  { %1505 = vst.msk [vmem:[%s2834_s3 + $0x298] sm:$0xff] %vm1441_vm3, %v1399_v34  ;;  %v1313_v41 = vadd.f32 %v1312_v54, %v2496_v61  ;;  %v1638_v40 = vpop.f32.mrf.mxu0 }
 0x152   :  { %v1357_v52 = vmax.f32 %v1298_v3, 0.0  ;;  %v1647_v53 = vpop.f32.mrf.mxu1 }
 0x153   :  { %v1420_v55 = vmax.f32 %v1313_v41, 0.0  ;;  %v1302_v56 = vpop.f32.mrf.mxu0 }
 0x154   :  { %1463 = vst.msk [vmem:[%s2834_s3 + $0x148] sm:$0xff] %vm1441_vm3, %v1357_v52  ;;  %v1303_v0 = vadd.f32 %v1302_v56, %v2426_v16 }
 0x155   :  { %1526 = vst.msk [vmem:[%s2834_s3 + $0x340] sm:$0xff] %vm1441_vm3, %v1420_v55  ;;  %v1641_v57 = vpop.f32.mrf.mxu0 }
 0x156   :  { %v1378_v58 = vmax.f32 %v1303_v0, 0.0 }
 0x158   :  { %1484 = vst.msk [vmem:[%s2834_s3 + $0x1f0] sm:$0xff] %vm1441_vm3, %v1378_v58 }

// kernel: generator_forward.11
= control target key start
LH: loop header
LB: loop body
LE: loop exit
PB: predicated region body
PF: predicated region fallthrough
CT: control target
= control target key end

     0   :  { %s646_s12 = smov 0   ;;  %s797_s0 = inlined_call_operand.vmem [shape: f32[5,10,200], index: 0, kind: input, shape index: {}]   ;;  %s798_s1 = inlined_call_operand.vmem [shape: f32[5,200,392], index: 1, kind: input, shape index: {}]   ;;  %s799_s2 = inlined_call_operand.vmem [shape: f32[5,10,1], index: 2, kind: input, shape index: {}]   ;;  %s800_s3 = inlined_call_operand.vmem [shape: f32[5,10,392], index: 3, kind: output, shape index: {}]  }
   0x1 LB: > { %s585_s13 = sadd.s32 4294967295, %s623_s12   ;;  %p589_p0 = scmp.ge.s32.totalorder %s623_s12, 1  ;;  %s623_s12 = sphi %s646_s12, %s13_s12  }
   0x2   : > { %p157_p1 = scmp.lt.s32.totalorder %s623_s12, 6 }
   0x4   : > { %p158_p2 = pnand %p589_p0, %p157_p1 }
   0x5   : > { %p191_p3 = scmp.lt.s32.totalorder (!%p158_p2), %s585_s13, 4 }
   0x6   : > { %161 = sbr.rel (%p158_p2) target bundleno = 270 (0x10e), region = 32 }
   0xb   : > { %v625_v0 = vmov 0   ;;  %s802_s13 = smov (!%p191_p3, %s585_s13), 4  ;;  %vm327_vm0 = vcmask 588800   ;;  %vm499_vm1 = vcmask 64512   ;;  %vm504_vm2 = vcmask 58368  }
   0xc   : > { %616 = vset.pattern.permute.xlu0 %v625_v0  ;;  %s606_s14 = smul.u32 800, %s802_s13  ;;  %s603_s15 = sshll.u32 %s802_s13, 5 }
   0xd   : > { %s661_s18 = scalar_lea.vmem %s797_s0, %s603_s15  ;;  %s604_s22 = sshll.u32 %s802_s13, 4 }
   0xe   : > { %s666_s21 = scalar_lea.vmem %s798_s1, %s606_s14  ;;  %v212_v1 = vld [vmem:[%s661_s18 + $0x8] sm:$0xff]  ;;  %s205_s25 = scalar_lea.vmem %s799_s2, %s604_s22 }
   0xf   : > { %v276_v2 = vld [vmem:[%s666_s21 + $0x1e8] sm:$0xff]  ;;  %v278_v3 = vld [vmem:[%s666_s21 + $0x1f8] sm:$0xff]  ;;  %v275_v4 = vld [vmem:[%s666_s21 + $0x1e0] sm:$0xff]  ;;  %597 = vmatprep.mubr.msk.f32.mxu0 %vm327_vm0, %v212_v1  ;;  %599 = vmatprep.mubr.msk.f32.mxu1 %vm327_vm0, %v212_v1  ;;  %s605_s26 = sshll.u32 %s802_s13, 6 }
  0x10   : > { %334 = vmatprep.subr.mxu0 %v276_v2  ;;  %411 = vmatprep.subr.mxu1 %v278_v3  ;;  %v277_v5 = vld [vmem:[%s666_s21 + $0x1f0] sm:$0xff]  ;;  %v272_v6 = vld [vmem:[%s666_s21 + $0x1c8] sm:$0xff]  ;;  %v274_v7 = vld [vmem:[%s666_s21 + $0x1d8] sm:$0xff]  ;;  %s784_s29 = scalar_lea.vmem %s800_s3, %s605_s26 }
  0x11   : > { %335 = vmatpush1.msra.mxu0 %v275_v4  ;;  %412 = vmatpush1.msra.mxu1 %v277_v5  ;;  %v271_v8 = vld [vmem:[%s666_s21 + $0x1c0] sm:$0xff]  ;;  %v273_v9 = vld [vmem:[%s666_s21 + $0x1d0] sm:$0xff]  ;;  %v268_v10 = vld [vmem:[%s666_s21 + $0x1a8] sm:$0xff] }
  0x12   : > { %336 = vmatprep.subr.mxu0 %v272_v6  ;;  %413 = vmatprep.subr.mxu1 %v274_v7  ;;  %v270_v11 = vld [vmem:[%s666_s21 + $0x1b8] sm:$0xff]  ;;  %v267_v12 = vld [vmem:[%s666_s21 + $0x1a0] sm:$0xff]  ;;  %v269_v13 = vld [vmem:[%s666_s21 + $0x1b0] sm:$0xff] }
  0x13   : > { %337 = vmatpush1.msra.mxu0 %v271_v8  ;;  %414 = vmatpush1.msra.mxu1 %v273_v9  ;;  %v264_v14 = vld [vmem:[%s666_s21 + $0x188] sm:$0xff]  ;;  %v266_v15 = vld [vmem:[%s666_s21 + $0x198] sm:$0xff]  ;;  %v263_v16 = vld [vmem:[%s666_s21 + $0x180] sm:$0xff] }
  0x14   : > { %338 = vmatprep.subr.mxu0 %v268_v10  ;;  %415 = vmatprep.subr.mxu1 %v270_v11  ;;  %v265_v17 = vld [vmem:[%s666_s21 + $0x190] sm:$0xff]  ;;  %v260_v18 = vld [vmem:[%s666_s21 + $0x168] sm:$0xff]  ;;  %v262_v19 = vld [vmem:[%s666_s21 + $0x178] sm:$0xff] }
  0x15   : > { %339 = vmatpush1.msra.mxu0 %v267_v12  ;;  %416 = vmatpush1.msra.mxu1 %v269_v13  ;;  %v259_v20 = vld [vmem:[%s666_s21 + $0x160] sm:$0xff]  ;;  %v261_v21 = vld [vmem:[%s666_s21 + $0x170] sm:$0xff]  ;;  %v256_v22 = vld [vmem:[%s666_s21 + $0x148] sm:$0xff] }
  0x16   : > { %340 = vmatprep.subr.mxu0 %v264_v14  ;;  %417 = vmatprep.subr.mxu1 %v266_v15  ;;  %v258_v23 = vld [vmem:[%s666_s21 + $0x158] sm:$0xff]  ;;  %v255_v24 = vld [vmem:[%s666_s21 + $0x140] sm:$0xff]  ;;  %v257_v25 = vld [vmem:[%s666_s21 + $0x150] sm:$0xff] }
  0x17   : > { %341 = vmatpush1.msra.mxu0 %v263_v16  ;;  %418 = vmatpush1.msra.mxu1 %v265_v17  ;;  %v252_v26 = vld [vmem:[%s666_s21 + $0x128] sm:$0xff]  ;;  %v254_v27 = vld [vmem:[%s666_s21 + $0x138] sm:$0xff]  ;;  %v251_v28 = vld [vmem:[%s666_s21 + $0x120] sm:$0xff] }
  0x18   : > { %342 = vmatprep.subr.mxu0 %v260_v18  ;;  %419 = vmatprep.subr.mxu1 %v262_v19  ;;  %v253_v29 = vld [vmem:[%s666_s21 + $0x130] sm:$0xff]  ;;  %v248_v30 = vld [vmem:[%s666_s21 + $0x108] sm:$0xff]  ;;  %v250_v31 = vld [vmem:[%s666_s21 + $0x118] sm:$0xff] }
  0x19   : > { %343 = vmatpush1.msra.mxu0 %v259_v20  ;;  %420 = vmatpush1.msra.mxu1 %v261_v21  ;;  %v247_v32 = vld [vmem:[%s666_s21 + $0x100] sm:$0xff]  ;;  %v249_v33 = vld [vmem:[%s666_s21 + $0x110] sm:$0xff]  ;;  %v244_v34 = vld [vmem:[%s666_s21 + $0xe8] sm:$0xff] }
  0x1a   : > { %344 = vmatprep.subr.mxu0 %v256_v22  ;;  %421 = vmatprep.subr.mxu1 %v258_v23  ;;  %v246_v35 = vld [vmem:[%s666_s21 + $0xf8] sm:$0xff]  ;;  %v243_v36 = vld [vmem:[%s666_s21 + $0xe0] sm:$0xff]  ;;  %v245_v37 = vld [vmem:[%s666_s21 + $0xf0] sm:$0xff] }
  0x1b   : > { %345 = vmatpush1.msra.mxu0 %v255_v24  ;;  %422 = vmatpush1.msra.mxu1 %v257_v25  ;;  %v240_v38 = vld [vmem:[%s666_s21 + $0xc8] sm:$0xff]  ;;  %v242_v39 = vld [vmem:[%s666_s21 + $0xd8] sm:$0xff]  ;;  %v239_v40 = vld [vmem:[%s666_s21 + $0xc0] sm:$0xff] }
  0x1c   : > { %346 = vmatprep.subr.mxu0 %v252_v26  ;;  %423 = vmatprep.subr.mxu1 %v254_v27  ;;  %v241_v41 = vld [vmem:[%s666_s21 + $0xd0] sm:$0xff]  ;;  %v236_v42 = vld [vmem:[%s666_s21 + $0xa8] sm:$0xff]  ;;  %v238_v43 = vld [vmem:[%s666_s21 + $0xb8] sm:$0xff] }
  0x1d   : > { %347 = vmatpush1.msra.mxu0 %v251_v28  ;;  %424 = vmatpush1.msra.mxu1 %v253_v29  ;;  %v235_v44 = vld [vmem:[%s666_s21 + $0xa0] sm:$0xff]  ;;  %v237_v45 = vld [vmem:[%s666_s21 + $0xb0] sm:$0xff]  ;;  %v232_v46 = vld [vmem:[%s666_s21 + $0x88] sm:$0xff] }
  0x1e   : > { %348 = vmatprep.subr.mxu0 %v248_v30  ;;  %425 = vmatprep.subr.mxu1 %v250_v31  ;;  %v234_v47 = vld [vmem:[%s666_s21 + $0x98] sm:$0xff]  ;;  %v231_v48 = vld [vmem:[%s666_s21 + $0x80] sm:$0xff]  ;;  %v233_v49 = vld [vmem:[%s666_s21 + $0x90] sm:$0xff] }
  0x1f   : > { %349 = vmatpush1.msra.mxu0 %v247_v32  ;;  %426 = vmatpush1.msra.mxu1 %v249_v33  ;;  %v228_v50 = vld [vmem:[%s666_s21 + $0x68] sm:$0xff]  ;;  %v230_v51 = vld [vmem:[%s666_s21 + $0x78] sm:$0xff]  ;;  %v227_v52 = vld [vmem:[%s666_s21 + $0x60] sm:$0xff] }
  0x20   : > { %350 = vmatprep.subr.mxu0 %v244_v34  ;;  %427 = vmatprep.subr.mxu1 %v246_v35  ;;  %v229_v53 = vld [vmem:[%s666_s21 + $0x70] sm:$0xff]  ;;  %v224_v54 = vld [vmem:[%s666_s21 + $0x48] sm:$0xff]  ;;  %v226_v55 = vld [vmem:[%s666_s21 + $0x58] sm:$0xff] }
  0x21   : > { %351 = vmatpush1.msra.mxu0 %v243_v36  ;;  %428 = vmatpush1.msra.mxu1 %v245_v37  ;;  %v223_v56 = vld [vmem:[%s666_s21 + $0x40] sm:$0xff]  ;;  %v225_v57 = vld [vmem:[%s666_s21 + $0x50] sm:$0xff]  ;;  %v220_v58 = vld [vmem:[%s666_s21 + $0x28] sm:$0xff] }
  0x22   : > { %352 = vmatprep.subr.mxu0 %v240_v38  ;;  %429 = vmatprep.subr.mxu1 %v242_v39  ;;  %v222_v59 = vld [vmem:[%s666_s21 + $0x38] sm:$0xff]  ;;  %v219_v60 = vld [vmem:[%s666_s21 + $0x20] sm:$0xff]  ;;  %v221_v61 = vld [vmem:[%s666_s21 + $0x30] sm:$0xff] }
  0x23   : > { %353 = vmatpush1.msra.mxu0 %v239_v40  ;;  %430 = vmatpush1.msra.mxu1 %v241_v41  ;;  %v216_v62 = vld [vmem:[%s666_s21 + $0x8] sm:$0xff]  ;;  %v218_v63 = vld [vmem:[%s666_s21 + $0x18] sm:$0xff]  ;;  %v215_v0 = vld [vmem:[%s666_s21] sm:$0xff] }
  0x24   : > { %354 = vmatprep.subr.mxu0 %v236_v42  ;;  %431 = vmatprep.subr.mxu1 %v238_v43  ;;  %v217_v1 = vld [vmem:[%s666_s21 + $0x10] sm:$0xff]  ;;  %v312_v2 = vld [vmem:[%s666_s21 + $0x308] sm:$0xff]  ;;  %v314_v3 = vld [vmem:[%s666_s21 + $0x318] sm:$0xff] }
  0x25   : > { %355 = vmatpush1.msra.mxu0 %v235_v44  ;;  %432 = vmatpush1.msra.mxu1 %v237_v45  ;;  %v311_v4 = vld [vmem:[%s666_s21 + $0x300] sm:$0xff]  ;;  %v313_v5 = vld [vmem:[%s666_s21 + $0x310] sm:$0xff]  ;;  %v308_v6 = vld [vmem:[%s666_s21 + $0x2e8] sm:$0xff] }
  0x26   : > { %356 = vmatprep.subr.mxu0 %v232_v46  ;;  %433 = vmatprep.subr.mxu1 %v234_v47  ;;  %v310_v7 = vld [vmem:[%s666_s21 + $0x2f8] sm:$0xff]  ;;  %v307_v8 = vld [vmem:[%s666_s21 + $0x2e0] sm:$0xff]  ;;  %v309_v9 = vld [vmem:[%s666_s21 + $0x2f0] sm:$0xff] }
  0x27   : > { %357 = vmatpush1.msra.mxu0 %v231_v48  ;;  %434 = vmatpush1.msra.mxu1 %v233_v49  ;;  %v304_v10 = vld [vmem:[%s666_s21 + $0x2c8] sm:$0xff]  ;;  %v306_v11 = vld [vmem:[%s666_s21 + $0x2d8] sm:$0xff]  ;;  %v303_v12 = vld [vmem:[%s666_s21 + $0x2c0] sm:$0xff] }
  0x28   : > { %358 = vmatprep.subr.mxu0 %v228_v50  ;;  %435 = vmatprep.subr.mxu1 %v230_v51  ;;  %v305_v13 = vld [vmem:[%s666_s21 + $0x2d0] sm:$0xff]  ;;  %v300_v14 = vld [vmem:[%s666_s21 + $0x2a8] sm:$0xff]  ;;  %v302_v15 = vld [vmem:[%s666_s21 + $0x2b8] sm:$0xff] }
  0x29   : > { %359 = vmatpush1.msra.mxu0 %v227_v52  ;;  %436 = vmatpush1.msra.mxu1 %v229_v53  ;;  %v299_v16 = vld [vmem:[%s666_s21 + $0x2a0] sm:$0xff]  ;;  %v301_v17 = vld [vmem:[%s666_s21 + $0x2b0] sm:$0xff]  ;;  %v296_v18 = vld [vmem:[%s666_s21 + $0x288] sm:$0xff] }
  0x2a   : > { %360 = vmatprep.subr.mxu0 %v224_v54  ;;  %437 = vmatprep.subr.mxu1 %v226_v55  ;;  %v298_v19 = vld [vmem:[%s666_s21 + $0x298] sm:$0xff]  ;;  %v295_v20 = vld [vmem:[%s666_s21 + $0x280] sm:$0xff]  ;;  %v297_v21 = vld [vmem:[%s666_s21 + $0x290] sm:$0xff] }
  0x2b   : > { %361 = vmatpush1.msra.mxu0 %v223_v56  ;;  %438 = vmatpush1.msra.mxu1 %v225_v57  ;;  %v292_v22 = vld [vmem:[%s666_s21 + $0x268] sm:$0xff]  ;;  %v294_v23 = vld [vmem:[%s666_s21 + $0x278] sm:$0xff]  ;;  %v291_v24 = vld [vmem:[%s666_s21 + $0x260] sm:$0xff] }
  0x2c   : > { %362 = vmatprep.subr.mxu0 %v220_v58  ;;  %439 = vmatprep.subr.mxu1 %v222_v59  ;;  %v293_v25 = vld [vmem:[%s666_s21 + $0x270] sm:$0xff]  ;;  %v288_v26 = vld [vmem:[%s666_s21 + $0x248] sm:$0xff]  ;;  %v290_v27 = vld [vmem:[%s666_s21 + $0x258] sm:$0xff] }
  0x2d   : > { %363 = vmatpush1.msra.mxu0 %v219_v60  ;;  %440 = vmatpush1.msra.mxu1 %v221_v61  ;;  %v287_v28 = vld [vmem:[%s666_s21 + $0x240] sm:$0xff]  ;;  %v289_v29 = vld [vmem:[%s666_s21 + $0x250] sm:$0xff]  ;;  %v284_v30 = vld [vmem:[%s666_s21 + $0x228] sm:$0xff] }
  0x2e   : > { %364 = vmatprep.subr.mxu0 %v216_v62  ;;  %441 = vmatprep.subr.mxu1 %v218_v63  ;;  %v286_v31 = vld [vmem:[%s666_s21 + $0x238] sm:$0xff]  ;;  %v283_v32 = vld [vmem:[%s666_s21 + $0x220] sm:$0xff]  ;;  %v285_v33 = vld [vmem:[%s666_s21 + $0x230] sm:$0xff] }
  0x2f   : > { %365 = vmatpush1.msra.mxu0 %v215_v0  ;;  %442 = vmatpush1.msra.mxu1 %v217_v1  ;;  %v280_v34 = vld [vmem:[%s666_s21 + $0x208] sm:$0xff]  ;;  %v282_v35 = vld [vmem:[%s666_s21 + $0x218] sm:$0xff]  ;;  %v279_v36 = vld [vmem:[%s666_s21 + $0x200] sm:$0xff] }
  0x30   : > { %380 = vmatprep.subr.mxu0 %v312_v2  ;;  %457 = vmatprep.subr.mxu1 %v314_v3  ;;  %v281_v37 = vld [vmem:[%s666_s21 + $0x210] sm:$0xff]  ;;  %v211_v38 = vld [vmem:[%s661_s18] sm:$0xff]  ;;  %v214_v39 = vld [vmem:[%s661_s18 + $0x18] sm:$0x3] }
  0x31   : > { %381 = vmatpush2.msra.mxu0 %v311_v4  ;;  %458 = vmatpush2.msra.mxu1 %v313_v5  ;;  %v315_v40 = vld [vmem:[%s205_s25] sm:$0xff]  ;;  %v213_v41 = vld [vmem:[%s661_s18 + $0x10] sm:$0x3]  ;;  %v316_v42 = vld [vmem:[%s205_s25 + $0x8] sm:$0x3] }
  0x32   : > { %382 = vmatprep.subr.mxu0 %v308_v6  ;;  %459 = vmatprep.subr.mxu1 %v310_v7 }
  0x33   : > { %383 = vmatpush2.msra.mxu0 %v307_v8  ;;  %460 = vmatpush2.msra.mxu1 %v309_v9 }
  0x34   : > { %384 = vmatprep.subr.mxu0 %v304_v10  ;;  %461 = vmatprep.subr.mxu1 %v306_v11 }
  0x35   : > { %385 = vmatpush2.msra.mxu0 %v303_v12  ;;  %462 = vmatpush2.msra.mxu1 %v305_v13 }
  0x36   : > { %386 = vmatprep.subr.mxu0 %v300_v14  ;;  %463 = vmatprep.subr.mxu1 %v302_v15 }
  0x37   : > { %387 = vmatpush2.msra.mxu0 %v299_v16  ;;  %464 = vmatpush2.msra.mxu1 %v301_v17 }
  0x38   : > { %388 = vmatprep.subr.mxu0 %v296_v18  ;;  %465 = vmatprep.subr.mxu1 %v298_v19 }
  0x39   : > { %389 = vmatpush2.msra.mxu0 %v295_v20  ;;  %466 = vmatpush2.msra.mxu1 %v297_v21 }
  0x3a   : > { %390 = vmatprep.subr.mxu0 %v292_v22  ;;  %467 = vmatprep.subr.mxu1 %v294_v23 }
  0x3b   : > { %391 = vmatpush2.msra.mxu0 %v291_v24  ;;  %468 = vmatpush2.msra.mxu1 %v293_v25 }
  0x3c   : > { %392 = vmatprep.subr.mxu0 %v288_v26  ;;  %469 = vmatprep.subr.mxu1 %v290_v27 }
  0x3d   : > { %393 = vmatpush2.msra.mxu0 %v287_v28  ;;  %470 = vmatpush2.msra.mxu1 %v289_v29 }
  0x3e   : > { %394 = vmatprep.subr.mxu0 %v284_v30  ;;  %471 = vmatprep.subr.mxu1 %v286_v31 }
  0x3f   : > { %395 = vmatpush2.msra.mxu0 %v283_v32  ;;  %472 = vmatpush2.msra.mxu1 %v285_v33 }
  0x40   : > { %396 = vmatprep.subr.mxu0 %v280_v34  ;;  %473 = vmatprep.subr.mxu1 %v282_v35 }
  0x41   : > { %397 = vmatpush2.msra.mxu0 %v279_v36  ;;  %474 = vmatpush2.msra.mxu1 %v281_v37 }
  0x42   : > { %399 = vmatmul.mubr.f32.vlgmr.msra.gmra.mxu0 %v211_v38  ;;  %476 = vmatmul.mubr.f32.vlgmr.msra.gmra.mxu1 %v211_v38 }
  0x43   : > { %598 = vmatprep.mubr.msk.f32.mxu0 %vm327_vm0, %v214_v39  ;;  %600 = vmatprep.mubr.msk.f32.mxu1 %vm327_vm0, %v214_v39 }
  0x44   : > { %319 = vperm.xlu0 %616, %v315_v40  }
  0x46   : > { %405 = vmatmul.mubr.f32.gmra.mxu0 %v213_v41  ;;  %482 = vmatmul.mubr.f32.gmra.mxu1 %v213_v41 }
  0x48   : > { %324 = vperm.xlu0 %616, %v316_v42  }
  0xbf   : > { %v320_v43 = vpop.permute.xlu0 %319 }
  0xc3   : > { %v325_v52 = vpop.permute.xlu0 %324 }
 0x102   : > { %v400_v44 = vpop.f32.mrf.mxu0  ;;  %v477_v45 = vpop.f32.mrf.mxu1 }
 0x103   : > { %v401_v46 = vadd.f32 %v400_v44, %v320_v43  ;;  %v478_v47 = vadd.f32 %v477_v45, %v320_v43 }
 0x104   : > { %v402_v48 = vpop.f32.mrf.mxu0  ;;  %v479_v49 = vpop.f32.mrf.mxu1 }
 0x105   : > { %v488_v50 = vmax.f32 %v401_v46, 0.0  ;;  %v490_v51 = vmax.f32 %v478_v47, 0.0  ;;  %v403_v53 = vadd.f32 %v402_v48, %v320_v43  ;;  %v480_v54 = vadd.f32 %v479_v49, %v320_v43 }
 0x106   : > { %v406_v55 = vpop.f32.mrf.mxu0  ;;  %v483_v56 = vpop.f32.mrf.mxu1 }
 0x107   : > { %496 = vst [vmem:[%s784_s29] sm:$0xff] %v488_v50  ;;  %498 = vst [vmem:[%s784_s29 + $0x10] sm:$0xff] %v490_v51  ;;  %v489_v57 = vmax.f32 %v403_v53, 0.0  ;;  %v491_v58 = vmax.f32 %v480_v54, 0.0  ;;  %v407_v59 = vadd.f32 %v406_v55, %v325_v52  ;;  %v484_v60 = vadd.f32 %v483_v56, %v325_v52 }
 0x108   : > { %v408_v61 = vpop.f32.mrf.mxu0  ;;  %v485_v62 = vpop.f32.mrf.mxu1 }
 0x109   : > { %497 = vst [vmem:[%s784_s29 + $0x8] sm:$0xff] %v489_v57  ;;  %500 = vst.msk [vmem:[%s784_s29 + $0x18] sm:$0xff] %vm499_vm1, %v491_v58  ;;  %v492_v63 = vmax.f32 %v407_v59, 0.0  ;;  %v494_v0 = vmax.f32 %v484_v60, 0.0  ;;  %v409_v1 = vadd.f32 %v408_v61, %v325_v52  ;;  %v486_v2 = vadd.f32 %v485_v62, %v325_v52 }
 0x10b   : > { %501 = vst [vmem:[%s784_s29 + $0x20] sm:$0x3] %v492_v63  ;;  %503 = vst [vmem:[%s784_s29 + $0x30] sm:$0x3] %v494_v0  ;;  %v493_v3 = vmax.f32 %v409_v1, 0.0  ;;  %v495_v4 = vmax.f32 %v486_v2, 0.0 }
 0x10d   : > { %502 = vst [vmem:[%s784_s29 + $0x28] sm:$0x3] %v493_v3  ;;  %505 = vst.msk [vmem:[%s784_s29 + $0x38] sm:$0x3] %vm504_vm2, %v495_v4 }
 0x10e PF: > { %s13_s12 = sadd.s32 1, %s623_s12  }
 0x10f   : > { %p10_p4 = scmp.ge.s32.totalorder %s13_s12, 7  }
 0x111   :  { %12 = sbr.rel (!%p10_p4) target bundleno = 1 (0x1), region = 68 }

// kernel: generator_forward.12
= control target key start
LH: loop header
LB: loop body
LE: loop exit
PB: predicated region body
PF: predicated region fallthrough
CT: control target
= control target key end

     0   :  { %s837_s18 = smov 0   ;;  %s973_s0 = inlined_call_operand.vmem [shape: f32[5,2,490], index: 0, kind: input, shape index: {}]   ;;  %s974_s1 = inlined_call_operand.vmem [shape: f32[5,490,32], index: 1, kind: input, shape index: {}]   ;;  %s975_s2 = inlined_call_operand.vmem [shape: f32[5,1,32], index: 2, kind: input, shape index: {}]   ;;  %s976_s3 = inlined_call_operand.vmem [shape: f32[5,32,6], index: 3, kind: input, shape index: {}]   ;;  %s977_s4 = inlined_call_operand.vmem [shape: f32[5,1,6], index: 4, kind: input, shape index: {}]   ;;  %s978_s5 = inlined_call_operand.vmem [shape: f32[5,2,6], index: 5, kind: output, shape index: {}]  }
   0x1 LB: > { %s712_s19 = sadd.s32 4294967295, %s802_s18   ;;  %p716_p0 = scmp.ge.s32.totalorder %s802_s18, 1  ;;  %s802_s18 = sphi %s837_s18, %s15_s18  }
   0x2   : > { %p223_p1 = scmp.lt.s32.totalorder %s802_s18, 6 }
   0x4   : > { %p224_p2 = pnand %p716_p0, %p223_p1 }
   0x5   : > { %p266_p3 = scmp.lt.s32.totalorder (!%p224_p2), %s712_s19, 4 }
   0x6   : > { %227 = sbr.rel (%p224_p2) target bundleno = 468 (0x1d4), region = 40 }
   0xb   : > { %v804_v0 = vmov 0.0   ;;  %s980_s19 = smov (!%p266_p3, %s712_s19), 4  ;;  %v805_v27 = vmov 1983009808   ;;  %v366_v29 = vlaneseq  ;;  %vm385_vm0 = vcmask 1041408  }
   0xc   : > { %459 = vmatprep.subr.mxu1 %v804_v0  ;;  %s783_s20 = smul.u32 496, %s980_s19  ;;  %v364_v28 = vunpack.c.l.s4 %v805_v27  ;;  %s730_s24 = sshll.u32 %s980_s19, 3  ;;  %vm382_vm1 = vcmask 867328   ;;  %vm806_vm2 = vmmov 0   ;;  %vm541_vm3 = vcmask 261120  }
   0xd   : > { %v367_v37 = vshrl.u32 %v366_v29, 7  ;;  %s270_s27 = scalar_lea.vmem %s973_s0, %s730_s24  ;;  %s731_s28 = sshll.u32 %s980_s19, 5  ;;  %vm615_vm4 = vcmask 41984  }
   0xe   : > { %s852_s23 = scalar_lea.vmem %s974_s1, %s783_s20  ;;  %v365_v36 = vunpack.c.0.s8 %v364_v28  ;;  %v291_v46 = vld [vmem:[%s270_s27] sm:$0xff]  ;;  %s283_s6 = scalar_lea.vmem %s976_s3, %s731_s28 }
   0xf   : > { %v339_v1 = vld [vmem:[%s852_s23 + $0x178] sm:$0xff]  ;;  %v338_v2 = vld [vmem:[%s852_s23 + $0x170] sm:$0xff]  ;;  %v337_v3 = vld [vmem:[%s852_s23 + $0x168] sm:$0xff]  ;;  %v362_v49 = vcombine.high %v291_v46, %v291_v46  ;;  %s278_s9 = scalar_lea.vmem %s975_s2, %s980_s19  ;;  %s286_s12 = scalar_lea.vmem %s977_s4, %s980_s19 }
  0x10   : > { %460 = vmatpush1.msra.mxu1 %v339_v1  ;;  %v323_v4 = vld [vmem:[%s852_s23 + $0xf8] sm:$0xff]  ;;  %v336_v6 = vld [vmem:[%s852_s23 + $0x160] sm:$0xff]  ;;  %v322_v7 = vld [vmem:[%s852_s23 + $0xf0] sm:$0xff]  ;;  %v368_v44 = vsub.s32 %v365_v36, %v367_v37  ;;  %s722_s13 = sshll.u32 %s980_s19, 1 }
  0x11   : > { %461 = vmatprep.subr.mxu1 %v804_v0  ;;  %v307_v5 = vld [vmem:[%s852_s23 + $0x78] sm:$0xff]  ;;  %732 = vmatprep.subr.mxu0 %v323_v4  ;;  %v306_v8 = vld [vmem:[%s852_s23 + $0x70] sm:$0xff]  ;;  %v321_v9 = vld [vmem:[%s852_s23 + $0xe8] sm:$0xff]  ;;  %s290_s16 = scalar_lea.vmem %s978_s5, %s722_s13 }
  0x12   : > { %462 = vmatpush1.msra.mxu1 %v338_v2  ;;  %733 = vmatpush3.msra.mxu0 %v307_v5  ;;  %v335_v10 = vld [vmem:[%s852_s23 + $0x158] sm:$0xff]  ;;  %v305_v11 = vld [vmem:[%s852_s23 + $0x68] sm:$0xff]  ;;  %v320_v12 = vld [vmem:[%s852_s23 + $0xe0] sm:$0xff]  ;;  %v369_v53 = vrot.slane %v291_v46, %v368_v44  ;;  %v376_v57 = vrot.slane %v362_v49, %v368_v44 }
  0x13   : > { %463 = vmatprep.subr.mxu1 %v804_v0  ;;  %734 = vmatprep.subr.mxu0 %v322_v7  ;;  %v334_v13 = vld [vmem:[%s852_s23 + $0x150] sm:$0xff]  ;;  %v304_v14 = vld [vmem:[%s852_s23 + $0x60] sm:$0xff]  ;;  %v319_v15 = vld [vmem:[%s852_s23 + $0xd8] sm:$0xff] }
  0x14   : > { %464 = vmatpush1.msra.mxu1 %v337_v3  ;;  %735 = vmatpush3.msra.mxu0 %v306_v8  ;;  %v333_v16 = vld [vmem:[%s852_s23 + $0x148] sm:$0xff]  ;;  %v303_v17 = vld [vmem:[%s852_s23 + $0x58] sm:$0xff]  ;;  %v318_v18 = vld [vmem:[%s852_s23 + $0xd0] sm:$0xff]  ;;  %v377_v61 = vcombine.high %v369_v53, %v369_v53  ;;  %v378_v63 = vcombine.high %v376_v57, %v376_v57 }
  0x15   : > { %465 = vmatprep.subr.mxu1 %v804_v0  ;;  %736 = vmatprep.subr.mxu0 %v321_v9  ;;  %v332_v19 = vld [vmem:[%s852_s23 + $0x140] sm:$0xff]  ;;  %v302_v20 = vld [vmem:[%s852_s23 + $0x50] sm:$0xff]  ;;  %v317_v21 = vld [vmem:[%s852_s23 + $0xc8] sm:$0xff] }
  0x16   : > { %466 = vmatpush1.msra.mxu1 %v336_v6  ;;  %737 = vmatpush3.msra.mxu0 %v305_v11  ;;  %v331_v22 = vld [vmem:[%s852_s23 + $0x138] sm:$0xff]  ;;  %v301_v23 = vld [vmem:[%s852_s23 + $0x48] sm:$0xff]  ;;  %v316_v24 = vld [vmem:[%s852_s23 + $0xc0] sm:$0xff] }
  0x17   : > { %467 = vmatprep.subr.mxu1 %v804_v0  ;;  %738 = vmatprep.subr.mxu0 %v320_v12  ;;  %v330_v25 = vld [vmem:[%s852_s23 + $0x130] sm:$0xff]  ;;  %v300_v26 = vld [vmem:[%s852_s23 + $0x40] sm:$0xff]  ;;  %v315_v30 = vld [vmem:[%s852_s23 + $0xb8] sm:$0xff] }
  0x18   : > { %468 = vmatpush1.msra.mxu1 %v335_v10  ;;  %739 = vmatpush3.msra.mxu0 %v304_v14  ;;  %v329_v31 = vld [vmem:[%s852_s23 + $0x128] sm:$0xff]  ;;  %v299_v32 = vld [vmem:[%s852_s23 + $0x38] sm:$0xff]  ;;  %v314_v33 = vld [vmem:[%s852_s23 + $0xb0] sm:$0xff] }
  0x19   : > { %469 = vmatprep.subr.mxu1 %v804_v0  ;;  %740 = vmatprep.subr.mxu0 %v319_v15  ;;  %v328_v34 = vld [vmem:[%s852_s23 + $0x120] sm:$0xff]  ;;  %v298_v35 = vld [vmem:[%s852_s23 + $0x30] sm:$0xff]  ;;  %v313_v38 = vld [vmem:[%s852_s23 + $0xa8] sm:$0xff] }
  0x1a   : > { %470 = vmatpush1.msra.mxu1 %v334_v13  ;;  %741 = vmatpush3.msra.mxu0 %v303_v17  ;;  %v327_v39 = vld [vmem:[%s852_s23 + $0x118] sm:$0xff]  ;;  %v297_v40 = vld [vmem:[%s852_s23 + $0x28] sm:$0xff]  ;;  %v312_v41 = vld [vmem:[%s852_s23 + $0xa0] sm:$0xff] }
  0x1b   : > { %471 = vmatprep.subr.mxu1 %v804_v0  ;;  %742 = vmatprep.subr.mxu0 %v318_v18  ;;  %v326_v42 = vld [vmem:[%s852_s23 + $0x110] sm:$0xff]  ;;  %v296_v43 = vld [vmem:[%s852_s23 + $0x20] sm:$0xff]  ;;  %v311_v45 = vld [vmem:[%s852_s23 + $0x98] sm:$0xff] }
  0x1c   : > { %472 = vmatpush1.msra.mxu1 %v333_v16  ;;  %743 = vmatpush3.msra.mxu0 %v302_v20  ;;  %v325_v47 = vld [vmem:[%s852_s23 + $0x108] sm:$0xff]  ;;  %v295_v48 = vld [vmem:[%s852_s23 + $0x18] sm:$0xff]  ;;  %v310_v50 = vld [vmem:[%s852_s23 + $0x90] sm:$0xff] }
  0x1d   : > { %473 = vmatprep.subr.mxu1 %v804_v0  ;;  %744 = vmatprep.subr.mxu0 %v317_v21  ;;  %v324_v51 = vld [vmem:[%s852_s23 + $0x100] sm:$0xff]  ;;  %v294_v52 = vld [vmem:[%s852_s23 + $0x10] sm:$0xff]  ;;  %v309_v54 = vld [vmem:[%s852_s23 + $0x88] sm:$0xff] }
  0x1e   : > { %474 = vmatpush1.msra.mxu1 %v332_v19  ;;  %745 = vmatpush3.msra.mxu0 %v301_v23  ;;  %v353_v55 = vld [vmem:[%s852_s23 + $0x1e8] sm:$0x3]  ;;  %v308_v58 = vld [vmem:[%s852_s23 + $0x80] sm:$0xff]  ;;  %v351_v62 = vld [vmem:[%s852_s23 + $0x1d8] sm:$0xff] }
  0x1f   : > { %475 = vmatprep.subr.mxu1 %v804_v0  ;;  %746 = vmatprep.subr.mxu0 %v316_v24  ;;  %v293_v56 = vld [vmem:[%s852_s23 + $0x8] sm:$0xff]  ;;  %v352_v59 = vld [vmem:[%s852_s23 + $0x1e0] sm:$0xff]  ;;  %v350_v1 = vld [vmem:[%s852_s23 + $0x1d0] sm:$0xff] }
  0x20   : > { %476 = vmatpush1.msra.mxu1 %v331_v22  ;;  %747 = vmatpush3.msra.mxu0 %v300_v26  ;;  %v292_v60 = vld [vmem:[%s852_s23] sm:$0xff]  ;;  %v349_v2 = vld [vmem:[%s852_s23 + $0x1c8] sm:$0xff]  ;;  %v347_v4 = vld [vmem:[%s852_s23 + $0x1b8] sm:$0xff] }
  0x21   : > { %477 = vmatprep.subr.mxu1 %v804_v0  ;;  %748 = vmatprep.subr.mxu0 %v315_v30  ;;  %v348_v3 = vld [vmem:[%s852_s23 + $0x1c0] sm:$0xff]  ;;  %v346_v5 = vld [vmem:[%s852_s23 + $0x1b0] sm:$0xff]  ;;  %v345_v6 = vld [vmem:[%s852_s23 + $0x1a8] sm:$0xff] }
  0x22   : > { %478 = vmatpush1.msra.mxu1 %v330_v25  ;;  %749 = vmatpush3.msra.mxu0 %v299_v32  ;;  %v344_v7 = vld [vmem:[%s852_s23 + $0x1a0] sm:$0xff]  ;;  %v343_v8 = vld [vmem:[%s852_s23 + $0x198] sm:$0xff]  ;;  %v342_v9 = vld [vmem:[%s852_s23 + $0x190] sm:$0xff] }
  0x23   : > { %479 = vmatprep.subr.mxu1 %v804_v0  ;;  %750 = vmatprep.subr.mxu0 %v314_v33  ;;  %v341_v10 = vld [vmem:[%s852_s23 + $0x188] sm:$0xff]  ;;  %v340_v11 = vld [vmem:[%s852_s23 + $0x180] sm:$0xff]  ;;  %v533_v12 = vld [vmem:[%s283_s6 + $0x18] sm:$0xff] }
  0x24   : > { %480 = vmatpush1.msra.mxu1 %v329_v31  ;;  %751 = vmatpush3.msra.mxu0 %v298_v35  ;;  %v532_v13 = vld [vmem:[%s283_s6 + $0x10] sm:$0xff]  ;;  %v531_v14 = vld [vmem:[%s283_s6 + $0x8] sm:$0xff]  ;;  %v530_v15 = vld [vmem:[%s283_s6] sm:$0xff] }
  0x25   : > { %481 = vmatprep.subr.mxu1 %v804_v0  ;;  %752 = vmatprep.subr.mxu0 %v313_v38  ;;  %v723_v19 = vld [vmem:[%s278_s9] ss:$0 sm:$0xff] }
  0x26   : > { %482 = vmatpush1.msra.mxu1 %v328_v34  ;;  %753 = vmatpush3.msra.mxu0 %v297_v40 }
  0x27   : > { %483 = vmatprep.subr.mxu1 %v804_v0  ;;  %754 = vmatprep.subr.mxu0 %v312_v41 }
  0x28   : > { %484 = vmatpush1.msra.mxu1 %v327_v39  ;;  %755 = vmatpush3.msra.mxu0 %v296_v43 }
  0x29   : > { %485 = vmatprep.subr.mxu1 %v804_v0  ;;  %756 = vmatprep.subr.mxu0 %v311_v45 }
  0x2a   : > { %486 = vmatpush1.msra.mxu1 %v326_v42  ;;  %757 = vmatpush3.msra.mxu0 %v295_v48 }
  0x2b   : > { %487 = vmatprep.subr.mxu1 %v804_v0  ;;  %758 = vmatprep.subr.mxu0 %v310_v50 }
  0x2c   : > { %488 = vmatpush1.msra.mxu1 %v325_v47  ;;  %759 = vmatpush3.msra.mxu0 %v294_v52 }
  0x2d   : > { %489 = vmatprep.subr.mxu1 %v804_v0  ;;  %760 = vmatprep.subr.mxu0 %v309_v54 }
  0x2e   : > { %490 = vmatpush1.msra.mxu1 %v324_v51  ;;  %761 = vmatpush3.msra.mxu0 %v293_v56 }
  0x2f   : > { %495 = vmatprep.subr.mxu1 %v804_v0  ;;  %762 = vmatprep.subr.mxu0 %v308_v58 }
  0x30   : > { %724 = vmatpush2.msk.msra.mxu1 %vm385_vm0, %v353_v55  ;;  %763 = vmatpush3.msra.mxu0 %v292_v60 }
  0x31   : > { %497 = vmatprep.subr.mxu1 %v804_v0  ;;  %453 = vmatprep.mubr.f32.mxu0 %v377_v61 }
  0x32   : > { %498 = vmatpush2.msra.mxu1 %v352_v59  ;;  %454 = vmatmul.mubr.f32.vlgmr.msra.gmra.mxu0 %v369_v53 }
  0x33   : > { %499 = vmatprep.subr.mxu1 %v804_v0  ;;  %725 = vmatprep.mubr.msk.f32.mxu1 %vm382_vm1, %v378_v63 }
  0x34   : > { %500 = vmatpush2.msra.mxu1 %v351_v62  ;;  %772 = vmatprep.subr.mxu0 %v804_v0 }
  0x35   : > { %501 = vmatprep.subr.mxu1 %v804_v0  ;;  %773 = vmatpush3.msra.mxu0 %v533_v12 }
  0x36   : > { %502 = vmatpush2.msra.mxu1 %v350_v1  ;;  %774 = vmatprep.subr.mxu0 %v804_v0 }
  0x37   : > { %503 = vmatprep.subr.mxu1 %v804_v0  ;;  %775 = vmatpush3.msra.mxu0 %v532_v13 }
  0x38   : > { %504 = vmatpush2.msra.mxu1 %v349_v2  ;;  %776 = vmatprep.subr.mxu0 %v804_v0 }
  0x39   : > { %505 = vmatprep.subr.mxu1 %v804_v0  ;;  %777 = vmatpush3.msra.mxu0 %v531_v14 }
  0x3a   : > { %506 = vmatpush2.msra.mxu1 %v348_v3  ;;  %778 = vmatprep.subr.mxu0 %v804_v0 }
  0x3b   : > { %507 = vmatprep.subr.mxu1 %v804_v0  ;;  %779 = vmatpush3.msra.mxu0 %v530_v15 }
  0x3c   : > { %508 = vmatpush2.msra.mxu1 %v347_v4  ;;  %780 = vmatprep.mubr.msk.f32.mxu0 %vm806_vm2, %v804_v0 }
  0x3d   : > { %509 = vmatprep.subr.mxu1 %v804_v0 }
  0x3e   : > { %510 = vmatpush2.msra.mxu1 %v346_v5 }
  0x3f   : > { %511 = vmatprep.subr.mxu1 %v804_v0 }
  0x40   : > { %512 = vmatpush2.msra.mxu1 %v345_v6 }
  0x41   : > { %513 = vmatprep.subr.mxu1 %v804_v0 }
  0x42   : > { %514 = vmatpush2.msra.mxu1 %v344_v7 }
  0x43   : > { %515 = vmatprep.subr.mxu1 %v804_v0 }
  0x44   : > { %516 = vmatpush2.msra.mxu1 %v343_v8 }
  0x45   : > { %517 = vmatprep.subr.mxu1 %v804_v0 }
  0x46   : > { %518 = vmatpush2.msra.mxu1 %v342_v9 }
  0x47   : > { %519 = vmatprep.subr.mxu1 %v804_v0 }
  0x48   : > { %520 = vmatpush2.msra.mxu1 %v341_v10 }
  0x49   : > { %521 = vmatprep.subr.mxu1 %v804_v0  ;;  %v726_v0 = vld [vmem:[%s286_s12] ss:$0 sm:$0xff] }
  0x4a   : > { %522 = vmatpush2.msra.mxu1 %v340_v11 }
  0x4b   : > { %524 = vmatmul.mubr.f32.vlgmr.msra.gmra.mxu1 %v376_v57 }
  0xf2   : > { %v764_v16 = vpop.f32.mrf.mxu0 }
  0xf4   : > { %v765_v17 = vpop.f32.mrf.mxu0 }
  0xf5   : > { %v766_v18 = vadd.f32 %v765_v17, %v764_v16 }
  0xf7   : > { %v456_v20 = vadd.f32 %v766_v18, %v723_v19 }
 0x10b   : > { %v525_v21 = vpop.f32.mrf.mxu1 }
 0x10c   : > { %v526_v22 = vadd.f32 %v525_v21, %v456_v20 }
 0x10d   : > { %v527_v23 = vpop.f32.mrf.mxu1 }
 0x10e   : > { %v529_v24 = vmax.f32 %v526_v22, 0.0 }
 0x110   : > { %781 = vmatmul.mubr.msk.f32.vlgmr.msra.gmra.mxu0 %vm541_vm3, %v529_v24 }
 0x1d0   : > { %v611_v25 = vpop.f32.mrf.mxu0 }
 0x1d1   : > { %v612_v26 = vadd.f32 %v726_v0, %v611_v25 }
 0x1d2   : > { %v782_v27 = vpop.f32.mrf.mxu0 }
 0x1d3   : > { %616 = vst.msk [vmem:[%s290_s16] sm:$0x3] %vm615_vm4, %v612_v26 }
 0x1d4 PF: > { %s15_s18 = sadd.s32 1, %s802_s18  }
 0x1d5   : > { %p12_p4 = scmp.ge.s32.totalorder %s15_s18, 7  }
 0x1d7   :  { %14 = sbr.rel (!%p12_p4) target bundleno = 1 (0x1), region = 82 }

// kernel: generator_forward.14
= control target key start
LH: loop header
LB: loop body
LE: loop exit
PB: predicated region body
PF: predicated region fallthrough
CT: control target
= control target key end

     0   :  { %vm42_vm0 = vcmask 1044480   ;;  %vm96_vm1 = vcmask 585728   ;;  %s884_s0 = inlined_call_operand.vmem [shape: f32[5,3528], index: 0, kind: input, shape index: {}]   ;;  %s885_s1 = inlined_call_operand.vmem [shape: f32[5,1], index: 1, kind: input, shape index: {}]   ;;  %s886_s2 = inlined_call_operand.vmem [shape: f32[5,1], index: 2, kind: input, shape index: {}]   ;;  %s887_s3 = inlined_call_operand.vmem [shape: f32[5,3528], index: 3, kind: output, shape index: {}]  }
   0x1   :  { %v404_v0 = vld [vmem:[%s884_s0] sm:$0x1f]  ;;  %v409_v1 = vld [vmem:[%s884_s0 + $0x8] sm:$0x1f]  ;;  %v414_v2 = vld [vmem:[%s884_s0 + $0x10] sm:$0x1f] }
   0x2   :  { %v419_v3 = vld [vmem:[%s884_s0 + $0x18] sm:$0x1f]  ;;  %v43_v4 = vsel %vm42_vm0, %v404_v0, 0.0  ;;  %v44_v5 = vsel %vm42_vm0, %v409_v1, 0.0  ;;  %v46_v6 = vsel %vm42_vm0, %v414_v2, 0.0 }
   0x3   :  { %v430_v7 = vld [vmem:[%s884_s0 + $0x20] sm:$0x1f]  ;;  %v45_v8 = vadd.f32 %v44_v5, %v43_v4  ;;  %v48_v9 = vsel %vm42_vm0, %v419_v3, 0.0  ;;  %v437_v10 = vld [vmem:[%s884_s0 + $0x28] sm:$0x1f] }
   0x4   :  { %v50_v12 = vsel %vm42_vm0, %v430_v7, 0.0  ;;  %v444_v13 = vld [vmem:[%s884_s0 + $0x30] sm:$0x1f]  ;;  %v52_v15 = vsel %vm42_vm0, %v437_v10, 0.0  ;;  %v451_v16 = vld [vmem:[%s884_s0 + $0x38] sm:$0x1f] }
   0x5   :  { %v47_v11 = vadd.f32 %v46_v6, %v45_v8  ;;  %v54_v18 = vsel %vm42_vm0, %v444_v13, 0.0  ;;  %v458_v19 = vld [vmem:[%s884_s0 + $0x40] sm:$0x1f]  ;;  %v56_v21 = vsel %vm42_vm0, %v451_v16, 0.0  ;;  %v465_v22 = vld [vmem:[%s884_s0 + $0x48] sm:$0x1f] }
   0x6   :  { %v58_v24 = vsel %vm42_vm0, %v458_v19, 0.0  ;;  %v472_v25 = vld [vmem:[%s884_s0 + $0x50] sm:$0x1f]  ;;  %v60_v27 = vsel %vm42_vm0, %v465_v22, 0.0  ;;  %v479_v28 = vld [vmem:[%s884_s0 + $0x58] sm:$0x1f] }
   0x7   :  { %v49_v14 = vadd.f32 %v48_v9, %v47_v11  ;;  %v62_v30 = vsel %vm42_vm0, %v472_v25, 0.0  ;;  %v486_v31 = vld [vmem:[%s884_s0 + $0x60] sm:$0x1f]  ;;  %v64_v33 = vsel %vm42_vm0, %v479_v28, 0.0  ;;  %v493_v34 = vld [vmem:[%s884_s0 + $0x68] sm:$0x1f] }
   0x8   :  { %v66_v36 = vsel %vm42_vm0, %v486_v31, 0.0  ;;  %v500_v37 = vld [vmem:[%s884_s0 + $0x70] sm:$0x1f]  ;;  %v68_v39 = vsel %vm42_vm0, %v493_v34, 0.0  ;;  %v507_v40 = vld [vmem:[%s884_s0 + $0x78] sm:$0x1f] }
   0x9   :  { %v51_v17 = vadd.f32 %v50_v12, %v49_v14  ;;  %v70_v42 = vsel %vm42_vm0, %v500_v37, 0.0  ;;  %v514_v43 = vld [vmem:[%s884_s0 + $0x80] sm:$0x1f]  ;;  %v72_v45 = vsel %vm42_vm0, %v507_v40, 0.0  ;;  %v521_v46 = vld [vmem:[%s884_s0 + $0x88] sm:$0x1f] }
   0xa   :  { %v74_v48 = vsel %vm42_vm0, %v514_v43, 0.0  ;;  %v528_v49 = vld [vmem:[%s884_s0 + $0x90] sm:$0x1f]  ;;  %v76_v51 = vsel %vm42_vm0, %v521_v46, 0.0  ;;  %v535_v52 = vld [vmem:[%s884_s0 + $0x98] sm:$0x1f] }
   0xb   :  { %v53_v20 = vadd.f32 %v52_v15, %v51_v17  ;;  %v78_v54 = vsel %vm42_vm0, %v528_v49, 0.0  ;;  %v542_v55 = vld [vmem:[%s884_s0 + $0xa0] sm:$0x1f]  ;;  %v80_v57 = vsel %vm42_vm0, %v535_v52, 0.0  ;;  %v549_v58 = vld [vmem:[%s884_s0 + $0xa8] sm:$0x1f] }
   0xc   :  { %v82_v60 = vsel %vm42_vm0, %v542_v55, 0.0  ;;  %v556_v61 = vld [vmem:[%s884_s0 + $0xb0] sm:$0x1f]  ;;  %v84_v63 = vsel %vm42_vm0, %v549_v58, 0.0  ;;  %v563_v4 = vld [vmem:[%s884_s0 + $0xb8] sm:$0x1f] }
   0xd   :  { %v55_v23 = vadd.f32 %v54_v18, %v53_v20  ;;  %v86_v6 = vsel %vm42_vm0, %v556_v61, 0.0  ;;  %v570_v8 = vld [vmem:[%s884_s0 + $0xc0] sm:$0x1f]  ;;  %v88_v11 = vsel %vm42_vm0, %v563_v4, 0.0  ;;  %v577_v12 = vld [vmem:[%s884_s0 + $0xc8] sm:$0x1f] }
   0xe   :  { %v90_v15 = vsel %vm42_vm0, %v570_v8, 0.0  ;;  %v584_v17 = vld [vmem:[%s884_s0 + $0xd0] sm:$0x1f]  ;;  %v92_v20 = vsel %vm42_vm0, %v577_v12, 0.0 }
   0xf   :  { %v57_v26 = vadd.f32 %v56_v21, %v55_v23  ;;  %v591_v21 = vld [vmem:[%s884_s0 + $0xd8] sm:$0x1f] }
  0x11   :  { %v59_v29 = vadd.f32 %v58_v24, %v57_v26  ;;  %v94_v24 = vsel %vm42_vm0, %v584_v17, 0.0 }
  0x13   :  { %v61_v32 = vadd.f32 %v60_v27, %v59_v29  ;;  %v97_v27 = vsel %vm96_vm1, %v591_v21, 0.0 }
  0x15   :  { %v63_v35 = vadd.f32 %v62_v30, %v61_v32  ;;  %v380_v32 = vmov 0  }
  0x16   :  { %376 = vset.pattern.permute.xlu1 %v380_v32  ;;  %377 = vset.pattern.permute.xlu0 %v380_v32 }
  0x17   :  { %v65_v38 = vadd.f32 %v64_v33, %v63_v35  ;;  %v247_v33 = vld [vmem:[%s885_s1] sm:$0x1f] }
  0x18   :  { %250 = vperm.xlu1 %376, %v247_v33   ;;  %v281_v35 = vld [vmem:[%s886_s2] sm:$0x1f] }
  0x19   :  { %v67_v41 = vadd.f32 %v66_v36, %v65_v38 }
  0x1b   :  { %v69_v44 = vadd.f32 %v68_v39, %v67_v41 }
  0x1c   :  { %284 = vperm.xlu1 %376, %v281_v35  }
  0x1d   :  { %v71_v47 = vadd.f32 %v70_v42, %v69_v44 }
  0x1f   :  { %v73_v50 = vadd.f32 %v72_v45, %v71_v47 }
  0x21   :  { %v75_v53 = vadd.f32 %v74_v48, %v73_v50 }
  0x23   :  { %v77_v56 = vadd.f32 %v76_v51, %v75_v53 }
  0x25   :  { %v79_v59 = vadd.f32 %v78_v54, %v77_v56 }
  0x27   :  { %v81_v62 = vadd.f32 %v80_v57, %v79_v59 }
  0x29   :  { %v83_v5 = vadd.f32 %v82_v60, %v81_v62 }
  0x2b   :  { %v85_v9 = vadd.f32 %v84_v63, %v83_v5 }
  0x2d   :  { %v87_v14 = vadd.f32 %v86_v6, %v85_v9 }
  0x2f   :  { %v89_v18 = vadd.f32 %v88_v11, %v87_v14 }
  0x31   :  { %v91_v23 = vadd.f32 %v90_v15, %v89_v18 }
  0x33   :  { %v93_v26 = vadd.f32 %v92_v20, %v91_v23 }
  0x35   :  { %v95_v29 = vadd.f32 %v94_v24, %v93_v26 }
  0x37   :  { %v98_v30 = vadd.f32 %v97_v27, %v95_v29 }
  0x39   :  { %99 = vadd.xlane.f32.xlu0 %v98_v30 }
  0xc2   :  { %v100_v36 = vpop.xlane.xlu0 %99 }
  0xc3   :  { %v603_v38 = vmul.f32 0.00028344672, %v100_v36 }
  0xc5   :  { %v607_v39 = vsub.f32 %v404_v0, %v603_v38  ;;  %v611_v41 = vsub.f32 %v409_v1, %v603_v38  ;;  %v615_v42 = vsub.f32 %v414_v2, %v603_v38  ;;  %v619_v44 = vsub.f32 %v419_v3, %v603_v38 }
  0xc6   :  { %v627_v0 = vsub.f32 %v430_v7, %v603_v38  ;;  %v633_v2 = vsub.f32 %v437_v10, %v603_v38  ;;  %v641_v53 = vsub.f32 %v444_v13, %v603_v38  ;;  %v648_v10 = vsub.f32 %v451_v16, %v603_v38 }
  0xc7   :  { %v131_v45 = vmul.f32 %v607_v39, %v607_v39  ;;  %v132_v47 = vmul.f32 %v611_v41, %v611_v41  ;;  %v133_v1 = vmul.f32 %v615_v42, %v615_v42  ;;  %v134_v3 = vmul.f32 %v619_v44, %v619_v44 }
  0xc8   :  { %v135_v7 = vmul.f32 %v627_v0, %v627_v0  ;;  %v136_v57 = vmul.f32 %v633_v2, %v633_v2  ;;  %v655_v13 = vsub.f32 %v458_v19, %v603_v38  ;;  %v137_v62 = vmul.f32 %v641_v53, %v641_v53 }
  0xc9   :  { %v159_v48 = vsel %vm42_vm0, %v131_v45, 0.0  ;;  %v160_v50 = vsel %vm42_vm0, %v132_v47, 0.0  ;;  %v162_v54 = vsel %vm42_vm0, %v133_v1, 0.0  ;;  %v164_v59 = vsel %vm42_vm0, %v134_v3, 0.0 }
  0xca   :  { %v161_v51 = vadd.f32 %v160_v50, %v159_v48  ;;  %v166_v63 = vsel %vm42_vm0, %v135_v7, 0.0  ;;  %v662_v16 = vsub.f32 %v465_v22, %v603_v38  ;;  %v138_v6 = vmul.f32 %v648_v10, %v648_v10 }
  0xcb   :  { %v168_v9 = vsel %vm42_vm0, %v136_v57, 0.0  ;;  %v669_v19 = vsub.f32 %v472_v25, %v603_v38  ;;  %v139_v14 = vmul.f32 %v655_v13, %v655_v13  ;;  %v170_v15 = vsel %vm42_vm0, %v137_v62, 0.0 }
  0xcc   :  { %v163_v56 = vadd.f32 %v162_v54, %v161_v51  ;;  %v676_v22 = vsub.f32 %v479_v28, %v603_v38  ;;  %v140_v20 = vmul.f32 %v662_v16, %v662_v16  ;;  %v172_v23 = vsel %vm42_vm0, %v138_v6, 0.0 }
  0xcd   :  { %v683_v25 = vsub.f32 %v486_v31, %v603_v38  ;;  %v141_v26 = vmul.f32 %v669_v19, %v669_v19  ;;  %v174_v27 = vsel %vm42_vm0, %v139_v14, 0.0  ;;  %v690_v28 = vsub.f32 %v493_v34, %v603_v38 }
  0xce   :  { %v165_v60 = vadd.f32 %v164_v59, %v163_v56  ;;  %v142_v30 = vmul.f32 %v676_v22, %v676_v22  ;;  %v176_v32 = vsel %vm42_vm0, %v140_v20, 0.0  ;;  %v697_v31 = vsub.f32 %v500_v37, %v603_v38 }
  0xcf   :  { %v143_v35 = vmul.f32 %v683_v25, %v683_v25  ;;  %v178_v36 = vsel %vm42_vm0, %v141_v26, 0.0  ;;  %v704_v34 = vsub.f32 %v507_v40, %v603_v38  ;;  %v144_v47 = vmul.f32 %v690_v28, %v690_v28 }
  0xd0   :  { %v167_v5 = vadd.f32 %v166_v63, %v165_v60  ;;  %v180_v1 = vsel %vm42_vm0, %v142_v30, 0.0  ;;  %v711_v37 = vsub.f32 %v514_v43, %v603_v38  ;;  %v145_v48 = vmul.f32 %v697_v31, %v697_v31 }
  0xd1   :  { %v182_v50 = vsel %vm42_vm0, %v143_v35, 0.0  ;;  %v718_v40 = vsub.f32 %v521_v46, %v603_v38  ;;  %v146_v7 = vmul.f32 %v704_v34, %v704_v34  ;;  %v184_v54 = vsel %vm42_vm0, %v144_v47, 0.0 }
  0xd2   :  { %v169_v11 = vadd.f32 %v168_v9, %v167_v5  ;;  %v725_v43 = vsub.f32 %v528_v49, %v603_v38  ;;  %v147_v57 = vmul.f32 %v711_v37, %v711_v37  ;;  %v186_v59 = vsel %vm42_vm0, %v145_v48, 0.0 }
  0xd3   :  { %v732_v46 = vsub.f32 %v535_v52, %v603_v38  ;;  %v148_v62 = vmul.f32 %v718_v40, %v718_v40  ;;  %v188_v63 = vsel %vm42_vm0, %v146_v7, 0.0  ;;  %v739_v49 = vsub.f32 %v542_v55, %v603_v38 }
  0xd4   :  { %v171_v18 = vadd.f32 %v170_v15, %v169_v11  ;;  %v149_v6 = vmul.f32 %v725_v43, %v725_v43  ;;  %v190_v9 = vsel %vm42_vm0, %v147_v57, 0.0  ;;  %v746_v52 = vsub.f32 %v549_v58, %v603_v38 }
  0xd5   :  { %v150_v14 = vmul.f32 %v732_v46, %v732_v46  ;;  %v192_v15 = vsel %vm42_vm0, %v148_v62, 0.0  ;;  %v125_v55 = vsub.f32 %v556_v61, %v603_v38  ;;  %v151_v20 = vmul.f32 %v739_v49, %v739_v49 }
  0xd6   :  { %v173_v24 = vadd.f32 %v172_v23, %v171_v18  ;;  %v194_v23 = vsel %vm42_vm0, %v149_v6, 0.0  ;;  %v126_v26 = vsub.f32 %v563_v4, %v603_v38  ;;  %v152_v58 = vmul.f32 %v746_v52, %v746_v52 }
  0xd7   :  { %v127_v30 = vsub.f32 %v570_v8, %v603_v38  ;;  %v198_v61 = vsel %vm42_vm0, %v151_v20, 0.0  ;;  %v128_v35 = vsub.f32 %v577_v12, %v603_v38  ;;  %v129_v47 = vsub.f32 %v584_v17, %v603_v38 }
  0xd8   :  { %v175_v29 = vadd.f32 %v174_v27, %v173_v24  ;;  %v196_v27 = vsel %vm42_vm0, %v150_v14, 0.0  ;;  %v130_v8 = vsub.f32 %v591_v21, %v603_v38 }
  0xda   :  { %v177_v33 = vadd.f32 %v176_v32, %v175_v29  ;;  %v153_v32 = vmul.f32 %v125_v55, %v125_v55  ;;  %v158_v57 = vmul.f32 %v130_v8, %v130_v8 }
  0xdc   :  { %v179_v45 = vadd.f32 %v178_v36, %v177_v33  ;;  %v154_v36 = vmul.f32 %v126_v26, %v126_v26 }
  0xde   :  { %v181_v3 = vadd.f32 %v180_v1, %v179_v45  ;;  %v200_v45 = vsel %vm42_vm0, %v152_v58, 0.0  ;;  %v155_v1 = vmul.f32 %v127_v30, %v127_v30 }
  0xe0   :  { %v183_v51 = vadd.f32 %v182_v50, %v181_v3  ;;  %v202_v3 = vsel %vm42_vm0, %v153_v32, 0.0  ;;  %v156_v50 = vmul.f32 %v128_v35, %v128_v35  ;;  %v206_v12 = vsel %vm42_vm0, %v155_v1, 0.0 }
  0xe2   :  { %v185_v56 = vadd.f32 %v184_v54, %v183_v51  ;;  %v204_v51 = vsel %vm42_vm0, %v154_v36, 0.0  ;;  %v157_v54 = vmul.f32 %v129_v47, %v129_v47 }
  0xe4   :  { %v187_v60 = vadd.f32 %v186_v59, %v185_v56  ;;  %v208_v59 = vsel %vm42_vm0, %v156_v50, 0.0  ;;  %v210_v17 = vsel %vm42_vm0, %v157_v54, 0.0 }
  0xe6   :  { %v189_v5 = vadd.f32 %v188_v63, %v187_v60  ;;  %v212_v63 = vsel %vm96_vm1, %v158_v57, 0.0 }
  0xe8   :  { %v191_v11 = vadd.f32 %v190_v9, %v189_v5 }
  0xea   :  { %v193_v18 = vadd.f32 %v192_v15, %v191_v11 }
  0xec   :  { %v195_v24 = vadd.f32 %v194_v23, %v193_v18 }
  0xee   :  { %v197_v29 = vadd.f32 %v196_v27, %v195_v24 }
  0xf0   :  { %v199_v33 = vadd.f32 %v198_v61, %v197_v29  ;;  %v251_v61 = vpop.permute.xlu1 %250 }
  0xf2   :  { %v201_v4 = vadd.f32 %v200_v45, %v199_v33 }
  0xf4   :  { %v203_v48 = vadd.f32 %v202_v3, %v201_v4  ;;  %v285_v57 = vpop.permute.xlu1 %284 }
  0xf6   :  { %v205_v7 = vadd.f32 %v204_v51, %v203_v48 }
  0xf8   :  { %v207_v56 = vadd.f32 %v206_v12, %v205_v7 }
  0xfa   :  { %v209_v60 = vadd.f32 %v208_v59, %v207_v56 }
  0xfc   :  { %v211_v62 = vadd.f32 %v210_v17, %v209_v60 }
  0xfe   :  { %v213_v5 = vadd.f32 %v212_v63, %v211_v62 }
 0x100   :  { %214 = vadd.xlane.f32.xlu0 %v213_v5 }
 0x189   :  { %v215_v21 = vpop.xlane.xlu0 %214 }
 0x18a   :  { %v216_v38 = vmul.f32 0.00028344672, %v215_v21 }
 0x18c   :  { %v217_v6 = vadd.f32 1e-05, %v216_v38 }
 0x18e   :  { %378 = vrsqrt.f32 %v217_v6 }
 0x19b   :  { %v379_v9 = vpop.eup %378 }
 0x19c   :  { %v219_v11 = vmul.f32 %v379_v9, %v607_v39  ;;  %v220_v14 = vmul.f32 %v379_v9, %v611_v41  ;;  %v221_v15 = vmul.f32 %v379_v9, %v615_v42  ;;  %v222_v18 = vmul.f32 %v379_v9, %v619_v44 }
 0x19d   :  { %v223_v20 = vmul.f32 %v379_v9, %v627_v0  ;;  %v224_v23 = vmul.f32 %v379_v9, %v633_v2  ;;  %v225_v24 = vmul.f32 %v379_v9, %v641_v53  ;;  %v226_v58 = vmul.f32 %v379_v9, %v648_v10 }
 0x19e   :  { %v227_v27 = vmul.f32 %v379_v9, %v655_v13  ;;  %v228_v29 = vmul.f32 %v379_v9, %v662_v16  ;;  %v229_v39 = vmul.f32 %v379_v9, %v669_v19  ;;  %v230_v41 = vmul.f32 %v379_v9, %v676_v22 }
 0x19f   :  { %v231_v42 = vmul.f32 %v379_v9, %v683_v25  ;;  %v232_v44 = vmul.f32 %v379_v9, %v690_v28  ;;  %v233_v0 = vmul.f32 %v379_v9, %v697_v31  ;;  %v234_v2 = vmul.f32 %v379_v9, %v704_v34 }
 0x1a0   :  { %v235_v53 = vmul.f32 %v379_v9, %v711_v37  ;;  %v236_v10 = vmul.f32 %v379_v9, %v718_v40  ;;  %v237_v13 = vmul.f32 %v379_v9, %v725_v43  ;;  %v238_v16 = vmul.f32 %v379_v9, %v732_v46 }
 0x1a1   :  { %v239_v19 = vmul.f32 %v379_v9, %v739_v49  ;;  %v240_v22 = vmul.f32 %v379_v9, %v746_v52  ;;  %v241_v32 = vmul.f32 %v379_v9, %v125_v55  ;;  %v242_v25 = vmul.f32 %v379_v9, %v126_v26 }
 0x1a2   :  { %v243_v28 = vmul.f32 %v379_v9, %v127_v30  ;;  %v244_v33 = vmul.f32 %v379_v9, %v128_v35  ;;  %v245_v31 = vmul.f32 %v379_v9, %v129_v47  ;;  %v246_v36 = vmul.f32 %v379_v9, %v130_v8 }
 0x1a3   :  { %v253_v34 = vmul.f32 %v251_v61, %v219_v11  ;;  %v254_v45 = vmul.f32 %v251_v61, %v220_v14  ;;  %v255_v37 = vmul.f32 %v251_v61, %v221_v15  ;;  %v256_v4 = vmul.f32 %v251_v61, %v222_v18 }
 0x1a4   :  { %v257_v40 = vmul.f32 %v251_v61, %v223_v20  ;;  %v258_v1 = vmul.f32 %v251_v61, %v224_v23  ;;  %v259_v43 = vmul.f32 %v251_v61, %v225_v24  ;;  %v260_v3 = vmul.f32 %v251_v61, %v226_v58 }
 0x1a5   :  { %v261_v46 = vmul.f32 %v251_v61, %v227_v27  ;;  %v262_v48 = vmul.f32 %v251_v61, %v228_v29  ;;  %v263_v49 = vmul.f32 %v251_v61, %v229_v39  ;;  %v264_v50 = vmul.f32 %v251_v61, %v230_v41 }
 0x1a6   :  { %v265_v52 = vmul.f32 %v251_v61, %v231_v42  ;;  %v266_v55 = vmul.f32 %v251_v61, %v232_v44  ;;  %v267_v26 = vmul.f32 %v251_v61, %v233_v0  ;;  %v268_v51 = vmul.f32 %v251_v61, %v234_v2 }
 0x1a7   :  { %v269_v30 = vmul.f32 %v251_v61, %v235_v53  ;;  %v270_v35 = vmul.f32 %v251_v61, %v236_v10  ;;  %v271_v47 = vmul.f32 %v251_v61, %v237_v13  ;;  %v272_v8 = vmul.f32 %v251_v61, %v238_v16 }
 0x1a8   :  { %v273_v7 = vmul.f32 %v251_v61, %v239_v19  ;;  %v274_v54 = vmul.f32 %v251_v61, %v240_v22  ;;  %v275_v12 = vmul.f32 %v251_v61, %v241_v32  ;;  %v276_v56 = vmul.f32 %v251_v61, %v242_v25 }
 0x1a9   :  { %v277_v59 = vmul.f32 %v251_v61, %v243_v28  ;;  %v278_v60 = vmul.f32 %v251_v61, %v244_v33  ;;  %v279_v17 = vmul.f32 %v251_v61, %v245_v31  ;;  %v280_v62 = vmul.f32 %v251_v61, %v246_v36 }
 0x1aa   :  { %v287_v63 = vadd.f32 %v285_v57, %v253_v34  ;;  %v288_v5 = vadd.f32 %v285_v57, %v254_v45  ;;  %v289_v21 = vadd.f32 %v285_v57, %v255_v37  ;;  %v290_v38 = vadd.f32 %v285_v57, %v256_v4 }
 0x1ab   :  { %v291_v6 = vadd.f32 %v285_v57, %v257_v40  ;;  %v292_v9 = vadd.f32 %v285_v57, %v258_v1  ;;  %v293_v11 = vadd.f32 %v285_v57, %v259_v43  ;;  %v294_v14 = vadd.f32 %v285_v57, %v260_v3 }
 0x1ac   :  { %v295_v15 = vadd.f32 %v285_v57, %v261_v46  ;;  %v296_v18 = vadd.f32 %v285_v57, %v262_v48  ;;  %v297_v20 = vadd.f32 %v285_v57, %v263_v49  ;;  %v298_v23 = vadd.f32 %v285_v57, %v264_v50 }
 0x1ad   :  { %v299_v24 = vadd.f32 %v285_v57, %v265_v52  ;;  %v300_v58 = vadd.f32 %v285_v57, %v266_v55  ;;  %v301_v27 = vadd.f32 %v285_v57, %v267_v26  ;;  %v302_v29 = vadd.f32 %v285_v57, %v268_v51 }
 0x1ae   :  { %v303_v39 = vadd.f32 %v285_v57, %v269_v30  ;;  %v304_v41 = vadd.f32 %v285_v57, %v270_v35  ;;  %v305_v42 = vadd.f32 %v285_v57, %v271_v47  ;;  %v306_v44 = vadd.f32 %v285_v57, %v272_v8 }
 0x1af   :  { %v307_v0 = vadd.f32 %v285_v57, %v273_v7  ;;  %v308_v2 = vadd.f32 %v285_v57, %v274_v54  ;;  %v309_v53 = vadd.f32 %v285_v57, %v275_v12  ;;  %v310_v10 = vadd.f32 %v285_v57, %v276_v56 }
 0x1b0   :  { %v311_v13 = vadd.f32 %v285_v57, %v277_v59  ;;  %v312_v16 = vadd.f32 %v285_v57, %v278_v60  ;;  %v313_v19 = vadd.f32 %v285_v57, %v279_v17  ;;  %v314_v22 = vadd.f32 %v285_v57, %v280_v62 }
 0x1b1   :  { %v315_v32 = vmax.f32 %v287_v63, 0.0  ;;  %v316_v25 = vmax.f32 %v288_v5, 0.0  ;;  %v317_v61 = vmax.f32 %v289_v21, 0.0  ;;  %v318_v28 = vmax.f32 %v290_v38, 0.0 }
 0x1b2   :  { %v319_v33 = vmax.f32 %v291_v6, 0.0  ;;  %v320_v31 = vmax.f32 %v292_v9, 0.0  ;;  %v321_v36 = vmax.f32 %v293_v11, 0.0  ;;  %v322_v34 = vmax.f32 %v294_v14, 0.0 }
 0x1b3   :  { %v323_v45 = vmax.f32 %v295_v15, 0.0  ;;  %v324_v37 = vmax.f32 %v296_v18, 0.0  ;;  %v325_v4 = vmax.f32 %v297_v20, 0.0  ;;  %v326_v40 = vmax.f32 %v298_v23, 0.0  ;;  %343 = vst [vmem:[%s887_s3] sm:$0x1f] %v315_v32 }
 0x1b4   :  { %344 = vst [vmem:[%s887_s3 + $0x8] sm:$0x1f] %v316_v25  ;;  %345 = vst [vmem:[%s887_s3 + $0x10] sm:$0x1f] %v317_v61  ;;  %v327_v1 = vmax.f32 %v299_v24, 0.0  ;;  %v328_v43 = vmax.f32 %v300_v58, 0.0 }
 0x1b5   :  { %346 = vst [vmem:[%s887_s3 + $0x18] sm:$0x1f] %v318_v28  ;;  %v329_v3 = vmax.f32 %v301_v27, 0.0  ;;  %v330_v46 = vmax.f32 %v302_v29, 0.0  ;;  %347 = vst [vmem:[%s887_s3 + $0x20] sm:$0x1f] %v319_v33 }
 0x1b6   :  { %348 = vst [vmem:[%s887_s3 + $0x28] sm:$0x1f] %v320_v31  ;;  %349 = vst [vmem:[%s887_s3 + $0x30] sm:$0x1f] %v321_v36  ;;  %v331_v48 = vmax.f32 %v303_v39, 0.0  ;;  %v332_v49 = vmax.f32 %v304_v41, 0.0 }
 0x1b7   :  { %350 = vst [vmem:[%s887_s3 + $0x38] sm:$0x1f] %v322_v34  ;;  %v333_v50 = vmax.f32 %v305_v42, 0.0  ;;  %v334_v52 = vmax.f32 %v306_v44, 0.0  ;;  %351 = vst [vmem:[%s887_s3 + $0x40] sm:$0x1f] %v323_v45 }
 0x1b8   :  { %352 = vst [vmem:[%s887_s3 + $0x48] sm:$0x1f] %v324_v37  ;;  %353 = vst [vmem:[%s887_s3 + $0x50] sm:$0x1f] %v325_v4  ;;  %v335_v55 = vmax.f32 %v307_v0, 0.0  ;;  %v336_v26 = vmax.f32 %v308_v2, 0.0 }
 0x1b9   :  { %354 = vst [vmem:[%s887_s3 + $0x58] sm:$0x1f] %v326_v40  ;;  %v337_v51 = vmax.f32 %v309_v53, 0.0  ;;  %v338_v30 = vmax.f32 %v310_v10, 0.0  ;;  %355 = vst [vmem:[%s887_s3 + $0x60] sm:$0x1f] %v327_v1 }
 0x1ba   :  { %356 = vst [vmem:[%s887_s3 + $0x68] sm:$0x1f] %v328_v43  ;;  %357 = vst [vmem:[%s887_s3 + $0x70] sm:$0x1f] %v329_v3  ;;  %v339_v35 = vmax.f32 %v311_v13, 0.0  ;;  %v340_v47 = vmax.f32 %v312_v16, 0.0 }
 0x1bb   :  { %358 = vst [vmem:[%s887_s3 + $0x78] sm:$0x1f] %v330_v46  ;;  %v341_v8 = vmax.f32 %v313_v19, 0.0  ;;  %v342_v7 = vmax.f32 %v314_v22, 0.0  ;;  %359 = vst [vmem:[%s887_s3 + $0x80] sm:$0x1f] %v331_v48 }
 0x1bc   :  { %360 = vst [vmem:[%s887_s3 + $0x88] sm:$0x1f] %v332_v49  ;;  %361 = vst [vmem:[%s887_s3 + $0x90] sm:$0x1f] %v333_v50 }
 0x1bd   :  { %362 = vst [vmem:[%s887_s3 + $0x98] sm:$0x1f] %v334_v52  ;;  %363 = vst [vmem:[%s887_s3 + $0xa0] sm:$0x1f] %v335_v55 }
 0x1be   :  { %364 = vst [vmem:[%s887_s3 + $0xa8] sm:$0x1f] %v336_v26  ;;  %365 = vst [vmem:[%s887_s3 + $0xb0] sm:$0x1f] %v337_v51 }
 0x1bf   :  { %366 = vst [vmem:[%s887_s3 + $0xb8] sm:$0x1f] %v338_v30  ;;  %367 = vst [vmem:[%s887_s3 + $0xc0] sm:$0x1f] %v339_v35 }
 0x1c0   :  { %368 = vst [vmem:[%s887_s3 + $0xc8] sm:$0x1f] %v340_v47  ;;  %369 = vst [vmem:[%s887_s3 + $0xd0] sm:$0x1f] %v341_v8 }
 0x1c1   :  { %370 = vst.msk [vmem:[%s887_s3 + $0xd8] sm:$0x1f] %vm96_vm1, %v342_v7 }

// kernel: generator_forward.13
= control target key start
LH: loop header
LB: loop body
LE: loop exit
PB: predicated region body
PF: predicated region fallthrough
CT: control target
= control target key end

     0   :  { %s2600_s12 = smov 0   ;;  %s3276_s0 = inlined_call_operand.vmem [shape: f32[5,2,28,1764], index: 0, kind: input, shape index: {}]   ;;  %s3277_s1 = inlined_call_operand.vmem [shape: f32[5,2,28,1764], index: 1, kind: input, shape index: {}]   ;;  %s3278_s2 = inlined_call_operand.vmem [shape: f32[2,28,28], index: 2, kind: input, shape index: {}]   ;;  %s3279_s3 = inlined_call_operand.vmem [shape: f32[5,2,1764], index: 3, kind: output, shape index: {}]  }
   0x1 LB: > { %s2348_s13 = sadd.s32 4294967295, %s2576_s12   ;;  %p2352_p0 = scmp.ge.s32.totalorder %s2576_s12, 1  ;;  %s2576_s12 = sphi %s2600_s12, %s13_s12  }
   0x2   : > { %p147_p1 = scmp.lt.s32.totalorder %s2576_s12, 6 }
   0x4   : > { %p148_p2 = pnand %p2352_p0, %p147_p1 }
   0x5   : > { %p176_p3 = scmp.lt.s32.totalorder (!%p148_p2), %s2348_s13, 4 }
   0x6   : > { %151 = sbr.rel (%p148_p2) target bundleno = 353 (0x161), region = 32 }
   0xb   : > { %v2578_v0 = vmov 0.0   ;;  %s3281_s13 = smov (!%p176_p3, %s2348_s13), 4  ;;  %vm264_vm0 = vcmask 1043456   ;;  %v2643_v17 = vld [vmem:[%s3278_s2] sm:$0xff]  ;;  %vm251_vm1 = vcmask 228352   ;;  %v2658_v22 = vld [vmem:[%s3278_s2 + $0x8] sm:$0xff] }
   0xc   : > { %371 = vmatprep.mubr.f32.mxu0 %v2578_v0  ;;  %460 = vmatprep.mubr.f32.mxu1 %v2578_v0  ;;  %s2558_s14 = smul.u32 896, %s3281_s13  ;;  %v2675_v27 = vld [vmem:[%s3278_s2 + $0x10] sm:$0xff]  ;;  %v2690_v32 = vld [vmem:[%s3278_s2 + $0x18] sm:$0xf]  ;;  %vm1172_vm2 = vcmask 818176   ;;  %vm1178_vm3 = vcmask 814080  }
   0xd   : > { %vm2182_vm4 = vcmask 1040384   ;;  %s2559_s10 = smul.u32 28, %s3281_s13  ;;  %vm2277_vm5 = vcmask 1041408   ;;  %vm2278_vm6 = vcmask 814082  }
   0xe   : > { %s2618_s17 = scalar_lea.vmem %s3276_s0, %s2558_s14  ;;  %s2971_s9 = scalar_lea.vmem %s3277_s1, %s2558_s14  ;;  %vm2279_vm7 = vmor %vm2278_vm6, %vm2277_vm5 }
   0xf   : > { %v238_v1 = vld [vmem:[%s2618_s17 + $0x158] sm:$0xf]  ;;  %v240_v2 = vld [vmem:[%s2618_s17 + $0x168] sm:$0xf]  ;;  %v237_v3 = vld [vmem:[%s2618_s17 + $0x150] sm:$0xf]  ;;  %s3214_s14 = scalar_lea.vmem %s3279_s3, %s2559_s10 }
  0x10   : > { %2356 = vmatprep.subr.msk.mxu0 %vm264_vm0, %v238_v1  ;;  %2362 = vmatprep.subr.msk.mxu1 %vm264_vm0, %v240_v2  ;;  %v239_v4 = vld [vmem:[%s2618_s17 + $0x160] sm:$0xf]  ;;  %v224_v5 = vld [vmem:[%s2618_s17 + $0xe8] sm:$0xff]  ;;  %v226_v6 = vld [vmem:[%s2618_s17 + $0xf8] sm:$0xff] }
  0x11   : > { %2357 = vmatpush1.msk.msra.mxu0 %vm264_vm0, %v237_v3  ;;  %2363 = vmatpush1.msk.msra.mxu1 %vm264_vm0, %v239_v4  ;;  %v223_v7 = vld [vmem:[%s2618_s17 + $0xe0] sm:$0xff]  ;;  %v225_v8 = vld [vmem:[%s2618_s17 + $0xf0] sm:$0xff]  ;;  %v210_v9 = vld [vmem:[%s2618_s17 + $0x78] sm:$0xff] }
  0x12   : > { %333 = vmatprep.subr.mxu0 %v224_v5  ;;  %422 = vmatprep.subr.mxu1 %v226_v6  ;;  %v212_v10 = vld [vmem:[%s2618_s17 + $0x88] sm:$0xff]  ;;  %v209_v11 = vld [vmem:[%s2618_s17 + $0x70] sm:$0xff]  ;;  %v211_v12 = vld [vmem:[%s2618_s17 + $0x80] sm:$0xff] }
  0x13   : > { %334 = vmatpush1.msra.mxu0 %v223_v7  ;;  %423 = vmatpush1.msra.mxu1 %v225_v8  ;;  %v196_v13 = vld [vmem:[%s2618_s17 + $0x8] sm:$0xff]  ;;  %v198_v14 = vld [vmem:[%s2618_s17 + $0x18] sm:$0xff]  ;;  %v195_v15 = vld [vmem:[%s2618_s17] sm:$0xff] }
  0x14   : > { %335 = vmatprep.subr.mxu0 %v210_v9  ;;  %424 = vmatprep.subr.mxu1 %v212_v10  ;;  %v197_v16 = vld [vmem:[%s2618_s17 + $0x10] sm:$0xff]  ;;  %v242_v18 = vld [vmem:[%s2618_s17 + $0x178] sm:$0xf]  ;;  %v244_v19 = vld [vmem:[%s2618_s17 + $0x188] sm:$0xf] }
  0x15   : > { %336 = vmatpush1.msra.mxu0 %v209_v11  ;;  %425 = vmatpush1.msra.mxu1 %v211_v12  ;;  %v241_v20 = vld [vmem:[%s2618_s17 + $0x170] sm:$0xf]  ;;  %v243_v21 = vld [vmem:[%s2618_s17 + $0x180] sm:$0xf]  ;;  %v228_v23 = vld [vmem:[%s2618_s17 + $0x108] sm:$0xff] }
  0x16   : > { %337 = vmatprep.subr.mxu0 %v196_v13  ;;  %426 = vmatprep.subr.mxu1 %v198_v14  ;;  %v230_v24 = vld [vmem:[%s2618_s17 + $0x118] sm:$0xff]  ;;  %v227_v25 = vld [vmem:[%s2618_s17 + $0x100] sm:$0xff]  ;;  %v229_v26 = vld [vmem:[%s2618_s17 + $0x110] sm:$0xff] }
  0x17   : > { %338 = vmatpush1.msra.mxu0 %v195_v15  ;;  %427 = vmatpush1.msra.mxu1 %v197_v16  ;;  %v214_v28 = vld [vmem:[%s2618_s17 + $0x98] sm:$0xff]  ;;  %v216_v29 = vld [vmem:[%s2618_s17 + $0xa8] sm:$0xff]  ;;  %v213_v30 = vld [vmem:[%s2618_s17 + $0x90] sm:$0xff] }
  0x18   : > { %2358 = vmatmul.mubr.msk.f32.vlgmr.msra.gmra.mxu0 %vm251_vm1, %v2643_v17  ;;  %2364 = vmatmul.mubr.msk.f32.vlgmr.msra.gmra.mxu1 %vm251_vm1, %v2643_v17  ;;  %v215_v31 = vld [vmem:[%s2618_s17 + $0xa0] sm:$0xff]  ;;  %v200_v33 = vld [vmem:[%s2618_s17 + $0x28] sm:$0xff]  ;;  %v202_v34 = vld [vmem:[%s2618_s17 + $0x38] sm:$0xff] }
  0x19   : > { %2368 = vmatprep.subr.msk.mxu0 %vm264_vm0, %v242_v18  ;;  %2374 = vmatprep.subr.msk.mxu1 %vm264_vm0, %v244_v19  ;;  %v199_v35 = vld [vmem:[%s2618_s17 + $0x20] sm:$0xff]  ;;  %v201_v36 = vld [vmem:[%s2618_s17 + $0x30] sm:$0xff]  ;;  %v246_v37 = vld [vmem:[%s2618_s17 + $0x198] sm:$0xf] }
  0x1a   : > { %2369 = vmatpush1.msk.msra.mxu0 %vm264_vm0, %v241_v20  ;;  %377 = vmatprep.mubr.f32.mxu0 %v2578_v0  ;;  %v248_v38 = vld [vmem:[%s2618_s17 + $0x1a8] sm:$0xf]  ;;  %v245_v39 = vld [vmem:[%s2618_s17 + $0x190] sm:$0xf]  ;;  %v247_v40 = vld [vmem:[%s2618_s17 + $0x1a0] sm:$0xf] }
  0x1b   : > { %466 = vmatprep.mubr.f32.mxu1 %v2578_v0  ;;  %2375 = vmatpush1.msk.msra.mxu1 %vm264_vm0, %v243_v21  ;;  %v232_v41 = vld [vmem:[%s2618_s17 + $0x128] sm:$0xff]  ;;  %v234_v42 = vld [vmem:[%s2618_s17 + $0x138] sm:$0xff]  ;;  %v231_v43 = vld [vmem:[%s2618_s17 + $0x120] sm:$0xff] }
  0x1c   : > { %2359 = vmatmul.mubr.msk.f32.gmra.mxu0 %vm251_vm1, %v2658_v22  ;;  %2365 = vmatmul.mubr.msk.f32.gmra.mxu1 %vm251_vm1, %v2658_v22  ;;  %v233_v44 = vld [vmem:[%s2618_s17 + $0x130] sm:$0xff]  ;;  %v218_v45 = vld [vmem:[%s2618_s17 + $0xb8] sm:$0xff]  ;;  %v220_v46 = vld [vmem:[%s2618_s17 + $0xc8] sm:$0xff] }
  0x1d   : > { %511 = vmatprep.subr.mxu0 %v228_v23  ;;  %600 = vmatprep.subr.mxu1 %v230_v24  ;;  %v217_v47 = vld [vmem:[%s2618_s17 + $0xb0] sm:$0xff]  ;;  %v219_v48 = vld [vmem:[%s2618_s17 + $0xc0] sm:$0xff]  ;;  %v204_v49 = vld [vmem:[%s2618_s17 + $0x48] sm:$0xff] }
  0x1e   : > { %512 = vmatpush1.msra.mxu0 %v227_v25  ;;  %383 = vmatprep.mubr.f32.mxu0 %v2578_v0  ;;  %v206_v50 = vld [vmem:[%s2618_s17 + $0x58] sm:$0xff]  ;;  %v203_v51 = vld [vmem:[%s2618_s17 + $0x40] sm:$0xff]  ;;  %v205_v52 = vld [vmem:[%s2618_s17 + $0x50] sm:$0xff] }
  0x1f   : > { %472 = vmatprep.mubr.f32.mxu1 %v2578_v0  ;;  %601 = vmatpush1.msra.mxu1 %v229_v26  ;;  %v250_v53 = vld [vmem:[%s2618_s17 + $0x1b8] sm:$0xf]  ;;  %v249_v55 = vld [vmem:[%s2618_s17 + $0x1b0] sm:$0xf]  ;;  %v236_v57 = vld [vmem:[%s2618_s17 + $0x148] sm:$0xff] }
  0x20   : > { %2360 = vmatmul.mubr.msk.f32.gmra.mxu0 %vm251_vm1, %v2675_v27  ;;  %2366 = vmatmul.mubr.msk.f32.gmra.mxu1 %vm251_vm1, %v2675_v27  ;;  %v2445_v54 = vld [vmem:[%s2618_s17 + $0x318] sm:$0xf]  ;;  %v2444_v56 = vld [vmem:[%s2618_s17 + $0x310] sm:$0xf]  ;;  %v2431_v58 = vld [vmem:[%s2618_s17 + $0x2a8] sm:$0xff] }
  0x21   : > { %513 = vmatprep.subr.mxu0 %v214_v28  ;;  %602 = vmatprep.subr.mxu1 %v216_v29  ;;  %v235_v59 = vld [vmem:[%s2618_s17 + $0x140] sm:$0xff]  ;;  %v222_v61 = vld [vmem:[%s2618_s17 + $0xd8] sm:$0xff]  ;;  %v221_v63 = vld [vmem:[%s2618_s17 + $0xd0] sm:$0xff] }
  0x22   : > { %514 = vmatpush1.msra.mxu0 %v213_v30  ;;  %389 = vmatprep.mubr.f32.mxu0 %v2578_v0  ;;  %v2430_v60 = vld [vmem:[%s2618_s17 + $0x2a0] sm:$0xff]  ;;  %v2417_v62 = vld [vmem:[%s2618_s17 + $0x238] sm:$0xff]  ;;  %v2416_v1 = vld [vmem:[%s2618_s17 + $0x230] sm:$0xff] }
  0x23   : > { %478 = vmatprep.mubr.f32.mxu1 %v2578_v0  ;;  %603 = vmatpush1.msra.mxu1 %v215_v31  ;;  %v208_v2 = vld [vmem:[%s2618_s17 + $0x68] sm:$0xff]  ;;  %v207_v4 = vld [vmem:[%s2618_s17 + $0x60] sm:$0xff]  ;;  %v2449_v8 = vld [vmem:[%s2618_s17 + $0x338] sm:$0xf] }
  0x24   : > { %2361 = vmatmul.mubr.msk.f32.gmra.mxu0 %vm251_vm1, %v2690_v32  ;;  %2367 = vmatmul.mubr.msk.f32.gmra.mxu1 %vm251_vm1, %v2690_v32  ;;  %v2403_v3 = vld [vmem:[%s2618_s17 + $0x1c8] sm:$0xff]  ;;  %v2402_v5 = vld [vmem:[%s2618_s17 + $0x1c0] sm:$0xff]  ;;  %v2448_v10 = vld [vmem:[%s2618_s17 + $0x330] sm:$0xf] }
  0x25   : > { %515 = vmatprep.subr.mxu0 %v200_v33  ;;  %604 = vmatprep.subr.mxu1 %v202_v34  ;;  %v2793_v6 = vld [vmem:[%s3278_s2 + $0x20] sm:$0xff]  ;;  %v2447_v7 = vld [vmem:[%s2618_s17 + $0x328] sm:$0xf]  ;;  %v2433_v12 = vld [vmem:[%s2618_s17 + $0x2b8] sm:$0xff] }
  0x26   : > { %516 = vmatpush1.msra.mxu0 %v199_v35  ;;  %549 = vmatprep.mubr.f32.mxu0 %v2578_v0  ;;  %v2446_v9 = vld [vmem:[%s2618_s17 + $0x320] sm:$0xf]  ;;  %v2810_v11 = vld [vmem:[%s3278_s2 + $0x28] sm:$0xff]  ;;  %v2432_v14 = vld [vmem:[%s2618_s17 + $0x2b0] sm:$0xff] }
  0x27   : > { %605 = vmatpush1.msra.mxu1 %v201_v36  ;;  %638 = vmatprep.mubr.f32.mxu1 %v2578_v0  ;;  %v2435_v13 = vld [vmem:[%s2618_s17 + $0x2c8] sm:$0xff]  ;;  %v2434_v15 = vld [vmem:[%s2618_s17 + $0x2c0] sm:$0xff]  ;;  %v2827_v16 = vld [vmem:[%s3278_s2 + $0x30] sm:$0xff] }
  0x28   : > { %2370 = vmatmul.mubr.msk.f32.vlgmr.msra.gmra.mxu0 %vm251_vm1, %v2643_v17  ;;  %2376 = vmatmul.mubr.msk.f32.vlgmr.msra.gmra.mxu1 %vm251_vm1, %v2643_v17  ;;  %v2421_v18 = vld [vmem:[%s2618_s17 + $0x258] sm:$0xff]  ;;  %v2418_v19 = vld [vmem:[%s2618_s17 + $0x240] sm:$0xff]  ;;  %v2420_v20 = vld [vmem:[%s2618_s17 + $0x250] sm:$0xff] }
  0x29   : > { %2380 = vmatprep.subr.msk.mxu0 %vm264_vm0, %v246_v37  ;;  %2386 = vmatprep.subr.msk.mxu1 %vm264_vm0, %v248_v38  ;;  %v2842_v21 = vld [vmem:[%s3278_s2 + $0x38] sm:$0xf]  ;;  %v2407_v23 = vld [vmem:[%s2618_s17 + $0x1e8] sm:$0xff]  ;;  %v2404_v24 = vld [vmem:[%s2618_s17 + $0x1d0] sm:$0xff] }
  0x2a   : > { %2381 = vmatpush1.msk.msra.mxu0 %vm264_vm0, %v245_v39  ;;  %555 = vmatprep.mubr.f32.mxu0 %v2578_v0  ;;  %v2406_v25 = vld [vmem:[%s2618_s17 + $0x1e0] sm:$0xff]  ;;  %v2451_v26 = vld [vmem:[%s2618_s17 + $0x348] sm:$0xf]  ;;  %v2452_v29 = vld [vmem:[%s2618_s17 + $0x350] sm:$0xf] }
  0x2b   : > { %644 = vmatprep.mubr.f32.mxu1 %v2578_v0  ;;  %2387 = vmatpush1.msk.msra.mxu1 %vm264_vm0, %v247_v40  ;;  %v2450_v28 = vld [vmem:[%s2618_s17 + $0x340] sm:$0xf]  ;;  %v2437_v30 = vld [vmem:[%s2618_s17 + $0x2d8] sm:$0xff]  ;;  %v2439_v31 = vld [vmem:[%s2618_s17 + $0x2e8] sm:$0xff] }
  0x2c   : > { %2371 = vmatmul.mubr.msk.f32.gmra.mxu0 %vm251_vm1, %v2658_v22  ;;  %2377 = vmatmul.mubr.msk.f32.gmra.mxu1 %vm251_vm1, %v2658_v22  ;;  %v2438_v33 = vld [vmem:[%s2618_s17 + $0x2e0] sm:$0xff]  ;;  %v2423_v34 = vld [vmem:[%s2618_s17 + $0x268] sm:$0xff]  ;;  %v2425_v35 = vld [vmem:[%s2618_s17 + $0x278] sm:$0xff] }
  0x2d   : > { %689 = vmatprep.subr.mxu0 %v232_v41  ;;  %778 = vmatprep.subr.mxu1 %v234_v42  ;;  %v2422_v36 = vld [vmem:[%s2618_s17 + $0x260] sm:$0xff]  ;;  %v2424_v37 = vld [vmem:[%s2618_s17 + $0x270] sm:$0xff]  ;;  %v2409_v38 = vld [vmem:[%s2618_s17 + $0x1f8] sm:$0xff] }
  0x2e   : > { %690 = vmatpush1.msra.mxu0 %v231_v43  ;;  %561 = vmatprep.mubr.f32.mxu0 %v2578_v0  ;;  %v2411_v39 = vld [vmem:[%s2618_s17 + $0x208] sm:$0xff]  ;;  %v2408_v40 = vld [vmem:[%s2618_s17 + $0x1f0] sm:$0xff]  ;;  %v2410_v41 = vld [vmem:[%s2618_s17 + $0x200] sm:$0xff] }
  0x2f   : > { %650 = vmatprep.mubr.f32.mxu1 %v2578_v0  ;;  %779 = vmatpush1.msra.mxu1 %v233_v44  ;;  %v2455_v42 = vld [vmem:[%s2618_s17 + $0x368] sm:$0xf]  ;;  %v2457_v43 = vld [vmem:[%s2618_s17 + $0x378] sm:$0xf]  ;;  %v2454_v44 = vld [vmem:[%s2618_s17 + $0x360] sm:$0xf] }
  0x30   : > { %2372 = vmatmul.mubr.msk.f32.gmra.mxu0 %vm251_vm1, %v2675_v27  ;;  %2378 = vmatmul.mubr.msk.f32.gmra.mxu1 %vm251_vm1, %v2675_v27 }
  0x31   : > { %691 = vmatprep.subr.mxu0 %v218_v45  ;;  %780 = vmatprep.subr.mxu1 %v220_v46  ;;  %v2456_v45 = vld [vmem:[%s2618_s17 + $0x370] sm:$0xf]  ;;  %v2441_v46 = vld [vmem:[%s2618_s17 + $0x2f8] sm:$0xff] }
  0x32   : > { %692 = vmatpush1.msra.mxu0 %v217_v47  ;;  %567 = vmatprep.mubr.f32.mxu0 %v2578_v0  ;;  %v2443_v47 = vld [vmem:[%s2618_s17 + $0x308] sm:$0xff] }
  0x33   : > { %656 = vmatprep.mubr.f32.mxu1 %v2578_v0  ;;  %781 = vmatpush1.msra.mxu1 %v219_v48  ;;  %v2440_v48 = vld [vmem:[%s2618_s17 + $0x2f0] sm:$0xff] }
  0x34   : > { %2373 = vmatmul.mubr.msk.f32.gmra.mxu0 %vm251_vm1, %v2690_v32  ;;  %2379 = vmatmul.mubr.msk.f32.gmra.mxu1 %vm251_vm1, %v2690_v32 }
  0x35   : > { %693 = vmatprep.subr.mxu0 %v204_v49  ;;  %782 = vmatprep.subr.mxu1 %v206_v50  ;;  %v2442_v49 = vld [vmem:[%s2618_s17 + $0x300] sm:$0xff]  ;;  %v2427_v50 = vld [vmem:[%s2618_s17 + $0x288] sm:$0xff] }
  0x36   : > { %694 = vmatpush1.msra.mxu0 %v203_v51  ;;  %727 = vmatprep.mubr.f32.mxu0 %v2578_v0  ;;  %v2429_v51 = vld [vmem:[%s2618_s17 + $0x298] sm:$0xff] }
  0x37   : > { %783 = vmatpush1.msra.mxu1 %v205_v52  ;;  %816 = vmatprep.mubr.f32.mxu1 %v2578_v0  ;;  %v2426_v52 = vld [vmem:[%s2618_s17 + $0x280] sm:$0xff] }
  0x38   : > { %2382 = vmatmul.mubr.msk.f32.vlgmr.msra.gmra.mxu0 %vm251_vm1, %v2643_v17  ;;  %2388 = vmatmul.mubr.msk.f32.vlgmr.msra.gmra.mxu1 %vm251_vm1, %v2643_v17 }
  0x39   : > { %2392 = vmatprep.subr.msk.mxu0 %vm264_vm0, %v250_v53  ;;  %2458 = vmatprep.subr.msk.mxu1 %vm264_vm0, %v2445_v54  ;;  %v2428_v53 = vld [vmem:[%s2618_s17 + $0x290] sm:$0xff]  ;;  %v2413_v54 = vld [vmem:[%s2618_s17 + $0x218] sm:$0xff] }
  0x3a   : > { %2393 = vmatpush1.msk.msra.mxu0 %vm264_vm0, %v249_v55  ;;  %733 = vmatprep.mubr.f32.mxu0 %v2578_v0  ;;  %v2415_v55 = vld [vmem:[%s2618_s17 + $0x228] sm:$0xff] }
  0x3b   : > { %822 = vmatprep.mubr.f32.mxu1 %v2578_v0  ;;  %2459 = vmatpush1.msk.msra.mxu1 %vm264_vm0, %v2444_v56  ;;  %v2412_v56 = vld [vmem:[%s2618_s17 + $0x210] sm:$0xff] }
  0x3c   : > { %2383 = vmatmul.mubr.msk.f32.gmra.mxu0 %vm251_vm1, %v2658_v22  ;;  %2389 = vmatmul.mubr.msk.f32.gmra.mxu1 %vm251_vm1, %v2658_v22 }
  0x3d   : > { %867 = vmatprep.subr.mxu0 %v236_v57  ;;  %1329 = vmatprep.subr.mxu1 %v2431_v58  ;;  %v2414_v57 = vld [vmem:[%s2618_s17 + $0x220] sm:$0xff] }
  0x3e   : > { %868 = vmatpush1.msra.mxu0 %v235_v59  ;;  %739 = vmatprep.mubr.f32.mxu0 %v2578_v0  ;;  %v930_v58 = vld [vmem:[%s2971_s9] sm:$0xff] }
  0x3f   : > { %828 = vmatprep.mubr.f32.mxu1 %v2578_v0  ;;  %1330 = vmatpush1.msra.mxu1 %v2430_v60 }
  0x40   : > { %2384 = vmatmul.mubr.msk.f32.gmra.mxu0 %vm251_vm1, %v2675_v27  ;;  %2390 = vmatmul.mubr.msk.f32.gmra.mxu1 %vm251_vm1, %v2675_v27 }
  0x41   : > { %869 = vmatprep.subr.mxu0 %v222_v61  ;;  %1331 = vmatprep.subr.mxu1 %v2417_v62  ;;  %v931_v61 = vld [vmem:[%s2971_s9 + $0x8] sm:$0xff]  ;;  %v933_v62 = vld [vmem:[%s2971_s9 + $0x18] sm:$0xff] }
  0x42   : > { %870 = vmatpush1.msra.mxu0 %v221_v63  ;;  %745 = vmatprep.mubr.f32.mxu0 %v2578_v0 }
  0x43   : > { %834 = vmatprep.mubr.f32.mxu1 %v2578_v0  ;;  %1332 = vmatpush1.msra.mxu1 %v2416_v1 }
  0x44   : > { %2385 = vmatmul.mubr.msk.f32.gmra.mxu0 %vm251_vm1, %v2690_v32  ;;  %2391 = vmatmul.mubr.msk.f32.gmra.mxu1 %vm251_vm1, %v2690_v32 }
  0x45   : > { %871 = vmatprep.subr.mxu0 %v208_v2  ;;  %1333 = vmatprep.subr.mxu1 %v2403_v3 }
  0x46   : > { %872 = vmatpush1.msra.mxu0 %v207_v4  ;;  %905 = vmatprep.mubr.f32.mxu0 %v2578_v0  ;;  %v944_v4 = vld [vmem:[%s2971_s9 + $0x70] sm:$0xff] }
  0x47   : > { %1334 = vmatpush1.msra.mxu1 %v2402_v5  ;;  %1367 = vmatprep.mubr.f32.mxu1 %v2578_v0  ;;  %v946_v5 = vld [vmem:[%s2971_s9 + $0x80] sm:$0xff] }
  0x48   : > { %2394 = vmatmul.mubr.msk.f32.vlgmr.msra.gmra.mxu0 %vm251_vm1, %v2643_v17  ;;  %2460 = vmatmul.mubr.msk.f32.vlgmr.msra.gmra.mxu1 %vm251_vm1, %v2793_v6  ;;  %v2419_v17 = vld [vmem:[%s2618_s17 + $0x248] sm:$0xff] }
  0x49   : > { %2464 = vmatprep.subr.msk.mxu0 %vm264_vm0, %v2447_v7  ;;  %2470 = vmatprep.subr.msk.mxu1 %vm264_vm0, %v2449_v8 }
  0x4a   : > { %2465 = vmatpush1.msk.msra.mxu0 %vm264_vm0, %v2446_v9  ;;  %911 = vmatprep.mubr.f32.mxu0 %v2578_v0 }
  0x4b   : > { %1373 = vmatprep.mubr.f32.mxu1 %v2578_v0  ;;  %2471 = vmatpush1.msk.msra.mxu1 %vm264_vm0, %v2448_v10  ;;  %v945_v10 = vld [vmem:[%s2971_s9 + $0x78] sm:$0xff] }
  0x4c   : > { %2395 = vmatmul.mubr.msk.f32.gmra.mxu0 %vm251_vm1, %v2658_v22  ;;  %2461 = vmatmul.mubr.msk.f32.gmra.mxu1 %vm251_vm1, %v2810_v11  ;;  %v2405_v22 = vld [vmem:[%s2618_s17 + $0x1d8] sm:$0xff] }
  0x4d   : > { %1418 = vmatprep.subr.mxu0 %v2433_v12  ;;  %1507 = vmatprep.subr.mxu1 %v2435_v13 }
  0x4e   : > { %1419 = vmatpush1.msra.mxu0 %v2432_v14  ;;  %917 = vmatprep.mubr.f32.mxu0 %v2578_v0 }
  0x4f   : > { %1379 = vmatprep.mubr.f32.mxu1 %v2578_v0  ;;  %1508 = vmatpush1.msra.mxu1 %v2434_v15 }
  0x50   : > { %2396 = vmatmul.mubr.msk.f32.gmra.mxu0 %vm251_vm1, %v2675_v27  ;;  %2462 = vmatmul.mubr.msk.f32.gmra.mxu1 %vm251_vm1, %v2827_v16  ;;  %v2453_v27 = vld [vmem:[%s2618_s17 + $0x358] sm:$0xf] }
  0x51   : > { %1420 = vmatprep.subr.mxu0 %v2419_v17  ;;  %1509 = vmatprep.subr.mxu1 %v2421_v18  ;;  %v960_v17 = vld [vmem:[%s2971_s9 + $0xf0] sm:$0xff] }
  0x52   : > { %1421 = vmatpush1.msra.mxu0 %v2418_v19  ;;  %923 = vmatprep.mubr.f32.mxu0 %v2578_v0 }
  0x53   : > { %1385 = vmatprep.mubr.f32.mxu1 %v2578_v0  ;;  %1510 = vmatpush1.msra.mxu1 %v2420_v20 }
  0x54   : > { %2397 = vmatmul.mubr.msk.f32.gmra.mxu0 %vm251_vm1, %v2690_v32  ;;  %2463 = vmatmul.mubr.msk.f32.gmra.mxu1 %vm251_vm1, %v2842_v21  ;;  %v2436_v32 = vld [vmem:[%s2618_s17 + $0x2d0] sm:$0xff] }
  0x55   : > { %1422 = vmatprep.subr.mxu0 %v2405_v22  ;;  %1511 = vmatprep.subr.mxu1 %v2407_v23 }
  0x56   : > { %1423 = vmatpush1.msra.mxu0 %v2404_v24  ;;  %1456 = vmatprep.mubr.f32.mxu0 %v2578_v0  ;;  %v959_v24 = vld [vmem:[%s2971_s9 + $0xe8] sm:$0xff] }
  0x57   : > { %1512 = vmatpush1.msra.mxu1 %v2406_v25  ;;  %1545 = vmatprep.mubr.f32.mxu1 %v2578_v0  ;;  %v961_v25 = vld [vmem:[%s2971_s9 + $0xf8] sm:$0xff] }
  0x58   : > { %2466 = vmatmul.mubr.msk.f32.vlgmr.msra.gmra.mxu0 %vm251_vm1, %v2793_v6  ;;  %2472 = vmatmul.mubr.msk.f32.vlgmr.msra.gmra.mxu1 %vm251_vm1, %v2793_v6 }
  0x59   : > { %2476 = vmatprep.subr.msk.mxu0 %vm264_vm0, %v2451_v26  ;;  %2482 = vmatprep.subr.msk.mxu1 %vm264_vm0, %v2453_v27 }
  0x5a   : > { %2477 = vmatpush1.msk.msra.mxu0 %vm264_vm0, %v2450_v28  ;;  %1462 = vmatprep.mubr.f32.mxu0 %v2578_v0 }
  0x5b   : > { %1551 = vmatprep.mubr.f32.mxu1 %v2578_v0  ;;  %2483 = vmatpush1.msk.msra.mxu1 %vm264_vm0, %v2452_v29 }
  0x5c   : > { %2467 = vmatmul.mubr.msk.f32.gmra.mxu0 %vm251_vm1, %v2810_v11  ;;  %2473 = vmatmul.mubr.msk.f32.gmra.mxu1 %vm251_vm1, %v2810_v11 }
  0x5d   : > { %1596 = vmatprep.subr.mxu0 %v2437_v30  ;;  %1685 = vmatprep.subr.mxu1 %v2439_v31 }
  0x5e   : > { %1597 = vmatpush1.msra.mxu0 %v2436_v32  ;;  %1468 = vmatprep.mubr.f32.mxu0 %v2578_v0  ;;  %v972_v32 = vld [vmem:[%s2971_s9 + $0x150] sm:$0xf] }
  0x5f   : > { %1557 = vmatprep.mubr.f32.mxu1 %v2578_v0  ;;  %1686 = vmatpush1.msra.mxu1 %v2438_v33  ;;  %v974_v33 = vld [vmem:[%s2971_s9 + $0x160] sm:$0xf] }
  0x60   : > { %2468 = vmatmul.mubr.msk.f32.gmra.mxu0 %vm251_vm1, %v2827_v16  ;;  %2474 = vmatmul.mubr.msk.f32.gmra.mxu1 %vm251_vm1, %v2827_v16 }
  0x61   : > { %1598 = vmatprep.subr.mxu0 %v2423_v34  ;;  %1687 = vmatprep.subr.mxu1 %v2425_v35 }
  0x62   : > { %1599 = vmatpush1.msra.mxu0 %v2422_v36  ;;  %1474 = vmatprep.mubr.f32.mxu0 %v2578_v0 }
  0x63   : > { %1563 = vmatprep.mubr.f32.mxu1 %v2578_v0  ;;  %1688 = vmatpush1.msra.mxu1 %v2424_v37 }
  0x64   : > { %2469 = vmatmul.mubr.msk.f32.gmra.mxu0 %vm251_vm1, %v2842_v21  ;;  %2475 = vmatmul.mubr.msk.f32.gmra.mxu1 %vm251_vm1, %v2842_v21 }
  0x65   : > { %1600 = vmatprep.subr.mxu0 %v2409_v38  ;;  %1689 = vmatprep.subr.mxu1 %v2411_v39 }
  0x66   : > { %1601 = vmatpush1.msra.mxu0 %v2408_v40  ;;  %1634 = vmatprep.mubr.f32.mxu0 %v2578_v0  ;;  %v973_v40 = vld [vmem:[%s2971_s9 + $0x158] sm:$0xf] }
  0x67   : > { %1690 = vmatpush1.msra.mxu1 %v2410_v41  ;;  %1723 = vmatprep.mubr.f32.mxu1 %v2578_v0  ;;  %v975_v41 = vld [vmem:[%s2971_s9 + $0x168] sm:$0xf] }
  0x68   : > { %2478 = vmatmul.mubr.msk.f32.vlgmr.msra.gmra.mxu0 %vm251_vm1, %v2793_v6  ;;  %2484 = vmatmul.mubr.msk.f32.vlgmr.msra.gmra.mxu1 %vm251_vm1, %v2793_v6 }
  0x69   : > { %2488 = vmatprep.subr.msk.mxu0 %vm264_vm0, %v2455_v42  ;;  %2494 = vmatprep.subr.msk.mxu1 %vm264_vm0, %v2457_v43 }
  0x6a   : > { %2489 = vmatpush1.msk.msra.mxu0 %vm264_vm0, %v2454_v44  ;;  %1640 = vmatprep.mubr.f32.mxu0 %v2578_v0 }
  0x6b   : > { %1729 = vmatprep.mubr.f32.mxu1 %v2578_v0  ;;  %2495 = vmatpush1.msk.msra.mxu1 %vm264_vm0, %v2456_v45 }
  0x6c   : > { %2479 = vmatmul.mubr.msk.f32.gmra.mxu0 %vm251_vm1, %v2810_v11  ;;  %2485 = vmatmul.mubr.msk.f32.gmra.mxu1 %vm251_vm1, %v2810_v11 }
  0x6d   : > { %1774 = vmatprep.subr.mxu0 %v2441_v46  ;;  %1863 = vmatprep.subr.mxu1 %v2443_v47 }
  0x6e   : > { %1775 = vmatpush1.msra.mxu0 %v2440_v48  ;;  %1646 = vmatprep.mubr.f32.mxu0 %v2578_v0  ;;  %v934_v48 = vld [vmem:[%s2971_s9 + $0x20] sm:$0xff] }
  0x6f   : > { %1735 = vmatprep.mubr.f32.mxu1 %v2578_v0  ;;  %1864 = vmatpush1.msra.mxu1 %v2442_v49  ;;  %v936_v49 = vld [vmem:[%s2971_s9 + $0x30] sm:$0xff] }
  0x70   : > { %2480 = vmatmul.mubr.msk.f32.gmra.mxu0 %vm251_vm1, %v2827_v16  ;;  %2486 = vmatmul.mubr.msk.f32.gmra.mxu1 %vm251_vm1, %v2827_v16 }
  0x71   : > { %1776 = vmatprep.subr.mxu0 %v2427_v50  ;;  %1865 = vmatprep.subr.mxu1 %v2429_v51 }
  0x72   : > { %1777 = vmatpush1.msra.mxu0 %v2426_v52  ;;  %1652 = vmatprep.mubr.f32.mxu0 %v2578_v0 }
  0x73   : > { %1741 = vmatprep.mubr.f32.mxu1 %v2578_v0  ;;  %1866 = vmatpush1.msra.mxu1 %v2428_v53 }
  0x74   : > { %2481 = vmatmul.mubr.msk.f32.gmra.mxu0 %vm251_vm1, %v2842_v21  ;;  %2487 = vmatmul.mubr.msk.f32.gmra.mxu1 %vm251_vm1, %v2842_v21 }
  0x75   : > { %1778 = vmatprep.subr.mxu0 %v2413_v54  ;;  %1867 = vmatprep.subr.mxu1 %v2415_v55 }
  0x76   : > { %1779 = vmatpush1.msra.mxu0 %v2412_v56  ;;  %1812 = vmatprep.mubr.f32.mxu0 %v2578_v0 }
  0x77   : > { %1868 = vmatpush1.msra.mxu1 %v2414_v57  ;;  %1901 = vmatprep.mubr.f32.mxu1 %v2578_v0 }
  0x78   : > { %2490 = vmatmul.mubr.msk.f32.vlgmr.msra.gmra.mxu0 %vm251_vm1, %v2793_v6  ;;  %2496 = vmatmul.mubr.msk.f32.vlgmr.msra.gmra.mxu1 %vm251_vm1, %v2793_v6 }
  0x79   : > { %1818 = vmatprep.mubr.f32.mxu0 %v2578_v0  ;;  %1907 = vmatprep.mubr.f32.mxu1 %v2578_v0 }
  0x7c   : > { %2491 = vmatmul.mubr.msk.f32.gmra.mxu0 %vm251_vm1, %v2810_v11  ;;  %2497 = vmatmul.mubr.msk.f32.gmra.mxu1 %vm251_vm1, %v2810_v11  ;;  %v947_v11 = vld [vmem:[%s2971_s9 + $0x88] sm:$0xff] }
  0x7d   : > { %1824 = vmatprep.mubr.f32.mxu0 %v2578_v0  ;;  %1913 = vmatprep.mubr.f32.mxu1 %v2578_v0 }
  0x80   : > { %2492 = vmatmul.mubr.msk.f32.gmra.mxu0 %vm251_vm1, %v2827_v16  ;;  %2498 = vmatmul.mubr.msk.f32.gmra.mxu1 %vm251_vm1, %v2827_v16  ;;  %v958_v16 = vld [vmem:[%s2971_s9 + $0xe0] sm:$0xff] }
  0x81   : > { %1830 = vmatprep.mubr.f32.mxu0 %v2578_v0  ;;  %1919 = vmatprep.mubr.f32.mxu1 %v2578_v0  ;;  %v932_v0 = vld [vmem:[%s2971_s9 + $0x10] sm:$0xff] }
  0x84   : > { %2493 = vmatmul.mubr.msk.f32.gmra.mxu0 %vm251_vm1, %v2842_v21  ;;  %2499 = vmatmul.mubr.msk.f32.gmra.mxu1 %vm251_vm1, %v2842_v21 }
  0xd8   : > { %v373_v59 = vpop.f32.mrf.mxu0  ;;  %v462_v60 = vpop.f32.mrf.mxu1 }
  0xd9   : > { %v986_v63 = vmul.f32 %v930_v58, %v373_v59  ;;  %v988_v1 = vmul.f32 %v932_v0, %v462_v60  ;;  %v935_v58 = vld [vmem:[%s2971_s9 + $0x28] sm:$0xff]  ;;  %v937_v0 = vld [vmem:[%s2971_s9 + $0x38] sm:$0xff] }
  0xda   : > { %v375_v2 = vpop.f32.mrf.mxu0  ;;  %v464_v3 = vpop.f32.mrf.mxu1 }
  0xdb   : > { %v987_v6 = vmul.f32 %v931_v61, %v375_v2  ;;  %v989_v7 = vmul.f32 %v933_v62, %v464_v3 }
  0xdc   : > { %v379_v8 = vpop.f32.mrf.mxu0  ;;  %v468_v9 = vpop.f32.mrf.mxu1 }
  0xdd   : > { %v1000_v12 = vmul.f32 %v944_v4, %v379_v8  ;;  %v1002_v13 = vmul.f32 %v946_v5, %v468_v9  ;;  %v948_v4 = vld [vmem:[%s2971_s9 + $0x90] sm:$0xff]  ;;  %v950_v5 = vld [vmem:[%s2971_s9 + $0xa0] sm:$0xff] }
  0xde   : > { %v381_v14 = vpop.f32.mrf.mxu0  ;;  %v470_v15 = vpop.f32.mrf.mxu1 }
  0xdf   : > { %v1042_v18 = vadd.f32 %v1000_v12, %v986_v63  ;;  %v1062_v19 = vadd.f32 %v1002_v13, %v988_v1  ;;  %v1001_v20 = vmul.f32 %v945_v10, %v381_v14  ;;  %v1003_v21 = vmul.f32 %v947_v11, %v470_v15  ;;  %v949_v10 = vld [vmem:[%s2971_s9 + $0x98] sm:$0xff]  ;;  %v951_v11 = vld [vmem:[%s2971_s9 + $0xa8] sm:$0xff] }
  0xe0   : > { %v385_v22 = vpop.f32.mrf.mxu0  ;;  %v474_v23 = vpop.f32.mrf.mxu1 }
  0xe1   : > { %v1052_v26 = vadd.f32 %v1001_v20, %v987_v6  ;;  %v1072_v27 = vadd.f32 %v1003_v21, %v989_v7  ;;  %v1014_v28 = vmul.f32 %v958_v16, %v385_v22  ;;  %v1016_v29 = vmul.f32 %v960_v17, %v474_v23  ;;  %v962_v16 = vld [vmem:[%s2971_s9 + $0x100] sm:$0xff]  ;;  %v964_v17 = vld [vmem:[%s2971_s9 + $0x110] sm:$0xff] }
  0xe2   : > { %v387_v30 = vpop.f32.mrf.mxu0  ;;  %v476_v31 = vpop.f32.mrf.mxu1 }
  0xe3   : > { %v1043_v34 = vadd.f32 %v1042_v18, %v1014_v28  ;;  %v1063_v35 = vadd.f32 %v1062_v19, %v1016_v29  ;;  %v1015_v36 = vmul.f32 %v959_v24, %v387_v30  ;;  %v1017_v37 = vmul.f32 %v961_v25, %v476_v31  ;;  %v963_v24 = vld [vmem:[%s2971_s9 + $0x108] sm:$0xff]  ;;  %v965_v25 = vld [vmem:[%s2971_s9 + $0x118] sm:$0xff] }
  0xe4   : > { %v391_v38 = vpop.f32.mrf.mxu0  ;;  %v480_v39 = vpop.f32.mrf.mxu1 }
  0xe5   : > { %v1053_v42 = vadd.f32 %v1052_v26, %v1015_v36  ;;  %v1073_v43 = vadd.f32 %v1072_v27, %v1017_v37  ;;  %v1028_v44 = vmul.f32 %v972_v32, %v391_v38  ;;  %v1030_v45 = vmul.f32 %v974_v33, %v480_v39  ;;  %v976_v32 = vld [vmem:[%s2971_s9 + $0x170] sm:$0xf]  ;;  %v978_v33 = vld [vmem:[%s2971_s9 + $0x180] sm:$0xf] }
  0xe6   : > { %v393_v46 = vpop.f32.mrf.mxu0  ;;  %v482_v47 = vpop.f32.mrf.mxu1 }
  0xe7   : > { %v1044_v50 = vsel %vm264_vm0, %v1028_v44, 0.0  ;;  %v1064_v51 = vsel %vm264_vm0, %v1030_v45, 0.0  ;;  %v1029_v52 = vmul.f32 %v973_v40, %v393_v46  ;;  %v1031_v53 = vmul.f32 %v975_v41, %v482_v47  ;;  %v977_v40 = vld [vmem:[%s2971_s9 + $0x178] sm:$0xf]  ;;  %v979_v41 = vld [vmem:[%s2971_s9 + $0x188] sm:$0xf] }
  0xe8   : > { %v2993_v54 = vadd.f32 %v1044_v50, %v1043_v34  ;;  %v2995_v55 = vadd.f32 %v1064_v51, %v1063_v35  ;;  %v551_v56 = vpop.f32.mrf.mxu0  ;;  %v640_v57 = vpop.f32.mrf.mxu1  ;;  %v2579_v50 = vmov 1983009808  }
  0xe9   : > { %v1054_v59 = vsel %vm264_vm0, %v1029_v52, 0.0  ;;  %v1074_v60 = vsel %vm264_vm0, %v1031_v53, 0.0  ;;  %v990_v61 = vmul.f32 %v934_v48, %v551_v56  ;;  %v992_v62 = vmul.f32 %v936_v49, %v640_v57  ;;  %v938_v48 = vld [vmem:[%s2971_s9 + $0x40] sm:$0xff]  ;;  %v940_v49 = vld [vmem:[%s2971_s9 + $0x50] sm:$0xff] }
  0xea   : > { %v3001_v63 = vadd.f32 %v1054_v59, %v1053_v42  ;;  %v3003_v1 = vadd.f32 %v1074_v60, %v1073_v43  ;;  %v553_v2 = vpop.f32.mrf.mxu0  ;;  %v642_v3 = vpop.f32.mrf.mxu1  ;;  %v3019_v51 = vunpack.c.l.s4 %v2579_v50 }
  0xeb   : > { %v991_v6 = vmul.f32 %v935_v58, %v553_v2  ;;  %v993_v7 = vmul.f32 %v937_v0, %v642_v3  ;;  %v1046_v58 = vrot.slane %v2993_v54, 4  ;;  %v1066_v0 = vrot.slane %v2995_v55, 4  ;;  %v939_v2 = vld [vmem:[%s2971_s9 + $0x48] sm:$0xff]  ;;  %v941_v3 = vld [vmem:[%s2971_s9 + $0x58] sm:$0xff] }
  0xec   : > { %v557_v8 = vpop.f32.mrf.mxu0  ;;  %v646_v9 = vpop.f32.mrf.mxu1 }
  0xed   : > { %v1004_v12 = vmul.f32 %v948_v4, %v557_v8  ;;  %v1006_v13 = vmul.f32 %v950_v5, %v646_v9  ;;  %v1056_v8 = vrot.slane %v3001_v63, 4  ;;  %v1076_v9 = vrot.slane %v3003_v1, 4 }
  0xee   : > { %v559_v14 = vpop.f32.mrf.mxu0  ;;  %v648_v15 = vpop.f32.mrf.mxu1 }
  0xef   : > { %v1082_v18 = vadd.f32 %v1004_v12, %v990_v61  ;;  %v1102_v19 = vadd.f32 %v1006_v13, %v992_v62  ;;  %v1005_v20 = vmul.f32 %v949_v10, %v559_v14  ;;  %v1007_v21 = vmul.f32 %v951_v11, %v648_v15  ;;  %v952_v14 = vld [vmem:[%s2971_s9 + $0xb0] sm:$0xff]  ;;  %v954_v15 = vld [vmem:[%s2971_s9 + $0xc0] sm:$0xff] }
  0xf0   : > { %v563_v22 = vpop.f32.mrf.mxu0  ;;  %v652_v23 = vpop.f32.mrf.mxu1 }
  0xf1   : > { %v1092_v26 = vadd.f32 %v1005_v20, %v991_v6  ;;  %v1112_v27 = vadd.f32 %v1007_v21, %v993_v7  ;;  %v1018_v28 = vmul.f32 %v962_v16, %v563_v22  ;;  %v1020_v29 = vmul.f32 %v964_v17, %v652_v23  ;;  %v953_v20 = vld [vmem:[%s2971_s9 + $0xb8] sm:$0xff]  ;;  %v955_v21 = vld [vmem:[%s2971_s9 + $0xc8] sm:$0xff] }
  0xf2   : > { %v565_v30 = vpop.f32.mrf.mxu0  ;;  %v654_v31 = vpop.f32.mrf.mxu1 }
  0xf3   : > { %v1083_v34 = vadd.f32 %v1082_v18, %v1018_v28  ;;  %v1103_v35 = vadd.f32 %v1102_v19, %v1020_v29  ;;  %v1019_v36 = vmul.f32 %v963_v24, %v565_v30  ;;  %v1021_v37 = vmul.f32 %v965_v25, %v654_v31 }
  0xf4   : > { %v569_v38 = vpop.f32.mrf.mxu0  ;;  %v658_v39 = vpop.f32.mrf.mxu1  ;;  %v2215_v24 = vunpack.c.0.s8 %v3019_v51  ;;  %v2216_v25 = vlaneseq  ;;  %v1057_v28 = vadd.f32 %v1056_v8, %v3001_v63  ;;  %v1077_v29 = vadd.f32 %v1076_v9, %v3003_v1  ;;  %v967_v1 = vld [vmem:[%s2971_s9 + $0x128] sm:$0xff] }
  0xf5   : > { %v1093_v42 = vadd.f32 %v1092_v26, %v1019_v36  ;;  %v1113_v43 = vadd.f32 %v1112_v27, %v1021_v37  ;;  %v1032_v44 = vmul.f32 %v976_v32, %v569_v38  ;;  %v1034_v45 = vmul.f32 %v978_v33, %v658_v39  ;;  %v966_v32 = vld [vmem:[%s2971_s9 + $0x120] sm:$0xff]  ;;  %v968_v33 = vld [vmem:[%s2971_s9 + $0x130] sm:$0xff]  ;;  %v983_v8 = vld [vmem:[%s2971_s9 + $0x1a8] sm:$0xf] }
  0xf6   : > { %v571_v46 = vpop.f32.mrf.mxu0  ;;  %v660_v47 = vpop.f32.mrf.mxu1  ;;  %v1047_v26 = vadd.f32 %v1046_v58, %v2993_v54  ;;  %v1067_v27 = vadd.f32 %v1066_v0, %v2995_v55  ;;  %v1078_v50 = vrot.slane %v1077_v29, 2 }
  0xf7   : > { %v1084_v52 = vsel %vm264_vm0, %v1032_v44, 0.0  ;;  %v1104_v53 = vsel %vm264_vm0, %v1034_v45, 0.0  ;;  %v1033_v56 = vmul.f32 %v977_v40, %v571_v46  ;;  %v1035_v57 = vmul.f32 %v979_v41, %v660_v47  ;;  %v969_v41 = vld [vmem:[%s2971_s9 + $0x138] sm:$0xff]  ;;  %v980_v46 = vld [vmem:[%s2971_s9 + $0x190] sm:$0xf] }
  0xf8   : > { %v3025_v59 = vadd.f32 %v1084_v52, %v1083_v34  ;;  %v3027_v60 = vadd.f32 %v1104_v53, %v1103_v35  ;;  %v729_v61 = vpop.f32.mrf.mxu0  ;;  %v818_v62 = vpop.f32.mrf.mxu1  ;;  %v1048_v47 = vrot.slane %v1047_v26, 2 }
  0xf9   : > { %v1094_v4 = vsel %vm264_vm0, %v1033_v56, 0.0  ;;  %v1114_v5 = vsel %vm264_vm0, %v1035_v57, 0.0  ;;  %v994_v6 = vmul.f32 %v938_v48, %v729_v61  ;;  %v996_v7 = vmul.f32 %v940_v49, %v818_v62  ;;  %v982_v56 = vld [vmem:[%s2971_s9 + $0x1a0] sm:$0xf] }
  0xfa   : > { %v1095_v10 = vadd.f32 %v1094_v4, %v1093_v42  ;;  %v1115_v11 = vadd.f32 %v1114_v5, %v1113_v43  ;;  %v731_v12 = vpop.f32.mrf.mxu0  ;;  %v820_v13 = vpop.f32.mrf.mxu1  ;;  %v1086_v38 = vrot.slane %v3025_v59, 4  ;;  %v1106_v54 = vrot.slane %v3027_v60, 4 }
  0xfb   : > { %v995_v16 = vmul.f32 %v939_v2, %v731_v12  ;;  %v997_v17 = vmul.f32 %v941_v3, %v820_v13  ;;  %v1068_v48 = vrot.slane %v1067_v27, 2  ;;  %v1058_v49 = vrot.slane %v1057_v28, 2 }
  0xfc   : > { %v735_v18 = vpop.f32.mrf.mxu0  ;;  %v824_v19 = vpop.f32.mrf.mxu1  ;;  %v1096_v55 = vrot.slane %v1095_v10, 4  ;;  %v1116_v39 = vrot.slane %v1115_v11, 4  ;;  %v1087_v62 = vadd.f32 %v1086_v38, %v3025_v59  ;;  %v1107_v2 = vadd.f32 %v1106_v54, %v3027_v60 }
  0xfd   : > { %v1008_v22 = vmul.f32 %v952_v14, %v735_v18  ;;  %v1010_v23 = vmul.f32 %v954_v15, %v824_v19  ;;  %v1049_v15 = vadd.f32 %v1048_v47, %v1047_v26  ;;  %v1079_v18 = vadd.f32 %v1078_v50, %v1077_v29  ;;  %v942_v47 = vld [vmem:[%s2971_s9 + $0x60] sm:$0xff] }
  0xfe   : > { %v737_v30 = vpop.f32.mrf.mxu0  ;;  %v826_v31 = vpop.f32.mrf.mxu1  ;;  %v1097_v3 = vadd.f32 %v1096_v55, %v1095_v10  ;;  %v1117_v4 = vadd.f32 %v1116_v39, %v1115_v11  ;;  %v2217_v38 = vshrl.u32 %v2216_v25, 7 }
  0xff   : > { %v1122_v34 = vadd.f32 %v1008_v22, %v994_v6  ;;  %v1142_v35 = vadd.f32 %v1010_v23, %v996_v7  ;;  %v1009_v36 = vmul.f32 %v953_v20, %v737_v30  ;;  %v1011_v37 = vmul.f32 %v955_v21, %v826_v31  ;;  %v981_v7 = vld [vmem:[%s2971_s9 + $0x198] sm:$0xf] }
 0x100   : > { %v741_v63 = vpop.f32.mrf.mxu0  ;;  %v830_v40 = vpop.f32.mrf.mxu1  ;;  %v1088_v21 = vrot.slane %v1087_v62, 2  ;;  %v1108_v22 = vrot.slane %v1107_v2, 2  ;;  %v1118_v26 = vrot.slane %v1117_v4, 2  ;;  %v1050_v54 = vrot.slane %v1049_v15, 1 }
 0x101   : > { %v1132_v42 = vadd.f32 %v1009_v36, %v995_v16  ;;  %v1152_v43 = vadd.f32 %v1011_v37, %v997_v17  ;;  %v1022_v44 = vmul.f32 %v966_v32, %v741_v63  ;;  %v1024_v45 = vmul.f32 %v968_v33, %v830_v40 }
 0x102   : > { %v743_v52 = vpop.f32.mrf.mxu0  ;;  %v832_v53 = vpop.f32.mrf.mxu1  ;;  %v1069_v16 = vadd.f32 %v1068_v48, %v1067_v27  ;;  %v1059_v17 = vadd.f32 %v1058_v49, %v1057_v28  ;;  %v1098_v33 = vrot.slane %v1097_v3, 2  ;;  %v1080_v63 = vrot.slane %v1079_v18, 1 }
 0x103   : > { %v1123_v57 = vadd.f32 %v1122_v34, %v1022_v44  ;;  %v1143_v58 = vadd.f32 %v1142_v35, %v1024_v45  ;;  %v1023_v0 = vmul.f32 %v967_v1, %v743_v52  ;;  %v1025_v61 = vmul.f32 %v969_v41, %v832_v53 }
 0x104   : > { %v747_v5 = vpop.f32.mrf.mxu0  ;;  %v836_v6 = vpop.f32.mrf.mxu1  ;;  %v1070_v55 = vrot.slane %v1069_v16, 1  ;;  %v1060_v39 = vrot.slane %v1059_v17, 1  ;;  %v3065_v40 = vadd.f32 %v1088_v21, %v1087_v62  ;;  %v3069_v44 = vadd.f32 %v1098_v33, %v1097_v3 }
 0x105   : > { %v1133_v9 = vadd.f32 %v1132_v42, %v1023_v0  ;;  %v1153_v12 = vadd.f32 %v1152_v43, %v1025_v61  ;;  %v1036_v13 = vmul.f32 %v980_v46, %v747_v5  ;;  %v1038_v14 = vmul.f32 %v982_v56, %v836_v6  ;;  %v2514_v46 = vld [vmem:[%s2971_s9 + $0x230] sm:$0xff]  ;;  %v2528_v61 = vld [vmem:[%s2971_s9 + $0x2a0] sm:$0xff]  ;;  %v2515_v5 = vld [vmem:[%s2971_s9 + $0x238] sm:$0xff] }
 0x106   : > { %v749_v19 = vpop.f32.mrf.mxu0  ;;  %v838_v20 = vpop.f32.mrf.mxu1  ;;  %v3067_v43 = vadd.f32 %v1108_v22, %v1107_v2  ;;  %v3071_v45 = vadd.f32 %v1118_v26, %v1117_v4  ;;  %v3077_v50 = vsub.s32 %v2215_v24, %v2217_v38  ;;  %v3079_v52 = vadd.f32 %v1050_v54, %v1049_v15  ;;  %v956_v0 = vld [vmem:[%s2971_s9 + $0xd0] sm:$0xff]  ;;  %v943_v24 = vld [vmem:[%s2971_s9 + $0x68] sm:$0xff]  ;;  %v957_v4 = vld [vmem:[%s2971_s9 + $0xd8] sm:$0xff] }
 0x107   : > { %v1124_v59 = vsel %vm264_vm0, %v1036_v13, 0.0  ;;  %v1144_v60 = vsel %vm264_vm0, %v1038_v14, 0.0  ;;  %v1037_v10 = vmul.f32 %v981_v7, %v749_v19  ;;  %v1039_v11 = vmul.f32 %v983_v8, %v838_v20  ;;  %v2501_v14 = vld [vmem:[%s2971_s9 + $0x1c8] sm:$0xff]  ;;  %v970_v15 = vld [vmem:[%s2971_s9 + $0x140] sm:$0xff] }
 0x108   : > { %v1125_v23 = vadd.f32 %v1124_v59, %v1123_v57  ;;  %v3058_v30 = vadd.f32 %v1144_v60, %v1143_v58  ;;  %v907_v31 = vpop.f32.mrf.mxu0  ;;  %v1369_v32 = vpop.f32.mrf.mxu1  ;;  %v3081_v53 = vadd.f32 %v1070_v55, %v1069_v16  ;;  %v3083_v56 = vadd.f32 %v1060_v39, %v1059_v17  ;;  %v2500_v58 = vld [vmem:[%s2971_s9 + $0x1c0] sm:$0xff]  ;;  %v2529_v60 = vld [vmem:[%s2971_s9 + $0x2a8] sm:$0xff] }
 0x109   : > { %v1134_v27 = vsel %vm264_vm0, %v1037_v10, 0.0  ;;  %v1154_v28 = vsel %vm264_vm0, %v1039_v11, 0.0  ;;  %v3088_v62 = vadd.f32 %v1080_v63, %v1079_v18  ;;  %v1090_v2 = vrot.slane %v3065_v40, 1  ;;  %v984_v10 = vld [vmem:[%s2971_s9 + $0x1b0] sm:$0xf] }
 0x10a   : > { %v1126_v29 = vrot.slane %v1125_v23, 4  ;;  %v1135_v34 = vadd.f32 %v1134_v27, %v1133_v9  ;;  %v3062_v35 = vadd.f32 %v1154_v28, %v1153_v12  ;;  %v909_v36 = vpop.f32.mrf.mxu0  ;;  %v1371_v37 = vpop.f32.mrf.mxu1  ;;  %v1146_v51 = vrot.slane %v3058_v30, 4  ;;  %v2542_v11 = vld [vmem:[%s2971_s9 + $0x310] sm:$0xf]  ;;  %v985_v63 = vld [vmem:[%s2971_s9 + $0x1b8] sm:$0xf] }
 0x10b   : > { %v1110_v8 = vrot.slane %v3067_v43, 1  ;;  %v1100_v9 = vrot.slane %v3069_v44, 1  ;;  %v1120_v12 = vrot.slane %v3071_v45, 1  ;;  %v998_v13 = vmul.f32 %v942_v47, %v907_v31  ;;  %v971_v31 = vld [vmem:[%s2971_s9 + $0x148] sm:$0xff] }
 0x10c   : > { %v1136_v1 = vrot.slane %v1135_v34, 4  ;;  %v913_v41 = vpop.f32.mrf.mxu0  ;;  %v1375_v42 = vpop.f32.mrf.mxu1  ;;  %v1127_v25 = vadd.f32 %v1126_v29, %v1125_v23  ;;  %v1983_v17 = vmul.f32 %v2500_v58, %v1369_v32  ;;  %v999_v22 = vmul.f32 %v943_v24, %v909_v36 }
 0x10d   : > { %v1997_v3 = vmul.f32 %v2514_v46, %v1375_v42  ;;  %v1012_v18 = vmul.f32 %v956_v0, %v913_v41  ;;  %v3105_v26 = vadd.f32 %v1146_v51, %v3058_v30  ;;  %v1156_v27 = vrot.slane %v3062_v35, 4 }
 0x10e   : > { %v915_v48 = vpop.f32.mrf.mxu0  ;;  %v1377_v49 = vpop.f32.mrf.mxu1  ;;  %v1137_v57 = vadd.f32 %v1136_v1, %v1135_v34  ;;  %v1128_v16 = vrot.slane %v1127_v25, 2  ;;  %v1984_v32 = vmul.f32 %v2501_v14, %v1371_v37  ;;  %v2543_v1 = vld [vmem:[%s2971_s9 + $0x318] sm:$0xf] }
 0x10f   : > { %v1013_v23 = vmul.f32 %v957_v4, %v915_v48  ;;  %v1998_v33 = vmul.f32 %v2515_v5, %v1377_v49  ;;  %v2039_v28 = vadd.f32 %v1997_v3, %v1983_v17  ;;  %v1162_v36 = vadd.f32 %v1012_v18, %v998_v13 }
 0x110   : > { %v919_v6 = vpop.f32.mrf.mxu0  ;;  %v1381_v7 = vpop.f32.mrf.mxu1  ;;  %v1138_v21 = vrot.slane %v1137_v57, 2  ;;  %v1129_v41 = vadd.f32 %v1128_v16, %v1127_v25  ;;  %v3114_v25 = vadd.f32 %v1156_v27, %v3062_v35  ;;  %v1173_v5 = vsel %vm1172_vm2, %v999_v22, 0.0 }
 0x111   : > { %v2011_v19 = vmul.f32 %v2528_v61, %v1381_v7  ;;  %v1026_v38 = vmul.f32 %v970_v15, %v919_v6  ;;  %v1174_v49 = vsel %vm1172_vm2, %v1013_v23, 0.0  ;;  %v2049_v58 = vadd.f32 %v1998_v33, %v1984_v32  ;;  %v2502_v33 = vld [vmem:[%s2971_s9 + $0x1d0] sm:$0xff] }
 0x112   : > { %v921_v20 = vpop.f32.mrf.mxu0  ;;  %v1383_v59 = vpop.f32.mrf.mxu1  ;;  %v1139_v30 = vadd.f32 %v1138_v21, %v1137_v57  ;;  %v1130_v57 = vrot.slane %v1129_v41, 1  ;;  %v3122_v18 = vadd.f32 %v1090_v2, %v3065_v40  ;;  %v1175_v35 = vadd.f32 %v1174_v49, %v1173_v5  ;;  %v2516_v40 = vld [vmem:[%s2971_s9 + $0x240] sm:$0xff] }
 0x113   : > { %v2012_v54 = vmul.f32 %v2529_v60, %v1383_v59  ;;  %v2040_v42 = vadd.f32 %v2039_v28, %v2011_v19  ;;  %v1027_v46 = vmul.f32 %v971_v31, %v921_v20  ;;  %v1163_v6 = vadd.f32 %v1162_v36, %v1026_v38  ;;  %v2518_v31 = vld [vmem:[%s2971_s9 + $0x250] sm:$0xff]  ;;  %v2517_v38 = vld [vmem:[%s2971_s9 + $0x248] sm:$0xff] }
 0x114   : > { %v925_v29 = vpop.f32.mrf.mxu0  ;;  %v1387_v34 = vpop.f32.mrf.mxu1  ;;  %v3127_v59 = vadd.f32 %v1110_v8, %v3067_v43  ;;  %v1140_v60 = vrot.slane %v1139_v30, 1  ;;  %v3134_v22 = vadd.f32 %v1100_v9, %v3069_v44  ;;  %v3139_v43 = vadd.f32 %v1120_v12, %v3071_v45  ;;  %v2504_v9 = vld [vmem:[%s2971_s9 + $0x1e0] sm:$0xff] }
 0x115   : > { %v1040_v55 = vmul.f32 %v984_v10, %v925_v29  ;;  %v2025_v39 = vmul.f32 %v2542_v11, %v1387_v34  ;;  %v2050_v7 = vadd.f32 %v2049_v58, %v2012_v54  ;;  %v1176_v13 = vsel %vm1172_vm2, %v1027_v46, 0.0  ;;  %v2503_v29 = vld [vmem:[%s2971_s9 + $0x1d8] sm:$0xff] }
 0x116   : > { %v927_v47 = vpop.f32.mrf.mxu0  ;;  %v1389_v48 = vpop.f32.mrf.mxu1  ;;  %v1177_v8 = vadd.f32 %v1176_v13, %v1175_v35  ;;  %v3143_v27 = vadd.f32 %v1130_v57, %v1129_v41  ;;  %v1148_v32 = vrot.slane %v3105_v26, 2  ;;  %v1158_v28 = vrot.slane %v3114_v25, 2  ;;  %v2532_v41 = vld [vmem:[%s2971_s9 + $0x2c0] sm:$0xff] }
 0x117   : > { %v2041_v37 = vsel %vm264_vm0, %v2025_v39, 0.0  ;;  %v1164_v0 = vsel %vm264_vm0, %v1040_v55, 0.0  ;;  %v1041_v51 = vmul.f32 %v985_v63, %v927_v47  ;;  %v2026_v24 = vmul.f32 %v2543_v1, %v1389_v48  ;;  %v2505_v39 = vld [vmem:[%s2971_s9 + $0x1e8] sm:$0xff]  ;;  %v2530_v1 = vld [vmem:[%s2971_s9 + $0x2b0] sm:$0xff] }
 0x118   : > { %v2042_v61 = vadd.f32 %v2041_v37, %v2040_v42  ;;  %v1458_v3 = vpop.f32.mrf.mxu0  ;;  %v1547_v4 = vpop.f32.mrf.mxu1  ;;  %v1165_v19 = vadd.f32 %v1164_v0, %v1163_v6  ;;  %v3153_v36 = vadd.f32 %v1140_v60, %v1139_v30 }
 0x119   : > { %v2051_v15 = vsel %vm264_vm0, %v2026_v24, 0.0  ;;  %v1179_v11 = vsel %vm1178_vm3, %v1041_v51, 0.0  ;;  %v1985_v46 = vmul.f32 %v2502_v33, %v1458_v3  ;;  %v1987_v37 = vmul.f32 %v2504_v9, %v1547_v4  ;;  %v2519_v51 = vld [vmem:[%s2971_s9 + $0x258] sm:$0xff]  ;;  %v2544_v3 = vld [vmem:[%s2971_s9 + $0x320] sm:$0xf] }
 0x11a   : > { %v2043_v14 = vrot.slane %v2042_v61, 4  ;;  %v1460_v16 = vpop.f32.mrf.mxu0  ;;  %v1549_v17 = vpop.f32.mrf.mxu1  ;;  %v2052_v20 = vadd.f32 %v2051_v15, %v2050_v7  ;;  %v1166_v12 = vrot.slane %v1165_v19, 4  ;;  %v1180_v54 = vadd.f32 %v1179_v11, %v1177_v8  ;;  %v2531_v24 = vld [vmem:[%s2971_s9 + $0x2b8] sm:$0xff] }
 0x11b   : > { %v1986_v0 = vmul.f32 %v2503_v29, %v1460_v16  ;;  %v1988_v6 = vmul.f32 %v2505_v39, %v1549_v17  ;;  %v2533_v16 = vld [vmem:[%s2971_s9 + $0x2c8] sm:$0xff] }
 0x11c   : > { %v2044_v10 = vadd.f32 %v2043_v14, %v2042_v61  ;;  %v1464_v21 = vpop.f32.mrf.mxu0  ;;  %v1553_v2 = vpop.f32.mrf.mxu1  ;;  %v2053_v23 = vrot.slane %v2052_v20, 4  ;;  %v2546_v14 = vld [vmem:[%s2971_s9 + $0x330] sm:$0xf]  ;;  %v3159_v15 = vadd.f32 %v1166_v12, %v1165_v19  ;;  %v1181_v35 = vrot.slane %v1180_v54, 4 }
 0x11d   : > { %v1999_v63 = vmul.f32 %v2516_v40, %v1464_v21  ;;  %v2001_v47 = vmul.f32 %v2518_v31, %v1553_v2  ;;  %v2545_v2 = vld [vmem:[%s2971_s9 + $0x328] sm:$0xf] }
 0x11e   : > { %v2045_v44 = vrot.slane %v2044_v10, 2  ;;  %v1466_v34 = vpop.f32.mrf.mxu0  ;;  %v1555_v45 = vpop.f32.mrf.mxu1  ;;  %v2054_v55 = vadd.f32 %v2053_v23, %v2052_v20 }
 0x11f   : > { %v2000_v61 = vmul.f32 %v2517_v38, %v1466_v34  ;;  %v2059_v4 = vadd.f32 %v1999_v63, %v1985_v46  ;;  %v2002_v11 = vmul.f32 %v2519_v51, %v1555_v45  ;;  %v2507_v51 = vld [vmem:[%s2971_s9 + $0x1f8] sm:$0xff] }
 0x120   : > { %v2046_v42 = vadd.f32 %v2045_v44, %v2044_v10  ;;  %v1470_v48 = vpop.f32.mrf.mxu0  ;;  %v1559_v49 = vpop.f32.mrf.mxu1  ;;  %v2055_v58 = vrot.slane %v2054_v55, 2  ;;  %v2079_v10 = vadd.f32 %v2001_v47, %v1987_v37  ;;  %v2547_v44 = vld [vmem:[%s2971_s9 + $0x338] sm:$0xf] }
 0x121   : > { %v2013_v7 = vmul.f32 %v2530_v1, %v1470_v48  ;;  %v2015_v57 = vmul.f32 %v2532_v41, %v1559_v49  ;;  %v2069_v23 = vadd.f32 %v2000_v61, %v1986_v0  ;;  %v2508_v49 = vld [vmem:[%s2971_s9 + $0x200] sm:$0xff]  ;;  %v2089_v0 = vadd.f32 %v2002_v11, %v1988_v6 }
 0x122   : > { %v2047_v5 = vrot.slane %v2046_v42, 1  ;;  %v1472_v30 = vpop.f32.mrf.mxu0  ;;  %v1561_v13 = vpop.f32.mrf.mxu1  ;;  %v2056_v20 = vadd.f32 %v2055_v58, %v2054_v55  ;;  %v3170_v58 = vadd.f32 %v1181_v35, %v1180_v54 }
 0x123   : > { %v2014_v21 = vmul.f32 %v2531_v24, %v1472_v30  ;;  %v2060_v9 = vadd.f32 %v2059_v4, %v2013_v7  ;;  %v2080_v29 = vadd.f32 %v2079_v10, %v2015_v57  ;;  %v2016_v34 = vmul.f32 %v2533_v16, %v1561_v13 }
 0x124   : > { %v2048_v60 = vadd.f32 %v2047_v5, %v2046_v42  ;;  %v1476_v40 = vpop.f32.mrf.mxu0  ;;  %v1565_v17 = vpop.f32.mrf.mxu1  ;;  %v2057_v8 = vrot.slane %v2056_v20, 1 }
 0x125   : > { %v2027_v33 = vmul.f32 %v2544_v3, %v1476_v40  ;;  %v2029_v31 = vmul.f32 %v2546_v14, %v1565_v17  ;;  %v2070_v1 = vadd.f32 %v2069_v23, %v2014_v21  ;;  %v2509_v3 = vld [vmem:[%s2971_s9 + $0x208] sm:$0xff]  ;;  %v2520_v14 = vld [vmem:[%s2971_s9 + $0x260] sm:$0xff]  ;;  %v2090_v54 = vadd.f32 %v2089_v0, %v2016_v34 }
 0x126   : > { %v2183_v19 = vsel %vm2182_vm4, %v3079_v52, %v2048_v60  ;;  %v1478_v38 = vpop.f32.mrf.mxu0  ;;  %v1567_v12 = vpop.f32.mrf.mxu1  ;;  %v2058_v45 = vadd.f32 %v2057_v8, %v2056_v20  ;;  %v2506_v52 = vld [vmem:[%s2971_s9 + $0x1f0] sm:$0xff]  ;;  %v2521_v40 = vld [vmem:[%s2971_s9 + $0x268] sm:$0xff] }
 0x127   : > { %v2061_v55 = vsel %vm264_vm0, %v2027_v33, 0.0  ;;  %v2081_v39 = vsel %vm264_vm0, %v2029_v31, 0.0  ;;  %v2028_v63 = vmul.f32 %v2545_v2, %v1478_v38  ;;  %v2030_v46 = vmul.f32 %v2547_v44, %v1567_v12  ;;  %v2522_v20 = vld [vmem:[%s2971_s9 + $0x270] sm:$0xff]  ;;  %v2523_v33 = vld [vmem:[%s2971_s9 + $0x278] sm:$0xff]  ;;  %v2536_v12 = vld [vmem:[%s2971_s9 + $0x2e0] sm:$0xff] }
 0x128   : > { %v2062_v41 = vadd.f32 %v2061_v55, %v2060_v9  ;;  %v2082_v42 = vadd.f32 %v2081_v39, %v2080_v29  ;;  %v1636_v47 = vpop.f32.mrf.mxu0  ;;  %v1725_v48 = vpop.f32.mrf.mxu1  ;;  %v2184_v37 = vsel %vm2182_vm4, %v3083_v56, %v2058_v45  ;;  %v2534_v38 = vld [vmem:[%s2971_s9 + $0x2d0] sm:$0xff] }
 0x129   : > { %v2071_v61 = vsel %vm264_vm0, %v2028_v63, 0.0  ;;  %v2211_v24 = vcombine.low %v2183_v19, %v2184_v37  ;;  %v2091_v35 = vsel %vm264_vm0, %v2030_v46, 0.0  ;;  %v1989_v4 = vmul.f32 %v2506_v52, %v1636_v47 }
 0x12a   : > { %v2063_v5 = vrot.slane %v2062_v41, 4  ;;  %v2083_v7 = vrot.slane %v2082_v42, 4  ;;  %v2072_v57 = vadd.f32 %v2071_v61, %v2070_v1  ;;  %v1638_v30 = vpop.f32.mrf.mxu0  ;;  %v1727_v13 = vpop.f32.mrf.mxu1  ;;  %v1991_v56 = vmul.f32 %v2508_v49, %v1725_v48  ;;  %v2535_v48 = vld [vmem:[%s2971_s9 + $0x2d8] sm:$0xff] }
 0x12b   : > { %v1990_v10 = vmul.f32 %v2507_v51, %v1638_v30  ;;  %v2092_v17 = vadd.f32 %v2091_v35, %v2090_v54  ;;  %v1992_v2 = vmul.f32 %v2509_v3, %v1727_v13  ;;  %v3183_v31 = vrot.slane %v2211_v24, %v3077_v50  ;;  %v2537_v51 = vld [vmem:[%s2971_s9 + $0x2e8] sm:$0xff]  ;;  %v2548_v3 = vld [vmem:[%s2971_s9 + $0x340] sm:$0xf] }
 0x12c   : > { %v2064_v6 = vadd.f32 %v2063_v5, %v2062_v41  ;;  %v2084_v16 = vadd.f32 %v2083_v7, %v2082_v42  ;;  %v2073_v60 = vrot.slane %v2072_v57, 4  ;;  %v1642_v11 = vpop.f32.mrf.mxu0  ;;  %v1731_v21 = vpop.f32.mrf.mxu1 }
 0x12d   : > { %v2003_v8 = vmul.f32 %v2520_v14, %v1642_v11  ;;  %v2005_v23 = vmul.f32 %v2522_v20, %v1731_v21  ;;  %v2093_v45 = vrot.slane %v2092_v17, 4  ;;  %v2550_v14 = vld [vmem:[%s2971_s9 + $0x350] sm:$0xf]  ;;  %v2549_v21 = vld [vmem:[%s2971_s9 + $0x348] sm:$0xf] }
 0x12e   : > { %v2065_v44 = vrot.slane %v2064_v6, 2  ;;  %v2085_v19 = vrot.slane %v2084_v16, 2  ;;  %v2074_v9 = vadd.f32 %v2073_v60, %v2072_v57  ;;  %v1644_v29 = vpop.f32.mrf.mxu0  ;;  %v1733_v34 = vpop.f32.mrf.mxu1 }
 0x12f   : > { %v2099_v55 = vadd.f32 %v2003_v8, %v1989_v4  ;;  %v2119_v39 = vadd.f32 %v2005_v23, %v1991_v56  ;;  %v2004_v63 = vmul.f32 %v2521_v40, %v1644_v29  ;;  %v2006_v46 = vmul.f32 %v2523_v33, %v1733_v34  ;;  %v2551_v23 = vld [vmem:[%s2971_s9 + $0x358] sm:$0xf] }
 0x130   : > { %v2066_v1 = vadd.f32 %v2065_v44, %v2064_v6  ;;  %v2086_v41 = vadd.f32 %v2085_v19, %v2084_v16  ;;  %v2075_v42 = vrot.slane %v2074_v9, 2  ;;  %v1648_v47 = vpop.f32.mrf.mxu0  ;;  %v1737_v52 = vpop.f32.mrf.mxu1  ;;  %v2094_v49 = vadd.f32 %v2093_v45, %v2092_v17 }
 0x131   : > { %v2109_v37 = vadd.f32 %v2004_v63, %v1990_v10  ;;  %v2017_v0 = vmul.f32 %v2534_v38, %v1648_v47  ;;  %v2019_v61 = vmul.f32 %v2536_v12, %v1737_v52  ;;  %v2129_v57 = vadd.f32 %v2006_v46, %v1992_v2  ;;  %v2510_v38 = vld [vmem:[%s2971_s9 + $0x210] sm:$0xff]  ;;  %v2512_v46 = vld [vmem:[%s2971_s9 + $0x220] sm:$0xff] }
 0x132   : > { %v2067_v24 = vrot.slane %v2066_v1, 1  ;;  %v2087_v5 = vrot.slane %v2086_v41, 1  ;;  %v2076_v7 = vadd.f32 %v2075_v42, %v2074_v9  ;;  %v1650_v30 = vpop.f32.mrf.mxu0  ;;  %v1739_v13 = vpop.f32.mrf.mxu1  ;;  %v2095_v20 = vrot.slane %v2094_v49, 2 }
 0x133   : > { %v2100_v54 = vadd.f32 %v2099_v55, %v2017_v0  ;;  %v2120_v35 = vadd.f32 %v2119_v39, %v2019_v61  ;;  %v2018_v4 = vmul.f32 %v2535_v48, %v1650_v30  ;;  %v2020_v60 = vmul.f32 %v2537_v51, %v1739_v13 }
 0x134   : > { %v2068_v56 = vadd.f32 %v2067_v24, %v2066_v1  ;;  %v2088_v6 = vadd.f32 %v2087_v5, %v2086_v41  ;;  %v2077_v16 = vrot.slane %v2076_v7, 1  ;;  %v1654_v10 = vpop.f32.mrf.mxu0  ;;  %v1743_v11 = vpop.f32.mrf.mxu1  ;;  %v2096_v40 = vadd.f32 %v2095_v20, %v2094_v49  ;;  %v2511_v24 = vld [vmem:[%s2971_s9 + $0x218] sm:$0xff] }
 0x135   : > { %v2110_v17 = vadd.f32 %v2109_v37, %v2018_v4  ;;  %v2031_v2 = vmul.f32 %v2548_v3, %v1654_v10  ;;  %v2033_v8 = vmul.f32 %v2550_v14, %v1743_v11  ;;  %v2130_v9 = vadd.f32 %v2129_v57, %v2020_v60 }
 0x136   : > { %v2185_v33 = vsel %vm2182_vm4, %v3081_v53, %v2068_v56  ;;  %v2187_v44 = vsel %vm2182_vm4, %v3122_v18, %v2088_v6  ;;  %v2078_v19 = vadd.f32 %v2077_v16, %v2076_v7  ;;  %v1656_v29 = vpop.f32.mrf.mxu0  ;;  %v1745_v34 = vpop.f32.mrf.mxu1  ;;  %v2097_v12 = vrot.slane %v2096_v40, 1  ;;  %v2513_v7 = vld [vmem:[%s2971_s9 + $0x228] sm:$0xff]  ;;  %v2524_v56 = vld [vmem:[%s2971_s9 + $0x280] sm:$0xff]  ;;  %v2526_v16 = vld [vmem:[%s2971_s9 + $0x290] sm:$0xff] }
 0x137   : > { %v2101_v45 = vsel %vm264_vm0, %v2031_v2, 0.0  ;;  %v2121_v55 = vsel %vm264_vm0, %v2033_v8, 0.0  ;;  %v2032_v39 = vmul.f32 %v2549_v21, %v1656_v29  ;;  %v2034_v18 = vmul.f32 %v2551_v23, %v1745_v34  ;;  %v2525_v21 = vld [vmem:[%s2971_s9 + $0x288] sm:$0xff] }
 0x138   : > { %v2186_v63 = vsel %vm2182_vm4, %v3088_v62, %v2078_v19  ;;  %v2102_v53 = vadd.f32 %v2101_v45, %v2100_v54  ;;  %v2122_v1 = vadd.f32 %v2121_v55, %v2120_v35  ;;  %v1814_v41 = vpop.f32.mrf.mxu0  ;;  %v1903_v42 = vpop.f32.mrf.mxu1  ;;  %v2098_v52 = vadd.f32 %v2097_v12, %v2096_v40 }
 0x139   : > { %v2212_v47 = vcombine.low %v2185_v33, %v2186_v63  ;;  %v2111_v48 = vsel %vm264_vm0, %v2032_v39, 0.0  ;;  %v1993_v49 = vmul.f32 %v2510_v38, %v1814_v41  ;;  %v2131_v51 = vsel %vm264_vm0, %v2034_v18, 0.0  ;;  %v2538_v39 = vld [vmem:[%s2971_s9 + $0x2f0] sm:$0xff] }
 0x13a   : > { %v2103_v37 = vrot.slane %v2102_v53, 4  ;;  %v2123_v0 = vrot.slane %v2122_v1, 4  ;;  %v2112_v61 = vadd.f32 %v2111_v48, %v2110_v17  ;;  %v1816_v62 = vpop.f32.mrf.mxu0  ;;  %v1905_v5 = vpop.f32.mrf.mxu1  ;;  %v2188_v30 = vsel %vm2182_vm4, %v3134_v22, %v2098_v52 }
 0x13b   : > { %v2226_v57 = vrot.slane %v2212_v47, %v3077_v50  ;;  %v2132_v13 = vadd.f32 %v2131_v51, %v2130_v9  ;;  %v1995_v3 = vmul.f32 %v2512_v46, %v1903_v42  ;;  %v2228_v14 = vcombine.low %v2187_v44, %v2188_v30  ;;  %v2527_v44 = vld [vmem:[%s2971_s9 + $0x298] sm:$0xff] }
 0x13c   : > { %v2104_v20 = vadd.f32 %v2103_v37, %v2102_v53  ;;  %v2124_v54 = vadd.f32 %v2123_v0, %v2122_v1  ;;  %v2113_v35 = vrot.slane %v2112_v61, 4  ;;  %v1820_v4 = vpop.f32.mrf.mxu0  ;;  %v1909_v6 = vpop.f32.mrf.mxu1  ;;  %v1994_v10 = vmul.f32 %v2511_v24, %v1816_v62  ;;  %v2540_v53 = vld [vmem:[%s2971_s9 + $0x300] sm:$0xff]  ;;  %v2539_v0 = vld [vmem:[%s2971_s9 + $0x2f8] sm:$0xff] }
 0x13d   : > { %v2227_v22 = vcombine.low %v3183_v31, %v2226_v57  ;;  %v2133_v60 = vrot.slane %v2132_v13, 4  ;;  %v1996_v11 = vmul.f32 %v2513_v7, %v1905_v5  ;;  %v3221_v40 = vrot.slane %v2228_v14, %v3077_v50  ;;  %v2541_v7 = vld [vmem:[%s2971_s9 + $0x308] sm:$0xff]  ;;  %v2552_v14 = vld [vmem:[%s2971_s9 + $0x360] sm:$0xf] }
 0x13e   : > { %v2105_v17 = vrot.slane %v2104_v20, 2  ;;  %v2125_v2 = vrot.slane %v2124_v54, 2  ;;  %v2114_v8 = vadd.f32 %v2113_v35, %v2112_v61  ;;  %v1822_v23 = vpop.f32.mrf.mxu0  ;;  %v1911_v33 = vpop.f32.mrf.mxu1  ;;  %v2007_v31 = vmul.f32 %v2524_v56, %v1820_v4 }
 0x13f   : > { %2274 = vst [vmem:[%s3214_s14] sm:$0xff] %v2227_v22  ;;  %v2134_v19 = vadd.f32 %v2133_v60, %v2132_v13  ;;  %v2169_v9 = vsel %vm1172_vm2, %v1996_v11, 0.0  ;;  %v2009_v29 = vmul.f32 %v2526_v16, %v1909_v6  ;;  %v2008_v45 = vmul.f32 %v2525_v21, %v1822_v23  ;;  %v2553_v16 = vld [vmem:[%s2971_s9 + $0x368] sm:$0xf]  ;;  %v2555_v22 = vld [vmem:[%s2971_s9 + $0x378] sm:$0xf] }
 0x140   : > { %v2106_v34 = vadd.f32 %v2105_v17, %v2104_v20  ;;  %v2126_v38 = vadd.f32 %v2125_v2, %v2124_v54  ;;  %v2115_v12 = vrot.slane %v2114_v8, 2  ;;  %v1826_v55 = vpop.f32.mrf.mxu0  ;;  %v1915_v63 = vpop.f32.mrf.mxu1  ;;  %v2139_v18 = vadd.f32 %v2007_v31, %v1993_v49  ;;  %v2554_v54 = vld [vmem:[%s2971_s9 + $0x370] sm:$0xf] }
 0x141   : > { %v2135_v1 = vrot.slane %v2134_v19, 2  ;;  %v2159_v41 = vadd.f32 %v2009_v29, %v1995_v3  ;;  %v2010_v42 = vmul.f32 %v2527_v44, %v1911_v33  ;;  %v2149_v48 = vadd.f32 %v2008_v45, %v1994_v10 }
 0x142   : > { %v2107_v46 = vrot.slane %v2106_v34, 1  ;;  %v2127_v47 = vrot.slane %v2126_v38, 1  ;;  %v2116_v52 = vadd.f32 %v2115_v12, %v2114_v8  ;;  %v1828_v37 = vpop.f32.mrf.mxu0  ;;  %v1917_v61 = vpop.f32.mrf.mxu1  ;;  %v2021_v24 = vmul.f32 %v2538_v39, %v1826_v55 }
 0x143   : > { %v2136_v51 = vadd.f32 %v2135_v1, %v2134_v19  ;;  %v2170_v62 = vsel %vm1172_vm2, %v2010_v42, 0.0  ;;  %v2023_v5 = vmul.f32 %v2540_v53, %v1915_v63  ;;  %v2022_v6 = vmul.f32 %v2539_v0, %v1828_v37 }
 0x144   : > { %v2108_v49 = vadd.f32 %v2107_v46, %v2106_v34  ;;  %v2128_v57 = vadd.f32 %v2127_v47, %v2126_v38  ;;  %v2117_v30 = vrot.slane %v2116_v52, 1  ;;  %v2171_v13 = vadd.f32 %v2170_v62, %v2169_v9  ;;  %v1832_v3 = vpop.f32.mrf.mxu0  ;;  %v1921_v20 = vpop.f32.mrf.mxu1 }
 0x145   : > { %v2137_v35 = vrot.slane %v2136_v51, 1  ;;  %v2140_v4 = vadd.f32 %v2139_v18, %v2021_v24  ;;  %v2160_v56 = vadd.f32 %v2159_v41, %v2023_v5  ;;  %v2024_v21 = vmul.f32 %v2541_v7, %v1917_v61 }
 0x146   : > { %v2189_v60 = vsel %vm2182_vm4, %v3127_v59, %v2108_v49  ;;  %v3239_v10 = vsel %vm2182_vm4, %v3143_v27, %v2128_v57  ;;  %v2118_v11 = vadd.f32 %v2117_v30, %v2116_v52  ;;  %v1834_v17 = vpop.f32.mrf.mxu0  ;;  %v1923_v2 = vpop.f32.mrf.mxu1  ;;  %v2150_v23 = vadd.f32 %v2149_v48, %v2022_v6 }
 0x147   : > { %v2138_v8 = vadd.f32 %v2137_v35, %v2136_v51  ;;  %v2035_v33 = vmul.f32 %v2552_v14, %v1832_v3  ;;  %v2037_v44 = vmul.f32 %v2554_v54, %v1921_v20  ;;  %v2172_v9 = vsel %vm1172_vm2, %v2024_v21, 0.0 }
 0x148   : > { %v2190_v19 = vsel %vm2182_vm4, %v3139_v43, %v2118_v11  ;;  %v2036_v31 = vmul.f32 %v2553_v16, %v1834_v17  ;;  %v2038_v29 = vmul.f32 %v2555_v22, %v1923_v2  ;;  %v2173_v34 = vadd.f32 %v2172_v9, %v2171_v13 }
 0x149   : > { %v2229_v59 = vcombine.low %v2189_v60, %v2190_v19  ;;  %v2192_v27 = vsel %vm2182_vm4, %v3153_v36, %v2138_v8  ;;  %v2141_v38 = vsel %vm264_vm0, %v2035_v33, 0.0  ;;  %v2161_v55 = vsel %vm264_vm0, %v2037_v44, 0.0 }
 0x14a   : > { %v2245_v12 = vcombine.low %v3239_v10, %v2192_v27  ;;  %v2142_v45 = vadd.f32 %v2141_v38, %v2140_v4  ;;  %v2151_v39 = vsel %vm264_vm0, %v2036_v31, 0.0  ;;  %v2162_v63 = vadd.f32 %v2161_v55, %v2160_v56 }
 0x14b   : > { %v2243_v43 = vrot.slane %v2229_v59, %v3077_v50  ;;  %v2152_v53 = vadd.f32 %v2151_v39, %v2150_v23  ;;  %v2174_v1 = vsel %vm1178_vm3, %v2038_v29, 0.0  ;;  %v1168_v18 = vrot.slane %v3159_v15, 2 }
 0x14c   : > { %v1183_v36 = vrot.slane %v3170_v58, 2  ;;  %v2143_v41 = vrot.slane %v2142_v45, 4  ;;  %v2175_v42 = vadd.f32 %v2174_v1, %v2173_v34  ;;  %v2163_v47 = vrot.slane %v2162_v63, 4 }
 0x14d   : > { %v2244_v46 = vcombine.low %v3221_v40, %v2243_v43  ;;  %v2153_v52 = vrot.slane %v2152_v53, 4  ;;  %v1149_v48 = vadd.f32 %v1148_v32, %v3105_v26  ;;  %v1159_v61 = vadd.f32 %v1158_v28, %v3114_v25 }
 0x14e   : > { %v2144_v37 = vadd.f32 %v2143_v41, %v2142_v45  ;;  %v2176_v0 = vrot.slane %v2175_v42, 4  ;;  %v2164_v51 = vadd.f32 %v2163_v47, %v2162_v63  ;;  %v1169_v24 = vadd.f32 %v1168_v18, %v3159_v15 }
 0x14f   : > { %2275 = vst [vmem:[%s3214_s14 + $0x8] sm:$0xff] %v2244_v46  ;;  %v2154_v62 = vadd.f32 %v2153_v52, %v2152_v53  ;;  %v1184_v5 = vadd.f32 %v1183_v36, %v3170_v58  ;;  %v1150_v30 = vrot.slane %v1149_v48, 1  ;;  %v1160_v32 = vrot.slane %v1159_v61, 1 }
 0x150   : > { %v2145_v40 = vrot.slane %v2144_v37, 2  ;;  %v2177_v7 = vadd.f32 %v2176_v0, %v2175_v42  ;;  %v2165_v49 = vrot.slane %v2164_v51, 2  ;;  %v1170_v20 = vrot.slane %v1169_v24, 1 }
 0x151   : > { %v2155_v57 = vrot.slane %v2154_v62, 2  ;;  %v1185_v54 = vrot.slane %v1184_v5, 1  ;;  %v1151_v56 = vadd.f32 %v1150_v30, %v1149_v48  ;;  %v1161_v58 = vadd.f32 %v1160_v32, %v1159_v61 }
 0x152   : > { %v2146_v13 = vadd.f32 %v2145_v40, %v2144_v37  ;;  %v2178_v26 = vrot.slane %v2177_v7, 2  ;;  %v2166_v3 = vadd.f32 %v2165_v49, %v2164_v51  ;;  %v1171_v60 = vadd.f32 %v1170_v20, %v1169_v24 }
 0x153   : > { %v2156_v14 = vadd.f32 %v2155_v57, %v2154_v62  ;;  %v1186_v10 = vadd.f32 %v1185_v54, %v1184_v5  ;;  %v2253_v44 = vrot.slane %v2245_v12, %v3077_v50 }
 0x154   : > { %v2147_v25 = vrot.slane %v2146_v13, 1  ;;  %v2179_v28 = vadd.f32 %v2178_v26, %v2177_v7  ;;  %v2167_v35 = vrot.slane %v2166_v3, 1 }
 0x155   : > { %v2157_v4 = vrot.slane %v2156_v14, 1 }
 0x156   : > { %v2148_v15 = vadd.f32 %v2147_v25, %v2146_v13  ;;  %v2180_v6 = vrot.slane %v2179_v28, 1  ;;  %v2168_v16 = vadd.f32 %v2167_v35, %v2166_v3 }
 0x157   : > { %v2158_v22 = vadd.f32 %v2157_v4, %v2156_v14 }
 0x158   : > { %v2193_v11 = vsel %vm2182_vm4, %v1151_v56, %v2148_v15  ;;  %v2181_v21 = vadd.f32 %v2180_v6, %v2179_v28  ;;  %v2195_v2 = vsel %vm2182_vm4, %v1171_v60, %v2168_v16 }
 0x159   : > { %v2194_v17 = vsel %vm2182_vm4, %v1161_v58, %v2158_v22 }
 0x15a   : > { %v2246_v8 = vcombine.low %v2193_v11, %v2194_v17  ;;  %v2196_v23 = vsel %vm2182_vm4, %v1186_v10, %v2181_v21 }
 0x15b   : > { %v2262_v33 = vcombine.low %v2195_v2, %v2196_v23 }
 0x15c   : > { %v2260_v19 = vrot.slane %v2246_v8, %v3077_v50 }
 0x15d   : > { %v2269_v9 = vrot.slane %v2262_v33, %v3077_v50 }
 0x15e   : > { %v2261_v31 = vcombine.low %v2253_v44, %v2260_v19 }
 0x15f   : > { %2280 = vst.msk [vmem:[%s3214_s14 + $0x18] sm:$0xf] %vm2279_vm7, %v2269_v9 }
 0x160   : > { %2276 = vst [vmem:[%s3214_s14 + $0x10] sm:$0xff] %v2261_v31 }
 0x161 PF: > { %s13_s12 = sadd.s32 1, %s2576_s12  }
 0x162   : > { %p10_p4 = scmp.ge.s32.totalorder %s13_s12, 7  }
 0x164   :  { %12 = sbr.rel (!%p10_p4) target bundleno = 1 (0x1), region = 68 }

// kernel: generator_forward.15
= control target key start
LH: loop header
LB: loop body
LE: loop exit
PB: predicated region body
PF: predicated region fallthrough
CT: control target
= control target key end

     0   :  { %vm479_vm0 = vcmask 1044480   ;;  %v1939_v3 = vmov 0.0   ;;  %vm475_vm1 = vcmask 1022976   ;;  %vm1611_vm2 = vcmask 585728   ;;  %s3839_s1 = inlined_call_operand.vmem [shape: f32[125,3528], index: 1, kind: input, shape index: {}]   ;;  %s3840_s0 = inlined_call_operand.vmem [shape: f32[5,125], index: 0, kind: input, shape index: {}]   ;;  %s3841_s2 = inlined_call_operand.vmem [shape: f32[5,1], index: 2, kind: input, shape index: {}]   ;;  %s3842_s3 = inlined_call_operand.vmem [shape: f32[5,1], index: 3, kind: input, shape index: {}]   ;;  %s3843_s4 = inlined_call_operand.vmem [shape: f32[5,1], index: 4, kind: input, shape index: {}]   ;;  %s3844_s5 = inlined_call_operand.vmem [shape: f32[5,3528], index: 5, kind: output, shape index: {}]  }
   0x1   :  { %v442_v0 = vld [vmem:[%s3839_s1 + $0xd28] sm:$0x1f]  ;;  %v444_v1 = vld [vmem:[%s3839_s1 + $0xd38] sm:$0x1f]  ;;  %v441_v2 = vld [vmem:[%s3839_s1 + $0xd20] sm:$0x1f]  ;;  %628 = vmatprep.mubr.f32.mxu0 %v1939_v3  ;;  %699 = vmatprep.mubr.f32.mxu1 %v1939_v3 }
   0x2   :  { %1890 = vmatprep.subr.msk.mxu0 %vm479_vm0, %v442_v0  ;;  %1893 = vmatprep.subr.msk.mxu1 %vm479_vm0, %v444_v1  ;;  %v443_v4 = vld [vmem:[%s3839_s1 + $0xd30] sm:$0x1f]  ;;  %v414_v5 = vld [vmem:[%s3839_s1 + $0xc48] sm:$0xff]  ;;  %v416_v6 = vld [vmem:[%s3839_s1 + $0xc58] sm:$0xff] }
   0x3   :  { %1891 = vmatpush1.msk.msra.mxu0 %vm479_vm0, %v441_v2  ;;  %1894 = vmatpush1.msk.msra.mxu1 %vm479_vm0, %v443_v4  ;;  %v413_v7 = vld [vmem:[%s3839_s1 + $0xc40] sm:$0xff]  ;;  %v415_v8 = vld [vmem:[%s3839_s1 + $0xc50] sm:$0xff]  ;;  %v386_v9 = vld [vmem:[%s3839_s1 + $0xb68] sm:$0xff] }
   0x4   :  { %566 = vmatprep.subr.mxu0 %v414_v5  ;;  %637 = vmatprep.subr.mxu1 %v416_v6  ;;  %v388_v10 = vld [vmem:[%s3839_s1 + $0xb78] sm:$0xff]  ;;  %v385_v11 = vld [vmem:[%s3839_s1 + $0xb60] sm:$0xff]  ;;  %v387_v12 = vld [vmem:[%s3839_s1 + $0xb70] sm:$0xff] }
   0x5   :  { %567 = vmatpush1.msra.mxu0 %v413_v7  ;;  %638 = vmatpush1.msra.mxu1 %v415_v8  ;;  %v358_v13 = vld [vmem:[%s3839_s1 + $0xa88] sm:$0xff]  ;;  %v360_v14 = vld [vmem:[%s3839_s1 + $0xa98] sm:$0xff]  ;;  %v357_v15 = vld [vmem:[%s3839_s1 + $0xa80] sm:$0xff] }
   0x6   :  { %568 = vmatprep.subr.mxu0 %v386_v9  ;;  %639 = vmatprep.subr.mxu1 %v388_v10  ;;  %v359_v16 = vld [vmem:[%s3839_s1 + $0xa90] sm:$0xff]  ;;  %v330_v17 = vld [vmem:[%s3839_s1 + $0x9a8] sm:$0xff]  ;;  %v332_v18 = vld [vmem:[%s3839_s1 + $0x9b8] sm:$0xff] }
   0x7   :  { %569 = vmatpush1.msra.mxu0 %v385_v11  ;;  %640 = vmatpush1.msra.mxu1 %v387_v12  ;;  %v329_v19 = vld [vmem:[%s3839_s1 + $0x9a0] sm:$0xff]  ;;  %v331_v20 = vld [vmem:[%s3839_s1 + $0x9b0] sm:$0xff]  ;;  %v302_v21 = vld [vmem:[%s3839_s1 + $0x8c8] sm:$0xff] }
   0x8   :  { %570 = vmatprep.subr.mxu0 %v358_v13  ;;  %641 = vmatprep.subr.mxu1 %v360_v14  ;;  %v304_v22 = vld [vmem:[%s3839_s1 + $0x8d8] sm:$0xff]  ;;  %v301_v23 = vld [vmem:[%s3839_s1 + $0x8c0] sm:$0xff]  ;;  %v303_v24 = vld [vmem:[%s3839_s1 + $0x8d0] sm:$0xff] }
   0x9   :  { %571 = vmatpush1.msra.mxu0 %v357_v15  ;;  %642 = vmatpush1.msra.mxu1 %v359_v16  ;;  %v274_v25 = vld [vmem:[%s3839_s1 + $0x7e8] sm:$0xff]  ;;  %v276_v26 = vld [vmem:[%s3839_s1 + $0x7f8] sm:$0xff]  ;;  %v273_v27 = vld [vmem:[%s3839_s1 + $0x7e0] sm:$0xff] }
   0xa   :  { %572 = vmatprep.subr.mxu0 %v330_v17  ;;  %643 = vmatprep.subr.mxu1 %v332_v18  ;;  %v275_v28 = vld [vmem:[%s3839_s1 + $0x7f0] sm:$0xff]  ;;  %v246_v29 = vld [vmem:[%s3839_s1 + $0x708] sm:$0xff]  ;;  %v248_v30 = vld [vmem:[%s3839_s1 + $0x718] sm:$0xff] }
   0xb   :  { %573 = vmatpush1.msra.mxu0 %v329_v19  ;;  %644 = vmatpush1.msra.mxu1 %v331_v20  ;;  %v245_v31 = vld [vmem:[%s3839_s1 + $0x700] sm:$0xff]  ;;  %v247_v32 = vld [vmem:[%s3839_s1 + $0x710] sm:$0xff]  ;;  %v218_v33 = vld [vmem:[%s3839_s1 + $0x628] sm:$0xff] }
   0xc   :  { %574 = vmatprep.subr.mxu0 %v302_v21  ;;  %645 = vmatprep.subr.mxu1 %v304_v22  ;;  %v220_v34 = vld [vmem:[%s3839_s1 + $0x638] sm:$0xff]  ;;  %v217_v35 = vld [vmem:[%s3839_s1 + $0x620] sm:$0xff]  ;;  %v219_v36 = vld [vmem:[%s3839_s1 + $0x630] sm:$0xff] }
   0xd   :  { %575 = vmatpush1.msra.mxu0 %v301_v23  ;;  %646 = vmatpush1.msra.mxu1 %v303_v24  ;;  %v190_v37 = vld [vmem:[%s3839_s1 + $0x548] sm:$0xff]  ;;  %v192_v38 = vld [vmem:[%s3839_s1 + $0x558] sm:$0xff]  ;;  %v189_v39 = vld [vmem:[%s3839_s1 + $0x540] sm:$0xff] }
   0xe   :  { %576 = vmatprep.subr.mxu0 %v274_v25  ;;  %647 = vmatprep.subr.mxu1 %v276_v26  ;;  %v191_v40 = vld [vmem:[%s3839_s1 + $0x550] sm:$0xff]  ;;  %v162_v41 = vld [vmem:[%s3839_s1 + $0x468] sm:$0xff]  ;;  %v164_v42 = vld [vmem:[%s3839_s1 + $0x478] sm:$0xff] }
   0xf   :  { %577 = vmatpush1.msra.mxu0 %v273_v27  ;;  %648 = vmatpush1.msra.mxu1 %v275_v28  ;;  %v161_v43 = vld [vmem:[%s3839_s1 + $0x460] sm:$0xff]  ;;  %v163_v44 = vld [vmem:[%s3839_s1 + $0x470] sm:$0xff]  ;;  %v134_v45 = vld [vmem:[%s3839_s1 + $0x388] sm:$0xff] }
  0x10   :  { %578 = vmatprep.subr.mxu0 %v246_v29  ;;  %649 = vmatprep.subr.mxu1 %v248_v30  ;;  %v136_v46 = vld [vmem:[%s3839_s1 + $0x398] sm:$0xff]  ;;  %v133_v47 = vld [vmem:[%s3839_s1 + $0x380] sm:$0xff]  ;;  %v135_v48 = vld [vmem:[%s3839_s1 + $0x390] sm:$0xff] }
  0x11   :  { %579 = vmatpush1.msra.mxu0 %v245_v31  ;;  %650 = vmatpush1.msra.mxu1 %v247_v32  ;;  %v106_v49 = vld [vmem:[%s3839_s1 + $0x2a8] sm:$0xff]  ;;  %v108_v50 = vld [vmem:[%s3839_s1 + $0x2b8] sm:$0xff]  ;;  %v105_v51 = vld [vmem:[%s3839_s1 + $0x2a0] sm:$0xff] }
  0x12   :  { %580 = vmatprep.subr.mxu0 %v218_v33  ;;  %651 = vmatprep.subr.mxu1 %v220_v34  ;;  %v107_v52 = vld [vmem:[%s3839_s1 + $0x2b0] sm:$0xff]  ;;  %v78_v53 = vld [vmem:[%s3839_s1 + $0x1c8] sm:$0xff]  ;;  %v80_v54 = vld [vmem:[%s3839_s1 + $0x1d8] sm:$0xff] }
  0x13   :  { %581 = vmatpush1.msra.mxu0 %v217_v35  ;;  %652 = vmatpush1.msra.mxu1 %v219_v36  ;;  %v77_v55 = vld [vmem:[%s3839_s1 + $0x1c0] sm:$0xff]  ;;  %v79_v56 = vld [vmem:[%s3839_s1 + $0x1d0] sm:$0xff]  ;;  %v50_v57 = vld [vmem:[%s3839_s1 + $0xe8] sm:$0xff] }
  0x14   :  { %582 = vmatprep.subr.mxu0 %v190_v37  ;;  %653 = vmatprep.subr.mxu1 %v192_v38  ;;  %v52_v58 = vld [vmem:[%s3839_s1 + $0xf8] sm:$0xff]  ;;  %v49_v59 = vld [vmem:[%s3839_s1 + $0xe0] sm:$0xff]  ;;  %v51_v60 = vld [vmem:[%s3839_s1 + $0xf0] sm:$0xff] }
  0x15   :  { %583 = vmatpush1.msra.mxu0 %v189_v39  ;;  %654 = vmatpush1.msra.mxu1 %v191_v40  ;;  %v22_v61 = vld [vmem:[%s3839_s1 + $0x8] sm:$0xff]  ;;  %v24_v62 = vld [vmem:[%s3839_s1 + $0x18] sm:$0xff]  ;;  %v21_v63 = vld [vmem:[%s3839_s1] sm:$0xff] }
  0x16   :  { %584 = vmatprep.subr.mxu0 %v162_v41  ;;  %655 = vmatprep.subr.mxu1 %v164_v42  ;;  %v23_v0 = vld [vmem:[%s3839_s1 + $0x10] sm:$0xff]  ;;  %v2172_v1 = vld [vmem:[%s3840_s0] sm:$0x1f]  ;;  %v446_v2 = vld [vmem:[%s3839_s1 + $0xd48] sm:$0x1f] }
  0x17   :  { %585 = vmatpush1.msra.mxu0 %v161_v43  ;;  %656 = vmatpush1.msra.mxu1 %v163_v44  ;;  %v448_v4 = vld [vmem:[%s3839_s1 + $0xd58] sm:$0x1f]  ;;  %v445_v5 = vld [vmem:[%s3839_s1 + $0xd40] sm:$0x1f]  ;;  %v447_v6 = vld [vmem:[%s3839_s1 + $0xd50] sm:$0x1f] }
  0x18   :  { %586 = vmatprep.subr.mxu0 %v134_v45  ;;  %657 = vmatprep.subr.mxu1 %v136_v46  ;;  %v418_v7 = vld [vmem:[%s3839_s1 + $0xc68] sm:$0xff]  ;;  %v420_v8 = vld [vmem:[%s3839_s1 + $0xc78] sm:$0xff]  ;;  %v417_v9 = vld [vmem:[%s3839_s1 + $0xc60] sm:$0xff] }
  0x19   :  { %587 = vmatpush1.msra.mxu0 %v133_v47  ;;  %658 = vmatpush1.msra.mxu1 %v135_v48  ;;  %v419_v10 = vld [vmem:[%s3839_s1 + $0xc70] sm:$0xff]  ;;  %v390_v11 = vld [vmem:[%s3839_s1 + $0xb88] sm:$0xff]  ;;  %v392_v12 = vld [vmem:[%s3839_s1 + $0xb98] sm:$0xff] }
  0x1a   :  { %588 = vmatprep.subr.mxu0 %v106_v49  ;;  %659 = vmatprep.subr.mxu1 %v108_v50  ;;  %v389_v13 = vld [vmem:[%s3839_s1 + $0xb80] sm:$0xff]  ;;  %v391_v14 = vld [vmem:[%s3839_s1 + $0xb90] sm:$0xff]  ;;  %v362_v15 = vld [vmem:[%s3839_s1 + $0xaa8] sm:$0xff] }
  0x1b   :  { %589 = vmatpush1.msra.mxu0 %v105_v51  ;;  %660 = vmatpush1.msra.mxu1 %v107_v52  ;;  %v364_v16 = vld [vmem:[%s3839_s1 + $0xab8] sm:$0xff]  ;;  %v361_v17 = vld [vmem:[%s3839_s1 + $0xaa0] sm:$0xff]  ;;  %v363_v18 = vld [vmem:[%s3839_s1 + $0xab0] sm:$0xff] }
  0x1c   :  { %590 = vmatprep.subr.mxu0 %v78_v53  ;;  %661 = vmatprep.subr.mxu1 %v80_v54  ;;  %v334_v19 = vld [vmem:[%s3839_s1 + $0x9c8] sm:$0xff]  ;;  %v336_v20 = vld [vmem:[%s3839_s1 + $0x9d8] sm:$0xff]  ;;  %v333_v21 = vld [vmem:[%s3839_s1 + $0x9c0] sm:$0xff] }
  0x1d   :  { %591 = vmatpush1.msra.mxu0 %v77_v55  ;;  %662 = vmatpush1.msra.mxu1 %v79_v56  ;;  %v335_v22 = vld [vmem:[%s3839_s1 + $0x9d0] sm:$0xff]  ;;  %v306_v23 = vld [vmem:[%s3839_s1 + $0x8e8] sm:$0xff]  ;;  %v308_v24 = vld [vmem:[%s3839_s1 + $0x8f8] sm:$0xff] }
  0x1e   :  { %592 = vmatprep.subr.mxu0 %v50_v57  ;;  %663 = vmatprep.subr.mxu1 %v52_v58  ;;  %v305_v25 = vld [vmem:[%s3839_s1 + $0x8e0] sm:$0xff]  ;;  %v307_v26 = vld [vmem:[%s3839_s1 + $0x8f0] sm:$0xff]  ;;  %v278_v27 = vld [vmem:[%s3839_s1 + $0x808] sm:$0xff] }
  0x1f   :  { %593 = vmatpush1.msra.mxu0 %v49_v59  ;;  %664 = vmatpush1.msra.mxu1 %v51_v60  ;;  %v280_v28 = vld [vmem:[%s3839_s1 + $0x818] sm:$0xff]  ;;  %v277_v29 = vld [vmem:[%s3839_s1 + $0x800] sm:$0xff]  ;;  %v279_v30 = vld [vmem:[%s3839_s1 + $0x810] sm:$0xff] }
  0x20   :  { %594 = vmatprep.subr.mxu0 %v22_v61  ;;  %665 = vmatprep.subr.mxu1 %v24_v62  ;;  %v250_v31 = vld [vmem:[%s3839_s1 + $0x728] sm:$0xff]  ;;  %v252_v32 = vld [vmem:[%s3839_s1 + $0x738] sm:$0xff]  ;;  %v249_v33 = vld [vmem:[%s3839_s1 + $0x720] sm:$0xff] }
  0x21   :  { %595 = vmatpush1.msra.mxu0 %v21_v63  ;;  %666 = vmatpush1.msra.mxu1 %v23_v0  ;;  %v251_v34 = vld [vmem:[%s3839_s1 + $0x730] sm:$0xff]  ;;  %v222_v35 = vld [vmem:[%s3839_s1 + $0x648] sm:$0xff]  ;;  %v224_v36 = vld [vmem:[%s3839_s1 + $0x658] sm:$0xff] }
  0x22   :  { %1892 = vmatmul.mubr.msk.f32.vlgmr.msra.gmra.mxu0 %vm475_vm1, %v2172_v1  ;;  %1896 = vmatprep.subr.msk.mxu0 %vm479_vm0, %v446_v2  ;;  %v221_v37 = vld [vmem:[%s3839_s1 + $0x640] sm:$0xff]  ;;  %v223_v38 = vld [vmem:[%s3839_s1 + $0x650] sm:$0xff]  ;;  %v194_v39 = vld [vmem:[%s3839_s1 + $0x568] sm:$0xff] }
  0x23   :  { %1899 = vmatprep.subr.msk.mxu1 %vm479_vm0, %v448_v4  ;;  %1895 = vmatmul.mubr.msk.f32.vlgmr.msra.gmra.mxu1 %vm475_vm1, %v2172_v1  ;;  %v196_v40 = vld [vmem:[%s3839_s1 + $0x578] sm:$0xff]  ;;  %v193_v41 = vld [vmem:[%s3839_s1 + $0x560] sm:$0xff]  ;;  %v195_v42 = vld [vmem:[%s3839_s1 + $0x570] sm:$0xff] }
  0x24   :  { %1897 = vmatpush1.msk.msra.mxu0 %vm479_vm0, %v445_v5  ;;  %1900 = vmatpush1.msk.msra.mxu1 %vm479_vm0, %v447_v6  ;;  %v166_v43 = vld [vmem:[%s3839_s1 + $0x488] sm:$0xff]  ;;  %v168_v44 = vld [vmem:[%s3839_s1 + $0x498] sm:$0xff]  ;;  %v165_v45 = vld [vmem:[%s3839_s1 + $0x480] sm:$0xff] }
  0x25   :  { %708 = vmatprep.subr.mxu0 %v418_v7  ;;  %779 = vmatprep.subr.mxu1 %v420_v8  ;;  %v167_v46 = vld [vmem:[%s3839_s1 + $0x490] sm:$0xff]  ;;  %v138_v47 = vld [vmem:[%s3839_s1 + $0x3a8] sm:$0xff]  ;;  %v140_v48 = vld [vmem:[%s3839_s1 + $0x3b8] sm:$0xff] }
  0x26   :  { %709 = vmatpush1.msra.mxu0 %v417_v9  ;;  %780 = vmatpush1.msra.mxu1 %v419_v10  ;;  %v137_v49 = vld [vmem:[%s3839_s1 + $0x3a0] sm:$0xff]  ;;  %v139_v50 = vld [vmem:[%s3839_s1 + $0x3b0] sm:$0xff]  ;;  %v110_v51 = vld [vmem:[%s3839_s1 + $0x2c8] sm:$0xff] }
  0x27   :  { %710 = vmatprep.subr.mxu0 %v390_v11  ;;  %781 = vmatprep.subr.mxu1 %v392_v12  ;;  %v112_v52 = vld [vmem:[%s3839_s1 + $0x2d8] sm:$0xff]  ;;  %v109_v53 = vld [vmem:[%s3839_s1 + $0x2c0] sm:$0xff]  ;;  %v111_v54 = vld [vmem:[%s3839_s1 + $0x2d0] sm:$0xff] }
  0x28   :  { %711 = vmatpush1.msra.mxu0 %v389_v13  ;;  %782 = vmatpush1.msra.mxu1 %v391_v14  ;;  %v82_v55 = vld [vmem:[%s3839_s1 + $0x1e8] sm:$0xff]  ;;  %v84_v56 = vld [vmem:[%s3839_s1 + $0x1f8] sm:$0xff]  ;;  %v81_v57 = vld [vmem:[%s3839_s1 + $0x1e0] sm:$0xff] }
  0x29   :  { %712 = vmatprep.subr.mxu0 %v362_v15  ;;  %783 = vmatprep.subr.mxu1 %v364_v16  ;;  %v83_v58 = vld [vmem:[%s3839_s1 + $0x1f0] sm:$0xff]  ;;  %v54_v59 = vld [vmem:[%s3839_s1 + $0x108] sm:$0xff]  ;;  %v56_v60 = vld [vmem:[%s3839_s1 + $0x118] sm:$0xff] }
  0x2a   :  { %713 = vmatpush1.msra.mxu0 %v361_v17  ;;  %784 = vmatpush1.msra.mxu1 %v363_v18  ;;  %v53_v61 = vld [vmem:[%s3839_s1 + $0x100] sm:$0xff]  ;;  %v55_v62 = vld [vmem:[%s3839_s1 + $0x110] sm:$0xff]  ;;  %v26_v63 = vld [vmem:[%s3839_s1 + $0x28] sm:$0xff] }
  0x2b   :  { %714 = vmatprep.subr.mxu0 %v334_v19  ;;  %785 = vmatprep.subr.mxu1 %v336_v20  ;;  %v28_v0 = vld [vmem:[%s3839_s1 + $0x38] sm:$0xff]  ;;  %v25_v2 = vld [vmem:[%s3839_s1 + $0x20] sm:$0xff]  ;;  %v27_v4 = vld [vmem:[%s3839_s1 + $0x30] sm:$0xff] }
  0x2c   :  { %715 = vmatpush1.msra.mxu0 %v333_v21  ;;  %786 = vmatpush1.msra.mxu1 %v335_v22  ;;  %v450_v5 = vld [vmem:[%s3839_s1 + $0xd68] sm:$0x1f]  ;;  %v452_v6 = vld [vmem:[%s3839_s1 + $0xd78] sm:$0x1f]  ;;  %v449_v7 = vld [vmem:[%s3839_s1 + $0xd60] sm:$0x1f] }
  0x2d   :  { %716 = vmatprep.subr.mxu0 %v306_v23  ;;  %787 = vmatprep.subr.mxu1 %v308_v24  ;;  %v451_v8 = vld [vmem:[%s3839_s1 + $0xd70] sm:$0x1f]  ;;  %v422_v9 = vld [vmem:[%s3839_s1 + $0xc88] sm:$0xff]  ;;  %v424_v10 = vld [vmem:[%s3839_s1 + $0xc98] sm:$0xff] }
  0x2e   :  { %717 = vmatpush1.msra.mxu0 %v305_v25  ;;  %788 = vmatpush1.msra.mxu1 %v307_v26  ;;  %v421_v11 = vld [vmem:[%s3839_s1 + $0xc80] sm:$0xff]  ;;  %v423_v12 = vld [vmem:[%s3839_s1 + $0xc90] sm:$0xff]  ;;  %v394_v13 = vld [vmem:[%s3839_s1 + $0xba8] sm:$0xff] }
  0x2f   :  { %718 = vmatprep.subr.mxu0 %v278_v27  ;;  %789 = vmatprep.subr.mxu1 %v280_v28  ;;  %v396_v14 = vld [vmem:[%s3839_s1 + $0xbb8] sm:$0xff]  ;;  %v393_v15 = vld [vmem:[%s3839_s1 + $0xba0] sm:$0xff]  ;;  %v395_v16 = vld [vmem:[%s3839_s1 + $0xbb0] sm:$0xff] }
  0x30   :  { %719 = vmatpush1.msra.mxu0 %v277_v29  ;;  %790 = vmatpush1.msra.mxu1 %v279_v30  ;;  %v366_v17 = vld [vmem:[%s3839_s1 + $0xac8] sm:$0xff]  ;;  %v368_v18 = vld [vmem:[%s3839_s1 + $0xad8] sm:$0xff]  ;;  %v365_v19 = vld [vmem:[%s3839_s1 + $0xac0] sm:$0xff] }
  0x31   :  { %720 = vmatprep.subr.mxu0 %v250_v31  ;;  %791 = vmatprep.subr.mxu1 %v252_v32  ;;  %v367_v20 = vld [vmem:[%s3839_s1 + $0xad0] sm:$0xff]  ;;  %v338_v21 = vld [vmem:[%s3839_s1 + $0x9e8] sm:$0xff]  ;;  %v340_v22 = vld [vmem:[%s3839_s1 + $0x9f8] sm:$0xff] }
  0x32   :  { %721 = vmatpush1.msra.mxu0 %v249_v33  ;;  %792 = vmatpush1.msra.mxu1 %v251_v34  ;;  %v337_v23 = vld [vmem:[%s3839_s1 + $0x9e0] sm:$0xff]  ;;  %v339_v24 = vld [vmem:[%s3839_s1 + $0x9f0] sm:$0xff]  ;;  %v310_v25 = vld [vmem:[%s3839_s1 + $0x908] sm:$0xff] }
  0x33   :  { %722 = vmatprep.subr.mxu0 %v222_v35  ;;  %793 = vmatprep.subr.mxu1 %v224_v36  ;;  %v312_v26 = vld [vmem:[%s3839_s1 + $0x918] sm:$0xff]  ;;  %v309_v27 = vld [vmem:[%s3839_s1 + $0x900] sm:$0xff]  ;;  %v311_v28 = vld [vmem:[%s3839_s1 + $0x910] sm:$0xff] }
  0x34   :  { %723 = vmatpush1.msra.mxu0 %v221_v37  ;;  %794 = vmatpush1.msra.mxu1 %v223_v38  ;;  %v282_v29 = vld [vmem:[%s3839_s1 + $0x828] sm:$0xff]  ;;  %v284_v30 = vld [vmem:[%s3839_s1 + $0x838] sm:$0xff]  ;;  %v281_v31 = vld [vmem:[%s3839_s1 + $0x820] sm:$0xff] }
  0x35   :  { %724 = vmatprep.subr.mxu0 %v194_v39  ;;  %795 = vmatprep.subr.mxu1 %v196_v40  ;;  %v283_v32 = vld [vmem:[%s3839_s1 + $0x830] sm:$0xff]  ;;  %v254_v33 = vld [vmem:[%s3839_s1 + $0x748] sm:$0xff]  ;;  %v256_v34 = vld [vmem:[%s3839_s1 + $0x758] sm:$0xff] }
  0x36   :  { %725 = vmatpush1.msra.mxu0 %v193_v41  ;;  %796 = vmatpush1.msra.mxu1 %v195_v42  ;;  %v253_v35 = vld [vmem:[%s3839_s1 + $0x740] sm:$0xff]  ;;  %v255_v36 = vld [vmem:[%s3839_s1 + $0x750] sm:$0xff]  ;;  %v226_v37 = vld [vmem:[%s3839_s1 + $0x668] sm:$0xff] }
  0x37   :  { %726 = vmatprep.subr.mxu0 %v166_v43  ;;  %797 = vmatprep.subr.mxu1 %v168_v44  ;;  %v228_v38 = vld [vmem:[%s3839_s1 + $0x678] sm:$0xff]  ;;  %v225_v39 = vld [vmem:[%s3839_s1 + $0x660] sm:$0xff]  ;;  %v227_v40 = vld [vmem:[%s3839_s1 + $0x670] sm:$0xff] }
  0x38   :  { %727 = vmatpush1.msra.mxu0 %v165_v45  ;;  %798 = vmatpush1.msra.mxu1 %v167_v46  ;;  %v198_v41 = vld [vmem:[%s3839_s1 + $0x588] sm:$0xff]  ;;  %v200_v42 = vld [vmem:[%s3839_s1 + $0x598] sm:$0xff]  ;;  %v197_v43 = vld [vmem:[%s3839_s1 + $0x580] sm:$0xff] }
  0x39   :  { %728 = vmatprep.subr.mxu0 %v138_v47  ;;  %799 = vmatprep.subr.mxu1 %v140_v48  ;;  %v199_v44 = vld [vmem:[%s3839_s1 + $0x590] sm:$0xff]  ;;  %v170_v45 = vld [vmem:[%s3839_s1 + $0x4a8] sm:$0xff]  ;;  %v172_v46 = vld [vmem:[%s3839_s1 + $0x4b8] sm:$0xff] }
  0x3a   :  { %729 = vmatpush1.msra.mxu0 %v137_v49  ;;  %800 = vmatpush1.msra.mxu1 %v139_v50  ;;  %v169_v47 = vld [vmem:[%s3839_s1 + $0x4a0] sm:$0xff]  ;;  %v171_v48 = vld [vmem:[%s3839_s1 + $0x4b0] sm:$0xff]  ;;  %v142_v49 = vld [vmem:[%s3839_s1 + $0x3c8] sm:$0xff] }
  0x3b   :  { %730 = vmatprep.subr.mxu0 %v110_v51  ;;  %801 = vmatprep.subr.mxu1 %v112_v52  ;;  %v144_v50 = vld [vmem:[%s3839_s1 + $0x3d8] sm:$0xff]  ;;  %v141_v51 = vld [vmem:[%s3839_s1 + $0x3c0] sm:$0xff]  ;;  %v143_v52 = vld [vmem:[%s3839_s1 + $0x3d0] sm:$0xff] }
  0x3c   :  { %731 = vmatpush1.msra.mxu0 %v109_v53  ;;  %802 = vmatpush1.msra.mxu1 %v111_v54  ;;  %v114_v53 = vld [vmem:[%s3839_s1 + $0x2e8] sm:$0xff]  ;;  %v116_v54 = vld [vmem:[%s3839_s1 + $0x2f8] sm:$0xff] }
  0x3d   :  { %732 = vmatprep.subr.mxu0 %v82_v55  ;;  %803 = vmatprep.subr.mxu1 %v84_v56  ;;  %v113_v55 = vld [vmem:[%s3839_s1 + $0x2e0] sm:$0xff]  ;;  %v115_v56 = vld [vmem:[%s3839_s1 + $0x2f0] sm:$0xff] }
  0x3e   :  { %733 = vmatpush1.msra.mxu0 %v81_v57  ;;  %804 = vmatpush1.msra.mxu1 %v83_v58  ;;  %v86_v57 = vld [vmem:[%s3839_s1 + $0x208] sm:$0xff]  ;;  %v88_v58 = vld [vmem:[%s3839_s1 + $0x218] sm:$0xff] }
  0x3f   :  { %734 = vmatprep.subr.mxu0 %v54_v59  ;;  %805 = vmatprep.subr.mxu1 %v56_v60  ;;  %v85_v59 = vld [vmem:[%s3839_s1 + $0x200] sm:$0xff]  ;;  %v87_v60 = vld [vmem:[%s3839_s1 + $0x210] sm:$0xff] }
  0x40   :  { %735 = vmatpush1.msra.mxu0 %v53_v61  ;;  %806 = vmatpush1.msra.mxu1 %v55_v62  ;;  %v58_v61 = vld [vmem:[%s3839_s1 + $0x128] sm:$0xff]  ;;  %v60_v62 = vld [vmem:[%s3839_s1 + $0x138] sm:$0xff] }
  0x41   :  { %736 = vmatprep.subr.mxu0 %v26_v63  ;;  %807 = vmatprep.subr.mxu1 %v28_v0  ;;  %v57_v63 = vld [vmem:[%s3839_s1 + $0x120] sm:$0xff]  ;;  %v59_v0 = vld [vmem:[%s3839_s1 + $0x130] sm:$0xff] }
  0x42   :  { %737 = vmatpush1.msra.mxu0 %v25_v2  ;;  %770 = vmatprep.mubr.f32.mxu0 %v1939_v3  ;;  %v30_v2 = vld [vmem:[%s3839_s1 + $0x48] sm:$0xff] }
  0x43   :  { %808 = vmatpush1.msra.mxu1 %v27_v4  ;;  %1898 = vmatmul.mubr.msk.f32.vlgmr.msra.gmra.mxu0 %vm475_vm1, %v2172_v1  ;;  %v32_v4 = vld [vmem:[%s3839_s1 + $0x58] sm:$0xff] }
  0x44   :  { %841 = vmatprep.mubr.f32.mxu1 %v1939_v3  ;;  %1902 = vmatprep.subr.msk.mxu0 %vm479_vm0, %v450_v5  ;;  %v29_v5 = vld [vmem:[%s3839_s1 + $0x40] sm:$0xff] }
  0x45   :  { %1905 = vmatprep.subr.msk.mxu1 %vm479_vm0, %v452_v6  ;;  %1901 = vmatmul.mubr.msk.f32.vlgmr.msra.gmra.mxu1 %vm475_vm1, %v2172_v1  ;;  %v31_v6 = vld [vmem:[%s3839_s1 + $0x50] sm:$0xff] }
  0x46   :  { %1903 = vmatpush1.msk.msra.mxu0 %vm479_vm0, %v449_v7  ;;  %1906 = vmatpush1.msk.msra.mxu1 %vm479_vm0, %v451_v8  ;;  %v454_v7 = vld [vmem:[%s3839_s1 + $0xd88] sm:$0x1f]  ;;  %v456_v8 = vld [vmem:[%s3839_s1 + $0xd98] sm:$0x1f] }
  0x47   :  { %850 = vmatprep.subr.mxu0 %v422_v9  ;;  %921 = vmatprep.subr.mxu1 %v424_v10  ;;  %v453_v9 = vld [vmem:[%s3839_s1 + $0xd80] sm:$0x1f]  ;;  %v455_v10 = vld [vmem:[%s3839_s1 + $0xd90] sm:$0x1f] }
  0x48   :  { %851 = vmatpush1.msra.mxu0 %v421_v11  ;;  %922 = vmatpush1.msra.mxu1 %v423_v12  ;;  %v426_v11 = vld [vmem:[%s3839_s1 + $0xca8] sm:$0xff]  ;;  %v428_v12 = vld [vmem:[%s3839_s1 + $0xcb8] sm:$0xff] }
  0x49   :  { %852 = vmatprep.subr.mxu0 %v394_v13  ;;  %923 = vmatprep.subr.mxu1 %v396_v14  ;;  %v425_v13 = vld [vmem:[%s3839_s1 + $0xca0] sm:$0xff]  ;;  %v427_v14 = vld [vmem:[%s3839_s1 + $0xcb0] sm:$0xff] }
  0x4a   :  { %853 = vmatpush1.msra.mxu0 %v393_v15  ;;  %924 = vmatpush1.msra.mxu1 %v395_v16  ;;  %v398_v15 = vld [vmem:[%s3839_s1 + $0xbc8] sm:$0xff]  ;;  %v400_v16 = vld [vmem:[%s3839_s1 + $0xbd8] sm:$0xff] }
  0x4b   :  { %854 = vmatprep.subr.mxu0 %v366_v17  ;;  %925 = vmatprep.subr.mxu1 %v368_v18  ;;  %v397_v17 = vld [vmem:[%s3839_s1 + $0xbc0] sm:$0xff]  ;;  %v399_v18 = vld [vmem:[%s3839_s1 + $0xbd0] sm:$0xff] }
  0x4c   :  { %855 = vmatpush1.msra.mxu0 %v365_v19  ;;  %926 = vmatpush1.msra.mxu1 %v367_v20  ;;  %v469_v19 = vld [vmem:[%s3841_s2] sm:$0x1f]  ;;  %v370_v20 = vld [vmem:[%s3839_s1 + $0xae8] sm:$0xff] }
  0x4d   :  { %856 = vmatprep.subr.mxu0 %v338_v21  ;;  %927 = vmatprep.subr.mxu1 %v340_v22  ;;  %v372_v21 = vld [vmem:[%s3839_s1 + $0xaf8] sm:$0xff]  ;;  %v1940_v22 = vmov 0  }
  0x4e   :  { %857 = vmatpush1.msra.mxu0 %v337_v23  ;;  %928 = vmatpush1.msra.mxu1 %v339_v24  ;;  %v369_v23 = vld [vmem:[%s3839_s1 + $0xae0] sm:$0xff]  ;;  %v371_v24 = vld [vmem:[%s3839_s1 + $0xaf0] sm:$0xff] }
  0x4f   :  { %858 = vmatprep.subr.mxu0 %v310_v25  ;;  %929 = vmatprep.subr.mxu1 %v312_v26  ;;  %v342_v25 = vld [vmem:[%s3839_s1 + $0xa08] sm:$0xff]  ;;  %v344_v26 = vld [vmem:[%s3839_s1 + $0xa18] sm:$0xff] }
  0x50   :  { %859 = vmatpush1.msra.mxu0 %v309_v27  ;;  %930 = vmatpush1.msra.mxu1 %v311_v28  ;;  %v341_v27 = vld [vmem:[%s3839_s1 + $0xa00] sm:$0xff]  ;;  %v343_v28 = vld [vmem:[%s3839_s1 + $0xa10] sm:$0xff] }
  0x51   :  { %860 = vmatprep.subr.mxu0 %v282_v29  ;;  %931 = vmatprep.subr.mxu1 %v284_v30  ;;  %v314_v29 = vld [vmem:[%s3839_s1 + $0x928] sm:$0xff]  ;;  %v316_v30 = vld [vmem:[%s3839_s1 + $0x938] sm:$0xff] }
  0x52   :  { %861 = vmatpush1.msra.mxu0 %v281_v31  ;;  %932 = vmatpush1.msra.mxu1 %v283_v32  ;;  %v313_v31 = vld [vmem:[%s3839_s1 + $0x920] sm:$0xff]  ;;  %v315_v32 = vld [vmem:[%s3839_s1 + $0x930] sm:$0xff] }
  0x53   :  { %862 = vmatprep.subr.mxu0 %v254_v33  ;;  %933 = vmatprep.subr.mxu1 %v256_v34  ;;  %v286_v33 = vld [vmem:[%s3839_s1 + $0x848] sm:$0xff]  ;;  %v288_v34 = vld [vmem:[%s3839_s1 + $0x858] sm:$0xff] }
  0x54   :  { %863 = vmatpush1.msra.mxu0 %v253_v35  ;;  %934 = vmatpush1.msra.mxu1 %v255_v36  ;;  %v285_v35 = vld [vmem:[%s3839_s1 + $0x840] sm:$0xff]  ;;  %v287_v36 = vld [vmem:[%s3839_s1 + $0x850] sm:$0xff] }
  0x55   :  { %864 = vmatprep.subr.mxu0 %v226_v37  ;;  %935 = vmatprep.subr.mxu1 %v228_v38  ;;  %v258_v37 = vld [vmem:[%s3839_s1 + $0x768] sm:$0xff]  ;;  %v260_v38 = vld [vmem:[%s3839_s1 + $0x778] sm:$0xff] }
  0x56   :  { %865 = vmatpush1.msra.mxu0 %v225_v39  ;;  %936 = vmatpush1.msra.mxu1 %v227_v40  ;;  %v257_v39 = vld [vmem:[%s3839_s1 + $0x760] sm:$0xff]  ;;  %v259_v40 = vld [vmem:[%s3839_s1 + $0x770] sm:$0xff] }
  0x57   :  { %866 = vmatprep.subr.mxu0 %v198_v41  ;;  %937 = vmatprep.subr.mxu1 %v200_v42  ;;  %v230_v41 = vld [vmem:[%s3839_s1 + $0x688] sm:$0xff]  ;;  %v232_v42 = vld [vmem:[%s3839_s1 + $0x698] sm:$0xff] }
  0x58   :  { %867 = vmatpush1.msra.mxu0 %v197_v43  ;;  %938 = vmatpush1.msra.mxu1 %v199_v44  ;;  %v229_v43 = vld [vmem:[%s3839_s1 + $0x680] sm:$0xff]  ;;  %v231_v44 = vld [vmem:[%s3839_s1 + $0x690] sm:$0xff] }
  0x59   :  { %868 = vmatprep.subr.mxu0 %v170_v45  ;;  %939 = vmatprep.subr.mxu1 %v172_v46  ;;  %v202_v45 = vld [vmem:[%s3839_s1 + $0x5a8] sm:$0xff]  ;;  %v204_v46 = vld [vmem:[%s3839_s1 + $0x5b8] sm:$0xff] }
  0x5a   :  { %869 = vmatpush1.msra.mxu0 %v169_v47  ;;  %940 = vmatpush1.msra.mxu1 %v171_v48  ;;  %v201_v47 = vld [vmem:[%s3839_s1 + $0x5a0] sm:$0xff]  ;;  %v203_v48 = vld [vmem:[%s3839_s1 + $0x5b0] sm:$0xff] }
  0x5b   :  { %870 = vmatprep.subr.mxu0 %v142_v49  ;;  %941 = vmatprep.subr.mxu1 %v144_v50  ;;  %v174_v49 = vld [vmem:[%s3839_s1 + $0x4c8] sm:$0xff]  ;;  %v176_v50 = vld [vmem:[%s3839_s1 + $0x4d8] sm:$0xff] }
  0x5c   :  { %871 = vmatpush1.msra.mxu0 %v141_v51  ;;  %942 = vmatpush1.msra.mxu1 %v143_v52  ;;  %v173_v51 = vld [vmem:[%s3839_s1 + $0x4c0] sm:$0xff]  ;;  %v175_v52 = vld [vmem:[%s3839_s1 + $0x4d0] sm:$0xff] }
  0x5d   :  { %872 = vmatprep.subr.mxu0 %v114_v53  ;;  %943 = vmatprep.subr.mxu1 %v116_v54  ;;  %v146_v53 = vld [vmem:[%s3839_s1 + $0x3e8] sm:$0xff]  ;;  %v148_v54 = vld [vmem:[%s3839_s1 + $0x3f8] sm:$0xff] }
  0x5e   :  { %873 = vmatpush1.msra.mxu0 %v113_v55  ;;  %944 = vmatpush1.msra.mxu1 %v115_v56  ;;  %v145_v55 = vld [vmem:[%s3839_s1 + $0x3e0] sm:$0xff]  ;;  %v147_v56 = vld [vmem:[%s3839_s1 + $0x3f0] sm:$0xff] }
  0x5f   :  { %874 = vmatprep.subr.mxu0 %v86_v57  ;;  %945 = vmatprep.subr.mxu1 %v88_v58  ;;  %v118_v57 = vld [vmem:[%s3839_s1 + $0x308] sm:$0xff]  ;;  %v120_v58 = vld [vmem:[%s3839_s1 + $0x318] sm:$0xff] }
  0x60   :  { %875 = vmatpush1.msra.mxu0 %v85_v59  ;;  %946 = vmatpush1.msra.mxu1 %v87_v60  ;;  %v117_v59 = vld [vmem:[%s3839_s1 + $0x300] sm:$0xff]  ;;  %v119_v60 = vld [vmem:[%s3839_s1 + $0x310] sm:$0xff] }
  0x61   :  { %876 = vmatprep.subr.mxu0 %v58_v61  ;;  %947 = vmatprep.subr.mxu1 %v60_v62  ;;  %v90_v61 = vld [vmem:[%s3839_s1 + $0x228] sm:$0xff]  ;;  %v92_v62 = vld [vmem:[%s3839_s1 + $0x238] sm:$0xff] }
  0x62   :  { %877 = vmatpush1.msra.mxu0 %v57_v63  ;;  %948 = vmatpush1.msra.mxu1 %v59_v0  ;;  %v89_v63 = vld [vmem:[%s3839_s1 + $0x220] sm:$0xff]  ;;  %v91_v0 = vld [vmem:[%s3839_s1 + $0x230] sm:$0xff] }
  0x63   :  { %878 = vmatprep.subr.mxu0 %v30_v2  ;;  %949 = vmatprep.subr.mxu1 %v32_v4  ;;  %v62_v2 = vld [vmem:[%s3839_s1 + $0x148] sm:$0xff]  ;;  %v64_v4 = vld [vmem:[%s3839_s1 + $0x158] sm:$0xff] }
  0x64   :  { %879 = vmatpush1.msra.mxu0 %v29_v5  ;;  %912 = vmatprep.mubr.f32.mxu0 %v1939_v3  ;;  %v61_v5 = vld [vmem:[%s3839_s1 + $0x140] sm:$0xff] }
  0x65   :  { %950 = vmatpush1.msra.mxu1 %v31_v6  ;;  %1904 = vmatmul.mubr.msk.f32.vlgmr.msra.gmra.mxu0 %vm475_vm1, %v2172_v1  ;;  %v63_v6 = vld [vmem:[%s3839_s1 + $0x150] sm:$0xff] }
  0x66   :  { %983 = vmatprep.mubr.f32.mxu1 %v1939_v3  ;;  %1908 = vmatprep.subr.msk.mxu0 %vm479_vm0, %v454_v7  ;;  %v34_v7 = vld [vmem:[%s3839_s1 + $0x68] sm:$0xff] }
  0x67   :  { %1911 = vmatprep.subr.msk.mxu1 %vm479_vm0, %v456_v8  ;;  %1907 = vmatmul.mubr.msk.f32.vlgmr.msra.gmra.mxu1 %vm475_vm1, %v2172_v1  ;;  %v36_v8 = vld [vmem:[%s3839_s1 + $0x78] sm:$0xff] }
  0x68   :  { %1909 = vmatpush1.msk.msra.mxu0 %vm479_vm0, %v453_v9  ;;  %1912 = vmatpush1.msk.msra.mxu1 %vm479_vm0, %v455_v10  ;;  %v33_v9 = vld [vmem:[%s3839_s1 + $0x60] sm:$0xff]  ;;  %v35_v10 = vld [vmem:[%s3839_s1 + $0x70] sm:$0xff] }
  0x69   :  { %992 = vmatprep.subr.mxu0 %v426_v11  ;;  %1063 = vmatprep.subr.mxu1 %v428_v12  ;;  %v458_v11 = vld [vmem:[%s3839_s1 + $0xda8] sm:$0x1f]  ;;  %v460_v12 = vld [vmem:[%s3839_s1 + $0xdb8] sm:$0x1f] }
  0x6a   :  { %993 = vmatpush1.msra.mxu0 %v425_v13  ;;  %1064 = vmatpush1.msra.mxu1 %v427_v14  ;;  %v457_v13 = vld [vmem:[%s3839_s1 + $0xda0] sm:$0x1f]  ;;  %v459_v14 = vld [vmem:[%s3839_s1 + $0xdb0] sm:$0x1f] }
  0x6b   :  { %994 = vmatprep.subr.mxu0 %v398_v15  ;;  %1065 = vmatprep.subr.mxu1 %v400_v16  ;;  %v430_v15 = vld [vmem:[%s3839_s1 + $0xcc8] sm:$0xff]  ;;  %v432_v16 = vld [vmem:[%s3839_s1 + $0xcd8] sm:$0xff] }
  0x6c   :  { %1934 = vset.pattern.permute.xlu0 %v1940_v22  ;;  %995 = vmatpush1.msra.mxu0 %v397_v17  ;;  %v429_v17 = vld [vmem:[%s3839_s1 + $0xcc0] sm:$0xff] }
  0x6d   :  { %1066 = vmatpush1.msra.mxu1 %v399_v18  ;;  %472 = vperm.xlu0 %1934, %v469_v19   ;;  %v431_v18 = vld [vmem:[%s3839_s1 + $0xcd0] sm:$0xff]  ;;  %v402_v19 = vld [vmem:[%s3839_s1 + $0xbe8] sm:$0xff] }
  0x6e   :  { %996 = vmatprep.subr.mxu0 %v370_v20  ;;  %1067 = vmatprep.subr.mxu1 %v372_v21  ;;  %v401_v20 = vld [vmem:[%s3839_s1 + $0xbe0] sm:$0xff]  ;;  %v403_v21 = vld [vmem:[%s3839_s1 + $0xbf0] sm:$0xff] }
  0x6f   :  { %997 = vmatpush1.msra.mxu0 %v369_v23  ;;  %1068 = vmatpush1.msra.mxu1 %v371_v24  ;;  %v374_v23 = vld [vmem:[%s3839_s1 + $0xb08] sm:$0xff]  ;;  %v376_v24 = vld [vmem:[%s3839_s1 + $0xb18] sm:$0xff] }
  0x70   :  { %998 = vmatprep.subr.mxu0 %v342_v25  ;;  %1069 = vmatprep.subr.mxu1 %v344_v26  ;;  %v373_v25 = vld [vmem:[%s3839_s1 + $0xb00] sm:$0xff]  ;;  %v375_v26 = vld [vmem:[%s3839_s1 + $0xb10] sm:$0xff] }
  0x71   :  { %999 = vmatpush1.msra.mxu0 %v341_v27  ;;  %1070 = vmatpush1.msra.mxu1 %v343_v28  ;;  %v346_v27 = vld [vmem:[%s3839_s1 + $0xa28] sm:$0xff]  ;;  %v348_v28 = vld [vmem:[%s3839_s1 + $0xa38] sm:$0xff] }
  0x72   :  { %1000 = vmatprep.subr.mxu0 %v314_v29  ;;  %1071 = vmatprep.subr.mxu1 %v316_v30  ;;  %v345_v29 = vld [vmem:[%s3839_s1 + $0xa20] sm:$0xff]  ;;  %v347_v30 = vld [vmem:[%s3839_s1 + $0xa30] sm:$0xff] }
  0x73   :  { %1001 = vmatpush1.msra.mxu0 %v313_v31  ;;  %1072 = vmatpush1.msra.mxu1 %v315_v32  ;;  %v318_v31 = vld [vmem:[%s3839_s1 + $0x948] sm:$0xff]  ;;  %v320_v32 = vld [vmem:[%s3839_s1 + $0x958] sm:$0xff] }
  0x74   :  { %1002 = vmatprep.subr.mxu0 %v286_v33  ;;  %1073 = vmatprep.subr.mxu1 %v288_v34  ;;  %v317_v33 = vld [vmem:[%s3839_s1 + $0x940] sm:$0xff]  ;;  %v319_v34 = vld [vmem:[%s3839_s1 + $0x950] sm:$0xff] }
  0x75   :  { %1003 = vmatpush1.msra.mxu0 %v285_v35  ;;  %1074 = vmatpush1.msra.mxu1 %v287_v36  ;;  %v290_v35 = vld [vmem:[%s3839_s1 + $0x868] sm:$0xff]  ;;  %v292_v36 = vld [vmem:[%s3839_s1 + $0x878] sm:$0xff] }
  0x76   :  { %1004 = vmatprep.subr.mxu0 %v258_v37  ;;  %1075 = vmatprep.subr.mxu1 %v260_v38  ;;  %v289_v37 = vld [vmem:[%s3839_s1 + $0x860] sm:$0xff]  ;;  %v291_v38 = vld [vmem:[%s3839_s1 + $0x870] sm:$0xff] }
  0x77   :  { %1005 = vmatpush1.msra.mxu0 %v257_v39  ;;  %1076 = vmatpush1.msra.mxu1 %v259_v40  ;;  %v262_v39 = vld [vmem:[%s3839_s1 + $0x788] sm:$0xff]  ;;  %v264_v40 = vld [vmem:[%s3839_s1 + $0x798] sm:$0xff] }
  0x78   :  { %1006 = vmatprep.subr.mxu0 %v230_v41  ;;  %1077 = vmatprep.subr.mxu1 %v232_v42  ;;  %v261_v41 = vld [vmem:[%s3839_s1 + $0x780] sm:$0xff]  ;;  %v263_v42 = vld [vmem:[%s3839_s1 + $0x790] sm:$0xff] }
  0x79   :  { %1007 = vmatpush1.msra.mxu0 %v229_v43  ;;  %1078 = vmatpush1.msra.mxu1 %v231_v44  ;;  %v234_v43 = vld [vmem:[%s3839_s1 + $0x6a8] sm:$0xff]  ;;  %v236_v44 = vld [vmem:[%s3839_s1 + $0x6b8] sm:$0xff] }
  0x7a   :  { %1008 = vmatprep.subr.mxu0 %v202_v45  ;;  %1079 = vmatprep.subr.mxu1 %v204_v46  ;;  %v233_v45 = vld [vmem:[%s3839_s1 + $0x6a0] sm:$0xff]  ;;  %v235_v46 = vld [vmem:[%s3839_s1 + $0x6b0] sm:$0xff] }
  0x7b   :  { %1009 = vmatpush1.msra.mxu0 %v201_v47  ;;  %1080 = vmatpush1.msra.mxu1 %v203_v48  ;;  %v206_v47 = vld [vmem:[%s3839_s1 + $0x5c8] sm:$0xff]  ;;  %v208_v48 = vld [vmem:[%s3839_s1 + $0x5d8] sm:$0xff] }
  0x7c   :  { %1010 = vmatprep.subr.mxu0 %v174_v49  ;;  %1081 = vmatprep.subr.mxu1 %v176_v50  ;;  %v205_v49 = vld [vmem:[%s3839_s1 + $0x5c0] sm:$0xff]  ;;  %v207_v50 = vld [vmem:[%s3839_s1 + $0x5d0] sm:$0xff] }
  0x7d   :  { %1011 = vmatpush1.msra.mxu0 %v173_v51  ;;  %1082 = vmatpush1.msra.mxu1 %v175_v52  ;;  %v178_v51 = vld [vmem:[%s3839_s1 + $0x4e8] sm:$0xff]  ;;  %v180_v52 = vld [vmem:[%s3839_s1 + $0x4f8] sm:$0xff] }
  0x7e   :  { %1012 = vmatprep.subr.mxu0 %v146_v53  ;;  %1083 = vmatprep.subr.mxu1 %v148_v54  ;;  %v177_v53 = vld [vmem:[%s3839_s1 + $0x4e0] sm:$0xff]  ;;  %v179_v54 = vld [vmem:[%s3839_s1 + $0x4f0] sm:$0xff] }
  0x7f   :  { %1013 = vmatpush1.msra.mxu0 %v145_v55  ;;  %1084 = vmatpush1.msra.mxu1 %v147_v56  ;;  %v150_v55 = vld [vmem:[%s3839_s1 + $0x408] sm:$0xff]  ;;  %v152_v56 = vld [vmem:[%s3839_s1 + $0x418] sm:$0xff] }
  0x80   :  { %1014 = vmatprep.subr.mxu0 %v118_v57  ;;  %1085 = vmatprep.subr.mxu1 %v120_v58  ;;  %v149_v57 = vld [vmem:[%s3839_s1 + $0x400] sm:$0xff]  ;;  %v151_v58 = vld [vmem:[%s3839_s1 + $0x410] sm:$0xff] }
  0x81   :  { %1015 = vmatpush1.msra.mxu0 %v117_v59  ;;  %1086 = vmatpush1.msra.mxu1 %v119_v60  ;;  %v122_v59 = vld [vmem:[%s3839_s1 + $0x328] sm:$0xff]  ;;  %v124_v60 = vld [vmem:[%s3839_s1 + $0x338] sm:$0xff] }
  0x82   :  { %1016 = vmatprep.subr.mxu0 %v90_v61  ;;  %1087 = vmatprep.subr.mxu1 %v92_v62  ;;  %v121_v61 = vld [vmem:[%s3839_s1 + $0x320] sm:$0xff]  ;;  %v123_v62 = vld [vmem:[%s3839_s1 + $0x330] sm:$0xff] }
  0x83   :  { %1017 = vmatpush1.msra.mxu0 %v89_v63  ;;  %1088 = vmatpush1.msra.mxu1 %v91_v0  ;;  %v94_v63 = vld [vmem:[%s3839_s1 + $0x248] sm:$0xff]  ;;  %v96_v0 = vld [vmem:[%s3839_s1 + $0x258] sm:$0xff] }
  0x84   :  { %1018 = vmatprep.subr.mxu0 %v62_v2  ;;  %1089 = vmatprep.subr.mxu1 %v64_v4  ;;  %v93_v2 = vld [vmem:[%s3839_s1 + $0x240] sm:$0xff]  ;;  %v95_v4 = vld [vmem:[%s3839_s1 + $0x250] sm:$0xff] }
  0x85   :  { %1019 = vmatpush1.msra.mxu0 %v61_v5  ;;  %1090 = vmatpush1.msra.mxu1 %v63_v6  ;;  %v66_v5 = vld [vmem:[%s3839_s1 + $0x168] sm:$0xff]  ;;  %v68_v6 = vld [vmem:[%s3839_s1 + $0x178] sm:$0xff] }
  0x86   :  { %1020 = vmatprep.subr.mxu0 %v34_v7  ;;  %1091 = vmatprep.subr.mxu1 %v36_v8  ;;  %v65_v7 = vld [vmem:[%s3839_s1 + $0x160] sm:$0xff]  ;;  %v67_v8 = vld [vmem:[%s3839_s1 + $0x170] sm:$0xff] }
  0x87   :  { %1021 = vmatpush1.msra.mxu0 %v33_v9  ;;  %1054 = vmatprep.mubr.f32.mxu0 %v1939_v3  ;;  %v38_v9 = vld [vmem:[%s3839_s1 + $0x88] sm:$0xff] }
  0x88   :  { %1092 = vmatpush1.msra.mxu1 %v35_v10  ;;  %1910 = vmatmul.mubr.msk.f32.vlgmr.msra.gmra.mxu0 %vm475_vm1, %v2172_v1  ;;  %v40_v10 = vld [vmem:[%s3839_s1 + $0x98] sm:$0xff] }
  0x89   :  { %1125 = vmatprep.mubr.f32.mxu1 %v1939_v3  ;;  %1914 = vmatprep.subr.msk.mxu0 %vm479_vm0, %v458_v11  ;;  %v37_v11 = vld [vmem:[%s3839_s1 + $0x80] sm:$0xff] }
  0x8a   :  { %1917 = vmatprep.subr.msk.mxu1 %vm479_vm0, %v460_v12  ;;  %1913 = vmatmul.mubr.msk.f32.vlgmr.msra.gmra.mxu1 %vm475_vm1, %v2172_v1  ;;  %v404_v1 = vld [vmem:[%s3839_s1 + $0xbf8] sm:$0xff]  ;;  %v39_v12 = vld [vmem:[%s3839_s1 + $0x90] sm:$0xff] }
  0x8b   :  { %1915 = vmatpush1.msk.msra.mxu0 %vm479_vm0, %v457_v13  ;;  %1918 = vmatpush1.msk.msra.mxu1 %vm479_vm0, %v459_v14  ;;  %v462_v13 = vld [vmem:[%s3839_s1 + $0xdc8] sm:$0x1f]  ;;  %v464_v14 = vld [vmem:[%s3839_s1 + $0xdd8] sm:$0x1f] }
  0x8c   :  { %1134 = vmatprep.subr.mxu0 %v430_v15  ;;  %1205 = vmatprep.subr.mxu1 %v432_v16  ;;  %v2994_v15 = vld [vmem:[%s3840_s0] sm:$0x1f] }
  0x8d   :  { %1135 = vmatpush1.msra.mxu0 %v429_v17  ;;  %1206 = vmatpush1.msra.mxu1 %v431_v18  ;;  %v461_v16 = vld [vmem:[%s3839_s1 + $0xdc0] sm:$0x1f]  ;;  %v463_v17 = vld [vmem:[%s3839_s1 + $0xdd0] sm:$0x1f]  ;;  %v434_v18 = vld [vmem:[%s3839_s1 + $0xce8] sm:$0xff] }
  0x8e   :  { %1136 = vmatprep.subr.mxu0 %v402_v19  ;;  %1207 = vmatprep.subr.mxu1 %v404_v1  ;;  %v436_v19 = vld [vmem:[%s3839_s1 + $0xcf8] sm:$0xff]  ;;  %v433_v1 = vld [vmem:[%s3839_s1 + $0xce0] sm:$0xff] }
  0x8f   :  { %1137 = vmatpush1.msra.mxu0 %v401_v20  ;;  %1208 = vmatpush1.msra.mxu1 %v403_v21  ;;  %v435_v20 = vld [vmem:[%s3839_s1 + $0xcf0] sm:$0xff]  ;;  %v406_v21 = vld [vmem:[%s3839_s1 + $0xc08] sm:$0xff] }
  0x90   :  { %1138 = vmatprep.subr.mxu0 %v374_v23  ;;  %1209 = vmatprep.subr.mxu1 %v376_v24  ;;  %v408_v23 = vld [vmem:[%s3839_s1 + $0xc18] sm:$0xff]  ;;  %v405_v24 = vld [vmem:[%s3839_s1 + $0xc00] sm:$0xff] }
  0x91   :  { %1139 = vmatpush1.msra.mxu0 %v373_v25  ;;  %1210 = vmatpush1.msra.mxu1 %v375_v26  ;;  %v407_v25 = vld [vmem:[%s3839_s1 + $0xc10] sm:$0xff]  ;;  %v378_v26 = vld [vmem:[%s3839_s1 + $0xb28] sm:$0xff] }
  0x92   :  { %1140 = vmatprep.subr.mxu0 %v346_v27  ;;  %1211 = vmatprep.subr.mxu1 %v348_v28  ;;  %v380_v27 = vld [vmem:[%s3839_s1 + $0xb38] sm:$0xff]  ;;  %v377_v28 = vld [vmem:[%s3839_s1 + $0xb20] sm:$0xff] }
  0x93   :  { %1141 = vmatpush1.msra.mxu0 %v345_v29  ;;  %1212 = vmatpush1.msra.mxu1 %v347_v30  ;;  %v379_v29 = vld [vmem:[%s3839_s1 + $0xb30] sm:$0xff]  ;;  %v350_v30 = vld [vmem:[%s3839_s1 + $0xa48] sm:$0xff] }
  0x94   :  { %1142 = vmatprep.subr.mxu0 %v318_v31  ;;  %1213 = vmatprep.subr.mxu1 %v320_v32  ;;  %v352_v31 = vld [vmem:[%s3839_s1 + $0xa58] sm:$0xff]  ;;  %v349_v32 = vld [vmem:[%s3839_s1 + $0xa40] sm:$0xff] }
  0x95   :  { %1143 = vmatpush1.msra.mxu0 %v317_v33  ;;  %1214 = vmatpush1.msra.mxu1 %v319_v34  ;;  %v351_v33 = vld [vmem:[%s3839_s1 + $0xa50] sm:$0xff]  ;;  %v322_v34 = vld [vmem:[%s3839_s1 + $0x968] sm:$0xff] }
  0x96   :  { %1144 = vmatprep.subr.mxu0 %v290_v35  ;;  %1215 = vmatprep.subr.mxu1 %v292_v36  ;;  %v324_v35 = vld [vmem:[%s3839_s1 + $0x978] sm:$0xff]  ;;  %v321_v36 = vld [vmem:[%s3839_s1 + $0x960] sm:$0xff] }
  0x97   :  { %1145 = vmatpush1.msra.mxu0 %v289_v37  ;;  %1216 = vmatpush1.msra.mxu1 %v291_v38  ;;  %v323_v37 = vld [vmem:[%s3839_s1 + $0x970] sm:$0xff]  ;;  %v294_v38 = vld [vmem:[%s3839_s1 + $0x888] sm:$0xff] }
  0x98   :  { %1146 = vmatprep.subr.mxu0 %v262_v39  ;;  %1217 = vmatprep.subr.mxu1 %v264_v40  ;;  %v296_v39 = vld [vmem:[%s3839_s1 + $0x898] sm:$0xff]  ;;  %v293_v40 = vld [vmem:[%s3839_s1 + $0x880] sm:$0xff] }
  0x99   :  { %1147 = vmatpush1.msra.mxu0 %v261_v41  ;;  %1218 = vmatpush1.msra.mxu1 %v263_v42  ;;  %v295_v41 = vld [vmem:[%s3839_s1 + $0x890] sm:$0xff]  ;;  %v266_v42 = vld [vmem:[%s3839_s1 + $0x7a8] sm:$0xff] }
  0x9a   :  { %1148 = vmatprep.subr.mxu0 %v234_v43  ;;  %1219 = vmatprep.subr.mxu1 %v236_v44  ;;  %v268_v43 = vld [vmem:[%s3839_s1 + $0x7b8] sm:$0xff]  ;;  %v265_v44 = vld [vmem:[%s3839_s1 + $0x7a0] sm:$0xff] }
  0x9b   :  { %1149 = vmatpush1.msra.mxu0 %v233_v45  ;;  %1220 = vmatpush1.msra.mxu1 %v235_v46  ;;  %v267_v45 = vld [vmem:[%s3839_s1 + $0x7b0] sm:$0xff]  ;;  %v238_v46 = vld [vmem:[%s3839_s1 + $0x6c8] sm:$0xff] }
  0x9c   :  { %1150 = vmatprep.subr.mxu0 %v206_v47  ;;  %1221 = vmatprep.subr.mxu1 %v208_v48  ;;  %v240_v47 = vld [vmem:[%s3839_s1 + $0x6d8] sm:$0xff]  ;;  %v237_v48 = vld [vmem:[%s3839_s1 + $0x6c0] sm:$0xff] }
  0x9d   :  { %1151 = vmatpush1.msra.mxu0 %v205_v49  ;;  %1222 = vmatpush1.msra.mxu1 %v207_v50  ;;  %v239_v49 = vld [vmem:[%s3839_s1 + $0x6d0] sm:$0xff]  ;;  %v210_v50 = vld [vmem:[%s3839_s1 + $0x5e8] sm:$0xff] }
  0x9e   :  { %1152 = vmatprep.subr.mxu0 %v178_v51  ;;  %1223 = vmatprep.subr.mxu1 %v180_v52  ;;  %v212_v51 = vld [vmem:[%s3839_s1 + $0x5f8] sm:$0xff]  ;;  %v209_v52 = vld [vmem:[%s3839_s1 + $0x5e0] sm:$0xff] }
  0x9f   :  { %1153 = vmatpush1.msra.mxu0 %v177_v53  ;;  %1224 = vmatpush1.msra.mxu1 %v179_v54  ;;  %v211_v53 = vld [vmem:[%s3839_s1 + $0x5f0] sm:$0xff]  ;;  %v182_v54 = vld [vmem:[%s3839_s1 + $0x508] sm:$0xff] }
  0xa0   :  { %1154 = vmatprep.subr.mxu0 %v150_v55  ;;  %1225 = vmatprep.subr.mxu1 %v152_v56  ;;  %v184_v55 = vld [vmem:[%s3839_s1 + $0x518] sm:$0xff]  ;;  %v181_v56 = vld [vmem:[%s3839_s1 + $0x500] sm:$0xff] }
  0xa1   :  { %1155 = vmatpush1.msra.mxu0 %v149_v57  ;;  %1226 = vmatpush1.msra.mxu1 %v151_v58  ;;  %v183_v57 = vld [vmem:[%s3839_s1 + $0x510] sm:$0xff]  ;;  %v154_v58 = vld [vmem:[%s3839_s1 + $0x428] sm:$0xff] }
  0xa2   :  { %1156 = vmatprep.subr.mxu0 %v122_v59  ;;  %1227 = vmatprep.subr.mxu1 %v124_v60  ;;  %v156_v59 = vld [vmem:[%s3839_s1 + $0x438] sm:$0xff]  ;;  %v153_v60 = vld [vmem:[%s3839_s1 + $0x420] sm:$0xff] }
  0xa3   :  { %1157 = vmatpush1.msra.mxu0 %v121_v61  ;;  %1228 = vmatpush1.msra.mxu1 %v123_v62  ;;  %v155_v61 = vld [vmem:[%s3839_s1 + $0x430] sm:$0xff]  ;;  %v126_v62 = vld [vmem:[%s3839_s1 + $0x348] sm:$0xff] }
  0xa4   :  { %1158 = vmatprep.subr.mxu0 %v94_v63  ;;  %1229 = vmatprep.subr.mxu1 %v96_v0  ;;  %v128_v63 = vld [vmem:[%s3839_s1 + $0x358] sm:$0xff]  ;;  %v125_v0 = vld [vmem:[%s3839_s1 + $0x340] sm:$0xff] }
  0xa5   :  { %1159 = vmatpush1.msra.mxu0 %v93_v2  ;;  %1230 = vmatpush1.msra.mxu1 %v95_v4  ;;  %v127_v2 = vld [vmem:[%s3839_s1 + $0x350] sm:$0xff]  ;;  %v98_v4 = vld [vmem:[%s3839_s1 + $0x268] sm:$0xff] }
  0xa6   :  { %1160 = vmatprep.subr.mxu0 %v66_v5  ;;  %1231 = vmatprep.subr.mxu1 %v68_v6  ;;  %v100_v5 = vld [vmem:[%s3839_s1 + $0x278] sm:$0xff]  ;;  %v97_v6 = vld [vmem:[%s3839_s1 + $0x260] sm:$0xff] }
  0xa7   :  { %1161 = vmatpush1.msra.mxu0 %v65_v7  ;;  %1232 = vmatpush1.msra.mxu1 %v67_v8  ;;  %v99_v7 = vld [vmem:[%s3839_s1 + $0x270] sm:$0xff]  ;;  %v70_v8 = vld [vmem:[%s3839_s1 + $0x188] sm:$0xff] }
  0xa8   :  { %1162 = vmatprep.subr.mxu0 %v38_v9  ;;  %1233 = vmatprep.subr.mxu1 %v40_v10  ;;  %v72_v9 = vld [vmem:[%s3839_s1 + $0x198] sm:$0xff]  ;;  %v69_v10 = vld [vmem:[%s3839_s1 + $0x180] sm:$0xff] }
  0xa9   :  { %1163 = vmatpush1.msra.mxu0 %v37_v11  ;;  %1196 = vmatprep.mubr.f32.mxu0 %v1939_v3  ;;  %v71_v11 = vld [vmem:[%s3839_s1 + $0x190] sm:$0xff] }
  0xaa   :  { %1234 = vmatpush1.msra.mxu1 %v39_v12  ;;  %1916 = vmatmul.mubr.msk.f32.vlgmr.msra.gmra.mxu0 %vm475_vm1, %v2994_v15  ;;  %v42_v12 = vld [vmem:[%s3839_s1 + $0xa8] sm:$0xff] }
  0xab   :  { %1267 = vmatprep.mubr.f32.mxu1 %v1939_v3  ;;  %1920 = vmatprep.subr.msk.mxu0 %vm479_vm0, %v462_v13  ;;  %v44_v13 = vld [vmem:[%s3839_s1 + $0xb8] sm:$0xff] }
  0xac   :  { %1923 = vmatprep.subr.msk.mxu1 %vm479_vm0, %v464_v14  ;;  %1919 = vmatmul.mubr.msk.f32.vlgmr.msra.gmra.mxu1 %vm475_vm1, %v2994_v15  ;;  %v41_v14 = vld [vmem:[%s3839_s1 + $0xa0] sm:$0xff] }
  0xad   :  { %1921 = vmatpush1.msk.msra.mxu0 %vm479_vm0, %v461_v16  ;;  %1924 = vmatpush1.msk.msra.mxu1 %vm479_vm0, %v463_v17  ;;  %v43_v16 = vld [vmem:[%s3839_s1 + $0xb0] sm:$0xff]  ;;  %v466_v17 = vld [vmem:[%s3839_s1 + $0xde8] sm:$0x1f] }
  0xae   :  { %1276 = vmatprep.subr.mxu0 %v434_v18  ;;  %1347 = vmatprep.subr.mxu1 %v436_v19  ;;  %v468_v18 = vld [vmem:[%s3839_s1 + $0xdf8] sm:$0x1f]  ;;  %v465_v19 = vld [vmem:[%s3839_s1 + $0xde0] sm:$0x1f] }
  0xaf   :  { %1277 = vmatpush1.msra.mxu0 %v433_v1  ;;  %1348 = vmatpush1.msra.mxu1 %v435_v20  ;;  %v467_v1 = vld [vmem:[%s3839_s1 + $0xdf0] sm:$0x1f]  ;;  %v438_v20 = vld [vmem:[%s3839_s1 + $0xd08] sm:$0xff] }
  0xb0   :  { %1278 = vmatprep.subr.mxu0 %v406_v21  ;;  %1349 = vmatprep.subr.mxu1 %v408_v23  ;;  %v440_v21 = vld [vmem:[%s3839_s1 + $0xd18] sm:$0xff]  ;;  %v437_v23 = vld [vmem:[%s3839_s1 + $0xd00] sm:$0xff] }
  0xb1   :  { %1279 = vmatpush1.msra.mxu0 %v405_v24  ;;  %1350 = vmatpush1.msra.mxu1 %v407_v25  ;;  %v439_v24 = vld [vmem:[%s3839_s1 + $0xd10] sm:$0xff]  ;;  %v410_v25 = vld [vmem:[%s3839_s1 + $0xc28] sm:$0xff] }
  0xb2   :  { %1280 = vmatprep.subr.mxu0 %v378_v26  ;;  %1351 = vmatprep.subr.mxu1 %v380_v27  ;;  %v412_v26 = vld [vmem:[%s3839_s1 + $0xc38] sm:$0xff]  ;;  %v409_v27 = vld [vmem:[%s3839_s1 + $0xc20] sm:$0xff] }
  0xb3   :  { %1281 = vmatpush1.msra.mxu0 %v377_v28  ;;  %1352 = vmatpush1.msra.mxu1 %v379_v29  ;;  %v411_v28 = vld [vmem:[%s3839_s1 + $0xc30] sm:$0xff]  ;;  %v382_v29 = vld [vmem:[%s3839_s1 + $0xb48] sm:$0xff] }
  0xb4   :  { %1282 = vmatprep.subr.mxu0 %v350_v30  ;;  %1353 = vmatprep.subr.mxu1 %v352_v31  ;;  %v384_v30 = vld [vmem:[%s3839_s1 + $0xb58] sm:$0xff]  ;;  %v381_v31 = vld [vmem:[%s3839_s1 + $0xb40] sm:$0xff] }
  0xb5   :  { %1283 = vmatpush1.msra.mxu0 %v349_v32  ;;  %1354 = vmatpush1.msra.mxu1 %v351_v33  ;;  %v383_v32 = vld [vmem:[%s3839_s1 + $0xb50] sm:$0xff]  ;;  %v354_v33 = vld [vmem:[%s3839_s1 + $0xa68] sm:$0xff] }
  0xb6   :  { %1284 = vmatprep.subr.mxu0 %v322_v34  ;;  %1355 = vmatprep.subr.mxu1 %v324_v35  ;;  %v356_v34 = vld [vmem:[%s3839_s1 + $0xa78] sm:$0xff]  ;;  %v353_v35 = vld [vmem:[%s3839_s1 + $0xa60] sm:$0xff] }
  0xb7   :  { %1285 = vmatpush1.msra.mxu0 %v321_v36  ;;  %1356 = vmatpush1.msra.mxu1 %v323_v37  ;;  %v355_v36 = vld [vmem:[%s3839_s1 + $0xa70] sm:$0xff]  ;;  %v326_v37 = vld [vmem:[%s3839_s1 + $0x988] sm:$0xff] }
  0xb8   :  { %1286 = vmatprep.subr.mxu0 %v294_v38  ;;  %1357 = vmatprep.subr.mxu1 %v296_v39  ;;  %v328_v38 = vld [vmem:[%s3839_s1 + $0x998] sm:$0xff]  ;;  %v325_v39 = vld [vmem:[%s3839_s1 + $0x980] sm:$0xff] }
  0xb9   :  { %1287 = vmatpush1.msra.mxu0 %v293_v40  ;;  %1358 = vmatpush1.msra.mxu1 %v295_v41  ;;  %v327_v40 = vld [vmem:[%s3839_s1 + $0x990] sm:$0xff]  ;;  %v298_v41 = vld [vmem:[%s3839_s1 + $0x8a8] sm:$0xff] }
  0xba   :  { %1288 = vmatprep.subr.mxu0 %v266_v42  ;;  %1359 = vmatprep.subr.mxu1 %v268_v43  ;;  %v300_v42 = vld [vmem:[%s3839_s1 + $0x8b8] sm:$0xff]  ;;  %v297_v43 = vld [vmem:[%s3839_s1 + $0x8a0] sm:$0xff] }
  0xbb   :  { %1289 = vmatpush1.msra.mxu0 %v265_v44  ;;  %1360 = vmatpush1.msra.mxu1 %v267_v45  ;;  %v299_v44 = vld [vmem:[%s3839_s1 + $0x8b0] sm:$0xff]  ;;  %v270_v45 = vld [vmem:[%s3839_s1 + $0x7c8] sm:$0xff] }
  0xbc   :  { %1290 = vmatprep.subr.mxu0 %v238_v46  ;;  %1361 = vmatprep.subr.mxu1 %v240_v47  ;;  %v272_v46 = vld [vmem:[%s3839_s1 + $0x7d8] sm:$0xff]  ;;  %v269_v47 = vld [vmem:[%s3839_s1 + $0x7c0] sm:$0xff] }
  0xbd   :  { %1291 = vmatpush1.msra.mxu0 %v237_v48  ;;  %1362 = vmatpush1.msra.mxu1 %v239_v49  ;;  %v271_v48 = vld [vmem:[%s3839_s1 + $0x7d0] sm:$0xff]  ;;  %v242_v49 = vld [vmem:[%s3839_s1 + $0x6e8] sm:$0xff] }
  0xbe   :  { %1292 = vmatprep.subr.mxu0 %v210_v50  ;;  %1363 = vmatprep.subr.mxu1 %v212_v51  ;;  %v244_v50 = vld [vmem:[%s3839_s1 + $0x6f8] sm:$0xff]  ;;  %v241_v51 = vld [vmem:[%s3839_s1 + $0x6e0] sm:$0xff] }
  0xbf   :  { %1293 = vmatpush1.msra.mxu0 %v209_v52  ;;  %1364 = vmatpush1.msra.mxu1 %v211_v53  ;;  %v243_v52 = vld [vmem:[%s3839_s1 + $0x6f0] sm:$0xff]  ;;  %v214_v53 = vld [vmem:[%s3839_s1 + $0x608] sm:$0xff] }
  0xc0   :  { %1294 = vmatprep.subr.mxu0 %v182_v54  ;;  %1365 = vmatprep.subr.mxu1 %v184_v55  ;;  %v216_v54 = vld [vmem:[%s3839_s1 + $0x618] sm:$0xff]  ;;  %v213_v55 = vld [vmem:[%s3839_s1 + $0x600] sm:$0xff] }
  0xc1   :  { %1295 = vmatpush1.msra.mxu0 %v181_v56  ;;  %1366 = vmatpush1.msra.mxu1 %v183_v57  ;;  %v215_v56 = vld [vmem:[%s3839_s1 + $0x610] sm:$0xff]  ;;  %v186_v57 = vld [vmem:[%s3839_s1 + $0x528] sm:$0xff] }
  0xc2   :  { %1296 = vmatprep.subr.mxu0 %v154_v58  ;;  %1367 = vmatprep.subr.mxu1 %v156_v59  ;;  %v188_v58 = vld [vmem:[%s3839_s1 + $0x538] sm:$0xff]  ;;  %v185_v59 = vld [vmem:[%s3839_s1 + $0x520] sm:$0xff] }
  0xc3   :  { %1297 = vmatpush1.msra.mxu0 %v153_v60  ;;  %1368 = vmatpush1.msra.mxu1 %v155_v61  ;;  %v187_v60 = vld [vmem:[%s3839_s1 + $0x530] sm:$0xff]  ;;  %v158_v61 = vld [vmem:[%s3839_s1 + $0x448] sm:$0xff] }
  0xc4   :  { %1298 = vmatprep.subr.mxu0 %v126_v62  ;;  %1369 = vmatprep.subr.mxu1 %v128_v63  ;;  %v160_v62 = vld [vmem:[%s3839_s1 + $0x458] sm:$0xff]  ;;  %v157_v63 = vld [vmem:[%s3839_s1 + $0x440] sm:$0xff] }
  0xc5   :  { %1299 = vmatpush1.msra.mxu0 %v125_v0  ;;  %1370 = vmatpush1.msra.mxu1 %v127_v2  ;;  %v159_v0 = vld [vmem:[%s3839_s1 + $0x450] sm:$0xff]  ;;  %v130_v2 = vld [vmem:[%s3839_s1 + $0x368] sm:$0xff] }
  0xc6   :  { %1300 = vmatprep.subr.mxu0 %v98_v4  ;;  %1371 = vmatprep.subr.mxu1 %v100_v5  ;;  %v132_v4 = vld [vmem:[%s3839_s1 + $0x378] sm:$0xff]  ;;  %v129_v5 = vld [vmem:[%s3839_s1 + $0x360] sm:$0xff] }
  0xc7   :  { %1301 = vmatpush1.msra.mxu0 %v97_v6  ;;  %1372 = vmatpush1.msra.mxu1 %v99_v7  ;;  %v131_v6 = vld [vmem:[%s3839_s1 + $0x370] sm:$0xff]  ;;  %v102_v7 = vld [vmem:[%s3839_s1 + $0x288] sm:$0xff] }
  0xc8   :  { %1302 = vmatprep.subr.mxu0 %v70_v8  ;;  %1373 = vmatprep.subr.mxu1 %v72_v9  ;;  %v104_v8 = vld [vmem:[%s3839_s1 + $0x298] sm:$0xff]  ;;  %v101_v9 = vld [vmem:[%s3839_s1 + $0x280] sm:$0xff] }
  0xc9   :  { %1303 = vmatpush1.msra.mxu0 %v69_v10  ;;  %1374 = vmatpush1.msra.mxu1 %v71_v11  ;;  %v103_v10 = vld [vmem:[%s3839_s1 + $0x290] sm:$0xff]  ;;  %v74_v11 = vld [vmem:[%s3839_s1 + $0x1a8] sm:$0xff] }
  0xca   :  { %1304 = vmatprep.subr.mxu0 %v42_v12  ;;  %1375 = vmatprep.subr.mxu1 %v44_v13  ;;  %v76_v12 = vld [vmem:[%s3839_s1 + $0x1b8] sm:$0xff]  ;;  %v73_v13 = vld [vmem:[%s3839_s1 + $0x1a0] sm:$0xff] }
  0xcb   :  { %1305 = vmatpush1.msra.mxu0 %v41_v14  ;;  %1338 = vmatprep.mubr.f32.mxu0 %v1939_v3  ;;  %v75_v14 = vld [vmem:[%s3839_s1 + $0x1b0] sm:$0xff] }
  0xcc   :  { %1376 = vmatpush1.msra.mxu1 %v43_v16  ;;  %1409 = vmatprep.mubr.f32.mxu1 %v1939_v3  ;;  %v46_v16 = vld [vmem:[%s3839_s1 + $0xc8] sm:$0xff] }
  0xcd   :  { %1922 = vmatmul.mubr.msk.f32.vlgmr.msra.gmra.mxu0 %vm475_vm1, %v2994_v15  ;;  %1925 = vmatmul.mubr.msk.f32.vlgmr.msra.gmra.mxu1 %vm475_vm1, %v2994_v15 }
  0xce   :  { %1926 = vmatprep.subr.msk.mxu0 %vm479_vm0, %v466_v17  ;;  %1929 = vmatprep.subr.msk.mxu1 %vm479_vm0, %v468_v18  ;;  %v48_v17 = vld [vmem:[%s3839_s1 + $0xd8] sm:$0xff]  ;;  %v45_v18 = vld [vmem:[%s3839_s1 + $0xc0] sm:$0xff] }
  0xcf   :  { %1927 = vmatpush1.msk.msra.mxu0 %vm479_vm0, %v465_v19  ;;  %1930 = vmatpush1.msk.msra.mxu1 %vm479_vm0, %v467_v1  ;;  %v47_v19 = vld [vmem:[%s3839_s1 + $0xd0] sm:$0xff] }
  0xd0   :  { %1418 = vmatprep.subr.mxu0 %v438_v20  ;;  %1489 = vmatprep.subr.mxu1 %v440_v21 }
  0xd1   :  { %1419 = vmatpush1.msra.mxu0 %v437_v23  ;;  %1490 = vmatpush1.msra.mxu1 %v439_v24 }
  0xd2   :  { %1420 = vmatprep.subr.mxu0 %v410_v25  ;;  %1491 = vmatprep.subr.mxu1 %v412_v26 }
  0xd3   :  { %1421 = vmatpush1.msra.mxu0 %v409_v27  ;;  %1492 = vmatpush1.msra.mxu1 %v411_v28 }
  0xd4   :  { %1422 = vmatprep.subr.mxu0 %v382_v29  ;;  %1493 = vmatprep.subr.mxu1 %v384_v30 }
  0xd5   :  { %1423 = vmatpush1.msra.mxu0 %v381_v31  ;;  %1494 = vmatpush1.msra.mxu1 %v383_v32 }
  0xd6   :  { %1424 = vmatprep.subr.mxu0 %v354_v33  ;;  %1495 = vmatprep.subr.mxu1 %v356_v34 }
  0xd7   :  { %1425 = vmatpush1.msra.mxu0 %v353_v35  ;;  %1496 = vmatpush1.msra.mxu1 %v355_v36 }
  0xd8   :  { %1426 = vmatprep.subr.mxu0 %v326_v37  ;;  %1497 = vmatprep.subr.mxu1 %v328_v38 }
  0xd9   :  { %1427 = vmatpush1.msra.mxu0 %v325_v39  ;;  %1498 = vmatpush1.msra.mxu1 %v327_v40 }
  0xda   :  { %1428 = vmatprep.subr.mxu0 %v298_v41  ;;  %1499 = vmatprep.subr.mxu1 %v300_v42 }
  0xdb   :  { %1429 = vmatpush1.msra.mxu0 %v297_v43  ;;  %1500 = vmatpush1.msra.mxu1 %v299_v44 }
  0xdc   :  { %1430 = vmatprep.subr.mxu0 %v270_v45  ;;  %1501 = vmatprep.subr.mxu1 %v272_v46 }
  0xdd   :  { %1431 = vmatpush1.msra.mxu0 %v269_v47  ;;  %1502 = vmatpush1.msra.mxu1 %v271_v48 }
  0xde   :  { %1432 = vmatprep.subr.mxu0 %v242_v49  ;;  %1503 = vmatprep.subr.mxu1 %v244_v50 }
  0xdf   :  { %1433 = vmatpush1.msra.mxu0 %v241_v51  ;;  %1504 = vmatpush1.msra.mxu1 %v243_v52 }
  0xe0   :  { %1434 = vmatprep.subr.mxu0 %v214_v53  ;;  %1505 = vmatprep.subr.mxu1 %v216_v54 }
  0xe1   :  { %1435 = vmatpush1.msra.mxu0 %v213_v55  ;;  %1506 = vmatpush1.msra.mxu1 %v215_v56 }
  0xe2   :  { %1436 = vmatprep.subr.mxu0 %v186_v57  ;;  %1507 = vmatprep.subr.mxu1 %v188_v58  ;;  %v630_v1 = vpop.f32.mrf.mxu0 }
  0xe3   :  { %1437 = vmatpush1.msra.mxu0 %v185_v59  ;;  %1508 = vmatpush1.msra.mxu1 %v187_v60  ;;  %v701_v25 = vpop.f32.mrf.mxu1 }
  0xe4   :  { %1438 = vmatprep.subr.mxu0 %v158_v61  ;;  %1509 = vmatprep.subr.mxu1 %v160_v62  ;;  %v632_v21 = vpop.f32.mrf.mxu0 }
  0xe5   :  { %1439 = vmatpush1.msra.mxu0 %v157_v63  ;;  %1510 = vmatpush1.msra.mxu1 %v159_v0 }
  0xe6   :  { %1440 = vmatprep.subr.mxu0 %v130_v2  ;;  %1511 = vmatprep.subr.mxu1 %v132_v4 }
  0xe7   :  { %1441 = vmatpush1.msra.mxu0 %v129_v5  ;;  %1512 = vmatpush1.msra.mxu1 %v131_v6 }
  0xe8   :  { %1442 = vmatprep.subr.mxu0 %v102_v7  ;;  %1513 = vmatprep.subr.mxu1 %v104_v8  ;;  %v3400_v20 = vpop.permute.xlu0 %472 }
  0xe9   :  { %1443 = vmatpush1.msra.mxu0 %v101_v9  ;;  %1514 = vmatpush1.msra.mxu1 %v103_v10  ;;  %v3403_v23 = vadd.f32 %v630_v1, %v3400_v20  ;;  %v3406_v24 = vadd.f32 %v632_v21, %v3400_v20 }
  0xea   :  { %1444 = vmatprep.subr.mxu0 %v74_v11  ;;  %1515 = vmatprep.subr.mxu1 %v76_v12 }
  0xeb   :  { %1445 = vmatpush1.msra.mxu0 %v73_v13  ;;  %1516 = vmatpush1.msra.mxu1 %v75_v14  ;;  %v1559_v26 = vsel %vm479_vm0, %v3406_v24, 0.0 }
  0xec   :  { %1446 = vmatprep.subr.mxu0 %v46_v16  ;;  %1517 = vmatprep.subr.mxu1 %v48_v17 }
  0xed   :  { %1447 = vmatpush1.msra.mxu0 %v45_v18  ;;  %1480 = vmatprep.mubr.f32.mxu0 %v1939_v3 }
  0xee   :  { %1518 = vmatpush1.msra.mxu1 %v47_v19  ;;  %1551 = vmatprep.mubr.f32.mxu1 %v1939_v3  ;;  %v1558_v3 = vsel %vm479_vm0, %v3403_v23, 0.0 }
  0xef   :  { %1928 = vmatmul.mubr.msk.f32.vlgmr.msra.gmra.mxu0 %vm475_vm1, %v2994_v15  ;;  %1931 = vmatmul.mubr.msk.f32.vlgmr.msra.gmra.mxu1 %vm475_vm1, %v2994_v15  ;;  %v3413_v15 = vadd.f32 %v701_v25, %v3400_v20  ;;  %v1560_v27 = vadd.f32 %v1559_v26, %v1558_v3 }
  0xf0   :  { %1935 = vset.pattern.permute.xlu1 %v1940_v22  ;;  %v703_v22 = vpop.f32.mrf.mxu1 }
  0xf1   :  { %v1561_v29 = vsel %vm479_vm0, %v3413_v15, 0.0  ;;  %v3418_v30 = vadd.f32 %v703_v22, %v3400_v20 }
  0xf2   :  { %v1562_v32 = vadd.f32 %v1561_v29, %v1560_v27 }
  0xf3   :  { %v1563_v34 = vsel %vm479_vm0, %v3418_v30, 0.0 }
  0xf4   :  { %v1564_v37 = vadd.f32 %v1563_v34, %v1562_v32 }
 0x103   :  { %v772_v28 = vpop.f32.mrf.mxu0 }
 0x104   :  { %v3421_v31 = vadd.f32 %v772_v28, %v3400_v20 }
 0x105   :  { %v774_v33 = vpop.f32.mrf.mxu0  ;;  %v843_v38 = vpop.f32.mrf.mxu1 }
 0x106   :  { %v1565_v35 = vsel %vm479_vm0, %v3421_v31, 0.0  ;;  %v3428_v36 = vadd.f32 %v774_v33, %v3400_v20  ;;  %v3433_v41 = vadd.f32 %v843_v38, %v3400_v20 }
 0x107   :  { %v1566_v39 = vadd.f32 %v1565_v35, %v1564_v37  ;;  %v845_v42 = vpop.f32.mrf.mxu1 }
 0x108   :  { %v1567_v40 = vsel %vm479_vm0, %v3428_v36, 0.0  ;;  %v1569_v45 = vsel %vm479_vm0, %v3433_v41, 0.0  ;;  %v3438_v46 = vadd.f32 %v845_v42, %v3400_v20 }
 0x109   :  { %v1568_v43 = vadd.f32 %v1567_v40, %v1566_v39 }
 0x10a   :  { %v1571_v50 = vsel %vm479_vm0, %v3438_v46, 0.0 }
 0x10b   :  { %v1570_v48 = vadd.f32 %v1569_v45, %v1568_v43 }
 0x10d   :  { %v1572_v53 = vadd.f32 %v1571_v50, %v1570_v48 }
 0x125   :  { %v914_v44 = vpop.f32.mrf.mxu0 }
 0x126   :  { %v3441_v47 = vadd.f32 %v914_v44, %v3400_v20 }
 0x127   :  { %v916_v49 = vpop.f32.mrf.mxu0  ;;  %v985_v54 = vpop.f32.mrf.mxu1 }
 0x128   :  { %v1573_v51 = vsel %vm479_vm0, %v3441_v47, 0.0  ;;  %v3448_v52 = vadd.f32 %v916_v49, %v3400_v20  ;;  %v3453_v57 = vadd.f32 %v985_v54, %v3400_v20 }
 0x129   :  { %v1574_v55 = vadd.f32 %v1573_v51, %v1572_v53  ;;  %v987_v58 = vpop.f32.mrf.mxu1 }
 0x12a   :  { %v1575_v56 = vsel %vm479_vm0, %v3448_v52, 0.0  ;;  %v1577_v61 = vsel %vm479_vm0, %v3453_v57, 0.0  ;;  %v3458_v62 = vadd.f32 %v987_v58, %v3400_v20 }
 0x12b   :  { %v1576_v59 = vadd.f32 %v1575_v56, %v1574_v55 }
 0x12c   :  { %v1579_v4 = vsel %vm479_vm0, %v3458_v62, 0.0 }
 0x12d   :  { %v1578_v0 = vadd.f32 %v1577_v61, %v1576_v59 }
 0x12f   :  { %v1580_v7 = vadd.f32 %v1579_v4, %v1578_v0 }
 0x148   :  { %v1056_v60 = vpop.f32.mrf.mxu0 }
 0x149   :  { %v3461_v63 = vadd.f32 %v1056_v60, %v3400_v20 }
 0x14a   :  { %v1058_v2 = vpop.f32.mrf.mxu0  ;;  %v1127_v8 = vpop.f32.mrf.mxu1 }
 0x14b   :  { %v1581_v5 = vsel %vm479_vm0, %v3461_v63, 0.0  ;;  %v3468_v6 = vadd.f32 %v1058_v2, %v3400_v20  ;;  %v3473_v11 = vadd.f32 %v1127_v8, %v3400_v20 }
 0x14c   :  { %v1582_v9 = vadd.f32 %v1581_v5, %v1580_v7  ;;  %v1129_v12 = vpop.f32.mrf.mxu1 }
 0x14d   :  { %v1583_v10 = vsel %vm479_vm0, %v3468_v6, 0.0  ;;  %v1585_v16 = vsel %vm479_vm0, %v3473_v11, 0.0  ;;  %v3478_v17 = vadd.f32 %v1129_v12, %v3400_v20 }
 0x14e   :  { %v1584_v13 = vadd.f32 %v1583_v10, %v1582_v9 }
 0x14f   :  { %v1587_v21 = vsel %vm479_vm0, %v3478_v17, 0.0 }
 0x150   :  { %v1586_v19 = vadd.f32 %v1585_v16, %v1584_v13 }
 0x152   :  { %v1588_v26 = vadd.f32 %v1587_v21, %v1586_v19 }
 0x16a   :  { %v1198_v14 = vpop.f32.mrf.mxu0 }
 0x16b   :  { %v3481_v18 = vadd.f32 %v1198_v14, %v3400_v20 }
 0x16c   :  { %v1200_v1 = vpop.f32.mrf.mxu0  ;;  %v1269_v22 = vpop.f32.mrf.mxu1 }
 0x16d   :  { %v1589_v25 = vsel %vm479_vm0, %v3481_v18, 0.0  ;;  %v3488_v3 = vadd.f32 %v1200_v1, %v3400_v20  ;;  %v3493_v29 = vadd.f32 %v1269_v22, %v3400_v20 }
 0x16e   :  { %v1590_v27 = vadd.f32 %v1589_v25, %v1588_v26  ;;  %v1271_v32 = vpop.f32.mrf.mxu1  ;;  %v1762_v25 = vld [vmem:[%s3842_s3] sm:$0x1f] }
 0x16f   :  { %v1591_v28 = vsel %vm479_vm0, %v3488_v3, 0.0  ;;  %v1593_v35 = vsel %vm479_vm0, %v3493_v29, 0.0  ;;  %v3498_v37 = vadd.f32 %v1271_v32, %v3400_v20  ;;  %1765 = vperm.xlu1 %1935, %v1762_v25  }
 0x170   :  { %v1592_v33 = vadd.f32 %v1591_v28, %v1590_v27 }
 0x171   :  { %v1595_v42 = vsel %vm479_vm0, %v3498_v37, 0.0 }
 0x172   :  { %v1594_v39 = vadd.f32 %v1593_v35, %v1592_v33 }
 0x174   :  { %v1596_v45 = vadd.f32 %v1595_v42, %v1594_v39 }
 0x18d   :  { %v1340_v34 = vpop.f32.mrf.mxu0  ;;  %v1411_v49 = vpop.f32.mrf.mxu1 }
 0x18e   :  { %v3501_v38 = vadd.f32 %v1340_v34, %v3400_v20  ;;  %v3513_v51 = vadd.f32 %v1411_v49, %v3400_v20 }
 0x18f   :  { %v1342_v40 = vpop.f32.mrf.mxu0  ;;  %v1413_v54 = vpop.f32.mrf.mxu1 }
 0x190   :  { %v1597_v43 = vsel %vm479_vm0, %v3501_v38, 0.0  ;;  %v3508_v44 = vadd.f32 %v1342_v40, %v3400_v20  ;;  %v1601_v55 = vsel %vm479_vm0, %v3513_v51, 0.0  ;;  %v3518_v56 = vadd.f32 %v1413_v54, %v3400_v20 }
 0x191   :  { %v1598_v48 = vadd.f32 %v1597_v43, %v1596_v45 }
 0x192   :  { %v1599_v50 = vsel %vm479_vm0, %v3508_v44, 0.0  ;;  %v1603_v61 = vsel %vm479_vm0, %v3518_v56, 0.0 }
 0x193   :  { %v1600_v53 = vadd.f32 %v1599_v50, %v1598_v48 }
 0x195   :  { %v1602_v58 = vadd.f32 %v1601_v55, %v1600_v53 }
 0x197   :  { %v1604_v2 = vadd.f32 %v1603_v61, %v1602_v58 }
 0x1af   :  { %v1482_v59 = vpop.f32.mrf.mxu0  ;;  %v1553_v60 = vpop.f32.mrf.mxu1 }
 0x1b0   :  { %v3523_v0 = vadd.f32 %v1482_v59, %v3400_v20  ;;  %v3528_v8 = vadd.f32 %v1553_v60, %v3400_v20 }
 0x1b1   :  { %v1484_v4 = vpop.f32.mrf.mxu0  ;;  %v1555_v5 = vpop.f32.mrf.mxu1 }
 0x1b2   :  { %v1605_v7 = vsel %vm479_vm0, %v3523_v0, 0.0  ;;  %v3531_v9 = vadd.f32 %v1484_v4, %v3400_v20  ;;  %v3536_v13 = vadd.f32 %v1555_v5, %v3400_v20  ;;  %v1609_v16 = vsel %vm479_vm0, %v3528_v8, 0.0 }
 0x1b3   :  { %v1606_v10 = vadd.f32 %v1605_v7, %v1604_v2 }
 0x1b4   :  { %v1607_v12 = vsel %vm479_vm0, %v3531_v9, 0.0  ;;  %v1612_v1 = vsel %vm1611_vm2, %v3536_v13, 0.0 }
 0x1b5   :  { %v1608_v14 = vadd.f32 %v1607_v12, %v1606_v10 }
 0x1b7   :  { %v1610_v19 = vadd.f32 %v1609_v16, %v1608_v14 }
 0x1b9   :  { %v1613_v21 = vadd.f32 %v1612_v1, %v1610_v19 }
 0x1bb   :  { %1614 = vadd.xlane.f32.xlu0 %v1613_v21 }
 0x244   :  { %v1615_v26 = vpop.xlane.xlu0 %1614 }
 0x245   :  { %v3545_v22 = vmul.f32 0.00028344672, %v1615_v26 }
 0x247   :  { %v3549_v20 = vsub.f32 %v3403_v23, %v3545_v22  ;;  %v3553_v27 = vsub.f32 %v3406_v24, %v3545_v22  ;;  %v3557_v28 = vsub.f32 %v3413_v15, %v3545_v22  ;;  %v3561_v32 = vsub.f32 %v3418_v30, %v3545_v22 }
 0x248   :  { %v3569_v23 = vsub.f32 %v3421_v31, %v3545_v22  ;;  %v3575_v15 = vsub.f32 %v3428_v36, %v3545_v22  ;;  %v3583_v42 = vsub.f32 %v3433_v41, %v3545_v22  ;;  %v3590_v36 = vsub.f32 %v3438_v46, %v3545_v22 }
 0x249   :  { %v1646_v33 = vmul.f32 %v3549_v20, %v3549_v20  ;;  %v1647_v34 = vmul.f32 %v3553_v27, %v3553_v27  ;;  %v1648_v24 = vmul.f32 %v3557_v28, %v3557_v28  ;;  %v1649_v30 = vmul.f32 %v3561_v32, %v3561_v32 }
 0x24a   :  { %v1650_v31 = vmul.f32 %v3569_v23, %v3569_v23  ;;  %v1651_v48 = vmul.f32 %v3575_v15, %v3575_v15  ;;  %v3597_v41 = vsub.f32 %v3441_v47, %v3545_v22  ;;  %v1652_v53 = vmul.f32 %v3583_v42, %v3583_v42 }
 0x24b   :  { %v1674_v35 = vsel %vm479_vm0, %v1646_v33, 0.0  ;;  %v1675_v39 = vsel %vm479_vm0, %v1647_v34, 0.0  ;;  %v1677_v43 = vsel %vm479_vm0, %v1648_v24, 0.0  ;;  %v1679_v49 = vsel %vm479_vm0, %v1649_v30, 0.0 }
 0x24c   :  { %v1676_v40 = vadd.f32 %v1675_v39, %v1674_v35  ;;  %v1681_v54 = vsel %vm479_vm0, %v1650_v31, 0.0  ;;  %v3604_v46 = vsub.f32 %v3448_v52, %v3545_v22  ;;  %v1653_v58 = vmul.f32 %v3590_v36, %v3590_v36 }
 0x24d   :  { %v1683_v59 = vsel %vm479_vm0, %v1651_v48, 0.0  ;;  %v3611_v47 = vsub.f32 %v3453_v57, %v3545_v22  ;;  %v1654_v61 = vmul.f32 %v3597_v41, %v3597_v41  ;;  %v1685_v2 = vsel %vm479_vm0, %v1652_v53, 0.0 }
 0x24e   :  { %v1678_v45 = vadd.f32 %v1677_v43, %v1676_v40  ;;  %v3618_v52 = vsub.f32 %v3458_v62, %v3545_v22  ;;  %v1655_v5 = vmul.f32 %v3604_v46, %v3604_v46  ;;  %v1687_v7 = vsel %vm479_vm0, %v1653_v58, 0.0 }
 0x24f   :  { %v3625_v57 = vsub.f32 %v3461_v63, %v3545_v22  ;;  %v1656_v12 = vmul.f32 %v3611_v47, %v3611_v47  ;;  %v1689_v14 = vsel %vm479_vm0, %v1654_v61, 0.0  ;;  %v3632_v62 = vsub.f32 %v3468_v6, %v3545_v22 }
 0x250   :  { %v1680_v50 = vadd.f32 %v1679_v49, %v1678_v45  ;;  %v1657_v19 = vmul.f32 %v3618_v52, %v3618_v52  ;;  %v1691_v1 = vsel %vm479_vm0, %v1655_v5, 0.0  ;;  %v3639_v63 = vsub.f32 %v3473_v11, %v3545_v22 }
 0x251   :  { %v1658_v25 = vmul.f32 %v3625_v57, %v3625_v57  ;;  %v1693_v26 = vsel %vm479_vm0, %v1656_v12, 0.0  ;;  %v3646_v6 = vsub.f32 %v3478_v17, %v3545_v22  ;;  %v1659_v34 = vmul.f32 %v3632_v62, %v3632_v62 }
 0x252   :  { %v1682_v55 = vadd.f32 %v1681_v54, %v1680_v50  ;;  %v1695_v24 = vsel %vm479_vm0, %v1657_v19, 0.0  ;;  %v3653_v11 = vsub.f32 %v3481_v18, %v3545_v22  ;;  %v1660_v35 = vmul.f32 %v3639_v63, %v3639_v63 }
 0x253   :  { %v1697_v39 = vsel %vm479_vm0, %v1658_v25, 0.0  ;;  %v3660_v17 = vsub.f32 %v3488_v3, %v3545_v22  ;;  %v1661_v31 = vmul.f32 %v3646_v6, %v3646_v6  ;;  %v1699_v43 = vsel %vm479_vm0, %v1659_v34, 0.0 }
 0x254   :  { %v1684_v60 = vadd.f32 %v1683_v59, %v1682_v55  ;;  %v3667_v18 = vsub.f32 %v3493_v29, %v3545_v22  ;;  %v1662_v48 = vmul.f32 %v3653_v11, %v3653_v11  ;;  %v1701_v49 = vsel %vm479_vm0, %v1660_v35, 0.0 }
 0x255   :  { %v3674_v3 = vsub.f32 %v3498_v37, %v3545_v22  ;;  %v1663_v53 = vmul.f32 %v3660_v17, %v3660_v17  ;;  %v1703_v54 = vsel %vm479_vm0, %v1661_v31, 0.0  ;;  %v3681_v29 = vsub.f32 %v3501_v38, %v3545_v22 }
 0x256   :  { %v1686_v4 = vadd.f32 %v1685_v2, %v1684_v60  ;;  %v1664_v58 = vmul.f32 %v3667_v18, %v3667_v18  ;;  %v1705_v59 = vsel %vm479_vm0, %v1662_v48, 0.0  ;;  %v3688_v37 = vsub.f32 %v3508_v44, %v3545_v22 }
 0x257   :  { %v1665_v61 = vmul.f32 %v3674_v3, %v3674_v3  ;;  %v1707_v2 = vsel %vm479_vm0, %v1663_v53, 0.0  ;;  %v3695_v38 = vsub.f32 %v3513_v51, %v3545_v22  ;;  %v1666_v5 = vmul.f32 %v3681_v29, %v3681_v29 }
 0x258   :  { %v1688_v10 = vadd.f32 %v1687_v7, %v1686_v4  ;;  %v1709_v7 = vsel %vm479_vm0, %v1664_v58, 0.0  ;;  %v3702_v44 = vsub.f32 %v3518_v56, %v3545_v22  ;;  %v1667_v12 = vmul.f32 %v3688_v37, %v3688_v37 }
 0x259   :  { %v1642_v51 = vsub.f32 %v3523_v0, %v3545_v22  ;;  %v1668_v19 = vmul.f32 %v3695_v38, %v3695_v38  ;;  %v1643_v25 = vsub.f32 %v3531_v9, %v3545_v22  ;;  %v1644_v34 = vsub.f32 %v3528_v8, %v3545_v22 }
 0x25a   :  { %v1690_v16 = vadd.f32 %v1689_v14, %v1688_v10  ;;  %v1711_v14 = vsel %vm479_vm0, %v1665_v61, 0.0  ;;  %v1669_v56 = vmul.f32 %v3702_v44, %v3702_v44  ;;  %v1645_v35 = vsub.f32 %v3536_v13, %v3545_v22  ;;  %v1796_v13 = vld [vmem:[%s3843_s4] sm:$0x1f]  ;;  %v1766_v22 = vpop.permute.xlu1 %1765 }
 0x25b   :  { %v1717_v0 = vsel %vm479_vm0, %v1668_v19, 0.0  ;;  %v1672_v31 = vmul.f32 %v1644_v34, %v1644_v34 }
 0x25c   :  { %v1692_v21 = vadd.f32 %v1691_v1, %v1690_v16  ;;  %v1713_v1 = vsel %vm479_vm0, %v1666_v5, 0.0  ;;  %v1673_v48 = vmul.f32 %v1645_v35, %v1645_v35 }
 0x25d   :  { %v1725_v8 = vsel %vm479_vm0, %v1672_v31, 0.0 }
 0x25e   :  { %v1694_v33 = vadd.f32 %v1693_v26, %v1692_v21  ;;  %v1715_v26 = vsel %vm479_vm0, %v1667_v12, 0.0 }
 0x260   :  { %v1696_v30 = vadd.f32 %v1695_v24, %v1694_v33  ;;  %v1670_v24 = vmul.f32 %v1642_v51, %v1642_v51 }
 0x262   :  { %v1698_v40 = vadd.f32 %v1697_v39, %v1696_v30  ;;  %v1671_v39 = vmul.f32 %v1643_v25, %v1643_v25 }
 0x264   :  { %v1700_v45 = vadd.f32 %v1699_v43, %v1698_v40  ;;  %v1719_v40 = vsel %vm479_vm0, %v1669_v56, 0.0  ;;  %v1721_v43 = vsel %vm479_vm0, %v1670_v24, 0.0 }
 0x266   :  { %v1702_v50 = vadd.f32 %v1701_v49, %v1700_v45  ;;  %v1723_v49 = vsel %vm479_vm0, %v1671_v39, 0.0 }
 0x268   :  { %v1704_v55 = vadd.f32 %v1703_v54, %v1702_v50  ;;  %v1727_v54 = vsel %vm1611_vm2, %v1673_v48, 0.0 }
 0x26a   :  { %v1706_v60 = vadd.f32 %v1705_v59, %v1704_v55 }
 0x26c   :  { %v1708_v4 = vadd.f32 %v1707_v2, %v1706_v60 }
 0x26e   :  { %v1710_v10 = vadd.f32 %v1709_v7, %v1708_v4 }
 0x270   :  { %v1712_v16 = vadd.f32 %v1711_v14, %v1710_v10 }
 0x272   :  { %v1714_v21 = vadd.f32 %v1713_v1, %v1712_v16 }
 0x274   :  { %v1716_v33 = vadd.f32 %v1715_v26, %v1714_v21 }
 0x276   :  { %v1718_v30 = vadd.f32 %v1717_v0, %v1716_v33 }
 0x278   :  { %v1720_v9 = vadd.f32 %v1719_v40, %v1718_v30 }
 0x27a   :  { %v1722_v45 = vadd.f32 %v1721_v43, %v1720_v9 }
 0x27c   :  { %v1724_v50 = vadd.f32 %v1723_v49, %v1722_v45 }
 0x27e   :  { %v1726_v53 = vadd.f32 %v1725_v8, %v1724_v50 }
 0x280   :  { %v1728_v55 = vadd.f32 %v1727_v54, %v1726_v53 }
 0x282   :  { %1729 = vadd.xlane.f32.xlu1 %v1728_v55 }
 0x293   :  { %1799 = vperm.xlu1 %1935, %v1796_v13  }
 0x30b   :  { %v1730_v58 = vpop.xlane.xlu1 %1729 }
 0x30c   :  { %v1731_v59 = vmul.f32 0.00028344672, %v1730_v58 }
 0x30e   :  { %v1732_v60 = vadd.f32 1e-05, %v1731_v59 }
 0x30f   :  { %v1800_v54 = vpop.permute.xlu1 %1799 }
 0x310   :  { %1936 = vrsqrt.f32 %v1732_v60 }
 0x31d   :  { %v1937_v61 = vpop.eup %1936 }
 0x31e   :  { %v1734_v2 = vmul.f32 %v1937_v61, %v3549_v20  ;;  %v1735_v4 = vmul.f32 %v1937_v61, %v3553_v27  ;;  %v1736_v5 = vmul.f32 %v1937_v61, %v3557_v28  ;;  %v1737_v7 = vmul.f32 %v1937_v61, %v3561_v32 }
 0x31f   :  { %v1738_v10 = vmul.f32 %v1937_v61, %v3569_v23  ;;  %v1739_v12 = vmul.f32 %v1937_v61, %v3575_v15  ;;  %v1740_v14 = vmul.f32 %v1937_v61, %v3583_v42  ;;  %v1741_v16 = vmul.f32 %v1937_v61, %v3590_v36 }
 0x320   :  { %v1742_v19 = vmul.f32 %v1937_v61, %v3597_v41  ;;  %v1743_v1 = vmul.f32 %v1937_v61, %v3604_v46  ;;  %v1744_v20 = vmul.f32 %v1937_v61, %v3611_v47  ;;  %v1745_v27 = vmul.f32 %v1937_v61, %v3618_v52 }
 0x321   :  { %v1746_v28 = vmul.f32 %v1937_v61, %v3625_v57  ;;  %v1747_v32 = vmul.f32 %v1937_v61, %v3632_v62  ;;  %v1748_v23 = vmul.f32 %v1937_v61, %v3639_v63  ;;  %v1749_v15 = vmul.f32 %v1937_v61, %v3646_v6 }
 0x322   :  { %v1750_v42 = vmul.f32 %v1937_v61, %v3653_v11  ;;  %v1751_v36 = vmul.f32 %v1937_v61, %v3660_v17  ;;  %v1752_v41 = vmul.f32 %v1937_v61, %v3667_v18  ;;  %v1753_v46 = vmul.f32 %v1937_v61, %v3674_v3 }
 0x323   :  { %v1754_v47 = vmul.f32 %v1937_v61, %v3681_v29  ;;  %v1755_v52 = vmul.f32 %v1937_v61, %v3688_v37  ;;  %v1756_v57 = vmul.f32 %v1937_v61, %v3695_v38  ;;  %v1757_v62 = vmul.f32 %v1937_v61, %v3702_v44 }
 0x324   :  { %v1758_v21 = vmul.f32 %v1937_v61, %v1642_v51  ;;  %v1759_v63 = vmul.f32 %v1937_v61, %v1643_v25  ;;  %v1760_v56 = vmul.f32 %v1937_v61, %v1644_v34  ;;  %v1761_v6 = vmul.f32 %v1937_v61, %v1645_v35 }
 0x325   :  { %v1768_v26 = vmul.f32 %v1766_v22, %v1734_v2  ;;  %v1769_v11 = vmul.f32 %v1766_v22, %v1735_v4  ;;  %v1770_v33 = vmul.f32 %v1766_v22, %v1736_v5  ;;  %v1771_v17 = vmul.f32 %v1766_v22, %v1737_v7 }
 0x326   :  { %v1772_v24 = vmul.f32 %v1766_v22, %v1738_v10  ;;  %v1773_v18 = vmul.f32 %v1766_v22, %v1739_v12  ;;  %v1774_v0 = vmul.f32 %v1766_v22, %v1740_v14  ;;  %v1775_v3 = vmul.f32 %v1766_v22, %v1741_v16 }
 0x327   :  { %v1776_v30 = vmul.f32 %v1766_v22, %v1742_v19  ;;  %v1777_v29 = vmul.f32 %v1766_v22, %v1743_v1  ;;  %v1778_v39 = vmul.f32 %v1766_v22, %v1744_v20  ;;  %v1779_v37 = vmul.f32 %v1766_v22, %v1745_v27 }
 0x328   :  { %v1780_v40 = vmul.f32 %v1766_v22, %v1746_v28  ;;  %v1781_v38 = vmul.f32 %v1766_v22, %v1747_v32  ;;  %v1782_v9 = vmul.f32 %v1766_v22, %v1748_v23  ;;  %v1783_v44 = vmul.f32 %v1766_v22, %v1749_v15 }
 0x329   :  { %v1784_v51 = vmul.f32 %v1766_v22, %v1750_v42  ;;  %v1785_v25 = vmul.f32 %v1766_v22, %v1751_v36  ;;  %v1786_v34 = vmul.f32 %v1766_v22, %v1752_v41  ;;  %v1787_v35 = vmul.f32 %v1766_v22, %v1753_v46 }
 0x32a   :  { %v1788_v31 = vmul.f32 %v1766_v22, %v1754_v47  ;;  %v1789_v43 = vmul.f32 %v1766_v22, %v1755_v52  ;;  %v1790_v45 = vmul.f32 %v1766_v22, %v1756_v57  ;;  %v1791_v48 = vmul.f32 %v1766_v22, %v1757_v62 }
 0x32b   :  { %v1792_v49 = vmul.f32 %v1766_v22, %v1758_v21  ;;  %v1793_v50 = vmul.f32 %v1766_v22, %v1759_v63  ;;  %v1794_v8 = vmul.f32 %v1766_v22, %v1760_v56  ;;  %v1795_v53 = vmul.f32 %v1766_v22, %v1761_v6 }
 0x32c   :  { %v1802_v55 = vadd.f32 %v1800_v54, %v1768_v26  ;;  %v1803_v13 = vadd.f32 %v1800_v54, %v1769_v11  ;;  %v1804_v58 = vadd.f32 %v1800_v54, %v1770_v33  ;;  %v1805_v59 = vadd.f32 %v1800_v54, %v1771_v17 }
 0x32d   :  { %v1806_v60 = vadd.f32 %v1800_v54, %v1772_v24  ;;  %v1807_v61 = vadd.f32 %v1800_v54, %v1773_v18  ;;  %v1808_v2 = vadd.f32 %v1800_v54, %v1774_v0  ;;  %v1809_v4 = vadd.f32 %v1800_v54, %v1775_v3 }
 0x32e   :  { %v1810_v5 = vadd.f32 %v1800_v54, %v1776_v30  ;;  %v1811_v7 = vadd.f32 %v1800_v54, %v1777_v29  ;;  %v1812_v10 = vadd.f32 %v1800_v54, %v1778_v39  ;;  %v1813_v12 = vadd.f32 %v1800_v54, %v1779_v37 }
 0x32f   :  { %v1814_v14 = vadd.f32 %v1800_v54, %v1780_v40  ;;  %v1815_v16 = vadd.f32 %v1800_v54, %v1781_v38  ;;  %v1816_v19 = vadd.f32 %v1800_v54, %v1782_v9  ;;  %v1817_v1 = vadd.f32 %v1800_v54, %v1783_v44 }
 0x330   :  { %v1818_v20 = vadd.f32 %v1800_v54, %v1784_v51  ;;  %v1819_v27 = vadd.f32 %v1800_v54, %v1785_v25  ;;  %v1820_v22 = vadd.f32 %v1800_v54, %v1786_v34  ;;  %v1821_v28 = vadd.f32 %v1800_v54, %v1787_v35 }
 0x331   :  { %v1822_v32 = vadd.f32 %v1800_v54, %v1788_v31  ;;  %v1823_v23 = vadd.f32 %v1800_v54, %v1789_v43  ;;  %v1824_v15 = vadd.f32 %v1800_v54, %v1790_v45  ;;  %v1825_v42 = vadd.f32 %v1800_v54, %v1791_v48 }
 0x332   :  { %v1826_v36 = vadd.f32 %v1800_v54, %v1792_v49  ;;  %v1827_v41 = vadd.f32 %v1800_v54, %v1793_v50  ;;  %v1828_v46 = vadd.f32 %v1800_v54, %v1794_v8  ;;  %v1829_v47 = vadd.f32 %v1800_v54, %v1795_v53 }
 0x333   :  { %v1830_v52 = vmax.f32 %v1802_v55, 0.0  ;;  %v1831_v57 = vmax.f32 %v1803_v13, 0.0  ;;  %v1832_v62 = vmax.f32 %v1804_v58, 0.0  ;;  %v1833_v21 = vmax.f32 %v1805_v59, 0.0 }
 0x334   :  { %v1834_v63 = vmax.f32 %v1806_v60, 0.0  ;;  %v1835_v56 = vmax.f32 %v1807_v61, 0.0  ;;  %v1836_v6 = vmax.f32 %v1808_v2, 0.0  ;;  %v1837_v26 = vmax.f32 %v1809_v4, 0.0 }
 0x335   :  { %v1838_v11 = vmax.f32 %v1810_v5, 0.0  ;;  %v1839_v33 = vmax.f32 %v1811_v7, 0.0  ;;  %v1840_v17 = vmax.f32 %v1812_v10, 0.0  ;;  %v1841_v24 = vmax.f32 %v1813_v12, 0.0  ;;  %1858 = vst [vmem:[%s3844_s5] sm:$0x1f] %v1830_v52 }
 0x336   :  { %1859 = vst [vmem:[%s3844_s5 + $0x8] sm:$0x1f] %v1831_v57  ;;  %1860 = vst [vmem:[%s3844_s5 + $0x10] sm:$0x1f] %v1832_v62  ;;  %v1842_v18 = vmax.f32 %v1814_v14, 0.0  ;;  %v1843_v0 = vmax.f32 %v1815_v16, 0.0 }
 0x337   :  { %1861 = vst [vmem:[%s3844_s5 + $0x18] sm:$0x1f] %v1833_v21  ;;  %v1844_v3 = vmax.f32 %v1816_v19, 0.0  ;;  %v1845_v30 = vmax.f32 %v1817_v1, 0.0  ;;  %1862 = vst [vmem:[%s3844_s5 + $0x20] sm:$0x1f] %v1834_v63 }
 0x338   :  { %1863 = vst [vmem:[%s3844_s5 + $0x28] sm:$0x1f] %v1835_v56  ;;  %1864 = vst [vmem:[%s3844_s5 + $0x30] sm:$0x1f] %v1836_v6  ;;  %v1846_v29 = vmax.f32 %v1818_v20, 0.0  ;;  %v1847_v39 = vmax.f32 %v1819_v27, 0.0 }
 0x339   :  { %1865 = vst [vmem:[%s3844_s5 + $0x38] sm:$0x1f] %v1837_v26  ;;  %v1848_v37 = vmax.f32 %v1820_v22, 0.0  ;;  %v1849_v40 = vmax.f32 %v1821_v28, 0.0  ;;  %1866 = vst [vmem:[%s3844_s5 + $0x40] sm:$0x1f] %v1838_v11 }
 0x33a   :  { %1867 = vst [vmem:[%s3844_s5 + $0x48] sm:$0x1f] %v1839_v33  ;;  %1868 = vst [vmem:[%s3844_s5 + $0x50] sm:$0x1f] %v1840_v17  ;;  %v1850_v38 = vmax.f32 %v1822_v32, 0.0  ;;  %v1851_v9 = vmax.f32 %v1823_v23, 0.0 }
 0x33b   :  { %1869 = vst [vmem:[%s3844_s5 + $0x58] sm:$0x1f] %v1841_v24  ;;  %v1852_v44 = vmax.f32 %v1824_v15, 0.0  ;;  %v1853_v51 = vmax.f32 %v1825_v42, 0.0  ;;  %1870 = vst [vmem:[%s3844_s5 + $0x60] sm:$0x1f] %v1842_v18 }
 0x33c   :  { %1871 = vst [vmem:[%s3844_s5 + $0x68] sm:$0x1f] %v1843_v0  ;;  %1872 = vst [vmem:[%s3844_s5 + $0x70] sm:$0x1f] %v1844_v3  ;;  %v1854_v25 = vmax.f32 %v1826_v36, 0.0  ;;  %v1855_v34 = vmax.f32 %v1827_v41, 0.0 }
 0x33d   :  { %1873 = vst [vmem:[%s3844_s5 + $0x78] sm:$0x1f] %v1845_v30  ;;  %v1856_v35 = vmax.f32 %v1828_v46, 0.0  ;;  %v1857_v31 = vmax.f32 %v1829_v47, 0.0  ;;  %1874 = vst [vmem:[%s3844_s5 + $0x80] sm:$0x1f] %v1846_v29 }
 0x33e   :  { %1875 = vst [vmem:[%s3844_s5 + $0x88] sm:$0x1f] %v1847_v39  ;;  %1876 = vst [vmem:[%s3844_s5 + $0x90] sm:$0x1f] %v1848_v37 }
 0x33f   :  { %1877 = vst [vmem:[%s3844_s5 + $0x98] sm:$0x1f] %v1849_v40  ;;  %1878 = vst [vmem:[%s3844_s5 + $0xa0] sm:$0x1f] %v1850_v38 }
 0x340   :  { %1879 = vst [vmem:[%s3844_s5 + $0xa8] sm:$0x1f] %v1851_v9  ;;  %1880 = vst [vmem:[%s3844_s5 + $0xb0] sm:$0x1f] %v1852_v44 }
 0x341   :  { %1881 = vst [vmem:[%s3844_s5 + $0xb8] sm:$0x1f] %v1853_v51  ;;  %1882 = vst [vmem:[%s3844_s5 + $0xc0] sm:$0x1f] %v1854_v25 }
 0x342   :  { %1883 = vst [vmem:[%s3844_s5 + $0xc8] sm:$0x1f] %v1855_v34  ;;  %1884 = vst [vmem:[%s3844_s5 + $0xd0] sm:$0x1f] %v1856_v35 }
 0x343   :  { %1885 = vst.msk [vmem:[%s3844_s5 + $0xd8] sm:$0x1f] %vm1611_vm2, %v1857_v31 }

// kernel: generator_forward.16
= control target key start
LH: loop header
LB: loop body
LE: loop exit
PB: predicated region body
PF: predicated region fallthrough
CT: control target
= control target key end

     0   :  { %vm473_vm0 = vcmask 1044480   ;;  %v1631_v3 = vmov 0.0   ;;  %vm469_vm1 = vcmask 1022976   ;;  %vm1579_vm2 = vcmask 585728   ;;  %s3194_s1 = inlined_call_operand.vmem [shape: f32[125,3528], index: 1, kind: input, shape index: {}]   ;;  %s3195_s0 = inlined_call_operand.vmem [shape: f32[5,125], index: 0, kind: input, shape index: {}]   ;;  %s3196_s2 = inlined_call_operand.vmem [shape: f32[5,1], index: 2, kind: input, shape index: {}]   ;;  %s3197_s3 = inlined_call_operand.vmem [shape: f32[5,3528], index: 3, kind: output, shape index: {}]  }
   0x1   :  { %v436_v0 = vld [vmem:[%s3194_s1 + $0xd28] sm:$0x1f]  ;;  %v438_v1 = vld [vmem:[%s3194_s1 + $0xd38] sm:$0x1f]  ;;  %v435_v2 = vld [vmem:[%s3194_s1 + $0xd20] sm:$0x1f]  ;;  %622 = vmatprep.mubr.f32.mxu0 %v1631_v3  ;;  %693 = vmatprep.mubr.f32.mxu1 %v1631_v3 }
   0x2   :  { %1585 = vmatprep.subr.msk.mxu0 %vm473_vm0, %v436_v0  ;;  %1588 = vmatprep.subr.msk.mxu1 %vm473_vm0, %v438_v1  ;;  %v437_v4 = vld [vmem:[%s3194_s1 + $0xd30] sm:$0x1f]  ;;  %v408_v5 = vld [vmem:[%s3194_s1 + $0xc48] sm:$0xff]  ;;  %v410_v6 = vld [vmem:[%s3194_s1 + $0xc58] sm:$0xff] }
   0x3   :  { %1586 = vmatpush1.msk.msra.mxu0 %vm473_vm0, %v435_v2  ;;  %1589 = vmatpush1.msk.msra.mxu1 %vm473_vm0, %v437_v4  ;;  %v407_v7 = vld [vmem:[%s3194_s1 + $0xc40] sm:$0xff]  ;;  %v409_v8 = vld [vmem:[%s3194_s1 + $0xc50] sm:$0xff]  ;;  %v380_v9 = vld [vmem:[%s3194_s1 + $0xb68] sm:$0xff] }
   0x4   :  { %560 = vmatprep.subr.mxu0 %v408_v5  ;;  %631 = vmatprep.subr.mxu1 %v410_v6  ;;  %v382_v10 = vld [vmem:[%s3194_s1 + $0xb78] sm:$0xff]  ;;  %v379_v11 = vld [vmem:[%s3194_s1 + $0xb60] sm:$0xff]  ;;  %v381_v12 = vld [vmem:[%s3194_s1 + $0xb70] sm:$0xff] }
   0x5   :  { %561 = vmatpush1.msra.mxu0 %v407_v7  ;;  %632 = vmatpush1.msra.mxu1 %v409_v8  ;;  %v352_v13 = vld [vmem:[%s3194_s1 + $0xa88] sm:$0xff]  ;;  %v354_v14 = vld [vmem:[%s3194_s1 + $0xa98] sm:$0xff]  ;;  %v351_v15 = vld [vmem:[%s3194_s1 + $0xa80] sm:$0xff] }
   0x6   :  { %562 = vmatprep.subr.mxu0 %v380_v9  ;;  %633 = vmatprep.subr.mxu1 %v382_v10  ;;  %v353_v16 = vld [vmem:[%s3194_s1 + $0xa90] sm:$0xff]  ;;  %v324_v17 = vld [vmem:[%s3194_s1 + $0x9a8] sm:$0xff]  ;;  %v326_v18 = vld [vmem:[%s3194_s1 + $0x9b8] sm:$0xff] }
   0x7   :  { %563 = vmatpush1.msra.mxu0 %v379_v11  ;;  %634 = vmatpush1.msra.mxu1 %v381_v12  ;;  %v323_v19 = vld [vmem:[%s3194_s1 + $0x9a0] sm:$0xff]  ;;  %v325_v20 = vld [vmem:[%s3194_s1 + $0x9b0] sm:$0xff]  ;;  %v296_v21 = vld [vmem:[%s3194_s1 + $0x8c8] sm:$0xff] }
   0x8   :  { %564 = vmatprep.subr.mxu0 %v352_v13  ;;  %635 = vmatprep.subr.mxu1 %v354_v14  ;;  %v298_v22 = vld [vmem:[%s3194_s1 + $0x8d8] sm:$0xff]  ;;  %v295_v23 = vld [vmem:[%s3194_s1 + $0x8c0] sm:$0xff]  ;;  %v297_v24 = vld [vmem:[%s3194_s1 + $0x8d0] sm:$0xff] }
   0x9   :  { %565 = vmatpush1.msra.mxu0 %v351_v15  ;;  %636 = vmatpush1.msra.mxu1 %v353_v16  ;;  %v268_v25 = vld [vmem:[%s3194_s1 + $0x7e8] sm:$0xff]  ;;  %v270_v26 = vld [vmem:[%s3194_s1 + $0x7f8] sm:$0xff]  ;;  %v267_v27 = vld [vmem:[%s3194_s1 + $0x7e0] sm:$0xff] }
   0xa   :  { %566 = vmatprep.subr.mxu0 %v324_v17  ;;  %637 = vmatprep.subr.mxu1 %v326_v18  ;;  %v269_v28 = vld [vmem:[%s3194_s1 + $0x7f0] sm:$0xff]  ;;  %v240_v29 = vld [vmem:[%s3194_s1 + $0x708] sm:$0xff]  ;;  %v242_v30 = vld [vmem:[%s3194_s1 + $0x718] sm:$0xff] }
   0xb   :  { %567 = vmatpush1.msra.mxu0 %v323_v19  ;;  %638 = vmatpush1.msra.mxu1 %v325_v20  ;;  %v239_v31 = vld [vmem:[%s3194_s1 + $0x700] sm:$0xff]  ;;  %v241_v32 = vld [vmem:[%s3194_s1 + $0x710] sm:$0xff]  ;;  %v212_v33 = vld [vmem:[%s3194_s1 + $0x628] sm:$0xff] }
   0xc   :  { %568 = vmatprep.subr.mxu0 %v296_v21  ;;  %639 = vmatprep.subr.mxu1 %v298_v22  ;;  %v214_v34 = vld [vmem:[%s3194_s1 + $0x638] sm:$0xff]  ;;  %v211_v35 = vld [vmem:[%s3194_s1 + $0x620] sm:$0xff]  ;;  %v213_v36 = vld [vmem:[%s3194_s1 + $0x630] sm:$0xff] }
   0xd   :  { %569 = vmatpush1.msra.mxu0 %v295_v23  ;;  %640 = vmatpush1.msra.mxu1 %v297_v24  ;;  %v184_v37 = vld [vmem:[%s3194_s1 + $0x548] sm:$0xff]  ;;  %v186_v38 = vld [vmem:[%s3194_s1 + $0x558] sm:$0xff]  ;;  %v183_v39 = vld [vmem:[%s3194_s1 + $0x540] sm:$0xff] }
   0xe   :  { %570 = vmatprep.subr.mxu0 %v268_v25  ;;  %641 = vmatprep.subr.mxu1 %v270_v26  ;;  %v185_v40 = vld [vmem:[%s3194_s1 + $0x550] sm:$0xff]  ;;  %v156_v41 = vld [vmem:[%s3194_s1 + $0x468] sm:$0xff]  ;;  %v158_v42 = vld [vmem:[%s3194_s1 + $0x478] sm:$0xff] }
   0xf   :  { %571 = vmatpush1.msra.mxu0 %v267_v27  ;;  %642 = vmatpush1.msra.mxu1 %v269_v28  ;;  %v155_v43 = vld [vmem:[%s3194_s1 + $0x460] sm:$0xff]  ;;  %v157_v44 = vld [vmem:[%s3194_s1 + $0x470] sm:$0xff]  ;;  %v128_v45 = vld [vmem:[%s3194_s1 + $0x388] sm:$0xff] }
  0x10   :  { %572 = vmatprep.subr.mxu0 %v240_v29  ;;  %643 = vmatprep.subr.mxu1 %v242_v30  ;;  %v130_v46 = vld [vmem:[%s3194_s1 + $0x398] sm:$0xff]  ;;  %v127_v47 = vld [vmem:[%s3194_s1 + $0x380] sm:$0xff]  ;;  %v129_v48 = vld [vmem:[%s3194_s1 + $0x390] sm:$0xff] }
  0x11   :  { %573 = vmatpush1.msra.mxu0 %v239_v31  ;;  %644 = vmatpush1.msra.mxu1 %v241_v32  ;;  %v100_v49 = vld [vmem:[%s3194_s1 + $0x2a8] sm:$0xff]  ;;  %v102_v50 = vld [vmem:[%s3194_s1 + $0x2b8] sm:$0xff]  ;;  %v99_v51 = vld [vmem:[%s3194_s1 + $0x2a0] sm:$0xff] }
  0x12   :  { %574 = vmatprep.subr.mxu0 %v212_v33  ;;  %645 = vmatprep.subr.mxu1 %v214_v34  ;;  %v101_v52 = vld [vmem:[%s3194_s1 + $0x2b0] sm:$0xff]  ;;  %v72_v53 = vld [vmem:[%s3194_s1 + $0x1c8] sm:$0xff]  ;;  %v74_v54 = vld [vmem:[%s3194_s1 + $0x1d8] sm:$0xff] }
  0x13   :  { %575 = vmatpush1.msra.mxu0 %v211_v35  ;;  %646 = vmatpush1.msra.mxu1 %v213_v36  ;;  %v71_v55 = vld [vmem:[%s3194_s1 + $0x1c0] sm:$0xff]  ;;  %v73_v56 = vld [vmem:[%s3194_s1 + $0x1d0] sm:$0xff]  ;;  %v44_v57 = vld [vmem:[%s3194_s1 + $0xe8] sm:$0xff] }
  0x14   :  { %576 = vmatprep.subr.mxu0 %v184_v37  ;;  %647 = vmatprep.subr.mxu1 %v186_v38  ;;  %v46_v58 = vld [vmem:[%s3194_s1 + $0xf8] sm:$0xff]  ;;  %v43_v59 = vld [vmem:[%s3194_s1 + $0xe0] sm:$0xff]  ;;  %v45_v60 = vld [vmem:[%s3194_s1 + $0xf0] sm:$0xff] }
  0x15   :  { %577 = vmatpush1.msra.mxu0 %v183_v39  ;;  %648 = vmatpush1.msra.mxu1 %v185_v40  ;;  %v16_v61 = vld [vmem:[%s3194_s1 + $0x8] sm:$0xff]  ;;  %v18_v62 = vld [vmem:[%s3194_s1 + $0x18] sm:$0xff]  ;;  %v15_v63 = vld [vmem:[%s3194_s1] sm:$0xff] }
  0x16   :  { %578 = vmatprep.subr.mxu0 %v156_v41  ;;  %649 = vmatprep.subr.mxu1 %v158_v42  ;;  %v17_v0 = vld [vmem:[%s3194_s1 + $0x10] sm:$0xff]  ;;  %v1854_v1 = vld [vmem:[%s3195_s0] sm:$0x1f]  ;;  %v440_v2 = vld [vmem:[%s3194_s1 + $0xd48] sm:$0x1f] }
  0x17   :  { %579 = vmatpush1.msra.mxu0 %v155_v43  ;;  %650 = vmatpush1.msra.mxu1 %v157_v44  ;;  %v442_v4 = vld [vmem:[%s3194_s1 + $0xd58] sm:$0x1f]  ;;  %v439_v5 = vld [vmem:[%s3194_s1 + $0xd40] sm:$0x1f]  ;;  %v441_v6 = vld [vmem:[%s3194_s1 + $0xd50] sm:$0x1f] }
  0x18   :  { %580 = vmatprep.subr.mxu0 %v128_v45  ;;  %651 = vmatprep.subr.mxu1 %v130_v46  ;;  %v412_v7 = vld [vmem:[%s3194_s1 + $0xc68] sm:$0xff]  ;;  %v414_v8 = vld [vmem:[%s3194_s1 + $0xc78] sm:$0xff]  ;;  %v411_v9 = vld [vmem:[%s3194_s1 + $0xc60] sm:$0xff] }
  0x19   :  { %581 = vmatpush1.msra.mxu0 %v127_v47  ;;  %652 = vmatpush1.msra.mxu1 %v129_v48  ;;  %v413_v10 = vld [vmem:[%s3194_s1 + $0xc70] sm:$0xff]  ;;  %v384_v11 = vld [vmem:[%s3194_s1 + $0xb88] sm:$0xff]  ;;  %v386_v12 = vld [vmem:[%s3194_s1 + $0xb98] sm:$0xff] }
  0x1a   :  { %582 = vmatprep.subr.mxu0 %v100_v49  ;;  %653 = vmatprep.subr.mxu1 %v102_v50  ;;  %v383_v13 = vld [vmem:[%s3194_s1 + $0xb80] sm:$0xff]  ;;  %v385_v14 = vld [vmem:[%s3194_s1 + $0xb90] sm:$0xff]  ;;  %v356_v15 = vld [vmem:[%s3194_s1 + $0xaa8] sm:$0xff] }
  0x1b   :  { %583 = vmatpush1.msra.mxu0 %v99_v51  ;;  %654 = vmatpush1.msra.mxu1 %v101_v52  ;;  %v358_v16 = vld [vmem:[%s3194_s1 + $0xab8] sm:$0xff]  ;;  %v355_v17 = vld [vmem:[%s3194_s1 + $0xaa0] sm:$0xff]  ;;  %v357_v18 = vld [vmem:[%s3194_s1 + $0xab0] sm:$0xff] }
  0x1c   :  { %584 = vmatprep.subr.mxu0 %v72_v53  ;;  %655 = vmatprep.subr.mxu1 %v74_v54  ;;  %v328_v19 = vld [vmem:[%s3194_s1 + $0x9c8] sm:$0xff]  ;;  %v330_v20 = vld [vmem:[%s3194_s1 + $0x9d8] sm:$0xff]  ;;  %v327_v21 = vld [vmem:[%s3194_s1 + $0x9c0] sm:$0xff] }
  0x1d   :  { %585 = vmatpush1.msra.mxu0 %v71_v55  ;;  %656 = vmatpush1.msra.mxu1 %v73_v56  ;;  %v329_v22 = vld [vmem:[%s3194_s1 + $0x9d0] sm:$0xff]  ;;  %v300_v23 = vld [vmem:[%s3194_s1 + $0x8e8] sm:$0xff]  ;;  %v302_v24 = vld [vmem:[%s3194_s1 + $0x8f8] sm:$0xff] }
  0x1e   :  { %586 = vmatprep.subr.mxu0 %v44_v57  ;;  %657 = vmatprep.subr.mxu1 %v46_v58  ;;  %v299_v25 = vld [vmem:[%s3194_s1 + $0x8e0] sm:$0xff]  ;;  %v301_v26 = vld [vmem:[%s3194_s1 + $0x8f0] sm:$0xff]  ;;  %v272_v27 = vld [vmem:[%s3194_s1 + $0x808] sm:$0xff] }
  0x1f   :  { %587 = vmatpush1.msra.mxu0 %v43_v59  ;;  %658 = vmatpush1.msra.mxu1 %v45_v60  ;;  %v274_v28 = vld [vmem:[%s3194_s1 + $0x818] sm:$0xff]  ;;  %v271_v29 = vld [vmem:[%s3194_s1 + $0x800] sm:$0xff]  ;;  %v273_v30 = vld [vmem:[%s3194_s1 + $0x810] sm:$0xff] }
  0x20   :  { %588 = vmatprep.subr.mxu0 %v16_v61  ;;  %659 = vmatprep.subr.mxu1 %v18_v62  ;;  %v244_v31 = vld [vmem:[%s3194_s1 + $0x728] sm:$0xff]  ;;  %v246_v32 = vld [vmem:[%s3194_s1 + $0x738] sm:$0xff]  ;;  %v243_v33 = vld [vmem:[%s3194_s1 + $0x720] sm:$0xff] }
  0x21   :  { %589 = vmatpush1.msra.mxu0 %v15_v63  ;;  %660 = vmatpush1.msra.mxu1 %v17_v0  ;;  %v245_v34 = vld [vmem:[%s3194_s1 + $0x730] sm:$0xff]  ;;  %v216_v35 = vld [vmem:[%s3194_s1 + $0x648] sm:$0xff]  ;;  %v218_v36 = vld [vmem:[%s3194_s1 + $0x658] sm:$0xff] }
  0x22   :  { %1587 = vmatmul.mubr.msk.f32.vlgmr.msra.gmra.mxu0 %vm469_vm1, %v1854_v1  ;;  %1590 = vmatmul.mubr.msk.f32.vlgmr.msra.gmra.mxu1 %vm469_vm1, %v1854_v1  ;;  %v215_v37 = vld [vmem:[%s3194_s1 + $0x640] sm:$0xff]  ;;  %v217_v38 = vld [vmem:[%s3194_s1 + $0x650] sm:$0xff]  ;;  %v188_v39 = vld [vmem:[%s3194_s1 + $0x568] sm:$0xff] }
  0x23   :  { %1591 = vmatprep.subr.msk.mxu0 %vm473_vm0, %v440_v2  ;;  %1594 = vmatprep.subr.msk.mxu1 %vm473_vm0, %v442_v4  ;;  %v190_v40 = vld [vmem:[%s3194_s1 + $0x578] sm:$0xff]  ;;  %v187_v41 = vld [vmem:[%s3194_s1 + $0x560] sm:$0xff]  ;;  %v189_v42 = vld [vmem:[%s3194_s1 + $0x570] sm:$0xff] }
  0x24   :  { %1592 = vmatpush1.msk.msra.mxu0 %vm473_vm0, %v439_v5  ;;  %1595 = vmatpush1.msk.msra.mxu1 %vm473_vm0, %v441_v6  ;;  %v160_v43 = vld [vmem:[%s3194_s1 + $0x488] sm:$0xff]  ;;  %v162_v44 = vld [vmem:[%s3194_s1 + $0x498] sm:$0xff]  ;;  %v159_v45 = vld [vmem:[%s3194_s1 + $0x480] sm:$0xff] }
  0x25   :  { %702 = vmatprep.subr.mxu0 %v412_v7  ;;  %773 = vmatprep.subr.mxu1 %v414_v8  ;;  %v161_v46 = vld [vmem:[%s3194_s1 + $0x490] sm:$0xff]  ;;  %v132_v47 = vld [vmem:[%s3194_s1 + $0x3a8] sm:$0xff]  ;;  %v134_v48 = vld [vmem:[%s3194_s1 + $0x3b8] sm:$0xff] }
  0x26   :  { %703 = vmatpush1.msra.mxu0 %v411_v9  ;;  %774 = vmatpush1.msra.mxu1 %v413_v10  ;;  %v131_v49 = vld [vmem:[%s3194_s1 + $0x3a0] sm:$0xff]  ;;  %v133_v50 = vld [vmem:[%s3194_s1 + $0x3b0] sm:$0xff]  ;;  %v104_v51 = vld [vmem:[%s3194_s1 + $0x2c8] sm:$0xff] }
  0x27   :  { %704 = vmatprep.subr.mxu0 %v384_v11  ;;  %775 = vmatprep.subr.mxu1 %v386_v12  ;;  %v106_v52 = vld [vmem:[%s3194_s1 + $0x2d8] sm:$0xff]  ;;  %v103_v53 = vld [vmem:[%s3194_s1 + $0x2c0] sm:$0xff]  ;;  %v105_v54 = vld [vmem:[%s3194_s1 + $0x2d0] sm:$0xff] }
  0x28   :  { %705 = vmatpush1.msra.mxu0 %v383_v13  ;;  %776 = vmatpush1.msra.mxu1 %v385_v14  ;;  %v76_v55 = vld [vmem:[%s3194_s1 + $0x1e8] sm:$0xff]  ;;  %v78_v56 = vld [vmem:[%s3194_s1 + $0x1f8] sm:$0xff]  ;;  %v75_v57 = vld [vmem:[%s3194_s1 + $0x1e0] sm:$0xff] }
  0x29   :  { %706 = vmatprep.subr.mxu0 %v356_v15  ;;  %777 = vmatprep.subr.mxu1 %v358_v16  ;;  %v77_v58 = vld [vmem:[%s3194_s1 + $0x1f0] sm:$0xff]  ;;  %v48_v59 = vld [vmem:[%s3194_s1 + $0x108] sm:$0xff]  ;;  %v50_v60 = vld [vmem:[%s3194_s1 + $0x118] sm:$0xff] }
  0x2a   :  { %707 = vmatpush1.msra.mxu0 %v355_v17  ;;  %778 = vmatpush1.msra.mxu1 %v357_v18  ;;  %v47_v61 = vld [vmem:[%s3194_s1 + $0x100] sm:$0xff]  ;;  %v49_v62 = vld [vmem:[%s3194_s1 + $0x110] sm:$0xff]  ;;  %v20_v63 = vld [vmem:[%s3194_s1 + $0x28] sm:$0xff] }
  0x2b   :  { %708 = vmatprep.subr.mxu0 %v328_v19  ;;  %779 = vmatprep.subr.mxu1 %v330_v20  ;;  %v22_v0 = vld [vmem:[%s3194_s1 + $0x38] sm:$0xff]  ;;  %v19_v2 = vld [vmem:[%s3194_s1 + $0x20] sm:$0xff]  ;;  %v21_v4 = vld [vmem:[%s3194_s1 + $0x30] sm:$0xff] }
  0x2c   :  { %709 = vmatpush1.msra.mxu0 %v327_v21  ;;  %780 = vmatpush1.msra.mxu1 %v329_v22  ;;  %v444_v5 = vld [vmem:[%s3194_s1 + $0xd68] sm:$0x1f]  ;;  %v446_v6 = vld [vmem:[%s3194_s1 + $0xd78] sm:$0x1f]  ;;  %v443_v7 = vld [vmem:[%s3194_s1 + $0xd60] sm:$0x1f] }
  0x2d   :  { %710 = vmatprep.subr.mxu0 %v300_v23  ;;  %781 = vmatprep.subr.mxu1 %v302_v24  ;;  %v445_v8 = vld [vmem:[%s3194_s1 + $0xd70] sm:$0x1f]  ;;  %v416_v9 = vld [vmem:[%s3194_s1 + $0xc88] sm:$0xff]  ;;  %v418_v10 = vld [vmem:[%s3194_s1 + $0xc98] sm:$0xff] }
  0x2e   :  { %711 = vmatpush1.msra.mxu0 %v299_v25  ;;  %782 = vmatpush1.msra.mxu1 %v301_v26  ;;  %v415_v11 = vld [vmem:[%s3194_s1 + $0xc80] sm:$0xff]  ;;  %v417_v12 = vld [vmem:[%s3194_s1 + $0xc90] sm:$0xff]  ;;  %v388_v13 = vld [vmem:[%s3194_s1 + $0xba8] sm:$0xff] }
  0x2f   :  { %712 = vmatprep.subr.mxu0 %v272_v27  ;;  %783 = vmatprep.subr.mxu1 %v274_v28  ;;  %v390_v14 = vld [vmem:[%s3194_s1 + $0xbb8] sm:$0xff]  ;;  %v387_v15 = vld [vmem:[%s3194_s1 + $0xba0] sm:$0xff]  ;;  %v389_v16 = vld [vmem:[%s3194_s1 + $0xbb0] sm:$0xff] }
  0x30   :  { %713 = vmatpush1.msra.mxu0 %v271_v29  ;;  %784 = vmatpush1.msra.mxu1 %v273_v30  ;;  %v360_v17 = vld [vmem:[%s3194_s1 + $0xac8] sm:$0xff]  ;;  %v362_v18 = vld [vmem:[%s3194_s1 + $0xad8] sm:$0xff]  ;;  %v359_v19 = vld [vmem:[%s3194_s1 + $0xac0] sm:$0xff] }
  0x31   :  { %714 = vmatprep.subr.mxu0 %v244_v31  ;;  %785 = vmatprep.subr.mxu1 %v246_v32  ;;  %v361_v20 = vld [vmem:[%s3194_s1 + $0xad0] sm:$0xff]  ;;  %v332_v21 = vld [vmem:[%s3194_s1 + $0x9e8] sm:$0xff]  ;;  %v334_v22 = vld [vmem:[%s3194_s1 + $0x9f8] sm:$0xff] }
  0x32   :  { %715 = vmatpush1.msra.mxu0 %v243_v33  ;;  %786 = vmatpush1.msra.mxu1 %v245_v34  ;;  %v331_v23 = vld [vmem:[%s3194_s1 + $0x9e0] sm:$0xff]  ;;  %v333_v24 = vld [vmem:[%s3194_s1 + $0x9f0] sm:$0xff]  ;;  %v304_v25 = vld [vmem:[%s3194_s1 + $0x908] sm:$0xff] }
  0x33   :  { %716 = vmatprep.subr.mxu0 %v216_v35  ;;  %787 = vmatprep.subr.mxu1 %v218_v36  ;;  %v306_v26 = vld [vmem:[%s3194_s1 + $0x918] sm:$0xff]  ;;  %v303_v27 = vld [vmem:[%s3194_s1 + $0x900] sm:$0xff]  ;;  %v305_v28 = vld [vmem:[%s3194_s1 + $0x910] sm:$0xff] }
  0x34   :  { %717 = vmatpush1.msra.mxu0 %v215_v37  ;;  %788 = vmatpush1.msra.mxu1 %v217_v38  ;;  %v276_v29 = vld [vmem:[%s3194_s1 + $0x828] sm:$0xff]  ;;  %v278_v30 = vld [vmem:[%s3194_s1 + $0x838] sm:$0xff]  ;;  %v275_v31 = vld [vmem:[%s3194_s1 + $0x820] sm:$0xff] }
  0x35   :  { %718 = vmatprep.subr.mxu0 %v188_v39  ;;  %789 = vmatprep.subr.mxu1 %v190_v40  ;;  %v277_v32 = vld [vmem:[%s3194_s1 + $0x830] sm:$0xff]  ;;  %v248_v33 = vld [vmem:[%s3194_s1 + $0x748] sm:$0xff]  ;;  %v250_v34 = vld [vmem:[%s3194_s1 + $0x758] sm:$0xff] }
  0x36   :  { %719 = vmatpush1.msra.mxu0 %v187_v41  ;;  %790 = vmatpush1.msra.mxu1 %v189_v42  ;;  %v247_v35 = vld [vmem:[%s3194_s1 + $0x740] sm:$0xff]  ;;  %v249_v36 = vld [vmem:[%s3194_s1 + $0x750] sm:$0xff]  ;;  %v220_v37 = vld [vmem:[%s3194_s1 + $0x668] sm:$0xff] }
  0x37   :  { %720 = vmatprep.subr.mxu0 %v160_v43  ;;  %791 = vmatprep.subr.mxu1 %v162_v44  ;;  %v222_v38 = vld [vmem:[%s3194_s1 + $0x678] sm:$0xff]  ;;  %v219_v39 = vld [vmem:[%s3194_s1 + $0x660] sm:$0xff]  ;;  %v221_v40 = vld [vmem:[%s3194_s1 + $0x670] sm:$0xff] }
  0x38   :  { %721 = vmatpush1.msra.mxu0 %v159_v45  ;;  %792 = vmatpush1.msra.mxu1 %v161_v46  ;;  %v192_v41 = vld [vmem:[%s3194_s1 + $0x588] sm:$0xff]  ;;  %v194_v42 = vld [vmem:[%s3194_s1 + $0x598] sm:$0xff]  ;;  %v191_v43 = vld [vmem:[%s3194_s1 + $0x580] sm:$0xff] }
  0x39   :  { %722 = vmatprep.subr.mxu0 %v132_v47  ;;  %793 = vmatprep.subr.mxu1 %v134_v48  ;;  %v193_v44 = vld [vmem:[%s3194_s1 + $0x590] sm:$0xff]  ;;  %v164_v45 = vld [vmem:[%s3194_s1 + $0x4a8] sm:$0xff]  ;;  %v166_v46 = vld [vmem:[%s3194_s1 + $0x4b8] sm:$0xff] }
  0x3a   :  { %723 = vmatpush1.msra.mxu0 %v131_v49  ;;  %794 = vmatpush1.msra.mxu1 %v133_v50  ;;  %v163_v47 = vld [vmem:[%s3194_s1 + $0x4a0] sm:$0xff]  ;;  %v165_v48 = vld [vmem:[%s3194_s1 + $0x4b0] sm:$0xff]  ;;  %v136_v49 = vld [vmem:[%s3194_s1 + $0x3c8] sm:$0xff] }
  0x3b   :  { %724 = vmatprep.subr.mxu0 %v104_v51  ;;  %795 = vmatprep.subr.mxu1 %v106_v52  ;;  %v138_v50 = vld [vmem:[%s3194_s1 + $0x3d8] sm:$0xff]  ;;  %v135_v51 = vld [vmem:[%s3194_s1 + $0x3c0] sm:$0xff]  ;;  %v137_v52 = vld [vmem:[%s3194_s1 + $0x3d0] sm:$0xff] }
  0x3c   :  { %725 = vmatpush1.msra.mxu0 %v103_v53  ;;  %796 = vmatpush1.msra.mxu1 %v105_v54  ;;  %v108_v53 = vld [vmem:[%s3194_s1 + $0x2e8] sm:$0xff]  ;;  %v110_v54 = vld [vmem:[%s3194_s1 + $0x2f8] sm:$0xff] }
  0x3d   :  { %726 = vmatprep.subr.mxu0 %v76_v55  ;;  %797 = vmatprep.subr.mxu1 %v78_v56  ;;  %v107_v55 = vld [vmem:[%s3194_s1 + $0x2e0] sm:$0xff]  ;;  %v109_v56 = vld [vmem:[%s3194_s1 + $0x2f0] sm:$0xff] }
  0x3e   :  { %727 = vmatpush1.msra.mxu0 %v75_v57  ;;  %798 = vmatpush1.msra.mxu1 %v77_v58  ;;  %v80_v57 = vld [vmem:[%s3194_s1 + $0x208] sm:$0xff]  ;;  %v82_v58 = vld [vmem:[%s3194_s1 + $0x218] sm:$0xff] }
  0x3f   :  { %728 = vmatprep.subr.mxu0 %v48_v59  ;;  %799 = vmatprep.subr.mxu1 %v50_v60  ;;  %v79_v59 = vld [vmem:[%s3194_s1 + $0x200] sm:$0xff]  ;;  %v81_v60 = vld [vmem:[%s3194_s1 + $0x210] sm:$0xff] }
  0x40   :  { %729 = vmatpush1.msra.mxu0 %v47_v61  ;;  %800 = vmatpush1.msra.mxu1 %v49_v62  ;;  %v52_v61 = vld [vmem:[%s3194_s1 + $0x128] sm:$0xff]  ;;  %v54_v62 = vld [vmem:[%s3194_s1 + $0x138] sm:$0xff] }
  0x41   :  { %730 = vmatprep.subr.mxu0 %v20_v63  ;;  %801 = vmatprep.subr.mxu1 %v22_v0  ;;  %v51_v63 = vld [vmem:[%s3194_s1 + $0x120] sm:$0xff]  ;;  %v53_v0 = vld [vmem:[%s3194_s1 + $0x130] sm:$0xff] }
  0x42   :  { %731 = vmatpush1.msra.mxu0 %v19_v2  ;;  %764 = vmatprep.mubr.f32.mxu0 %v1631_v3  ;;  %v24_v2 = vld [vmem:[%s3194_s1 + $0x48] sm:$0xff] }
  0x43   :  { %802 = vmatpush1.msra.mxu1 %v21_v4  ;;  %835 = vmatprep.mubr.f32.mxu1 %v1631_v3  ;;  %v26_v4 = vld [vmem:[%s3194_s1 + $0x58] sm:$0xff] }
  0x44   :  { %1593 = vmatmul.mubr.msk.f32.vlgmr.msra.gmra.mxu0 %vm469_vm1, %v1854_v1  ;;  %1596 = vmatmul.mubr.msk.f32.vlgmr.msra.gmra.mxu1 %vm469_vm1, %v1854_v1 }
  0x45   :  { %1597 = vmatprep.subr.msk.mxu0 %vm473_vm0, %v444_v5  ;;  %1600 = vmatprep.subr.msk.mxu1 %vm473_vm0, %v446_v6  ;;  %v23_v5 = vld [vmem:[%s3194_s1 + $0x40] sm:$0xff]  ;;  %v25_v6 = vld [vmem:[%s3194_s1 + $0x50] sm:$0xff] }
  0x46   :  { %1598 = vmatpush1.msk.msra.mxu0 %vm473_vm0, %v443_v7  ;;  %1601 = vmatpush1.msk.msra.mxu1 %vm473_vm0, %v445_v8  ;;  %v448_v7 = vld [vmem:[%s3194_s1 + $0xd88] sm:$0x1f]  ;;  %v450_v8 = vld [vmem:[%s3194_s1 + $0xd98] sm:$0x1f] }
  0x47   :  { %844 = vmatprep.subr.mxu0 %v416_v9  ;;  %915 = vmatprep.subr.mxu1 %v418_v10  ;;  %v447_v9 = vld [vmem:[%s3194_s1 + $0xd80] sm:$0x1f]  ;;  %v449_v10 = vld [vmem:[%s3194_s1 + $0xd90] sm:$0x1f] }
  0x48   :  { %845 = vmatpush1.msra.mxu0 %v415_v11  ;;  %916 = vmatpush1.msra.mxu1 %v417_v12  ;;  %v420_v11 = vld [vmem:[%s3194_s1 + $0xca8] sm:$0xff]  ;;  %v422_v12 = vld [vmem:[%s3194_s1 + $0xcb8] sm:$0xff] }
  0x49   :  { %846 = vmatprep.subr.mxu0 %v388_v13  ;;  %917 = vmatprep.subr.mxu1 %v390_v14  ;;  %v419_v13 = vld [vmem:[%s3194_s1 + $0xca0] sm:$0xff]  ;;  %v421_v14 = vld [vmem:[%s3194_s1 + $0xcb0] sm:$0xff] }
  0x4a   :  { %847 = vmatpush1.msra.mxu0 %v387_v15  ;;  %918 = vmatpush1.msra.mxu1 %v389_v16  ;;  %v392_v15 = vld [vmem:[%s3194_s1 + $0xbc8] sm:$0xff]  ;;  %v394_v16 = vld [vmem:[%s3194_s1 + $0xbd8] sm:$0xff] }
  0x4b   :  { %848 = vmatprep.subr.mxu0 %v360_v17  ;;  %919 = vmatprep.subr.mxu1 %v362_v18  ;;  %v391_v17 = vld [vmem:[%s3194_s1 + $0xbc0] sm:$0xff]  ;;  %v393_v18 = vld [vmem:[%s3194_s1 + $0xbd0] sm:$0xff] }
  0x4c   :  { %849 = vmatpush1.msra.mxu0 %v359_v19  ;;  %920 = vmatpush1.msra.mxu1 %v361_v20  ;;  %v463_v19 = vld [vmem:[%s3196_s2] sm:$0x1f]  ;;  %v364_v20 = vld [vmem:[%s3194_s1 + $0xae8] sm:$0xff] }
  0x4d   :  { %850 = vmatprep.subr.mxu0 %v332_v21  ;;  %921 = vmatprep.subr.mxu1 %v334_v22  ;;  %v366_v21 = vld [vmem:[%s3194_s1 + $0xaf8] sm:$0xff]  ;;  %v1632_v22 = vmov 0  }
  0x4e   :  { %851 = vmatpush1.msra.mxu0 %v331_v23  ;;  %922 = vmatpush1.msra.mxu1 %v333_v24  ;;  %v363_v23 = vld [vmem:[%s3194_s1 + $0xae0] sm:$0xff]  ;;  %v365_v24 = vld [vmem:[%s3194_s1 + $0xaf0] sm:$0xff] }
  0x4f   :  { %852 = vmatprep.subr.mxu0 %v304_v25  ;;  %923 = vmatprep.subr.mxu1 %v306_v26  ;;  %v336_v25 = vld [vmem:[%s3194_s1 + $0xa08] sm:$0xff]  ;;  %v338_v26 = vld [vmem:[%s3194_s1 + $0xa18] sm:$0xff] }
  0x50   :  { %853 = vmatpush1.msra.mxu0 %v303_v27  ;;  %924 = vmatpush1.msra.mxu1 %v305_v28  ;;  %v335_v27 = vld [vmem:[%s3194_s1 + $0xa00] sm:$0xff]  ;;  %v337_v28 = vld [vmem:[%s3194_s1 + $0xa10] sm:$0xff] }
  0x51   :  { %854 = vmatprep.subr.mxu0 %v276_v29  ;;  %925 = vmatprep.subr.mxu1 %v278_v30  ;;  %v308_v29 = vld [vmem:[%s3194_s1 + $0x928] sm:$0xff]  ;;  %v310_v30 = vld [vmem:[%s3194_s1 + $0x938] sm:$0xff] }
  0x52   :  { %855 = vmatpush1.msra.mxu0 %v275_v31  ;;  %926 = vmatpush1.msra.mxu1 %v277_v32  ;;  %v307_v31 = vld [vmem:[%s3194_s1 + $0x920] sm:$0xff]  ;;  %v309_v32 = vld [vmem:[%s3194_s1 + $0x930] sm:$0xff] }
  0x53   :  { %856 = vmatprep.subr.mxu0 %v248_v33  ;;  %927 = vmatprep.subr.mxu1 %v250_v34  ;;  %v280_v33 = vld [vmem:[%s3194_s1 + $0x848] sm:$0xff]  ;;  %v282_v34 = vld [vmem:[%s3194_s1 + $0x858] sm:$0xff] }
  0x54   :  { %857 = vmatpush1.msra.mxu0 %v247_v35  ;;  %928 = vmatpush1.msra.mxu1 %v249_v36  ;;  %v279_v35 = vld [vmem:[%s3194_s1 + $0x840] sm:$0xff]  ;;  %v281_v36 = vld [vmem:[%s3194_s1 + $0x850] sm:$0xff] }
  0x55   :  { %858 = vmatprep.subr.mxu0 %v220_v37  ;;  %929 = vmatprep.subr.mxu1 %v222_v38  ;;  %v252_v37 = vld [vmem:[%s3194_s1 + $0x768] sm:$0xff]  ;;  %v254_v38 = vld [vmem:[%s3194_s1 + $0x778] sm:$0xff] }
  0x56   :  { %859 = vmatpush1.msra.mxu0 %v219_v39  ;;  %930 = vmatpush1.msra.mxu1 %v221_v40  ;;  %v251_v39 = vld [vmem:[%s3194_s1 + $0x760] sm:$0xff]  ;;  %v253_v40 = vld [vmem:[%s3194_s1 + $0x770] sm:$0xff] }
  0x57   :  { %860 = vmatprep.subr.mxu0 %v192_v41  ;;  %931 = vmatprep.subr.mxu1 %v194_v42  ;;  %v224_v41 = vld [vmem:[%s3194_s1 + $0x688] sm:$0xff]  ;;  %v226_v42 = vld [vmem:[%s3194_s1 + $0x698] sm:$0xff] }
  0x58   :  { %861 = vmatpush1.msra.mxu0 %v191_v43  ;;  %932 = vmatpush1.msra.mxu1 %v193_v44  ;;  %v223_v43 = vld [vmem:[%s3194_s1 + $0x680] sm:$0xff]  ;;  %v225_v44 = vld [vmem:[%s3194_s1 + $0x690] sm:$0xff] }
  0x59   :  { %862 = vmatprep.subr.mxu0 %v164_v45  ;;  %933 = vmatprep.subr.mxu1 %v166_v46  ;;  %v196_v45 = vld [vmem:[%s3194_s1 + $0x5a8] sm:$0xff]  ;;  %v198_v46 = vld [vmem:[%s3194_s1 + $0x5b8] sm:$0xff] }
  0x5a   :  { %863 = vmatpush1.msra.mxu0 %v163_v47  ;;  %934 = vmatpush1.msra.mxu1 %v165_v48  ;;  %v195_v47 = vld [vmem:[%s3194_s1 + $0x5a0] sm:$0xff]  ;;  %v197_v48 = vld [vmem:[%s3194_s1 + $0x5b0] sm:$0xff] }
  0x5b   :  { %864 = vmatprep.subr.mxu0 %v136_v49  ;;  %935 = vmatprep.subr.mxu1 %v138_v50  ;;  %v168_v49 = vld [vmem:[%s3194_s1 + $0x4c8] sm:$0xff]  ;;  %v170_v50 = vld [vmem:[%s3194_s1 + $0x4d8] sm:$0xff] }
  0x5c   :  { %865 = vmatpush1.msra.mxu0 %v135_v51  ;;  %936 = vmatpush1.msra.mxu1 %v137_v52  ;;  %v167_v51 = vld [vmem:[%s3194_s1 + $0x4c0] sm:$0xff]  ;;  %v169_v52 = vld [vmem:[%s3194_s1 + $0x4d0] sm:$0xff] }
  0x5d   :  { %866 = vmatprep.subr.mxu0 %v108_v53  ;;  %937 = vmatprep.subr.mxu1 %v110_v54  ;;  %v140_v53 = vld [vmem:[%s3194_s1 + $0x3e8] sm:$0xff]  ;;  %v142_v54 = vld [vmem:[%s3194_s1 + $0x3f8] sm:$0xff] }
  0x5e   :  { %867 = vmatpush1.msra.mxu0 %v107_v55  ;;  %938 = vmatpush1.msra.mxu1 %v109_v56  ;;  %v139_v55 = vld [vmem:[%s3194_s1 + $0x3e0] sm:$0xff]  ;;  %v141_v56 = vld [vmem:[%s3194_s1 + $0x3f0] sm:$0xff] }
  0x5f   :  { %868 = vmatprep.subr.mxu0 %v80_v57  ;;  %939 = vmatprep.subr.mxu1 %v82_v58  ;;  %v112_v57 = vld [vmem:[%s3194_s1 + $0x308] sm:$0xff]  ;;  %v114_v58 = vld [vmem:[%s3194_s1 + $0x318] sm:$0xff] }
  0x60   :  { %869 = vmatpush1.msra.mxu0 %v79_v59  ;;  %940 = vmatpush1.msra.mxu1 %v81_v60  ;;  %v111_v59 = vld [vmem:[%s3194_s1 + $0x300] sm:$0xff]  ;;  %v113_v60 = vld [vmem:[%s3194_s1 + $0x310] sm:$0xff] }
  0x61   :  { %870 = vmatprep.subr.mxu0 %v52_v61  ;;  %941 = vmatprep.subr.mxu1 %v54_v62  ;;  %v84_v61 = vld [vmem:[%s3194_s1 + $0x228] sm:$0xff]  ;;  %v86_v62 = vld [vmem:[%s3194_s1 + $0x238] sm:$0xff] }
  0x62   :  { %871 = vmatpush1.msra.mxu0 %v51_v63  ;;  %942 = vmatpush1.msra.mxu1 %v53_v0  ;;  %v83_v63 = vld [vmem:[%s3194_s1 + $0x220] sm:$0xff]  ;;  %v85_v0 = vld [vmem:[%s3194_s1 + $0x230] sm:$0xff] }
  0x63   :  { %872 = vmatprep.subr.mxu0 %v24_v2  ;;  %943 = vmatprep.subr.mxu1 %v26_v4  ;;  %v56_v2 = vld [vmem:[%s3194_s1 + $0x148] sm:$0xff]  ;;  %v58_v4 = vld [vmem:[%s3194_s1 + $0x158] sm:$0xff] }
  0x64   :  { %873 = vmatpush1.msra.mxu0 %v23_v5  ;;  %906 = vmatprep.mubr.f32.mxu0 %v1631_v3  ;;  %v55_v5 = vld [vmem:[%s3194_s1 + $0x140] sm:$0xff] }
  0x65   :  { %944 = vmatpush1.msra.mxu1 %v25_v6  ;;  %977 = vmatprep.mubr.f32.mxu1 %v1631_v3  ;;  %v57_v6 = vld [vmem:[%s3194_s1 + $0x150] sm:$0xff] }
  0x66   :  { %1599 = vmatmul.mubr.msk.f32.vlgmr.msra.gmra.mxu0 %vm469_vm1, %v1854_v1  ;;  %1602 = vmatmul.mubr.msk.f32.vlgmr.msra.gmra.mxu1 %vm469_vm1, %v1854_v1 }
  0x67   :  { %1603 = vmatprep.subr.msk.mxu0 %vm473_vm0, %v448_v7  ;;  %1606 = vmatprep.subr.msk.mxu1 %vm473_vm0, %v450_v8  ;;  %v28_v7 = vld [vmem:[%s3194_s1 + $0x68] sm:$0xff]  ;;  %v30_v8 = vld [vmem:[%s3194_s1 + $0x78] sm:$0xff] }
  0x68   :  { %1604 = vmatpush1.msk.msra.mxu0 %vm473_vm0, %v447_v9  ;;  %1607 = vmatpush1.msk.msra.mxu1 %vm473_vm0, %v449_v10  ;;  %v27_v9 = vld [vmem:[%s3194_s1 + $0x60] sm:$0xff]  ;;  %v29_v10 = vld [vmem:[%s3194_s1 + $0x70] sm:$0xff] }
  0x69   :  { %986 = vmatprep.subr.mxu0 %v420_v11  ;;  %1057 = vmatprep.subr.mxu1 %v422_v12  ;;  %v452_v11 = vld [vmem:[%s3194_s1 + $0xda8] sm:$0x1f]  ;;  %v454_v12 = vld [vmem:[%s3194_s1 + $0xdb8] sm:$0x1f] }
  0x6a   :  { %987 = vmatpush1.msra.mxu0 %v419_v13  ;;  %1058 = vmatpush1.msra.mxu1 %v421_v14  ;;  %v451_v13 = vld [vmem:[%s3194_s1 + $0xda0] sm:$0x1f]  ;;  %v453_v14 = vld [vmem:[%s3194_s1 + $0xdb0] sm:$0x1f] }
  0x6b   :  { %988 = vmatprep.subr.mxu0 %v392_v15  ;;  %1059 = vmatprep.subr.mxu1 %v394_v16  ;;  %v424_v15 = vld [vmem:[%s3194_s1 + $0xcc8] sm:$0xff]  ;;  %v426_v16 = vld [vmem:[%s3194_s1 + $0xcd8] sm:$0xff] }
  0x6c   :  { %1629 = vset.pattern.permute.xlu0 %v1632_v22  ;;  %989 = vmatpush1.msra.mxu0 %v391_v17  ;;  %v423_v17 = vld [vmem:[%s3194_s1 + $0xcc0] sm:$0xff]  ;;  %v368_v22 = vld [vmem:[%s3194_s1 + $0xb08] sm:$0xff] }
  0x6d   :  { %1060 = vmatpush1.msra.mxu1 %v393_v18  ;;  %466 = vperm.xlu0 %1629, %v463_v19   ;;  %v396_v18 = vld [vmem:[%s3194_s1 + $0xbe8] sm:$0xff]  ;;  %v398_v19 = vld [vmem:[%s3194_s1 + $0xbf8] sm:$0xff] }
  0x6e   :  { %990 = vmatprep.subr.mxu0 %v364_v20  ;;  %1061 = vmatprep.subr.mxu1 %v366_v21  ;;  %v395_v20 = vld [vmem:[%s3194_s1 + $0xbe0] sm:$0xff]  ;;  %v397_v21 = vld [vmem:[%s3194_s1 + $0xbf0] sm:$0xff] }
  0x6f   :  { %991 = vmatpush1.msra.mxu0 %v363_v23  ;;  %1062 = vmatpush1.msra.mxu1 %v365_v24  ;;  %v370_v23 = vld [vmem:[%s3194_s1 + $0xb18] sm:$0xff]  ;;  %v367_v24 = vld [vmem:[%s3194_s1 + $0xb00] sm:$0xff] }
  0x70   :  { %992 = vmatprep.subr.mxu0 %v336_v25  ;;  %1063 = vmatprep.subr.mxu1 %v338_v26  ;;  %v369_v25 = vld [vmem:[%s3194_s1 + $0xb10] sm:$0xff]  ;;  %v340_v26 = vld [vmem:[%s3194_s1 + $0xa28] sm:$0xff] }
  0x71   :  { %993 = vmatpush1.msra.mxu0 %v335_v27  ;;  %1064 = vmatpush1.msra.mxu1 %v337_v28  ;;  %v342_v27 = vld [vmem:[%s3194_s1 + $0xa38] sm:$0xff]  ;;  %v339_v28 = vld [vmem:[%s3194_s1 + $0xa20] sm:$0xff] }
  0x72   :  { %994 = vmatprep.subr.mxu0 %v308_v29  ;;  %1065 = vmatprep.subr.mxu1 %v310_v30  ;;  %v341_v29 = vld [vmem:[%s3194_s1 + $0xa30] sm:$0xff]  ;;  %v312_v30 = vld [vmem:[%s3194_s1 + $0x948] sm:$0xff] }
  0x73   :  { %995 = vmatpush1.msra.mxu0 %v307_v31  ;;  %1066 = vmatpush1.msra.mxu1 %v309_v32  ;;  %v314_v31 = vld [vmem:[%s3194_s1 + $0x958] sm:$0xff]  ;;  %v311_v32 = vld [vmem:[%s3194_s1 + $0x940] sm:$0xff] }
  0x74   :  { %996 = vmatprep.subr.mxu0 %v280_v33  ;;  %1067 = vmatprep.subr.mxu1 %v282_v34  ;;  %v313_v33 = vld [vmem:[%s3194_s1 + $0x950] sm:$0xff]  ;;  %v284_v34 = vld [vmem:[%s3194_s1 + $0x868] sm:$0xff] }
  0x75   :  { %997 = vmatpush1.msra.mxu0 %v279_v35  ;;  %1068 = vmatpush1.msra.mxu1 %v281_v36  ;;  %v286_v35 = vld [vmem:[%s3194_s1 + $0x878] sm:$0xff]  ;;  %v283_v36 = vld [vmem:[%s3194_s1 + $0x860] sm:$0xff] }
  0x76   :  { %998 = vmatprep.subr.mxu0 %v252_v37  ;;  %1069 = vmatprep.subr.mxu1 %v254_v38  ;;  %v285_v37 = vld [vmem:[%s3194_s1 + $0x870] sm:$0xff]  ;;  %v256_v38 = vld [vmem:[%s3194_s1 + $0x788] sm:$0xff] }
  0x77   :  { %999 = vmatpush1.msra.mxu0 %v251_v39  ;;  %1070 = vmatpush1.msra.mxu1 %v253_v40  ;;  %v258_v39 = vld [vmem:[%s3194_s1 + $0x798] sm:$0xff]  ;;  %v255_v40 = vld [vmem:[%s3194_s1 + $0x780] sm:$0xff] }
  0x78   :  { %1000 = vmatprep.subr.mxu0 %v224_v41  ;;  %1071 = vmatprep.subr.mxu1 %v226_v42  ;;  %v257_v41 = vld [vmem:[%s3194_s1 + $0x790] sm:$0xff]  ;;  %v228_v42 = vld [vmem:[%s3194_s1 + $0x6a8] sm:$0xff] }
  0x79   :  { %1001 = vmatpush1.msra.mxu0 %v223_v43  ;;  %1072 = vmatpush1.msra.mxu1 %v225_v44  ;;  %v230_v43 = vld [vmem:[%s3194_s1 + $0x6b8] sm:$0xff]  ;;  %v227_v44 = vld [vmem:[%s3194_s1 + $0x6a0] sm:$0xff] }
  0x7a   :  { %1002 = vmatprep.subr.mxu0 %v196_v45  ;;  %1073 = vmatprep.subr.mxu1 %v198_v46  ;;  %v229_v45 = vld [vmem:[%s3194_s1 + $0x6b0] sm:$0xff]  ;;  %v200_v46 = vld [vmem:[%s3194_s1 + $0x5c8] sm:$0xff] }
  0x7b   :  { %1003 = vmatpush1.msra.mxu0 %v195_v47  ;;  %1074 = vmatpush1.msra.mxu1 %v197_v48  ;;  %v202_v47 = vld [vmem:[%s3194_s1 + $0x5d8] sm:$0xff]  ;;  %v199_v48 = vld [vmem:[%s3194_s1 + $0x5c0] sm:$0xff] }
  0x7c   :  { %1004 = vmatprep.subr.mxu0 %v168_v49  ;;  %1075 = vmatprep.subr.mxu1 %v170_v50  ;;  %v201_v49 = vld [vmem:[%s3194_s1 + $0x5d0] sm:$0xff]  ;;  %v172_v50 = vld [vmem:[%s3194_s1 + $0x4e8] sm:$0xff] }
  0x7d   :  { %1005 = vmatpush1.msra.mxu0 %v167_v51  ;;  %1076 = vmatpush1.msra.mxu1 %v169_v52  ;;  %v174_v51 = vld [vmem:[%s3194_s1 + $0x4f8] sm:$0xff]  ;;  %v171_v52 = vld [vmem:[%s3194_s1 + $0x4e0] sm:$0xff] }
  0x7e   :  { %1006 = vmatprep.subr.mxu0 %v140_v53  ;;  %1077 = vmatprep.subr.mxu1 %v142_v54  ;;  %v173_v53 = vld [vmem:[%s3194_s1 + $0x4f0] sm:$0xff]  ;;  %v144_v54 = vld [vmem:[%s3194_s1 + $0x408] sm:$0xff] }
  0x7f   :  { %1007 = vmatpush1.msra.mxu0 %v139_v55  ;;  %1078 = vmatpush1.msra.mxu1 %v141_v56  ;;  %v146_v55 = vld [vmem:[%s3194_s1 + $0x418] sm:$0xff]  ;;  %v143_v56 = vld [vmem:[%s3194_s1 + $0x400] sm:$0xff] }
  0x80   :  { %1008 = vmatprep.subr.mxu0 %v112_v57  ;;  %1079 = vmatprep.subr.mxu1 %v114_v58  ;;  %v145_v57 = vld [vmem:[%s3194_s1 + $0x410] sm:$0xff]  ;;  %v116_v58 = vld [vmem:[%s3194_s1 + $0x328] sm:$0xff] }
  0x81   :  { %1009 = vmatpush1.msra.mxu0 %v111_v59  ;;  %1080 = vmatpush1.msra.mxu1 %v113_v60  ;;  %v118_v59 = vld [vmem:[%s3194_s1 + $0x338] sm:$0xff]  ;;  %v115_v60 = vld [vmem:[%s3194_s1 + $0x320] sm:$0xff] }
  0x82   :  { %1010 = vmatprep.subr.mxu0 %v84_v61  ;;  %1081 = vmatprep.subr.mxu1 %v86_v62  ;;  %v117_v61 = vld [vmem:[%s3194_s1 + $0x330] sm:$0xff]  ;;  %v88_v62 = vld [vmem:[%s3194_s1 + $0x248] sm:$0xff] }
  0x83   :  { %1011 = vmatpush1.msra.mxu0 %v83_v63  ;;  %1082 = vmatpush1.msra.mxu1 %v85_v0  ;;  %v90_v63 = vld [vmem:[%s3194_s1 + $0x258] sm:$0xff]  ;;  %v87_v0 = vld [vmem:[%s3194_s1 + $0x240] sm:$0xff] }
  0x84   :  { %1012 = vmatprep.subr.mxu0 %v56_v2  ;;  %1083 = vmatprep.subr.mxu1 %v58_v4  ;;  %v89_v2 = vld [vmem:[%s3194_s1 + $0x250] sm:$0xff]  ;;  %v60_v4 = vld [vmem:[%s3194_s1 + $0x168] sm:$0xff] }
  0x85   :  { %1013 = vmatpush1.msra.mxu0 %v55_v5  ;;  %1084 = vmatpush1.msra.mxu1 %v57_v6  ;;  %v62_v5 = vld [vmem:[%s3194_s1 + $0x178] sm:$0xff]  ;;  %v59_v6 = vld [vmem:[%s3194_s1 + $0x160] sm:$0xff] }
  0x86   :  { %1014 = vmatprep.subr.mxu0 %v28_v7  ;;  %1085 = vmatprep.subr.mxu1 %v30_v8  ;;  %v61_v7 = vld [vmem:[%s3194_s1 + $0x170] sm:$0xff]  ;;  %v32_v8 = vld [vmem:[%s3194_s1 + $0x88] sm:$0xff] }
  0x87   :  { %1015 = vmatpush1.msra.mxu0 %v27_v9  ;;  %1048 = vmatprep.mubr.f32.mxu0 %v1631_v3  ;;  %v34_v9 = vld [vmem:[%s3194_s1 + $0x98] sm:$0xff] }
  0x88   :  { %1086 = vmatpush1.msra.mxu1 %v29_v10  ;;  %1119 = vmatprep.mubr.f32.mxu1 %v1631_v3  ;;  %v31_v10 = vld [vmem:[%s3194_s1 + $0x80] sm:$0xff] }
  0x89   :  { %1605 = vmatmul.mubr.msk.f32.vlgmr.msra.gmra.mxu0 %vm469_vm1, %v1854_v1  ;;  %1608 = vmatmul.mubr.msk.f32.vlgmr.msra.gmra.mxu1 %vm469_vm1, %v1854_v1  ;;  %v425_v1 = vld [vmem:[%s3194_s1 + $0xcd0] sm:$0xff] }
  0x8a   :  { %1609 = vmatprep.subr.msk.mxu0 %vm473_vm0, %v452_v11  ;;  %1612 = vmatprep.subr.msk.mxu1 %vm473_vm0, %v454_v12  ;;  %v33_v11 = vld [vmem:[%s3194_s1 + $0x90] sm:$0xff]  ;;  %v456_v12 = vld [vmem:[%s3194_s1 + $0xdc8] sm:$0x1f] }
  0x8b   :  { %1610 = vmatpush1.msk.msra.mxu0 %vm473_vm0, %v451_v13  ;;  %1613 = vmatpush1.msk.msra.mxu1 %vm473_vm0, %v453_v14  ;;  %v458_v13 = vld [vmem:[%s3194_s1 + $0xdd8] sm:$0x1f]  ;;  %v455_v14 = vld [vmem:[%s3194_s1 + $0xdc0] sm:$0x1f] }
  0x8c   :  { %1128 = vmatprep.subr.mxu0 %v424_v15  ;;  %1199 = vmatprep.subr.mxu1 %v426_v16  ;;  %v457_v15 = vld [vmem:[%s3194_s1 + $0xdd0] sm:$0x1f]  ;;  %v2682_v16 = vld [vmem:[%s3195_s0] sm:$0x1f] }
  0x8d   :  { %1129 = vmatpush1.msra.mxu0 %v423_v17  ;;  %1200 = vmatpush1.msra.mxu1 %v425_v1  ;;  %v428_v17 = vld [vmem:[%s3194_s1 + $0xce8] sm:$0xff]  ;;  %v430_v1 = vld [vmem:[%s3194_s1 + $0xcf8] sm:$0xff] }
  0x8e   :  { %1130 = vmatprep.subr.mxu0 %v396_v18  ;;  %1201 = vmatprep.subr.mxu1 %v398_v19  ;;  %v427_v18 = vld [vmem:[%s3194_s1 + $0xce0] sm:$0xff]  ;;  %v429_v19 = vld [vmem:[%s3194_s1 + $0xcf0] sm:$0xff] }
  0x8f   :  { %1131 = vmatpush1.msra.mxu0 %v395_v20  ;;  %1202 = vmatpush1.msra.mxu1 %v397_v21  ;;  %v400_v20 = vld [vmem:[%s3194_s1 + $0xc08] sm:$0xff]  ;;  %v402_v21 = vld [vmem:[%s3194_s1 + $0xc18] sm:$0xff] }
  0x90   :  { %1132 = vmatprep.subr.mxu0 %v368_v22  ;;  %1203 = vmatprep.subr.mxu1 %v370_v23  ;;  %v399_v22 = vld [vmem:[%s3194_s1 + $0xc00] sm:$0xff]  ;;  %v401_v23 = vld [vmem:[%s3194_s1 + $0xc10] sm:$0xff] }
  0x91   :  { %1133 = vmatpush1.msra.mxu0 %v367_v24  ;;  %1204 = vmatpush1.msra.mxu1 %v369_v25  ;;  %v372_v24 = vld [vmem:[%s3194_s1 + $0xb28] sm:$0xff]  ;;  %v374_v25 = vld [vmem:[%s3194_s1 + $0xb38] sm:$0xff] }
  0x92   :  { %1134 = vmatprep.subr.mxu0 %v340_v26  ;;  %1205 = vmatprep.subr.mxu1 %v342_v27  ;;  %v371_v26 = vld [vmem:[%s3194_s1 + $0xb20] sm:$0xff]  ;;  %v373_v27 = vld [vmem:[%s3194_s1 + $0xb30] sm:$0xff] }
  0x93   :  { %1135 = vmatpush1.msra.mxu0 %v339_v28  ;;  %1206 = vmatpush1.msra.mxu1 %v341_v29  ;;  %v344_v28 = vld [vmem:[%s3194_s1 + $0xa48] sm:$0xff]  ;;  %v346_v29 = vld [vmem:[%s3194_s1 + $0xa58] sm:$0xff] }
  0x94   :  { %1136 = vmatprep.subr.mxu0 %v312_v30  ;;  %1207 = vmatprep.subr.mxu1 %v314_v31  ;;  %v343_v30 = vld [vmem:[%s3194_s1 + $0xa40] sm:$0xff]  ;;  %v345_v31 = vld [vmem:[%s3194_s1 + $0xa50] sm:$0xff] }
  0x95   :  { %1137 = vmatpush1.msra.mxu0 %v311_v32  ;;  %1208 = vmatpush1.msra.mxu1 %v313_v33  ;;  %v316_v32 = vld [vmem:[%s3194_s1 + $0x968] sm:$0xff]  ;;  %v318_v33 = vld [vmem:[%s3194_s1 + $0x978] sm:$0xff] }
  0x96   :  { %1138 = vmatprep.subr.mxu0 %v284_v34  ;;  %1209 = vmatprep.subr.mxu1 %v286_v35  ;;  %v315_v34 = vld [vmem:[%s3194_s1 + $0x960] sm:$0xff]  ;;  %v317_v35 = vld [vmem:[%s3194_s1 + $0x970] sm:$0xff] }
  0x97   :  { %1139 = vmatpush1.msra.mxu0 %v283_v36  ;;  %1210 = vmatpush1.msra.mxu1 %v285_v37  ;;  %v288_v36 = vld [vmem:[%s3194_s1 + $0x888] sm:$0xff]  ;;  %v290_v37 = vld [vmem:[%s3194_s1 + $0x898] sm:$0xff] }
  0x98   :  { %1140 = vmatprep.subr.mxu0 %v256_v38  ;;  %1211 = vmatprep.subr.mxu1 %v258_v39  ;;  %v287_v38 = vld [vmem:[%s3194_s1 + $0x880] sm:$0xff]  ;;  %v289_v39 = vld [vmem:[%s3194_s1 + $0x890] sm:$0xff] }
  0x99   :  { %1141 = vmatpush1.msra.mxu0 %v255_v40  ;;  %1212 = vmatpush1.msra.mxu1 %v257_v41  ;;  %v260_v40 = vld [vmem:[%s3194_s1 + $0x7a8] sm:$0xff]  ;;  %v262_v41 = vld [vmem:[%s3194_s1 + $0x7b8] sm:$0xff] }
  0x9a   :  { %1142 = vmatprep.subr.mxu0 %v228_v42  ;;  %1213 = vmatprep.subr.mxu1 %v230_v43  ;;  %v259_v42 = vld [vmem:[%s3194_s1 + $0x7a0] sm:$0xff]  ;;  %v261_v43 = vld [vmem:[%s3194_s1 + $0x7b0] sm:$0xff] }
  0x9b   :  { %1143 = vmatpush1.msra.mxu0 %v227_v44  ;;  %1214 = vmatpush1.msra.mxu1 %v229_v45  ;;  %v232_v44 = vld [vmem:[%s3194_s1 + $0x6c8] sm:$0xff]  ;;  %v234_v45 = vld [vmem:[%s3194_s1 + $0x6d8] sm:$0xff] }
  0x9c   :  { %1144 = vmatprep.subr.mxu0 %v200_v46  ;;  %1215 = vmatprep.subr.mxu1 %v202_v47  ;;  %v231_v46 = vld [vmem:[%s3194_s1 + $0x6c0] sm:$0xff]  ;;  %v233_v47 = vld [vmem:[%s3194_s1 + $0x6d0] sm:$0xff] }
  0x9d   :  { %1145 = vmatpush1.msra.mxu0 %v199_v48  ;;  %1216 = vmatpush1.msra.mxu1 %v201_v49  ;;  %v204_v48 = vld [vmem:[%s3194_s1 + $0x5e8] sm:$0xff]  ;;  %v206_v49 = vld [vmem:[%s3194_s1 + $0x5f8] sm:$0xff] }
  0x9e   :  { %1146 = vmatprep.subr.mxu0 %v172_v50  ;;  %1217 = vmatprep.subr.mxu1 %v174_v51  ;;  %v203_v50 = vld [vmem:[%s3194_s1 + $0x5e0] sm:$0xff]  ;;  %v205_v51 = vld [vmem:[%s3194_s1 + $0x5f0] sm:$0xff] }
  0x9f   :  { %1147 = vmatpush1.msra.mxu0 %v171_v52  ;;  %1218 = vmatpush1.msra.mxu1 %v173_v53  ;;  %v176_v52 = vld [vmem:[%s3194_s1 + $0x508] sm:$0xff]  ;;  %v178_v53 = vld [vmem:[%s3194_s1 + $0x518] sm:$0xff] }
  0xa0   :  { %1148 = vmatprep.subr.mxu0 %v144_v54  ;;  %1219 = vmatprep.subr.mxu1 %v146_v55  ;;  %v175_v54 = vld [vmem:[%s3194_s1 + $0x500] sm:$0xff]  ;;  %v177_v55 = vld [vmem:[%s3194_s1 + $0x510] sm:$0xff] }
  0xa1   :  { %1149 = vmatpush1.msra.mxu0 %v143_v56  ;;  %1220 = vmatpush1.msra.mxu1 %v145_v57  ;;  %v148_v56 = vld [vmem:[%s3194_s1 + $0x428] sm:$0xff]  ;;  %v150_v57 = vld [vmem:[%s3194_s1 + $0x438] sm:$0xff] }
  0xa2   :  { %1150 = vmatprep.subr.mxu0 %v116_v58  ;;  %1221 = vmatprep.subr.mxu1 %v118_v59  ;;  %v147_v58 = vld [vmem:[%s3194_s1 + $0x420] sm:$0xff]  ;;  %v149_v59 = vld [vmem:[%s3194_s1 + $0x430] sm:$0xff] }
  0xa3   :  { %1151 = vmatpush1.msra.mxu0 %v115_v60  ;;  %1222 = vmatpush1.msra.mxu1 %v117_v61  ;;  %v120_v60 = vld [vmem:[%s3194_s1 + $0x348] sm:$0xff]  ;;  %v122_v61 = vld [vmem:[%s3194_s1 + $0x358] sm:$0xff] }
  0xa4   :  { %1152 = vmatprep.subr.mxu0 %v88_v62  ;;  %1223 = vmatprep.subr.mxu1 %v90_v63  ;;  %v119_v62 = vld [vmem:[%s3194_s1 + $0x340] sm:$0xff]  ;;  %v121_v63 = vld [vmem:[%s3194_s1 + $0x350] sm:$0xff] }
  0xa5   :  { %1153 = vmatpush1.msra.mxu0 %v87_v0  ;;  %1224 = vmatpush1.msra.mxu1 %v89_v2  ;;  %v92_v0 = vld [vmem:[%s3194_s1 + $0x268] sm:$0xff]  ;;  %v94_v2 = vld [vmem:[%s3194_s1 + $0x278] sm:$0xff] }
  0xa6   :  { %1154 = vmatprep.subr.mxu0 %v60_v4  ;;  %1225 = vmatprep.subr.mxu1 %v62_v5  ;;  %v91_v4 = vld [vmem:[%s3194_s1 + $0x260] sm:$0xff]  ;;  %v93_v5 = vld [vmem:[%s3194_s1 + $0x270] sm:$0xff] }
  0xa7   :  { %1155 = vmatpush1.msra.mxu0 %v59_v6  ;;  %1226 = vmatpush1.msra.mxu1 %v61_v7  ;;  %v64_v6 = vld [vmem:[%s3194_s1 + $0x188] sm:$0xff]  ;;  %v66_v7 = vld [vmem:[%s3194_s1 + $0x198] sm:$0xff] }
  0xa8   :  { %1156 = vmatprep.subr.mxu0 %v32_v8  ;;  %1227 = vmatprep.subr.mxu1 %v34_v9  ;;  %v63_v8 = vld [vmem:[%s3194_s1 + $0x180] sm:$0xff]  ;;  %v65_v9 = vld [vmem:[%s3194_s1 + $0x190] sm:$0xff] }
  0xa9   :  { %1157 = vmatpush1.msra.mxu0 %v31_v10  ;;  %1190 = vmatprep.mubr.f32.mxu0 %v1631_v3  ;;  %v36_v10 = vld [vmem:[%s3194_s1 + $0xa8] sm:$0xff] }
  0xaa   :  { %1228 = vmatpush1.msra.mxu1 %v33_v11  ;;  %1261 = vmatprep.mubr.f32.mxu1 %v1631_v3  ;;  %v38_v11 = vld [vmem:[%s3194_s1 + $0xb8] sm:$0xff] }
  0xab   :  { %1611 = vmatmul.mubr.msk.f32.vlgmr.msra.gmra.mxu0 %vm469_vm1, %v2682_v16  ;;  %1614 = vmatmul.mubr.msk.f32.vlgmr.msra.gmra.mxu1 %vm469_vm1, %v2682_v16 }
  0xac   :  { %1615 = vmatprep.subr.msk.mxu0 %vm473_vm0, %v456_v12  ;;  %1618 = vmatprep.subr.msk.mxu1 %vm473_vm0, %v458_v13  ;;  %v35_v12 = vld [vmem:[%s3194_s1 + $0xa0] sm:$0xff]  ;;  %v37_v13 = vld [vmem:[%s3194_s1 + $0xb0] sm:$0xff] }
  0xad   :  { %1616 = vmatpush1.msk.msra.mxu0 %vm473_vm0, %v455_v14  ;;  %1619 = vmatpush1.msk.msra.mxu1 %vm473_vm0, %v457_v15  ;;  %v460_v14 = vld [vmem:[%s3194_s1 + $0xde8] sm:$0x1f]  ;;  %v462_v15 = vld [vmem:[%s3194_s1 + $0xdf8] sm:$0x1f] }
  0xae   :  { %1270 = vmatprep.subr.mxu0 %v428_v17  ;;  %1341 = vmatprep.subr.mxu1 %v430_v1  ;;  %v459_v17 = vld [vmem:[%s3194_s1 + $0xde0] sm:$0x1f]  ;;  %v461_v1 = vld [vmem:[%s3194_s1 + $0xdf0] sm:$0x1f] }
  0xaf   :  { %1271 = vmatpush1.msra.mxu0 %v427_v18  ;;  %1342 = vmatpush1.msra.mxu1 %v429_v19  ;;  %v432_v18 = vld [vmem:[%s3194_s1 + $0xd08] sm:$0xff]  ;;  %v434_v19 = vld [vmem:[%s3194_s1 + $0xd18] sm:$0xff] }
  0xb0   :  { %1272 = vmatprep.subr.mxu0 %v400_v20  ;;  %1343 = vmatprep.subr.mxu1 %v402_v21  ;;  %v431_v20 = vld [vmem:[%s3194_s1 + $0xd00] sm:$0xff]  ;;  %v433_v21 = vld [vmem:[%s3194_s1 + $0xd10] sm:$0xff] }
  0xb1   :  { %1273 = vmatpush1.msra.mxu0 %v399_v22  ;;  %1344 = vmatpush1.msra.mxu1 %v401_v23  ;;  %v404_v22 = vld [vmem:[%s3194_s1 + $0xc28] sm:$0xff]  ;;  %v406_v23 = vld [vmem:[%s3194_s1 + $0xc38] sm:$0xff] }
  0xb2   :  { %1274 = vmatprep.subr.mxu0 %v372_v24  ;;  %1345 = vmatprep.subr.mxu1 %v374_v25  ;;  %v403_v24 = vld [vmem:[%s3194_s1 + $0xc20] sm:$0xff]  ;;  %v405_v25 = vld [vmem:[%s3194_s1 + $0xc30] sm:$0xff] }
  0xb3   :  { %1275 = vmatpush1.msra.mxu0 %v371_v26  ;;  %1346 = vmatpush1.msra.mxu1 %v373_v27  ;;  %v376_v26 = vld [vmem:[%s3194_s1 + $0xb48] sm:$0xff]  ;;  %v378_v27 = vld [vmem:[%s3194_s1 + $0xb58] sm:$0xff] }
  0xb4   :  { %1276 = vmatprep.subr.mxu0 %v344_v28  ;;  %1347 = vmatprep.subr.mxu1 %v346_v29  ;;  %v375_v28 = vld [vmem:[%s3194_s1 + $0xb40] sm:$0xff]  ;;  %v377_v29 = vld [vmem:[%s3194_s1 + $0xb50] sm:$0xff] }
  0xb5   :  { %1277 = vmatpush1.msra.mxu0 %v343_v30  ;;  %1348 = vmatpush1.msra.mxu1 %v345_v31  ;;  %v348_v30 = vld [vmem:[%s3194_s1 + $0xa68] sm:$0xff]  ;;  %v350_v31 = vld [vmem:[%s3194_s1 + $0xa78] sm:$0xff] }
  0xb6   :  { %1278 = vmatprep.subr.mxu0 %v316_v32  ;;  %1349 = vmatprep.subr.mxu1 %v318_v33  ;;  %v347_v32 = vld [vmem:[%s3194_s1 + $0xa60] sm:$0xff]  ;;  %v349_v33 = vld [vmem:[%s3194_s1 + $0xa70] sm:$0xff] }
  0xb7   :  { %1279 = vmatpush1.msra.mxu0 %v315_v34  ;;  %1350 = vmatpush1.msra.mxu1 %v317_v35  ;;  %v320_v34 = vld [vmem:[%s3194_s1 + $0x988] sm:$0xff]  ;;  %v322_v35 = vld [vmem:[%s3194_s1 + $0x998] sm:$0xff] }
  0xb8   :  { %1280 = vmatprep.subr.mxu0 %v288_v36  ;;  %1351 = vmatprep.subr.mxu1 %v290_v37  ;;  %v319_v36 = vld [vmem:[%s3194_s1 + $0x980] sm:$0xff]  ;;  %v321_v37 = vld [vmem:[%s3194_s1 + $0x990] sm:$0xff] }
  0xb9   :  { %1281 = vmatpush1.msra.mxu0 %v287_v38  ;;  %1352 = vmatpush1.msra.mxu1 %v289_v39  ;;  %v292_v38 = vld [vmem:[%s3194_s1 + $0x8a8] sm:$0xff]  ;;  %v294_v39 = vld [vmem:[%s3194_s1 + $0x8b8] sm:$0xff] }
  0xba   :  { %1282 = vmatprep.subr.mxu0 %v260_v40  ;;  %1353 = vmatprep.subr.mxu1 %v262_v41  ;;  %v291_v40 = vld [vmem:[%s3194_s1 + $0x8a0] sm:$0xff]  ;;  %v293_v41 = vld [vmem:[%s3194_s1 + $0x8b0] sm:$0xff] }
  0xbb   :  { %1283 = vmatpush1.msra.mxu0 %v259_v42  ;;  %1354 = vmatpush1.msra.mxu1 %v261_v43  ;;  %v264_v42 = vld [vmem:[%s3194_s1 + $0x7c8] sm:$0xff]  ;;  %v266_v43 = vld [vmem:[%s3194_s1 + $0x7d8] sm:$0xff] }
  0xbc   :  { %1284 = vmatprep.subr.mxu0 %v232_v44  ;;  %1355 = vmatprep.subr.mxu1 %v234_v45  ;;  %v263_v44 = vld [vmem:[%s3194_s1 + $0x7c0] sm:$0xff]  ;;  %v265_v45 = vld [vmem:[%s3194_s1 + $0x7d0] sm:$0xff] }
  0xbd   :  { %1285 = vmatpush1.msra.mxu0 %v231_v46  ;;  %1356 = vmatpush1.msra.mxu1 %v233_v47  ;;  %v236_v46 = vld [vmem:[%s3194_s1 + $0x6e8] sm:$0xff]  ;;  %v238_v47 = vld [vmem:[%s3194_s1 + $0x6f8] sm:$0xff] }
  0xbe   :  { %1286 = vmatprep.subr.mxu0 %v204_v48  ;;  %1357 = vmatprep.subr.mxu1 %v206_v49  ;;  %v235_v48 = vld [vmem:[%s3194_s1 + $0x6e0] sm:$0xff]  ;;  %v237_v49 = vld [vmem:[%s3194_s1 + $0x6f0] sm:$0xff] }
  0xbf   :  { %1287 = vmatpush1.msra.mxu0 %v203_v50  ;;  %1358 = vmatpush1.msra.mxu1 %v205_v51  ;;  %v208_v50 = vld [vmem:[%s3194_s1 + $0x608] sm:$0xff]  ;;  %v210_v51 = vld [vmem:[%s3194_s1 + $0x618] sm:$0xff] }
  0xc0   :  { %1288 = vmatprep.subr.mxu0 %v176_v52  ;;  %1359 = vmatprep.subr.mxu1 %v178_v53  ;;  %v207_v52 = vld [vmem:[%s3194_s1 + $0x600] sm:$0xff]  ;;  %v209_v53 = vld [vmem:[%s3194_s1 + $0x610] sm:$0xff] }
  0xc1   :  { %1289 = vmatpush1.msra.mxu0 %v175_v54  ;;  %1360 = vmatpush1.msra.mxu1 %v177_v55  ;;  %v180_v54 = vld [vmem:[%s3194_s1 + $0x528] sm:$0xff]  ;;  %v182_v55 = vld [vmem:[%s3194_s1 + $0x538] sm:$0xff] }
  0xc2   :  { %1290 = vmatprep.subr.mxu0 %v148_v56  ;;  %1361 = vmatprep.subr.mxu1 %v150_v57  ;;  %v179_v56 = vld [vmem:[%s3194_s1 + $0x520] sm:$0xff]  ;;  %v181_v57 = vld [vmem:[%s3194_s1 + $0x530] sm:$0xff] }
  0xc3   :  { %1291 = vmatpush1.msra.mxu0 %v147_v58  ;;  %1362 = vmatpush1.msra.mxu1 %v149_v59  ;;  %v152_v58 = vld [vmem:[%s3194_s1 + $0x448] sm:$0xff]  ;;  %v154_v59 = vld [vmem:[%s3194_s1 + $0x458] sm:$0xff] }
  0xc4   :  { %1292 = vmatprep.subr.mxu0 %v120_v60  ;;  %1363 = vmatprep.subr.mxu1 %v122_v61  ;;  %v151_v60 = vld [vmem:[%s3194_s1 + $0x440] sm:$0xff]  ;;  %v153_v61 = vld [vmem:[%s3194_s1 + $0x450] sm:$0xff] }
  0xc5   :  { %1293 = vmatpush1.msra.mxu0 %v119_v62  ;;  %1364 = vmatpush1.msra.mxu1 %v121_v63  ;;  %v124_v63 = vld [vmem:[%s3194_s1 + $0x368] sm:$0xff] }
  0xc6   :  { %1294 = vmatprep.subr.mxu0 %v92_v0  ;;  %1365 = vmatprep.subr.mxu1 %v94_v2  ;;  %v126_v0 = vld [vmem:[%s3194_s1 + $0x378] sm:$0xff] }
  0xc7   :  { %1295 = vmatpush1.msra.mxu0 %v91_v4  ;;  %1366 = vmatpush1.msra.mxu1 %v93_v5  ;;  %v123_v4 = vld [vmem:[%s3194_s1 + $0x360] sm:$0xff]  ;;  %v125_v5 = vld [vmem:[%s3194_s1 + $0x370] sm:$0xff] }
  0xc8   :  { %1296 = vmatprep.subr.mxu0 %v64_v6  ;;  %1367 = vmatprep.subr.mxu1 %v66_v7  ;;  %v96_v6 = vld [vmem:[%s3194_s1 + $0x288] sm:$0xff]  ;;  %v98_v7 = vld [vmem:[%s3194_s1 + $0x298] sm:$0xff] }
  0xc9   :  { %1297 = vmatpush1.msra.mxu0 %v63_v8  ;;  %1368 = vmatpush1.msra.mxu1 %v65_v9  ;;  %v95_v8 = vld [vmem:[%s3194_s1 + $0x280] sm:$0xff]  ;;  %v97_v9 = vld [vmem:[%s3194_s1 + $0x290] sm:$0xff] }
  0xca   :  { %1298 = vmatprep.subr.mxu0 %v36_v10  ;;  %1369 = vmatprep.subr.mxu1 %v38_v11  ;;  %v68_v11 = vld [vmem:[%s3194_s1 + $0x1a8] sm:$0xff] }
  0xcb   :  { %1299 = vmatpush1.msra.mxu0 %v35_v12  ;;  %1332 = vmatprep.mubr.f32.mxu0 %v1631_v3  ;;  %v70_v12 = vld [vmem:[%s3194_s1 + $0x1b8] sm:$0xff] }
  0xcc   :  { %1370 = vmatpush1.msra.mxu1 %v37_v13  ;;  %1403 = vmatprep.mubr.f32.mxu1 %v1631_v3 }
  0xcd   :  { %1617 = vmatmul.mubr.msk.f32.vlgmr.msra.gmra.mxu0 %vm469_vm1, %v2682_v16  ;;  %1620 = vmatmul.mubr.msk.f32.vlgmr.msra.gmra.mxu1 %vm469_vm1, %v2682_v16 }
  0xce   :  { %1621 = vmatprep.subr.msk.mxu0 %vm473_vm0, %v460_v14  ;;  %1624 = vmatprep.subr.msk.mxu1 %vm473_vm0, %v462_v15  ;;  %v67_v14 = vld [vmem:[%s3194_s1 + $0x1a0] sm:$0xff]  ;;  %v69_v15 = vld [vmem:[%s3194_s1 + $0x1b0] sm:$0xff] }
  0xcf   :  { %1622 = vmatpush1.msk.msra.mxu0 %vm473_vm0, %v459_v17  ;;  %1625 = vmatpush1.msk.msra.mxu1 %vm473_vm0, %v461_v1  ;;  %v40_v1 = vld [vmem:[%s3194_s1 + $0xc8] sm:$0xff] }
  0xd0   :  { %1412 = vmatprep.subr.mxu0 %v432_v18  ;;  %1483 = vmatprep.subr.mxu1 %v434_v19  ;;  %v42_v18 = vld [vmem:[%s3194_s1 + $0xd8] sm:$0xff] }
  0xd1   :  { %1413 = vmatpush1.msra.mxu0 %v431_v20  ;;  %1484 = vmatpush1.msra.mxu1 %v433_v21 }
  0xd2   :  { %1414 = vmatprep.subr.mxu0 %v404_v22  ;;  %1485 = vmatprep.subr.mxu1 %v406_v23  ;;  %v39_v22 = vld [vmem:[%s3194_s1 + $0xc0] sm:$0xff] }
  0xd3   :  { %1415 = vmatpush1.msra.mxu0 %v403_v24  ;;  %1486 = vmatpush1.msra.mxu1 %v405_v25  ;;  %v41_v24 = vld [vmem:[%s3194_s1 + $0xd0] sm:$0xff] }
  0xd4   :  { %1416 = vmatprep.subr.mxu0 %v376_v26  ;;  %1487 = vmatprep.subr.mxu1 %v378_v27 }
  0xd5   :  { %1417 = vmatpush1.msra.mxu0 %v375_v28  ;;  %1488 = vmatpush1.msra.mxu1 %v377_v29 }
  0xd6   :  { %1418 = vmatprep.subr.mxu0 %v348_v30  ;;  %1489 = vmatprep.subr.mxu1 %v350_v31 }
  0xd7   :  { %1419 = vmatpush1.msra.mxu0 %v347_v32  ;;  %1490 = vmatpush1.msra.mxu1 %v349_v33 }
  0xd8   :  { %1420 = vmatprep.subr.mxu0 %v320_v34  ;;  %1491 = vmatprep.subr.mxu1 %v322_v35 }
  0xd9   :  { %1421 = vmatpush1.msra.mxu0 %v319_v36  ;;  %1492 = vmatpush1.msra.mxu1 %v321_v37 }
  0xda   :  { %1422 = vmatprep.subr.mxu0 %v292_v38  ;;  %1493 = vmatprep.subr.mxu1 %v294_v39 }
  0xdb   :  { %1423 = vmatpush1.msra.mxu0 %v291_v40  ;;  %1494 = vmatpush1.msra.mxu1 %v293_v41 }
  0xdc   :  { %1424 = vmatprep.subr.mxu0 %v264_v42  ;;  %1495 = vmatprep.subr.mxu1 %v266_v43 }
  0xdd   :  { %1425 = vmatpush1.msra.mxu0 %v263_v44  ;;  %1496 = vmatpush1.msra.mxu1 %v265_v45 }
  0xde   :  { %1426 = vmatprep.subr.mxu0 %v236_v46  ;;  %1497 = vmatprep.subr.mxu1 %v238_v47 }
  0xdf   :  { %1427 = vmatpush1.msra.mxu0 %v235_v48  ;;  %1498 = vmatpush1.msra.mxu1 %v237_v49 }
  0xe0   :  { %1428 = vmatprep.subr.mxu0 %v208_v50  ;;  %1499 = vmatprep.subr.mxu1 %v210_v51 }
  0xe1   :  { %1429 = vmatpush1.msra.mxu0 %v207_v52  ;;  %1500 = vmatpush1.msra.mxu1 %v209_v53 }
  0xe2   :  { %1430 = vmatprep.subr.mxu0 %v180_v54  ;;  %1501 = vmatprep.subr.mxu1 %v182_v55  ;;  %v624_v62 = vpop.f32.mrf.mxu0  ;;  %v695_v2 = vpop.f32.mrf.mxu1 }
  0xe3   :  { %1431 = vmatpush1.msra.mxu0 %v179_v56  ;;  %1502 = vmatpush1.msra.mxu1 %v181_v57 }
  0xe4   :  { %1432 = vmatprep.subr.mxu0 %v152_v58  ;;  %1503 = vmatprep.subr.mxu1 %v154_v59  ;;  %v626_v10 = vpop.f32.mrf.mxu0  ;;  %v697_v13 = vpop.f32.mrf.mxu1 }
  0xe5   :  { %1433 = vmatpush1.msra.mxu0 %v151_v60  ;;  %1504 = vmatpush1.msra.mxu1 %v153_v61 }
  0xe6   :  { %1434 = vmatprep.subr.mxu0 %v124_v63  ;;  %1505 = vmatprep.subr.mxu1 %v126_v0 }
  0xe7   :  { %1435 = vmatpush1.msra.mxu0 %v123_v4  ;;  %1506 = vmatpush1.msra.mxu1 %v125_v5 }
  0xe8   :  { %1436 = vmatprep.subr.mxu0 %v96_v6  ;;  %1507 = vmatprep.subr.mxu1 %v98_v7  ;;  %v3062_v17 = vpop.permute.xlu0 %466 }
  0xe9   :  { %1437 = vmatpush1.msra.mxu0 %v95_v8  ;;  %1508 = vmatpush1.msra.mxu1 %v97_v9  ;;  %v625_v19 = vadd.f32 %v624_v62, %v3062_v17  ;;  %v696_v20 = vadd.f32 %v695_v2, %v3062_v17  ;;  %v627_v21 = vadd.f32 %v626_v10, %v3062_v17 }
  0xea   :  { %1438 = vmatprep.subr.mxu0 %v68_v11  ;;  %1509 = vmatprep.subr.mxu1 %v70_v12  ;;  %v698_v23 = vadd.f32 %v697_v13, %v3062_v17 }
  0xeb   :  { %1439 = vmatpush1.msra.mxu0 %v67_v14  ;;  %1510 = vmatpush1.msra.mxu1 %v69_v15  ;;  %1552 = vst [vmem:[%s3197_s3] sm:$0x1f] %v625_v19  ;;  %1554 = vst [vmem:[%s3197_s3 + $0x10] sm:$0x1f] %v696_v20 }
  0xec   :  { %1553 = vst [vmem:[%s3197_s3 + $0x8] sm:$0x1f] %v627_v21  ;;  %1440 = vmatprep.subr.mxu0 %v40_v1  ;;  %1511 = vmatprep.subr.mxu1 %v42_v18  ;;  %1555 = vst [vmem:[%s3197_s3 + $0x18] sm:$0x1f] %v698_v23 }
  0xed   :  { %1441 = vmatpush1.msra.mxu0 %v39_v22  ;;  %1474 = vmatprep.mubr.f32.mxu0 %v1631_v3 }
  0xee   :  { %1512 = vmatpush1.msra.mxu1 %v41_v24  ;;  %1545 = vmatprep.mubr.f32.mxu1 %v1631_v3 }
  0xef   :  { %1623 = vmatmul.mubr.msk.f32.vlgmr.msra.gmra.mxu0 %vm469_vm1, %v2682_v16  ;;  %1626 = vmatmul.mubr.msk.f32.vlgmr.msra.gmra.mxu1 %vm469_vm1, %v2682_v16 }
 0x104   :  { %v766_v25 = vpop.f32.mrf.mxu0  ;;  %v837_v26 = vpop.f32.mrf.mxu1 }
 0x105   :  { %v767_v27 = vadd.f32 %v766_v25, %v3062_v17  ;;  %v838_v28 = vadd.f32 %v837_v26, %v3062_v17 }
 0x106   :  { %v768_v29 = vpop.f32.mrf.mxu0  ;;  %v839_v30 = vpop.f32.mrf.mxu1 }
 0x107   :  { %1556 = vst [vmem:[%s3197_s3 + $0x20] sm:$0x1f] %v767_v27  ;;  %1558 = vst [vmem:[%s3197_s3 + $0x30] sm:$0x1f] %v838_v28  ;;  %v769_v3 = vadd.f32 %v768_v29, %v3062_v17  ;;  %v840_v16 = vadd.f32 %v839_v30, %v3062_v17 }
 0x109   :  { %1557 = vst [vmem:[%s3197_s3 + $0x28] sm:$0x1f] %v769_v3  ;;  %1559 = vst [vmem:[%s3197_s3 + $0x38] sm:$0x1f] %v840_v16 }
 0x126   :  { %v908_v31 = vpop.f32.mrf.mxu0  ;;  %v979_v32 = vpop.f32.mrf.mxu1 }
 0x127   :  { %v909_v33 = vadd.f32 %v908_v31, %v3062_v17  ;;  %v980_v34 = vadd.f32 %v979_v32, %v3062_v17 }
 0x128   :  { %v910_v35 = vpop.f32.mrf.mxu0  ;;  %v981_v36 = vpop.f32.mrf.mxu1 }
 0x129   :  { %1560 = vst [vmem:[%s3197_s3 + $0x40] sm:$0x1f] %v909_v33  ;;  %1562 = vst [vmem:[%s3197_s3 + $0x50] sm:$0x1f] %v980_v34  ;;  %v911_v37 = vadd.f32 %v910_v35, %v3062_v17  ;;  %v982_v38 = vadd.f32 %v981_v36, %v3062_v17 }
 0x12b   :  { %1561 = vst [vmem:[%s3197_s3 + $0x48] sm:$0x1f] %v911_v37  ;;  %1563 = vst [vmem:[%s3197_s3 + $0x58] sm:$0x1f] %v982_v38 }
 0x149   :  { %v1050_v39 = vpop.f32.mrf.mxu0  ;;  %v1121_v40 = vpop.f32.mrf.mxu1 }
 0x14a   :  { %v1051_v41 = vadd.f32 %v1050_v39, %v3062_v17  ;;  %v1122_v42 = vadd.f32 %v1121_v40, %v3062_v17 }
 0x14b   :  { %v1052_v43 = vpop.f32.mrf.mxu0  ;;  %v1123_v44 = vpop.f32.mrf.mxu1 }
 0x14c   :  { %1564 = vst [vmem:[%s3197_s3 + $0x60] sm:$0x1f] %v1051_v41  ;;  %1566 = vst [vmem:[%s3197_s3 + $0x70] sm:$0x1f] %v1122_v42  ;;  %v1053_v45 = vadd.f32 %v1052_v43, %v3062_v17  ;;  %v1124_v46 = vadd.f32 %v1123_v44, %v3062_v17 }
 0x14e   :  { %1565 = vst [vmem:[%s3197_s3 + $0x68] sm:$0x1f] %v1053_v45  ;;  %1567 = vst [vmem:[%s3197_s3 + $0x78] sm:$0x1f] %v1124_v46 }
 0x16b   :  { %v1192_v47 = vpop.f32.mrf.mxu0  ;;  %v1263_v48 = vpop.f32.mrf.mxu1 }
 0x16c   :  { %v1193_v49 = vadd.f32 %v1192_v47, %v3062_v17  ;;  %v1264_v50 = vadd.f32 %v1263_v48, %v3062_v17 }
 0x16d   :  { %v1194_v51 = vpop.f32.mrf.mxu0  ;;  %v1265_v52 = vpop.f32.mrf.mxu1 }
 0x16e   :  { %1568 = vst [vmem:[%s3197_s3 + $0x80] sm:$0x1f] %v1193_v49  ;;  %1570 = vst [vmem:[%s3197_s3 + $0x90] sm:$0x1f] %v1264_v50  ;;  %v1195_v53 = vadd.f32 %v1194_v51, %v3062_v17  ;;  %v1266_v54 = vadd.f32 %v1265_v52, %v3062_v17 }
 0x170   :  { %1569 = vst [vmem:[%s3197_s3 + $0x88] sm:$0x1f] %v1195_v53  ;;  %1571 = vst [vmem:[%s3197_s3 + $0x98] sm:$0x1f] %v1266_v54 }
 0x18d   :  { %v1334_v55 = vpop.f32.mrf.mxu0  ;;  %v1405_v56 = vpop.f32.mrf.mxu1 }
 0x18e   :  { %v1335_v57 = vadd.f32 %v1334_v55, %v3062_v17  ;;  %v1406_v58 = vadd.f32 %v1405_v56, %v3062_v17 }
 0x18f   :  { %v1336_v59 = vpop.f32.mrf.mxu0  ;;  %v1407_v60 = vpop.f32.mrf.mxu1 }
 0x190   :  { %1572 = vst [vmem:[%s3197_s3 + $0xa0] sm:$0x1f] %v1335_v57  ;;  %1574 = vst [vmem:[%s3197_s3 + $0xb0] sm:$0x1f] %v1406_v58  ;;  %v1337_v61 = vadd.f32 %v1336_v59, %v3062_v17  ;;  %v1408_v62 = vadd.f32 %v1407_v60, %v3062_v17 }
 0x192   :  { %1573 = vst [vmem:[%s3197_s3 + $0xa8] sm:$0x1f] %v1337_v61  ;;  %1575 = vst [vmem:[%s3197_s3 + $0xb8] sm:$0x1f] %v1408_v62 }
 0x1af   :  { %v1476_v63 = vpop.f32.mrf.mxu0  ;;  %v1547_v0 = vpop.f32.mrf.mxu1 }
 0x1b0   :  { %v1477_v2 = vadd.f32 %v1476_v63, %v3062_v17  ;;  %v1548_v4 = vadd.f32 %v1547_v0, %v3062_v17 }
 0x1b1   :  { %v1478_v5 = vpop.f32.mrf.mxu0  ;;  %v1549_v6 = vpop.f32.mrf.mxu1 }
 0x1b2   :  { %1576 = vst [vmem:[%s3197_s3 + $0xc0] sm:$0x1f] %v1477_v2  ;;  %1578 = vst [vmem:[%s3197_s3 + $0xd0] sm:$0x1f] %v1548_v4  ;;  %v1479_v7 = vadd.f32 %v1478_v5, %v3062_v17  ;;  %v1550_v8 = vadd.f32 %v1549_v6, %v3062_v17 }
 0x1b4   :  { %1577 = vst [vmem:[%s3197_s3 + $0xc8] sm:$0x1f] %v1479_v7  ;;  %1580 = vst.msk [vmem:[%s3197_s3 + $0xd8] sm:$0x1f] %vm1579_vm2, %v1550_v8 }

// kernel: generator_forward.17
= control target key start
LH: loop header
LB: loop body
LE: loop exit
PB: predicated region body
PF: predicated region fallthrough
CT: control target
= control target key end

     0   :  { %vm479_vm0 = vcmask 1044480   ;;  %v2128_v3 = vmov 0.0   ;;  %vm475_vm1 = vcmask 1022976   ;;  %s3649_s1 = inlined_call_operand.vmem [shape: f32[125,3528], index: 1, kind: input, shape index: {}]   ;;  %s3650_s2 = inlined_call_operand.<no memory space> [shape: f32[1,1], index: 2, kind: input, shape index: {}]   ;;  %s3651_s0 = inlined_call_operand.vmem [shape: f32[1,125], index: 0, kind: input, shape index: {}]   ;;  %s3652_s3 = inlined_call_operand.vmem [shape: f32[1,3528], index: 3, kind: output, shape index: {}]  }
   0x1   :  { %v438_v0 = vld [vmem:[%s3649_s1 + $0xd28] sm:$0x1f]  ;;  %v440_v1 = vld [vmem:[%s3649_s1 + $0xd38] sm:$0x1f]  ;;  %v437_v2 = vld [vmem:[%s3649_s1 + $0xd20] sm:$0x1f]  ;;  %628 = vmatprep.mubr.f32.mxu0 %v2128_v3  ;;  %699 = vmatprep.mubr.f32.mxu1 %v2128_v3  ;;  %v8_v4 = vstv %s3650_s2 }
   0x2   :  { %1941 = vmatprep.subr.msk.mxu0 %vm479_vm0, %v438_v0  ;;  %1944 = vmatprep.subr.msk.mxu1 %vm479_vm0, %v440_v1  ;;  %v439_v5 = vld [vmem:[%s3649_s1 + $0xd30] sm:$0x1f]  ;;  %v410_v6 = vld [vmem:[%s3649_s1 + $0xc48] sm:$0xff]  ;;  %v412_v7 = vld [vmem:[%s3649_s1 + $0xc58] sm:$0xff]  ;;  %9 = vst [vmem:[#allocation2] sm:$0x1] %v8_v4 }
   0x3   :  { %1942 = vmatpush1.msk.msra.mxu0 %vm479_vm0, %v437_v2  ;;  %1945 = vmatpush1.msk.msra.mxu1 %vm479_vm0, %v439_v5  ;;  %v409_v8 = vld [vmem:[%s3649_s1 + $0xc40] sm:$0xff]  ;;  %v411_v9 = vld [vmem:[%s3649_s1 + $0xc50] sm:$0xff]  ;;  %v382_v10 = vld [vmem:[%s3649_s1 + $0xb68] sm:$0xff] }
   0x4   :  { %566 = vmatprep.subr.mxu0 %v410_v6  ;;  %637 = vmatprep.subr.mxu1 %v412_v7  ;;  %v384_v11 = vld [vmem:[%s3649_s1 + $0xb78] sm:$0xff]  ;;  %v381_v12 = vld [vmem:[%s3649_s1 + $0xb60] sm:$0xff]  ;;  %v383_v13 = vld [vmem:[%s3649_s1 + $0xb70] sm:$0xff] }
   0x5   :  { %567 = vmatpush1.msra.mxu0 %v409_v8  ;;  %638 = vmatpush1.msra.mxu1 %v411_v9  ;;  %v354_v14 = vld [vmem:[%s3649_s1 + $0xa88] sm:$0xff]  ;;  %v356_v15 = vld [vmem:[%s3649_s1 + $0xa98] sm:$0xff]  ;;  %v353_v16 = vld [vmem:[%s3649_s1 + $0xa80] sm:$0xff] }
   0x6   :  { %568 = vmatprep.subr.mxu0 %v382_v10  ;;  %639 = vmatprep.subr.mxu1 %v384_v11  ;;  %v355_v17 = vld [vmem:[%s3649_s1 + $0xa90] sm:$0xff]  ;;  %v326_v18 = vld [vmem:[%s3649_s1 + $0x9a8] sm:$0xff]  ;;  %v328_v19 = vld [vmem:[%s3649_s1 + $0x9b8] sm:$0xff] }
   0x7   :  { %569 = vmatpush1.msra.mxu0 %v381_v12  ;;  %640 = vmatpush1.msra.mxu1 %v383_v13  ;;  %v325_v20 = vld [vmem:[%s3649_s1 + $0x9a0] sm:$0xff]  ;;  %v327_v21 = vld [vmem:[%s3649_s1 + $0x9b0] sm:$0xff]  ;;  %v298_v22 = vld [vmem:[%s3649_s1 + $0x8c8] sm:$0xff] }
   0x8   :  { %570 = vmatprep.subr.mxu0 %v354_v14  ;;  %641 = vmatprep.subr.mxu1 %v356_v15  ;;  %v300_v23 = vld [vmem:[%s3649_s1 + $0x8d8] sm:$0xff]  ;;  %v297_v24 = vld [vmem:[%s3649_s1 + $0x8c0] sm:$0xff]  ;;  %v299_v25 = vld [vmem:[%s3649_s1 + $0x8d0] sm:$0xff] }
   0x9   :  { %571 = vmatpush1.msra.mxu0 %v353_v16  ;;  %642 = vmatpush1.msra.mxu1 %v355_v17  ;;  %v270_v26 = vld [vmem:[%s3649_s1 + $0x7e8] sm:$0xff]  ;;  %v272_v27 = vld [vmem:[%s3649_s1 + $0x7f8] sm:$0xff]  ;;  %v269_v28 = vld [vmem:[%s3649_s1 + $0x7e0] sm:$0xff] }
   0xa   :  { %572 = vmatprep.subr.mxu0 %v326_v18  ;;  %643 = vmatprep.subr.mxu1 %v328_v19  ;;  %v271_v29 = vld [vmem:[%s3649_s1 + $0x7f0] sm:$0xff]  ;;  %v242_v30 = vld [vmem:[%s3649_s1 + $0x708] sm:$0xff]  ;;  %v244_v31 = vld [vmem:[%s3649_s1 + $0x718] sm:$0xff] }
   0xb   :  { %573 = vmatpush1.msra.mxu0 %v325_v20  ;;  %644 = vmatpush1.msra.mxu1 %v327_v21  ;;  %v241_v32 = vld [vmem:[%s3649_s1 + $0x700] sm:$0xff]  ;;  %v243_v33 = vld [vmem:[%s3649_s1 + $0x710] sm:$0xff]  ;;  %v214_v34 = vld [vmem:[%s3649_s1 + $0x628] sm:$0xff] }
   0xc   :  { %574 = vmatprep.subr.mxu0 %v298_v22  ;;  %645 = vmatprep.subr.mxu1 %v300_v23  ;;  %v216_v35 = vld [vmem:[%s3649_s1 + $0x638] sm:$0xff]  ;;  %v213_v36 = vld [vmem:[%s3649_s1 + $0x620] sm:$0xff]  ;;  %v215_v37 = vld [vmem:[%s3649_s1 + $0x630] sm:$0xff] }
   0xd   :  { %575 = vmatpush1.msra.mxu0 %v297_v24  ;;  %646 = vmatpush1.msra.mxu1 %v299_v25  ;;  %v186_v38 = vld [vmem:[%s3649_s1 + $0x548] sm:$0xff]  ;;  %v188_v39 = vld [vmem:[%s3649_s1 + $0x558] sm:$0xff]  ;;  %v185_v40 = vld [vmem:[%s3649_s1 + $0x540] sm:$0xff] }
   0xe   :  { %576 = vmatprep.subr.mxu0 %v270_v26  ;;  %647 = vmatprep.subr.mxu1 %v272_v27  ;;  %v187_v41 = vld [vmem:[%s3649_s1 + $0x550] sm:$0xff]  ;;  %v158_v42 = vld [vmem:[%s3649_s1 + $0x468] sm:$0xff]  ;;  %v160_v43 = vld [vmem:[%s3649_s1 + $0x478] sm:$0xff] }
   0xf   :  { %577 = vmatpush1.msra.mxu0 %v269_v28  ;;  %648 = vmatpush1.msra.mxu1 %v271_v29  ;;  %v157_v44 = vld [vmem:[%s3649_s1 + $0x460] sm:$0xff]  ;;  %v159_v45 = vld [vmem:[%s3649_s1 + $0x470] sm:$0xff]  ;;  %v130_v46 = vld [vmem:[%s3649_s1 + $0x388] sm:$0xff] }
  0x10   :  { %578 = vmatprep.subr.mxu0 %v242_v30  ;;  %649 = vmatprep.subr.mxu1 %v244_v31  ;;  %v132_v47 = vld [vmem:[%s3649_s1 + $0x398] sm:$0xff]  ;;  %v129_v48 = vld [vmem:[%s3649_s1 + $0x380] sm:$0xff]  ;;  %v131_v49 = vld [vmem:[%s3649_s1 + $0x390] sm:$0xff] }
  0x11   :  { %579 = vmatpush1.msra.mxu0 %v241_v32  ;;  %650 = vmatpush1.msra.mxu1 %v243_v33  ;;  %v102_v50 = vld [vmem:[%s3649_s1 + $0x2a8] sm:$0xff]  ;;  %v104_v51 = vld [vmem:[%s3649_s1 + $0x2b8] sm:$0xff]  ;;  %v101_v52 = vld [vmem:[%s3649_s1 + $0x2a0] sm:$0xff] }
  0x12   :  { %580 = vmatprep.subr.mxu0 %v214_v34  ;;  %651 = vmatprep.subr.mxu1 %v216_v35  ;;  %v103_v53 = vld [vmem:[%s3649_s1 + $0x2b0] sm:$0xff]  ;;  %v74_v54 = vld [vmem:[%s3649_s1 + $0x1c8] sm:$0xff]  ;;  %v76_v55 = vld [vmem:[%s3649_s1 + $0x1d8] sm:$0xff] }
  0x13   :  { %581 = vmatpush1.msra.mxu0 %v213_v36  ;;  %652 = vmatpush1.msra.mxu1 %v215_v37  ;;  %v73_v56 = vld [vmem:[%s3649_s1 + $0x1c0] sm:$0xff]  ;;  %v75_v57 = vld [vmem:[%s3649_s1 + $0x1d0] sm:$0xff]  ;;  %v46_v58 = vld [vmem:[%s3649_s1 + $0xe8] sm:$0xff] }
  0x14   :  { %582 = vmatprep.subr.mxu0 %v186_v38  ;;  %653 = vmatprep.subr.mxu1 %v188_v39  ;;  %v48_v59 = vld [vmem:[%s3649_s1 + $0xf8] sm:$0xff]  ;;  %v45_v60 = vld [vmem:[%s3649_s1 + $0xe0] sm:$0xff]  ;;  %v47_v61 = vld [vmem:[%s3649_s1 + $0xf0] sm:$0xff] }
  0x15   :  { %583 = vmatpush1.msra.mxu0 %v185_v40  ;;  %654 = vmatpush1.msra.mxu1 %v187_v41  ;;  %v18_v62 = vld [vmem:[%s3649_s1 + $0x8] sm:$0xff]  ;;  %v20_v63 = vld [vmem:[%s3649_s1 + $0x18] sm:$0xff]  ;;  %v17_v0 = vld [vmem:[%s3649_s1] sm:$0xff] }
  0x16   :  { %584 = vmatprep.subr.mxu0 %v158_v42  ;;  %655 = vmatprep.subr.mxu1 %v160_v43  ;;  %v19_v1 = vld [vmem:[%s3649_s1 + $0x10] sm:$0xff]  ;;  %v2355_v2 = vld [vmem:[%s3651_s0] sm:$0x1]  ;;  %v442_v4 = vld [vmem:[%s3649_s1 + $0xd48] sm:$0x1f] }
  0x17   :  { %585 = vmatpush1.msra.mxu0 %v157_v44  ;;  %656 = vmatpush1.msra.mxu1 %v159_v45  ;;  %v444_v5 = vld [vmem:[%s3649_s1 + $0xd58] sm:$0x1f]  ;;  %v441_v6 = vld [vmem:[%s3649_s1 + $0xd40] sm:$0x1f]  ;;  %v443_v7 = vld [vmem:[%s3649_s1 + $0xd50] sm:$0x1f] }
  0x18   :  { %586 = vmatprep.subr.mxu0 %v130_v46  ;;  %657 = vmatprep.subr.mxu1 %v132_v47  ;;  %v414_v8 = vld [vmem:[%s3649_s1 + $0xc68] sm:$0xff]  ;;  %v416_v9 = vld [vmem:[%s3649_s1 + $0xc78] sm:$0xff]  ;;  %v413_v10 = vld [vmem:[%s3649_s1 + $0xc60] sm:$0xff] }
  0x19   :  { %587 = vmatpush1.msra.mxu0 %v129_v48  ;;  %658 = vmatpush1.msra.mxu1 %v131_v49  ;;  %v415_v11 = vld [vmem:[%s3649_s1 + $0xc70] sm:$0xff]  ;;  %v386_v12 = vld [vmem:[%s3649_s1 + $0xb88] sm:$0xff]  ;;  %v388_v13 = vld [vmem:[%s3649_s1 + $0xb98] sm:$0xff] }
  0x1a   :  { %588 = vmatprep.subr.mxu0 %v102_v50  ;;  %659 = vmatprep.subr.mxu1 %v104_v51  ;;  %v385_v14 = vld [vmem:[%s3649_s1 + $0xb80] sm:$0xff]  ;;  %v387_v15 = vld [vmem:[%s3649_s1 + $0xb90] sm:$0xff]  ;;  %v358_v16 = vld [vmem:[%s3649_s1 + $0xaa8] sm:$0xff] }
  0x1b   :  { %589 = vmatpush1.msra.mxu0 %v101_v52  ;;  %660 = vmatpush1.msra.mxu1 %v103_v53  ;;  %v360_v17 = vld [vmem:[%s3649_s1 + $0xab8] sm:$0xff]  ;;  %v357_v18 = vld [vmem:[%s3649_s1 + $0xaa0] sm:$0xff]  ;;  %v359_v19 = vld [vmem:[%s3649_s1 + $0xab0] sm:$0xff] }
  0x1c   :  { %590 = vmatprep.subr.mxu0 %v74_v54  ;;  %661 = vmatprep.subr.mxu1 %v76_v55  ;;  %v330_v20 = vld [vmem:[%s3649_s1 + $0x9c8] sm:$0xff]  ;;  %v332_v21 = vld [vmem:[%s3649_s1 + $0x9d8] sm:$0xff]  ;;  %v329_v22 = vld [vmem:[%s3649_s1 + $0x9c0] sm:$0xff] }
  0x1d   :  { %591 = vmatpush1.msra.mxu0 %v73_v56  ;;  %662 = vmatpush1.msra.mxu1 %v75_v57  ;;  %v331_v23 = vld [vmem:[%s3649_s1 + $0x9d0] sm:$0xff]  ;;  %v302_v24 = vld [vmem:[%s3649_s1 + $0x8e8] sm:$0xff]  ;;  %v304_v25 = vld [vmem:[%s3649_s1 + $0x8f8] sm:$0xff] }
  0x1e   :  { %592 = vmatprep.subr.mxu0 %v46_v58  ;;  %663 = vmatprep.subr.mxu1 %v48_v59  ;;  %v301_v26 = vld [vmem:[%s3649_s1 + $0x8e0] sm:$0xff]  ;;  %v303_v27 = vld [vmem:[%s3649_s1 + $0x8f0] sm:$0xff]  ;;  %v274_v28 = vld [vmem:[%s3649_s1 + $0x808] sm:$0xff] }
  0x1f   :  { %593 = vmatpush1.msra.mxu0 %v45_v60  ;;  %664 = vmatpush1.msra.mxu1 %v47_v61  ;;  %v276_v29 = vld [vmem:[%s3649_s1 + $0x818] sm:$0xff]  ;;  %v273_v30 = vld [vmem:[%s3649_s1 + $0x800] sm:$0xff]  ;;  %v275_v31 = vld [vmem:[%s3649_s1 + $0x810] sm:$0xff] }
  0x20   :  { %594 = vmatprep.subr.mxu0 %v18_v62  ;;  %665 = vmatprep.subr.mxu1 %v20_v63  ;;  %v246_v32 = vld [vmem:[%s3649_s1 + $0x728] sm:$0xff]  ;;  %v248_v33 = vld [vmem:[%s3649_s1 + $0x738] sm:$0xff]  ;;  %v245_v34 = vld [vmem:[%s3649_s1 + $0x720] sm:$0xff] }
  0x21   :  { %595 = vmatpush1.msra.mxu0 %v17_v0  ;;  %666 = vmatpush1.msra.mxu1 %v19_v1  ;;  %v247_v35 = vld [vmem:[%s3649_s1 + $0x730] sm:$0xff]  ;;  %v218_v36 = vld [vmem:[%s3649_s1 + $0x648] sm:$0xff]  ;;  %v220_v37 = vld [vmem:[%s3649_s1 + $0x658] sm:$0xff] }
  0x22   :  { %1943 = vmatmul.mubr.msk.f32.vlgmr.msra.gmra.mxu0 %vm475_vm1, %v2355_v2  ;;  %1946 = vmatmul.mubr.msk.f32.vlgmr.msra.gmra.mxu1 %vm475_vm1, %v2355_v2  ;;  %v217_v38 = vld [vmem:[%s3649_s1 + $0x640] sm:$0xff]  ;;  %v219_v39 = vld [vmem:[%s3649_s1 + $0x650] sm:$0xff]  ;;  %v190_v40 = vld [vmem:[%s3649_s1 + $0x568] sm:$0xff] }
  0x23   :  { %1947 = vmatprep.subr.msk.mxu0 %vm479_vm0, %v442_v4  ;;  %1950 = vmatprep.subr.msk.mxu1 %vm479_vm0, %v444_v5  ;;  %v192_v41 = vld [vmem:[%s3649_s1 + $0x578] sm:$0xff]  ;;  %v189_v42 = vld [vmem:[%s3649_s1 + $0x560] sm:$0xff]  ;;  %v191_v43 = vld [vmem:[%s3649_s1 + $0x570] sm:$0xff] }
  0x24   :  { %1948 = vmatpush1.msk.msra.mxu0 %vm479_vm0, %v441_v6  ;;  %1951 = vmatpush1.msk.msra.mxu1 %vm479_vm0, %v443_v7  ;;  %v162_v44 = vld [vmem:[%s3649_s1 + $0x488] sm:$0xff]  ;;  %v164_v45 = vld [vmem:[%s3649_s1 + $0x498] sm:$0xff]  ;;  %v161_v46 = vld [vmem:[%s3649_s1 + $0x480] sm:$0xff] }
  0x25   :  { %708 = vmatprep.subr.mxu0 %v414_v8  ;;  %779 = vmatprep.subr.mxu1 %v416_v9  ;;  %v163_v47 = vld [vmem:[%s3649_s1 + $0x490] sm:$0xff]  ;;  %v134_v48 = vld [vmem:[%s3649_s1 + $0x3a8] sm:$0xff]  ;;  %v136_v49 = vld [vmem:[%s3649_s1 + $0x3b8] sm:$0xff] }
  0x26   :  { %709 = vmatpush1.msra.mxu0 %v413_v10  ;;  %780 = vmatpush1.msra.mxu1 %v415_v11  ;;  %v133_v50 = vld [vmem:[%s3649_s1 + $0x3a0] sm:$0xff]  ;;  %v135_v51 = vld [vmem:[%s3649_s1 + $0x3b0] sm:$0xff]  ;;  %v106_v52 = vld [vmem:[%s3649_s1 + $0x2c8] sm:$0xff] }
  0x27   :  { %710 = vmatprep.subr.mxu0 %v386_v12  ;;  %781 = vmatprep.subr.mxu1 %v388_v13  ;;  %v108_v53 = vld [vmem:[%s3649_s1 + $0x2d8] sm:$0xff]  ;;  %v105_v54 = vld [vmem:[%s3649_s1 + $0x2c0] sm:$0xff]  ;;  %v107_v55 = vld [vmem:[%s3649_s1 + $0x2d0] sm:$0xff] }
  0x28   :  { %711 = vmatpush1.msra.mxu0 %v385_v14  ;;  %782 = vmatpush1.msra.mxu1 %v387_v15  ;;  %v78_v56 = vld [vmem:[%s3649_s1 + $0x1e8] sm:$0xff]  ;;  %v80_v57 = vld [vmem:[%s3649_s1 + $0x1f8] sm:$0xff]  ;;  %v77_v58 = vld [vmem:[%s3649_s1 + $0x1e0] sm:$0xff] }
  0x29   :  { %712 = vmatprep.subr.mxu0 %v358_v16  ;;  %783 = vmatprep.subr.mxu1 %v360_v17  ;;  %v79_v59 = vld [vmem:[%s3649_s1 + $0x1f0] sm:$0xff]  ;;  %v50_v60 = vld [vmem:[%s3649_s1 + $0x108] sm:$0xff]  ;;  %v52_v61 = vld [vmem:[%s3649_s1 + $0x118] sm:$0xff] }
  0x2a   :  { %713 = vmatpush1.msra.mxu0 %v357_v18  ;;  %784 = vmatpush1.msra.mxu1 %v359_v19  ;;  %v49_v62 = vld [vmem:[%s3649_s1 + $0x100] sm:$0xff]  ;;  %v51_v63 = vld [vmem:[%s3649_s1 + $0x110] sm:$0xff]  ;;  %v22_v0 = vld [vmem:[%s3649_s1 + $0x28] sm:$0xff] }
  0x2b   :  { %714 = vmatprep.subr.mxu0 %v330_v20  ;;  %785 = vmatprep.subr.mxu1 %v332_v21  ;;  %v24_v1 = vld [vmem:[%s3649_s1 + $0x38] sm:$0xff]  ;;  %v21_v4 = vld [vmem:[%s3649_s1 + $0x20] sm:$0xff]  ;;  %v23_v5 = vld [vmem:[%s3649_s1 + $0x30] sm:$0xff] }
  0x2c   :  { %715 = vmatpush1.msra.mxu0 %v329_v22  ;;  %786 = vmatpush1.msra.mxu1 %v331_v23  ;;  %v446_v6 = vld [vmem:[%s3649_s1 + $0xd68] sm:$0x1f]  ;;  %v448_v7 = vld [vmem:[%s3649_s1 + $0xd78] sm:$0x1f]  ;;  %v445_v8 = vld [vmem:[%s3649_s1 + $0xd60] sm:$0x1f] }
  0x2d   :  { %716 = vmatprep.subr.mxu0 %v302_v24  ;;  %787 = vmatprep.subr.mxu1 %v304_v25  ;;  %v447_v9 = vld [vmem:[%s3649_s1 + $0xd70] sm:$0x1f]  ;;  %v418_v10 = vld [vmem:[%s3649_s1 + $0xc88] sm:$0xff]  ;;  %v420_v11 = vld [vmem:[%s3649_s1 + $0xc98] sm:$0xff] }
  0x2e   :  { %717 = vmatpush1.msra.mxu0 %v301_v26  ;;  %788 = vmatpush1.msra.mxu1 %v303_v27  ;;  %v417_v12 = vld [vmem:[%s3649_s1 + $0xc80] sm:$0xff]  ;;  %v419_v13 = vld [vmem:[%s3649_s1 + $0xc90] sm:$0xff]  ;;  %v390_v14 = vld [vmem:[%s3649_s1 + $0xba8] sm:$0xff] }
  0x2f   :  { %718 = vmatprep.subr.mxu0 %v274_v28  ;;  %789 = vmatprep.subr.mxu1 %v276_v29  ;;  %v392_v15 = vld [vmem:[%s3649_s1 + $0xbb8] sm:$0xff]  ;;  %v389_v16 = vld [vmem:[%s3649_s1 + $0xba0] sm:$0xff]  ;;  %v391_v17 = vld [vmem:[%s3649_s1 + $0xbb0] sm:$0xff] }
  0x30   :  { %719 = vmatpush1.msra.mxu0 %v273_v30  ;;  %790 = vmatpush1.msra.mxu1 %v275_v31  ;;  %v362_v18 = vld [vmem:[%s3649_s1 + $0xac8] sm:$0xff]  ;;  %v364_v19 = vld [vmem:[%s3649_s1 + $0xad8] sm:$0xff]  ;;  %v361_v20 = vld [vmem:[%s3649_s1 + $0xac0] sm:$0xff] }
  0x31   :  { %720 = vmatprep.subr.mxu0 %v246_v32  ;;  %791 = vmatprep.subr.mxu1 %v248_v33  ;;  %v363_v21 = vld [vmem:[%s3649_s1 + $0xad0] sm:$0xff]  ;;  %v334_v22 = vld [vmem:[%s3649_s1 + $0x9e8] sm:$0xff]  ;;  %v336_v23 = vld [vmem:[%s3649_s1 + $0x9f8] sm:$0xff] }
  0x32   :  { %721 = vmatpush1.msra.mxu0 %v245_v34  ;;  %792 = vmatpush1.msra.mxu1 %v247_v35  ;;  %v333_v24 = vld [vmem:[%s3649_s1 + $0x9e0] sm:$0xff]  ;;  %v335_v25 = vld [vmem:[%s3649_s1 + $0x9f0] sm:$0xff]  ;;  %v306_v26 = vld [vmem:[%s3649_s1 + $0x908] sm:$0xff] }
  0x33   :  { %722 = vmatprep.subr.mxu0 %v218_v36  ;;  %793 = vmatprep.subr.mxu1 %v220_v37  ;;  %v308_v27 = vld [vmem:[%s3649_s1 + $0x918] sm:$0xff]  ;;  %v305_v28 = vld [vmem:[%s3649_s1 + $0x900] sm:$0xff]  ;;  %v307_v29 = vld [vmem:[%s3649_s1 + $0x910] sm:$0xff] }
  0x34   :  { %723 = vmatpush1.msra.mxu0 %v217_v38  ;;  %794 = vmatpush1.msra.mxu1 %v219_v39  ;;  %v278_v30 = vld [vmem:[%s3649_s1 + $0x828] sm:$0xff]  ;;  %v280_v31 = vld [vmem:[%s3649_s1 + $0x838] sm:$0xff]  ;;  %v277_v32 = vld [vmem:[%s3649_s1 + $0x820] sm:$0xff] }
  0x35   :  { %724 = vmatprep.subr.mxu0 %v190_v40  ;;  %795 = vmatprep.subr.mxu1 %v192_v41  ;;  %v279_v33 = vld [vmem:[%s3649_s1 + $0x830] sm:$0xff]  ;;  %v250_v34 = vld [vmem:[%s3649_s1 + $0x748] sm:$0xff]  ;;  %v252_v35 = vld [vmem:[%s3649_s1 + $0x758] sm:$0xff] }
  0x36   :  { %725 = vmatpush1.msra.mxu0 %v189_v42  ;;  %796 = vmatpush1.msra.mxu1 %v191_v43  ;;  %v249_v36 = vld [vmem:[%s3649_s1 + $0x740] sm:$0xff]  ;;  %v251_v37 = vld [vmem:[%s3649_s1 + $0x750] sm:$0xff]  ;;  %v222_v38 = vld [vmem:[%s3649_s1 + $0x668] sm:$0xff] }
  0x37   :  { %726 = vmatprep.subr.mxu0 %v162_v44  ;;  %797 = vmatprep.subr.mxu1 %v164_v45  ;;  %v224_v39 = vld [vmem:[%s3649_s1 + $0x678] sm:$0xff]  ;;  %v221_v40 = vld [vmem:[%s3649_s1 + $0x660] sm:$0xff]  ;;  %v223_v41 = vld [vmem:[%s3649_s1 + $0x670] sm:$0xff] }
  0x38   :  { %727 = vmatpush1.msra.mxu0 %v161_v46  ;;  %798 = vmatpush1.msra.mxu1 %v163_v47  ;;  %v194_v42 = vld [vmem:[%s3649_s1 + $0x588] sm:$0xff]  ;;  %v196_v43 = vld [vmem:[%s3649_s1 + $0x598] sm:$0xff]  ;;  %v193_v44 = vld [vmem:[%s3649_s1 + $0x580] sm:$0xff] }
  0x39   :  { %728 = vmatprep.subr.mxu0 %v134_v48  ;;  %799 = vmatprep.subr.mxu1 %v136_v49  ;;  %v195_v45 = vld [vmem:[%s3649_s1 + $0x590] sm:$0xff]  ;;  %v166_v46 = vld [vmem:[%s3649_s1 + $0x4a8] sm:$0xff]  ;;  %v168_v47 = vld [vmem:[%s3649_s1 + $0x4b8] sm:$0xff] }
  0x3a   :  { %729 = vmatpush1.msra.mxu0 %v133_v50  ;;  %800 = vmatpush1.msra.mxu1 %v135_v51  ;;  %v165_v48 = vld [vmem:[%s3649_s1 + $0x4a0] sm:$0xff]  ;;  %v167_v49 = vld [vmem:[%s3649_s1 + $0x4b0] sm:$0xff]  ;;  %v138_v50 = vld [vmem:[%s3649_s1 + $0x3c8] sm:$0xff] }
  0x3b   :  { %730 = vmatprep.subr.mxu0 %v106_v52  ;;  %801 = vmatprep.subr.mxu1 %v108_v53  ;;  %v140_v51 = vld [vmem:[%s3649_s1 + $0x3d8] sm:$0xff]  ;;  %v137_v52 = vld [vmem:[%s3649_s1 + $0x3c0] sm:$0xff]  ;;  %v139_v53 = vld [vmem:[%s3649_s1 + $0x3d0] sm:$0xff] }
  0x3c   :  { %731 = vmatpush1.msra.mxu0 %v105_v54  ;;  %802 = vmatpush1.msra.mxu1 %v107_v55  ;;  %v110_v54 = vld [vmem:[%s3649_s1 + $0x2e8] sm:$0xff]  ;;  %v112_v55 = vld [vmem:[%s3649_s1 + $0x2f8] sm:$0xff] }
  0x3d   :  { %732 = vmatprep.subr.mxu0 %v78_v56  ;;  %803 = vmatprep.subr.mxu1 %v80_v57  ;;  %v109_v56 = vld [vmem:[%s3649_s1 + $0x2e0] sm:$0xff]  ;;  %v111_v57 = vld [vmem:[%s3649_s1 + $0x2f0] sm:$0xff] }
  0x3e   :  { %733 = vmatpush1.msra.mxu0 %v77_v58  ;;  %804 = vmatpush1.msra.mxu1 %v79_v59  ;;  %v82_v58 = vld [vmem:[%s3649_s1 + $0x208] sm:$0xff]  ;;  %v84_v59 = vld [vmem:[%s3649_s1 + $0x218] sm:$0xff] }
  0x3f   :  { %734 = vmatprep.subr.mxu0 %v50_v60  ;;  %805 = vmatprep.subr.mxu1 %v52_v61  ;;  %v81_v60 = vld [vmem:[%s3649_s1 + $0x200] sm:$0xff]  ;;  %v83_v61 = vld [vmem:[%s3649_s1 + $0x210] sm:$0xff] }
  0x40   :  { %735 = vmatpush1.msra.mxu0 %v49_v62  ;;  %806 = vmatpush1.msra.mxu1 %v51_v63  ;;  %v54_v62 = vld [vmem:[%s3649_s1 + $0x128] sm:$0xff]  ;;  %v56_v63 = vld [vmem:[%s3649_s1 + $0x138] sm:$0xff] }
  0x41   :  { %736 = vmatprep.subr.mxu0 %v22_v0  ;;  %807 = vmatprep.subr.mxu1 %v24_v1  ;;  %v53_v0 = vld [vmem:[%s3649_s1 + $0x120] sm:$0xff]  ;;  %v55_v1 = vld [vmem:[%s3649_s1 + $0x130] sm:$0xff] }
  0x42   :  { %737 = vmatpush1.msra.mxu0 %v21_v4  ;;  %770 = vmatprep.mubr.f32.mxu0 %v2128_v3  ;;  %v26_v4 = vld [vmem:[%s3649_s1 + $0x48] sm:$0xff] }
  0x43   :  { %808 = vmatpush1.msra.mxu1 %v23_v5  ;;  %841 = vmatprep.mubr.f32.mxu1 %v2128_v3  ;;  %v28_v5 = vld [vmem:[%s3649_s1 + $0x58] sm:$0xff] }
  0x44   :  { %1949 = vmatmul.mubr.msk.f32.vlgmr.msra.gmra.mxu0 %vm475_vm1, %v2355_v2  ;;  %1952 = vmatmul.mubr.msk.f32.vlgmr.msra.gmra.mxu1 %vm475_vm1, %v2355_v2 }
  0x45   :  { %1953 = vmatprep.subr.msk.mxu0 %vm479_vm0, %v446_v6  ;;  %1956 = vmatprep.subr.msk.mxu1 %vm479_vm0, %v448_v7  ;;  %v25_v6 = vld [vmem:[%s3649_s1 + $0x40] sm:$0xff]  ;;  %v27_v7 = vld [vmem:[%s3649_s1 + $0x50] sm:$0xff] }
  0x46   :  { %1954 = vmatpush1.msk.msra.mxu0 %vm479_vm0, %v445_v8  ;;  %1957 = vmatpush1.msk.msra.mxu1 %vm479_vm0, %v447_v9  ;;  %v450_v8 = vld [vmem:[%s3649_s1 + $0xd88] sm:$0x1f]  ;;  %v452_v9 = vld [vmem:[%s3649_s1 + $0xd98] sm:$0x1f] }
  0x47   :  { %850 = vmatprep.subr.mxu0 %v418_v10  ;;  %921 = vmatprep.subr.mxu1 %v420_v11  ;;  %v449_v10 = vld [vmem:[%s3649_s1 + $0xd80] sm:$0x1f]  ;;  %v451_v11 = vld [vmem:[%s3649_s1 + $0xd90] sm:$0x1f] }
  0x48   :  { %851 = vmatpush1.msra.mxu0 %v417_v12  ;;  %922 = vmatpush1.msra.mxu1 %v419_v13  ;;  %v422_v12 = vld [vmem:[%s3649_s1 + $0xca8] sm:$0xff]  ;;  %v424_v13 = vld [vmem:[%s3649_s1 + $0xcb8] sm:$0xff] }
  0x49   :  { %852 = vmatprep.subr.mxu0 %v390_v14  ;;  %923 = vmatprep.subr.mxu1 %v392_v15  ;;  %v421_v14 = vld [vmem:[%s3649_s1 + $0xca0] sm:$0xff]  ;;  %v423_v15 = vld [vmem:[%s3649_s1 + $0xcb0] sm:$0xff] }
  0x4a   :  { %853 = vmatpush1.msra.mxu0 %v389_v16  ;;  %924 = vmatpush1.msra.mxu1 %v391_v17  ;;  %v465_v16 = vld [vmem:[#allocation2] sm:$0x1]  ;;  %v394_v17 = vld [vmem:[%s3649_s1 + $0xbc8] sm:$0xff] }
  0x4b   :  { %854 = vmatprep.subr.mxu0 %v362_v18  ;;  %925 = vmatprep.subr.mxu1 %v364_v19  ;;  %v396_v18 = vld [vmem:[%s3649_s1 + $0xbd8] sm:$0xff]  ;;  %v2129_v19 = vmov 0  }
  0x4c   :  { %855 = vmatpush1.msra.mxu0 %v361_v20  ;;  %926 = vmatpush1.msra.mxu1 %v363_v21  ;;  %v393_v20 = vld [vmem:[%s3649_s1 + $0xbc0] sm:$0xff]  ;;  %v395_v21 = vld [vmem:[%s3649_s1 + $0xbd0] sm:$0xff] }
  0x4d   :  { %856 = vmatprep.subr.mxu0 %v334_v22  ;;  %927 = vmatprep.subr.mxu1 %v336_v23  ;;  %v366_v22 = vld [vmem:[%s3649_s1 + $0xae8] sm:$0xff]  ;;  %v368_v23 = vld [vmem:[%s3649_s1 + $0xaf8] sm:$0xff] }
  0x4e   :  { %857 = vmatpush1.msra.mxu0 %v333_v24  ;;  %928 = vmatpush1.msra.mxu1 %v335_v25  ;;  %v365_v24 = vld [vmem:[%s3649_s1 + $0xae0] sm:$0xff]  ;;  %v367_v25 = vld [vmem:[%s3649_s1 + $0xaf0] sm:$0xff] }
  0x4f   :  { %858 = vmatprep.subr.mxu0 %v306_v26  ;;  %929 = vmatprep.subr.mxu1 %v308_v27  ;;  %v338_v26 = vld [vmem:[%s3649_s1 + $0xa08] sm:$0xff]  ;;  %v340_v27 = vld [vmem:[%s3649_s1 + $0xa18] sm:$0xff] }
  0x50   :  { %859 = vmatpush1.msra.mxu0 %v305_v28  ;;  %930 = vmatpush1.msra.mxu1 %v307_v29  ;;  %v337_v28 = vld [vmem:[%s3649_s1 + $0xa00] sm:$0xff]  ;;  %v339_v29 = vld [vmem:[%s3649_s1 + $0xa10] sm:$0xff] }
  0x51   :  { %860 = vmatprep.subr.mxu0 %v278_v30  ;;  %931 = vmatprep.subr.mxu1 %v280_v31  ;;  %v310_v30 = vld [vmem:[%s3649_s1 + $0x928] sm:$0xff]  ;;  %v312_v31 = vld [vmem:[%s3649_s1 + $0x938] sm:$0xff] }
  0x52   :  { %861 = vmatpush1.msra.mxu0 %v277_v32  ;;  %932 = vmatpush1.msra.mxu1 %v279_v33  ;;  %v309_v32 = vld [vmem:[%s3649_s1 + $0x920] sm:$0xff]  ;;  %v311_v33 = vld [vmem:[%s3649_s1 + $0x930] sm:$0xff] }
  0x53   :  { %862 = vmatprep.subr.mxu0 %v250_v34  ;;  %933 = vmatprep.subr.mxu1 %v252_v35  ;;  %v282_v34 = vld [vmem:[%s3649_s1 + $0x848] sm:$0xff]  ;;  %v284_v35 = vld [vmem:[%s3649_s1 + $0x858] sm:$0xff] }
  0x54   :  { %863 = vmatpush1.msra.mxu0 %v249_v36  ;;  %934 = vmatpush1.msra.mxu1 %v251_v37  ;;  %v281_v36 = vld [vmem:[%s3649_s1 + $0x840] sm:$0xff]  ;;  %v283_v37 = vld [vmem:[%s3649_s1 + $0x850] sm:$0xff] }
  0x55   :  { %864 = vmatprep.subr.mxu0 %v222_v38  ;;  %935 = vmatprep.subr.mxu1 %v224_v39  ;;  %v254_v38 = vld [vmem:[%s3649_s1 + $0x768] sm:$0xff]  ;;  %v256_v39 = vld [vmem:[%s3649_s1 + $0x778] sm:$0xff] }
  0x56   :  { %865 = vmatpush1.msra.mxu0 %v221_v40  ;;  %936 = vmatpush1.msra.mxu1 %v223_v41  ;;  %v253_v40 = vld [vmem:[%s3649_s1 + $0x760] sm:$0xff]  ;;  %v255_v41 = vld [vmem:[%s3649_s1 + $0x770] sm:$0xff] }
  0x57   :  { %866 = vmatprep.subr.mxu0 %v194_v42  ;;  %937 = vmatprep.subr.mxu1 %v196_v43  ;;  %v226_v42 = vld [vmem:[%s3649_s1 + $0x688] sm:$0xff]  ;;  %v228_v43 = vld [vmem:[%s3649_s1 + $0x698] sm:$0xff] }
  0x58   :  { %867 = vmatpush1.msra.mxu0 %v193_v44  ;;  %938 = vmatpush1.msra.mxu1 %v195_v45  ;;  %v225_v44 = vld [vmem:[%s3649_s1 + $0x680] sm:$0xff]  ;;  %v227_v45 = vld [vmem:[%s3649_s1 + $0x690] sm:$0xff] }
  0x59   :  { %868 = vmatprep.subr.mxu0 %v166_v46  ;;  %939 = vmatprep.subr.mxu1 %v168_v47  ;;  %v198_v46 = vld [vmem:[%s3649_s1 + $0x5a8] sm:$0xff]  ;;  %v200_v47 = vld [vmem:[%s3649_s1 + $0x5b8] sm:$0xff] }
  0x5a   :  { %869 = vmatpush1.msra.mxu0 %v165_v48  ;;  %940 = vmatpush1.msra.mxu1 %v167_v49  ;;  %v197_v48 = vld [vmem:[%s3649_s1 + $0x5a0] sm:$0xff]  ;;  %v199_v49 = vld [vmem:[%s3649_s1 + $0x5b0] sm:$0xff] }
  0x5b   :  { %870 = vmatprep.subr.mxu0 %v138_v50  ;;  %941 = vmatprep.subr.mxu1 %v140_v51  ;;  %v170_v50 = vld [vmem:[%s3649_s1 + $0x4c8] sm:$0xff]  ;;  %v172_v51 = vld [vmem:[%s3649_s1 + $0x4d8] sm:$0xff] }
  0x5c   :  { %871 = vmatpush1.msra.mxu0 %v137_v52  ;;  %942 = vmatpush1.msra.mxu1 %v139_v53  ;;  %v169_v52 = vld [vmem:[%s3649_s1 + $0x4c0] sm:$0xff]  ;;  %v171_v53 = vld [vmem:[%s3649_s1 + $0x4d0] sm:$0xff] }
  0x5d   :  { %872 = vmatprep.subr.mxu0 %v110_v54  ;;  %943 = vmatprep.subr.mxu1 %v112_v55  ;;  %v142_v54 = vld [vmem:[%s3649_s1 + $0x3e8] sm:$0xff]  ;;  %v144_v55 = vld [vmem:[%s3649_s1 + $0x3f8] sm:$0xff] }
  0x5e   :  { %873 = vmatpush1.msra.mxu0 %v109_v56  ;;  %944 = vmatpush1.msra.mxu1 %v111_v57  ;;  %v141_v56 = vld [vmem:[%s3649_s1 + $0x3e0] sm:$0xff]  ;;  %v143_v57 = vld [vmem:[%s3649_s1 + $0x3f0] sm:$0xff] }
  0x5f   :  { %874 = vmatprep.subr.mxu0 %v82_v58  ;;  %945 = vmatprep.subr.mxu1 %v84_v59  ;;  %v114_v58 = vld [vmem:[%s3649_s1 + $0x308] sm:$0xff]  ;;  %v116_v59 = vld [vmem:[%s3649_s1 + $0x318] sm:$0xff] }
  0x60   :  { %875 = vmatpush1.msra.mxu0 %v81_v60  ;;  %946 = vmatpush1.msra.mxu1 %v83_v61  ;;  %v113_v60 = vld [vmem:[%s3649_s1 + $0x300] sm:$0xff]  ;;  %v115_v61 = vld [vmem:[%s3649_s1 + $0x310] sm:$0xff] }
  0x61   :  { %876 = vmatprep.subr.mxu0 %v54_v62  ;;  %947 = vmatprep.subr.mxu1 %v56_v63  ;;  %v86_v62 = vld [vmem:[%s3649_s1 + $0x228] sm:$0xff]  ;;  %v88_v63 = vld [vmem:[%s3649_s1 + $0x238] sm:$0xff] }
  0x62   :  { %877 = vmatpush1.msra.mxu0 %v53_v0  ;;  %948 = vmatpush1.msra.mxu1 %v55_v1  ;;  %v85_v0 = vld [vmem:[%s3649_s1 + $0x220] sm:$0xff]  ;;  %v87_v1 = vld [vmem:[%s3649_s1 + $0x230] sm:$0xff] }
  0x63   :  { %878 = vmatprep.subr.mxu0 %v26_v4  ;;  %949 = vmatprep.subr.mxu1 %v28_v5  ;;  %v58_v4 = vld [vmem:[%s3649_s1 + $0x148] sm:$0xff]  ;;  %v60_v5 = vld [vmem:[%s3649_s1 + $0x158] sm:$0xff] }
  0x64   :  { %879 = vmatpush1.msra.mxu0 %v25_v6  ;;  %912 = vmatprep.mubr.f32.mxu0 %v2128_v3  ;;  %v57_v6 = vld [vmem:[%s3649_s1 + $0x140] sm:$0xff] }
  0x65   :  { %950 = vmatpush1.msra.mxu1 %v27_v7  ;;  %983 = vmatprep.mubr.f32.mxu1 %v2128_v3  ;;  %v59_v7 = vld [vmem:[%s3649_s1 + $0x150] sm:$0xff] }
  0x66   :  { %1955 = vmatmul.mubr.msk.f32.vlgmr.msra.gmra.mxu0 %vm475_vm1, %v2355_v2  ;;  %1958 = vmatmul.mubr.msk.f32.vlgmr.msra.gmra.mxu1 %vm475_vm1, %v2355_v2 }
  0x67   :  { %1959 = vmatprep.subr.msk.mxu0 %vm479_vm0, %v450_v8  ;;  %1962 = vmatprep.subr.msk.mxu1 %vm479_vm0, %v452_v9  ;;  %v30_v8 = vld [vmem:[%s3649_s1 + $0x68] sm:$0xff]  ;;  %v32_v9 = vld [vmem:[%s3649_s1 + $0x78] sm:$0xff] }
  0x68   :  { %1960 = vmatpush1.msk.msra.mxu0 %vm479_vm0, %v449_v10  ;;  %1963 = vmatpush1.msk.msra.mxu1 %vm479_vm0, %v451_v11  ;;  %v29_v10 = vld [vmem:[%s3649_s1 + $0x60] sm:$0xff]  ;;  %v31_v11 = vld [vmem:[%s3649_s1 + $0x70] sm:$0xff] }
  0x69   :  { %992 = vmatprep.subr.mxu0 %v422_v12  ;;  %1063 = vmatprep.subr.mxu1 %v424_v13  ;;  %v454_v12 = vld [vmem:[%s3649_s1 + $0xda8] sm:$0x1f]  ;;  %v456_v13 = vld [vmem:[%s3649_s1 + $0xdb8] sm:$0x1f] }
  0x6a   :  { %2014 = vset.pattern.permute.xlu0 %v2129_v19  ;;  %993 = vmatpush1.msra.mxu0 %v421_v14  ;;  %v453_v14 = vld [vmem:[%s3649_s1 + $0xda0] sm:$0x1f]  ;;  %v398_v19 = vld [vmem:[%s3649_s1 + $0xbe8] sm:$0xff] }
  0x6b   :  { %1064 = vmatpush1.msra.mxu1 %v423_v15  ;;  %468 = vperm.xlu0 %2014, %v465_v16   ;;  %v455_v15 = vld [vmem:[%s3649_s1 + $0xdb0] sm:$0x1f]  ;;  %v426_v16 = vld [vmem:[%s3649_s1 + $0xcc8] sm:$0xff] }
  0x6c   :  { %994 = vmatprep.subr.mxu0 %v394_v17  ;;  %1065 = vmatprep.subr.mxu1 %v396_v18  ;;  %v428_v17 = vld [vmem:[%s3649_s1 + $0xcd8] sm:$0xff]  ;;  %v425_v18 = vld [vmem:[%s3649_s1 + $0xcc0] sm:$0xff] }
  0x6d   :  { %995 = vmatpush1.msra.mxu0 %v393_v20  ;;  %1066 = vmatpush1.msra.mxu1 %v395_v21  ;;  %v400_v20 = vld [vmem:[%s3649_s1 + $0xbf8] sm:$0xff]  ;;  %v397_v21 = vld [vmem:[%s3649_s1 + $0xbe0] sm:$0xff] }
  0x6e   :  { %996 = vmatprep.subr.mxu0 %v366_v22  ;;  %1067 = vmatprep.subr.mxu1 %v368_v23  ;;  %v399_v22 = vld [vmem:[%s3649_s1 + $0xbf0] sm:$0xff]  ;;  %v370_v23 = vld [vmem:[%s3649_s1 + $0xb08] sm:$0xff] }
  0x6f   :  { %997 = vmatpush1.msra.mxu0 %v365_v24  ;;  %1068 = vmatpush1.msra.mxu1 %v367_v25  ;;  %v372_v24 = vld [vmem:[%s3649_s1 + $0xb18] sm:$0xff]  ;;  %v369_v25 = vld [vmem:[%s3649_s1 + $0xb00] sm:$0xff] }
  0x70   :  { %998 = vmatprep.subr.mxu0 %v338_v26  ;;  %1069 = vmatprep.subr.mxu1 %v340_v27  ;;  %v371_v26 = vld [vmem:[%s3649_s1 + $0xb10] sm:$0xff]  ;;  %v342_v27 = vld [vmem:[%s3649_s1 + $0xa28] sm:$0xff] }
  0x71   :  { %999 = vmatpush1.msra.mxu0 %v337_v28  ;;  %1070 = vmatpush1.msra.mxu1 %v339_v29  ;;  %v344_v28 = vld [vmem:[%s3649_s1 + $0xa38] sm:$0xff]  ;;  %v341_v29 = vld [vmem:[%s3649_s1 + $0xa20] sm:$0xff] }
  0x72   :  { %1000 = vmatprep.subr.mxu0 %v310_v30  ;;  %1071 = vmatprep.subr.mxu1 %v312_v31  ;;  %v343_v30 = vld [vmem:[%s3649_s1 + $0xa30] sm:$0xff]  ;;  %v314_v31 = vld [vmem:[%s3649_s1 + $0x948] sm:$0xff] }
  0x73   :  { %1001 = vmatpush1.msra.mxu0 %v309_v32  ;;  %1072 = vmatpush1.msra.mxu1 %v311_v33  ;;  %v316_v32 = vld [vmem:[%s3649_s1 + $0x958] sm:$0xff]  ;;  %v313_v33 = vld [vmem:[%s3649_s1 + $0x940] sm:$0xff] }
  0x74   :  { %1002 = vmatprep.subr.mxu0 %v282_v34  ;;  %1073 = vmatprep.subr.mxu1 %v284_v35  ;;  %v315_v34 = vld [vmem:[%s3649_s1 + $0x950] sm:$0xff]  ;;  %v286_v35 = vld [vmem:[%s3649_s1 + $0x868] sm:$0xff] }
  0x75   :  { %1003 = vmatpush1.msra.mxu0 %v281_v36  ;;  %1074 = vmatpush1.msra.mxu1 %v283_v37  ;;  %v288_v36 = vld [vmem:[%s3649_s1 + $0x878] sm:$0xff]  ;;  %v285_v37 = vld [vmem:[%s3649_s1 + $0x860] sm:$0xff] }
  0x76   :  { %1004 = vmatprep.subr.mxu0 %v254_v38  ;;  %1075 = vmatprep.subr.mxu1 %v256_v39  ;;  %v287_v38 = vld [vmem:[%s3649_s1 + $0x870] sm:$0xff]  ;;  %v258_v39 = vld [vmem:[%s3649_s1 + $0x788] sm:$0xff] }
  0x77   :  { %1005 = vmatpush1.msra.mxu0 %v253_v40  ;;  %1076 = vmatpush1.msra.mxu1 %v255_v41  ;;  %v260_v40 = vld [vmem:[%s3649_s1 + $0x798] sm:$0xff]  ;;  %v257_v41 = vld [vmem:[%s3649_s1 + $0x780] sm:$0xff] }
  0x78   :  { %1006 = vmatprep.subr.mxu0 %v226_v42  ;;  %1077 = vmatprep.subr.mxu1 %v228_v43  ;;  %v259_v42 = vld [vmem:[%s3649_s1 + $0x790] sm:$0xff]  ;;  %v230_v43 = vld [vmem:[%s3649_s1 + $0x6a8] sm:$0xff] }
  0x79   :  { %1007 = vmatpush1.msra.mxu0 %v225_v44  ;;  %1078 = vmatpush1.msra.mxu1 %v227_v45  ;;  %v232_v44 = vld [vmem:[%s3649_s1 + $0x6b8] sm:$0xff]  ;;  %v229_v45 = vld [vmem:[%s3649_s1 + $0x6a0] sm:$0xff] }
  0x7a   :  { %1008 = vmatprep.subr.mxu0 %v198_v46  ;;  %1079 = vmatprep.subr.mxu1 %v200_v47  ;;  %v231_v46 = vld [vmem:[%s3649_s1 + $0x6b0] sm:$0xff]  ;;  %v202_v47 = vld [vmem:[%s3649_s1 + $0x5c8] sm:$0xff] }
  0x7b   :  { %1009 = vmatpush1.msra.mxu0 %v197_v48  ;;  %1080 = vmatpush1.msra.mxu1 %v199_v49  ;;  %v204_v48 = vld [vmem:[%s3649_s1 + $0x5d8] sm:$0xff]  ;;  %v201_v49 = vld [vmem:[%s3649_s1 + $0x5c0] sm:$0xff] }
  0x7c   :  { %1010 = vmatprep.subr.mxu0 %v170_v50  ;;  %1081 = vmatprep.subr.mxu1 %v172_v51  ;;  %v203_v50 = vld [vmem:[%s3649_s1 + $0x5d0] sm:$0xff]  ;;  %v174_v51 = vld [vmem:[%s3649_s1 + $0x4e8] sm:$0xff] }
  0x7d   :  { %1011 = vmatpush1.msra.mxu0 %v169_v52  ;;  %1082 = vmatpush1.msra.mxu1 %v171_v53  ;;  %v176_v52 = vld [vmem:[%s3649_s1 + $0x4f8] sm:$0xff]  ;;  %v173_v53 = vld [vmem:[%s3649_s1 + $0x4e0] sm:$0xff] }
  0x7e   :  { %1012 = vmatprep.subr.mxu0 %v142_v54  ;;  %1083 = vmatprep.subr.mxu1 %v144_v55  ;;  %v175_v54 = vld [vmem:[%s3649_s1 + $0x4f0] sm:$0xff]  ;;  %v146_v55 = vld [vmem:[%s3649_s1 + $0x408] sm:$0xff] }
  0x7f   :  { %1013 = vmatpush1.msra.mxu0 %v141_v56  ;;  %1084 = vmatpush1.msra.mxu1 %v143_v57  ;;  %v148_v56 = vld [vmem:[%s3649_s1 + $0x418] sm:$0xff]  ;;  %v145_v57 = vld [vmem:[%s3649_s1 + $0x400] sm:$0xff] }
  0x80   :  { %1014 = vmatprep.subr.mxu0 %v114_v58  ;;  %1085 = vmatprep.subr.mxu1 %v116_v59  ;;  %v147_v58 = vld [vmem:[%s3649_s1 + $0x410] sm:$0xff]  ;;  %v118_v59 = vld [vmem:[%s3649_s1 + $0x328] sm:$0xff] }
  0x81   :  { %1015 = vmatpush1.msra.mxu0 %v113_v60  ;;  %1086 = vmatpush1.msra.mxu1 %v115_v61  ;;  %v120_v60 = vld [vmem:[%s3649_s1 + $0x338] sm:$0xff]  ;;  %v117_v61 = vld [vmem:[%s3649_s1 + $0x320] sm:$0xff] }
  0x82   :  { %1016 = vmatprep.subr.mxu0 %v86_v62  ;;  %1087 = vmatprep.subr.mxu1 %v88_v63  ;;  %v119_v62 = vld [vmem:[%s3649_s1 + $0x330] sm:$0xff]  ;;  %v90_v63 = vld [vmem:[%s3649_s1 + $0x248] sm:$0xff] }
  0x83   :  { %1017 = vmatpush1.msra.mxu0 %v85_v0  ;;  %1088 = vmatpush1.msra.mxu1 %v87_v1  ;;  %v92_v0 = vld [vmem:[%s3649_s1 + $0x258] sm:$0xff]  ;;  %v89_v1 = vld [vmem:[%s3649_s1 + $0x240] sm:$0xff] }
  0x84   :  { %1018 = vmatprep.subr.mxu0 %v58_v4  ;;  %1089 = vmatprep.subr.mxu1 %v60_v5  ;;  %v91_v4 = vld [vmem:[%s3649_s1 + $0x250] sm:$0xff]  ;;  %v62_v5 = vld [vmem:[%s3649_s1 + $0x168] sm:$0xff] }
  0x85   :  { %1019 = vmatpush1.msra.mxu0 %v57_v6  ;;  %1090 = vmatpush1.msra.mxu1 %v59_v7  ;;  %v64_v6 = vld [vmem:[%s3649_s1 + $0x178] sm:$0xff]  ;;  %v61_v7 = vld [vmem:[%s3649_s1 + $0x160] sm:$0xff] }
  0x86   :  { %1020 = vmatprep.subr.mxu0 %v30_v8  ;;  %1091 = vmatprep.subr.mxu1 %v32_v9  ;;  %v63_v8 = vld [vmem:[%s3649_s1 + $0x170] sm:$0xff]  ;;  %v34_v9 = vld [vmem:[%s3649_s1 + $0x88] sm:$0xff] }
  0x87   :  { %1021 = vmatpush1.msra.mxu0 %v29_v10  ;;  %1054 = vmatprep.mubr.f32.mxu0 %v2128_v3  ;;  %v36_v10 = vld [vmem:[%s3649_s1 + $0x98] sm:$0xff] }
  0x88   :  { %1092 = vmatpush1.msra.mxu1 %v31_v11  ;;  %1125 = vmatprep.mubr.f32.mxu1 %v2128_v3  ;;  %v33_v11 = vld [vmem:[%s3649_s1 + $0x80] sm:$0xff] }
  0x89   :  { %1961 = vmatmul.mubr.msk.f32.vlgmr.msra.gmra.mxu0 %vm475_vm1, %v2355_v2  ;;  %1964 = vmatmul.mubr.msk.f32.vlgmr.msra.gmra.mxu1 %vm475_vm1, %v2355_v2  ;;  %v427_v2 = vld [vmem:[%s3649_s1 + $0xcd0] sm:$0xff] }
  0x8a   :  { %1965 = vmatprep.subr.msk.mxu0 %vm479_vm0, %v454_v12  ;;  %1968 = vmatprep.subr.msk.mxu1 %vm479_vm0, %v456_v13  ;;  %v35_v12 = vld [vmem:[%s3649_s1 + $0x90] sm:$0xff]  ;;  %v458_v13 = vld [vmem:[%s3649_s1 + $0xdc8] sm:$0x1f] }
  0x8b   :  { %1966 = vmatpush1.msk.msra.mxu0 %vm479_vm0, %v453_v14  ;;  %1969 = vmatpush1.msk.msra.mxu1 %vm479_vm0, %v455_v15  ;;  %v460_v14 = vld [vmem:[%s3649_s1 + $0xdd8] sm:$0x1f]  ;;  %v457_v15 = vld [vmem:[%s3649_s1 + $0xdc0] sm:$0x1f] }
  0x8c   :  { %1134 = vmatprep.subr.mxu0 %v426_v16  ;;  %1205 = vmatprep.subr.mxu1 %v428_v17  ;;  %v459_v16 = vld [vmem:[%s3649_s1 + $0xdd0] sm:$0x1f]  ;;  %v3180_v17 = vld [vmem:[%s3651_s0] sm:$0x1] }
  0x8d   :  { %1135 = vmatpush1.msra.mxu0 %v425_v18  ;;  %1206 = vmatpush1.msra.mxu1 %v427_v2  ;;  %v430_v18 = vld [vmem:[%s3649_s1 + $0xce8] sm:$0xff]  ;;  %v432_v2 = vld [vmem:[%s3649_s1 + $0xcf8] sm:$0xff] }
  0x8e   :  { %1136 = vmatprep.subr.mxu0 %v398_v19  ;;  %1207 = vmatprep.subr.mxu1 %v400_v20  ;;  %v429_v19 = vld [vmem:[%s3649_s1 + $0xce0] sm:$0xff]  ;;  %v431_v20 = vld [vmem:[%s3649_s1 + $0xcf0] sm:$0xff] }
  0x8f   :  { %1137 = vmatpush1.msra.mxu0 %v397_v21  ;;  %1208 = vmatpush1.msra.mxu1 %v399_v22  ;;  %v402_v21 = vld [vmem:[%s3649_s1 + $0xc08] sm:$0xff]  ;;  %v404_v22 = vld [vmem:[%s3649_s1 + $0xc18] sm:$0xff] }
  0x90   :  { %1138 = vmatprep.subr.mxu0 %v370_v23  ;;  %1209 = vmatprep.subr.mxu1 %v372_v24  ;;  %v401_v23 = vld [vmem:[%s3649_s1 + $0xc00] sm:$0xff]  ;;  %v403_v24 = vld [vmem:[%s3649_s1 + $0xc10] sm:$0xff] }
  0x91   :  { %1139 = vmatpush1.msra.mxu0 %v369_v25  ;;  %1210 = vmatpush1.msra.mxu1 %v371_v26  ;;  %v374_v25 = vld [vmem:[%s3649_s1 + $0xb28] sm:$0xff]  ;;  %v376_v26 = vld [vmem:[%s3649_s1 + $0xb38] sm:$0xff] }
  0x92   :  { %1140 = vmatprep.subr.mxu0 %v342_v27  ;;  %1211 = vmatprep.subr.mxu1 %v344_v28  ;;  %v373_v27 = vld [vmem:[%s3649_s1 + $0xb20] sm:$0xff]  ;;  %v375_v28 = vld [vmem:[%s3649_s1 + $0xb30] sm:$0xff] }
  0x93   :  { %1141 = vmatpush1.msra.mxu0 %v341_v29  ;;  %1212 = vmatpush1.msra.mxu1 %v343_v30  ;;  %v346_v29 = vld [vmem:[%s3649_s1 + $0xa48] sm:$0xff]  ;;  %v348_v30 = vld [vmem:[%s3649_s1 + $0xa58] sm:$0xff] }
  0x94   :  { %1142 = vmatprep.subr.mxu0 %v314_v31  ;;  %1213 = vmatprep.subr.mxu1 %v316_v32  ;;  %v345_v31 = vld [vmem:[%s3649_s1 + $0xa40] sm:$0xff]  ;;  %v347_v32 = vld [vmem:[%s3649_s1 + $0xa50] sm:$0xff] }
  0x95   :  { %1143 = vmatpush1.msra.mxu0 %v313_v33  ;;  %1214 = vmatpush1.msra.mxu1 %v315_v34  ;;  %v318_v33 = vld [vmem:[%s3649_s1 + $0x968] sm:$0xff]  ;;  %v320_v34 = vld [vmem:[%s3649_s1 + $0x978] sm:$0xff] }
  0x96   :  { %1144 = vmatprep.subr.mxu0 %v286_v35  ;;  %1215 = vmatprep.subr.mxu1 %v288_v36  ;;  %v317_v35 = vld [vmem:[%s3649_s1 + $0x960] sm:$0xff]  ;;  %v319_v36 = vld [vmem:[%s3649_s1 + $0x970] sm:$0xff] }
  0x97   :  { %1145 = vmatpush1.msra.mxu0 %v285_v37  ;;  %1216 = vmatpush1.msra.mxu1 %v287_v38  ;;  %v290_v37 = vld [vmem:[%s3649_s1 + $0x888] sm:$0xff]  ;;  %v292_v38 = vld [vmem:[%s3649_s1 + $0x898] sm:$0xff] }
  0x98   :  { %1146 = vmatprep.subr.mxu0 %v258_v39  ;;  %1217 = vmatprep.subr.mxu1 %v260_v40  ;;  %v289_v39 = vld [vmem:[%s3649_s1 + $0x880] sm:$0xff]  ;;  %v291_v40 = vld [vmem:[%s3649_s1 + $0x890] sm:$0xff] }
  0x99   :  { %1147 = vmatpush1.msra.mxu0 %v257_v41  ;;  %1218 = vmatpush1.msra.mxu1 %v259_v42  ;;  %v262_v41 = vld [vmem:[%s3649_s1 + $0x7a8] sm:$0xff]  ;;  %v264_v42 = vld [vmem:[%s3649_s1 + $0x7b8] sm:$0xff] }
  0x9a   :  { %1148 = vmatprep.subr.mxu0 %v230_v43  ;;  %1219 = vmatprep.subr.mxu1 %v232_v44  ;;  %v261_v43 = vld [vmem:[%s3649_s1 + $0x7a0] sm:$0xff]  ;;  %v263_v44 = vld [vmem:[%s3649_s1 + $0x7b0] sm:$0xff] }
  0x9b   :  { %1149 = vmatpush1.msra.mxu0 %v229_v45  ;;  %1220 = vmatpush1.msra.mxu1 %v231_v46  ;;  %v234_v45 = vld [vmem:[%s3649_s1 + $0x6c8] sm:$0xff]  ;;  %v236_v46 = vld [vmem:[%s3649_s1 + $0x6d8] sm:$0xff] }
  0x9c   :  { %1150 = vmatprep.subr.mxu0 %v202_v47  ;;  %1221 = vmatprep.subr.mxu1 %v204_v48  ;;  %v233_v47 = vld [vmem:[%s3649_s1 + $0x6c0] sm:$0xff]  ;;  %v235_v48 = vld [vmem:[%s3649_s1 + $0x6d0] sm:$0xff] }
  0x9d   :  { %1151 = vmatpush1.msra.mxu0 %v201_v49  ;;  %1222 = vmatpush1.msra.mxu1 %v203_v50  ;;  %v206_v49 = vld [vmem:[%s3649_s1 + $0x5e8] sm:$0xff]  ;;  %v208_v50 = vld [vmem:[%s3649_s1 + $0x5f8] sm:$0xff] }
  0x9e   :  { %1152 = vmatprep.subr.mxu0 %v174_v51  ;;  %1223 = vmatprep.subr.mxu1 %v176_v52  ;;  %v205_v51 = vld [vmem:[%s3649_s1 + $0x5e0] sm:$0xff]  ;;  %v207_v52 = vld [vmem:[%s3649_s1 + $0x5f0] sm:$0xff] }
  0x9f   :  { %1153 = vmatpush1.msra.mxu0 %v173_v53  ;;  %1224 = vmatpush1.msra.mxu1 %v175_v54  ;;  %v178_v53 = vld [vmem:[%s3649_s1 + $0x508] sm:$0xff]  ;;  %v180_v54 = vld [vmem:[%s3649_s1 + $0x518] sm:$0xff] }
  0xa0   :  { %1154 = vmatprep.subr.mxu0 %v146_v55  ;;  %1225 = vmatprep.subr.mxu1 %v148_v56  ;;  %v177_v55 = vld [vmem:[%s3649_s1 + $0x500] sm:$0xff]  ;;  %v179_v56 = vld [vmem:[%s3649_s1 + $0x510] sm:$0xff] }
  0xa1   :  { %1155 = vmatpush1.msra.mxu0 %v145_v57  ;;  %1226 = vmatpush1.msra.mxu1 %v147_v58  ;;  %v150_v57 = vld [vmem:[%s3649_s1 + $0x428] sm:$0xff]  ;;  %v152_v58 = vld [vmem:[%s3649_s1 + $0x438] sm:$0xff] }
  0xa2   :  { %1156 = vmatprep.subr.mxu0 %v118_v59  ;;  %1227 = vmatprep.subr.mxu1 %v120_v60  ;;  %v149_v59 = vld [vmem:[%s3649_s1 + $0x420] sm:$0xff]  ;;  %v151_v60 = vld [vmem:[%s3649_s1 + $0x430] sm:$0xff] }
  0xa3   :  { %1157 = vmatpush1.msra.mxu0 %v117_v61  ;;  %1228 = vmatpush1.msra.mxu1 %v119_v62  ;;  %v122_v61 = vld [vmem:[%s3649_s1 + $0x348] sm:$0xff]  ;;  %v124_v62 = vld [vmem:[%s3649_s1 + $0x358] sm:$0xff] }
  0xa4   :  { %1158 = vmatprep.subr.mxu0 %v90_v63  ;;  %1229 = vmatprep.subr.mxu1 %v92_v0  ;;  %v121_v63 = vld [vmem:[%s3649_s1 + $0x340] sm:$0xff]  ;;  %v123_v0 = vld [vmem:[%s3649_s1 + $0x350] sm:$0xff] }
  0xa5   :  { %1159 = vmatpush1.msra.mxu0 %v89_v1  ;;  %1230 = vmatpush1.msra.mxu1 %v91_v4  ;;  %v94_v1 = vld [vmem:[%s3649_s1 + $0x268] sm:$0xff]  ;;  %v96_v4 = vld [vmem:[%s3649_s1 + $0x278] sm:$0xff] }
  0xa6   :  { %1160 = vmatprep.subr.mxu0 %v62_v5  ;;  %1231 = vmatprep.subr.mxu1 %v64_v6  ;;  %v93_v5 = vld [vmem:[%s3649_s1 + $0x260] sm:$0xff]  ;;  %v95_v6 = vld [vmem:[%s3649_s1 + $0x270] sm:$0xff] }
  0xa7   :  { %1161 = vmatpush1.msra.mxu0 %v61_v7  ;;  %1232 = vmatpush1.msra.mxu1 %v63_v8  ;;  %v66_v7 = vld [vmem:[%s3649_s1 + $0x188] sm:$0xff]  ;;  %v68_v8 = vld [vmem:[%s3649_s1 + $0x198] sm:$0xff] }
  0xa8   :  { %1162 = vmatprep.subr.mxu0 %v34_v9  ;;  %1233 = vmatprep.subr.mxu1 %v36_v10  ;;  %v65_v9 = vld [vmem:[%s3649_s1 + $0x180] sm:$0xff]  ;;  %v67_v10 = vld [vmem:[%s3649_s1 + $0x190] sm:$0xff] }
  0xa9   :  { %1163 = vmatpush1.msra.mxu0 %v33_v11  ;;  %1196 = vmatprep.mubr.f32.mxu0 %v2128_v3  ;;  %v38_v11 = vld [vmem:[%s3649_s1 + $0xa8] sm:$0xff] }
  0xaa   :  { %1234 = vmatpush1.msra.mxu1 %v35_v12  ;;  %1267 = vmatprep.mubr.f32.mxu1 %v2128_v3  ;;  %v40_v12 = vld [vmem:[%s3649_s1 + $0xb8] sm:$0xff] }
  0xab   :  { %1967 = vmatmul.mubr.msk.f32.vlgmr.msra.gmra.mxu0 %vm475_vm1, %v3180_v17  ;;  %1970 = vmatmul.mubr.msk.f32.vlgmr.msra.gmra.mxu1 %vm475_vm1, %v3180_v17 }
  0xac   :  { %1971 = vmatprep.subr.msk.mxu0 %vm479_vm0, %v458_v13  ;;  %1974 = vmatprep.subr.msk.mxu1 %vm479_vm0, %v460_v14  ;;  %v37_v13 = vld [vmem:[%s3649_s1 + $0xa0] sm:$0xff]  ;;  %v39_v14 = vld [vmem:[%s3649_s1 + $0xb0] sm:$0xff] }
  0xad   :  { %1972 = vmatpush1.msk.msra.mxu0 %vm479_vm0, %v457_v15  ;;  %1975 = vmatpush1.msk.msra.mxu1 %vm479_vm0, %v459_v16  ;;  %v462_v15 = vld [vmem:[%s3649_s1 + $0xde8] sm:$0x1f]  ;;  %v464_v16 = vld [vmem:[%s3649_s1 + $0xdf8] sm:$0x1f] }
  0xae   :  { %1276 = vmatprep.subr.mxu0 %v430_v18  ;;  %1347 = vmatprep.subr.mxu1 %v432_v2  ;;  %v461_v18 = vld [vmem:[%s3649_s1 + $0xde0] sm:$0x1f]  ;;  %v463_v2 = vld [vmem:[%s3649_s1 + $0xdf0] sm:$0x1f] }
  0xaf   :  { %1277 = vmatpush1.msra.mxu0 %v429_v19  ;;  %1348 = vmatpush1.msra.mxu1 %v431_v20  ;;  %v434_v19 = vld [vmem:[%s3649_s1 + $0xd08] sm:$0xff]  ;;  %v436_v20 = vld [vmem:[%s3649_s1 + $0xd18] sm:$0xff] }
  0xb0   :  { %1278 = vmatprep.subr.mxu0 %v402_v21  ;;  %1349 = vmatprep.subr.mxu1 %v404_v22  ;;  %v433_v21 = vld [vmem:[%s3649_s1 + $0xd00] sm:$0xff]  ;;  %v435_v22 = vld [vmem:[%s3649_s1 + $0xd10] sm:$0xff] }
  0xb1   :  { %1279 = vmatpush1.msra.mxu0 %v401_v23  ;;  %1350 = vmatpush1.msra.mxu1 %v403_v24  ;;  %v406_v23 = vld [vmem:[%s3649_s1 + $0xc28] sm:$0xff]  ;;  %v408_v24 = vld [vmem:[%s3649_s1 + $0xc38] sm:$0xff] }
  0xb2   :  { %1280 = vmatprep.subr.mxu0 %v374_v25  ;;  %1351 = vmatprep.subr.mxu1 %v376_v26  ;;  %v405_v25 = vld [vmem:[%s3649_s1 + $0xc20] sm:$0xff]  ;;  %v407_v26 = vld [vmem:[%s3649_s1 + $0xc30] sm:$0xff] }
  0xb3   :  { %1281 = vmatpush1.msra.mxu0 %v373_v27  ;;  %1352 = vmatpush1.msra.mxu1 %v375_v28  ;;  %v378_v27 = vld [vmem:[%s3649_s1 + $0xb48] sm:$0xff]  ;;  %v380_v28 = vld [vmem:[%s3649_s1 + $0xb58] sm:$0xff] }
  0xb4   :  { %1282 = vmatprep.subr.mxu0 %v346_v29  ;;  %1353 = vmatprep.subr.mxu1 %v348_v30  ;;  %v377_v29 = vld [vmem:[%s3649_s1 + $0xb40] sm:$0xff]  ;;  %v379_v30 = vld [vmem:[%s3649_s1 + $0xb50] sm:$0xff] }
  0xb5   :  { %1283 = vmatpush1.msra.mxu0 %v345_v31  ;;  %1354 = vmatpush1.msra.mxu1 %v347_v32  ;;  %v350_v31 = vld [vmem:[%s3649_s1 + $0xa68] sm:$0xff]  ;;  %v352_v32 = vld [vmem:[%s3649_s1 + $0xa78] sm:$0xff] }
  0xb6   :  { %1284 = vmatprep.subr.mxu0 %v318_v33  ;;  %1355 = vmatprep.subr.mxu1 %v320_v34  ;;  %v349_v33 = vld [vmem:[%s3649_s1 + $0xa60] sm:$0xff]  ;;  %v351_v34 = vld [vmem:[%s3649_s1 + $0xa70] sm:$0xff] }
  0xb7   :  { %1285 = vmatpush1.msra.mxu0 %v317_v35  ;;  %1356 = vmatpush1.msra.mxu1 %v319_v36  ;;  %v322_v35 = vld [vmem:[%s3649_s1 + $0x988] sm:$0xff]  ;;  %v324_v36 = vld [vmem:[%s3649_s1 + $0x998] sm:$0xff] }
  0xb8   :  { %1286 = vmatprep.subr.mxu0 %v290_v37  ;;  %1357 = vmatprep.subr.mxu1 %v292_v38  ;;  %v321_v37 = vld [vmem:[%s3649_s1 + $0x980] sm:$0xff]  ;;  %v323_v38 = vld [vmem:[%s3649_s1 + $0x990] sm:$0xff] }
  0xb9   :  { %1287 = vmatpush1.msra.mxu0 %v289_v39  ;;  %1358 = vmatpush1.msra.mxu1 %v291_v40  ;;  %v294_v39 = vld [vmem:[%s3649_s1 + $0x8a8] sm:$0xff]  ;;  %v296_v40 = vld [vmem:[%s3649_s1 + $0x8b8] sm:$0xff] }
  0xba   :  { %1288 = vmatprep.subr.mxu0 %v262_v41  ;;  %1359 = vmatprep.subr.mxu1 %v264_v42  ;;  %v293_v41 = vld [vmem:[%s3649_s1 + $0x8a0] sm:$0xff]  ;;  %v295_v42 = vld [vmem:[%s3649_s1 + $0x8b0] sm:$0xff] }
  0xbb   :  { %1289 = vmatpush1.msra.mxu0 %v261_v43  ;;  %1360 = vmatpush1.msra.mxu1 %v263_v44  ;;  %v266_v43 = vld [vmem:[%s3649_s1 + $0x7c8] sm:$0xff]  ;;  %v268_v44 = vld [vmem:[%s3649_s1 + $0x7d8] sm:$0xff] }
  0xbc   :  { %1290 = vmatprep.subr.mxu0 %v234_v45  ;;  %1361 = vmatprep.subr.mxu1 %v236_v46  ;;  %v265_v45 = vld [vmem:[%s3649_s1 + $0x7c0] sm:$0xff]  ;;  %v267_v46 = vld [vmem:[%s3649_s1 + $0x7d0] sm:$0xff] }
  0xbd   :  { %1291 = vmatpush1.msra.mxu0 %v233_v47  ;;  %1362 = vmatpush1.msra.mxu1 %v235_v48  ;;  %v238_v47 = vld [vmem:[%s3649_s1 + $0x6e8] sm:$0xff]  ;;  %v240_v48 = vld [vmem:[%s3649_s1 + $0x6f8] sm:$0xff] }
  0xbe   :  { %1292 = vmatprep.subr.mxu0 %v206_v49  ;;  %1363 = vmatprep.subr.mxu1 %v208_v50  ;;  %v237_v49 = vld [vmem:[%s3649_s1 + $0x6e0] sm:$0xff]  ;;  %v239_v50 = vld [vmem:[%s3649_s1 + $0x6f0] sm:$0xff] }
  0xbf   :  { %1293 = vmatpush1.msra.mxu0 %v205_v51  ;;  %1364 = vmatpush1.msra.mxu1 %v207_v52  ;;  %v210_v51 = vld [vmem:[%s3649_s1 + $0x608] sm:$0xff]  ;;  %v212_v52 = vld [vmem:[%s3649_s1 + $0x618] sm:$0xff] }
  0xc0   :  { %1294 = vmatprep.subr.mxu0 %v178_v53  ;;  %1365 = vmatprep.subr.mxu1 %v180_v54  ;;  %v209_v53 = vld [vmem:[%s3649_s1 + $0x600] sm:$0xff]  ;;  %v211_v54 = vld [vmem:[%s3649_s1 + $0x610] sm:$0xff] }
  0xc1   :  { %1295 = vmatpush1.msra.mxu0 %v177_v55  ;;  %1366 = vmatpush1.msra.mxu1 %v179_v56  ;;  %v182_v55 = vld [vmem:[%s3649_s1 + $0x528] sm:$0xff]  ;;  %v184_v56 = vld [vmem:[%s3649_s1 + $0x538] sm:$0xff] }
  0xc2   :  { %1296 = vmatprep.subr.mxu0 %v150_v57  ;;  %1367 = vmatprep.subr.mxu1 %v152_v58  ;;  %v181_v57 = vld [vmem:[%s3649_s1 + $0x520] sm:$0xff]  ;;  %v183_v58 = vld [vmem:[%s3649_s1 + $0x530] sm:$0xff] }
  0xc3   :  { %1297 = vmatpush1.msra.mxu0 %v149_v59  ;;  %1368 = vmatpush1.msra.mxu1 %v151_v60  ;;  %v154_v59 = vld [vmem:[%s3649_s1 + $0x448] sm:$0xff]  ;;  %v156_v60 = vld [vmem:[%s3649_s1 + $0x458] sm:$0xff] }
  0xc4   :  { %1298 = vmatprep.subr.mxu0 %v122_v61  ;;  %1369 = vmatprep.subr.mxu1 %v124_v62  ;;  %v153_v61 = vld [vmem:[%s3649_s1 + $0x440] sm:$0xff]  ;;  %v155_v62 = vld [vmem:[%s3649_s1 + $0x450] sm:$0xff] }
  0xc5   :  { %1299 = vmatpush1.msra.mxu0 %v121_v63  ;;  %1370 = vmatpush1.msra.mxu1 %v123_v0  ;;  %v126_v63 = vld [vmem:[%s3649_s1 + $0x368] sm:$0xff]  ;;  %v128_v0 = vld [vmem:[%s3649_s1 + $0x378] sm:$0xff] }
  0xc6   :  { %1300 = vmatprep.subr.mxu0 %v94_v1  ;;  %1371 = vmatprep.subr.mxu1 %v96_v4  ;;  %v125_v1 = vld [vmem:[%s3649_s1 + $0x360] sm:$0xff]  ;;  %v127_v4 = vld [vmem:[%s3649_s1 + $0x370] sm:$0xff] }
  0xc7   :  { %1301 = vmatpush1.msra.mxu0 %v93_v5  ;;  %1372 = vmatpush1.msra.mxu1 %v95_v6  ;;  %v98_v5 = vld [vmem:[%s3649_s1 + $0x288] sm:$0xff]  ;;  %v100_v6 = vld [vmem:[%s3649_s1 + $0x298] sm:$0xff] }
  0xc8   :  { %1302 = vmatprep.subr.mxu0 %v66_v7  ;;  %1373 = vmatprep.subr.mxu1 %v68_v8  ;;  %v471_v7 = vlaneseq  ;;  %v97_v8 = vld [vmem:[%s3649_s1 + $0x280] sm:$0xff] }
  0xc9   :  { %1303 = vmatpush1.msra.mxu0 %v65_v9  ;;  %1374 = vmatpush1.msra.mxu1 %v67_v10  ;;  %v99_v9 = vld [vmem:[%s3649_s1 + $0x290] sm:$0xff]  ;;  %v70_v10 = vld [vmem:[%s3649_s1 + $0x1a8] sm:$0xff] }
  0xca   :  { %1304 = vmatprep.subr.mxu0 %v38_v11  ;;  %1375 = vmatprep.subr.mxu1 %v40_v12  ;;  %v72_v11 = vld [vmem:[%s3649_s1 + $0x1b8] sm:$0xff]  ;;  %v69_v12 = vld [vmem:[%s3649_s1 + $0x1a0] sm:$0xff]  ;;  %vm1934_vm2 = vcmp.lt.s32.totalorder %v471_v7, 456 }
  0xcb   :  { %1305 = vmatpush1.msra.mxu0 %v37_v13  ;;  %1338 = vmatprep.mubr.f32.mxu0 %v2128_v3  ;;  %v71_v13 = vld [vmem:[%s3649_s1 + $0x1b0] sm:$0xff] }
  0xcc   :  { %1376 = vmatpush1.msra.mxu1 %v39_v14  ;;  %1409 = vmatprep.mubr.f32.mxu1 %v2128_v3  ;;  %v42_v14 = vld [vmem:[%s3649_s1 + $0xc8] sm:$0xff] }
  0xcd   :  { %1973 = vmatmul.mubr.msk.f32.vlgmr.msra.gmra.mxu0 %vm475_vm1, %v3180_v17  ;;  %1976 = vmatmul.mubr.msk.f32.vlgmr.msra.gmra.mxu1 %vm475_vm1, %v3180_v17 }
  0xce   :  { %1977 = vmatprep.subr.msk.mxu0 %vm479_vm0, %v462_v15  ;;  %1980 = vmatprep.subr.msk.mxu1 %vm479_vm0, %v464_v16  ;;  %v44_v15 = vld [vmem:[%s3649_s1 + $0xd8] sm:$0xff]  ;;  %v3567_v16 = vshrl.u32 %v471_v7, 7 }
  0xcf   :  { %1978 = vmatpush1.msk.msra.mxu0 %vm479_vm0, %v461_v18  ;;  %1981 = vmatpush1.msk.msra.mxu1 %vm479_vm0, %v463_v2  ;;  %v41_v18 = vld [vmem:[%s3649_s1 + $0xc0] sm:$0xff]  ;;  %v43_v2 = vld [vmem:[%s3649_s1 + $0xd0] sm:$0xff] }
  0xd0   :  { %1418 = vmatprep.subr.mxu0 %v434_v19  ;;  %1489 = vmatprep.subr.mxu1 %v436_v20  ;;  %v473_v19 = vsub.s32 0, %v3567_v16 }
  0xd1   :  { %1419 = vmatpush1.msra.mxu0 %v433_v21  ;;  %1490 = vmatpush1.msra.mxu1 %v435_v22 }
  0xd2   :  { %1420 = vmatprep.subr.mxu0 %v406_v23  ;;  %1491 = vmatprep.subr.mxu1 %v408_v24 }
  0xd3   :  { %1421 = vmatpush1.msra.mxu0 %v405_v25  ;;  %1492 = vmatpush1.msra.mxu1 %v407_v26 }
  0xd4   :  { %1422 = vmatprep.subr.mxu0 %v378_v27  ;;  %1493 = vmatprep.subr.mxu1 %v380_v28 }
  0xd5   :  { %1423 = vmatpush1.msra.mxu0 %v377_v29  ;;  %1494 = vmatpush1.msra.mxu1 %v379_v30 }
  0xd6   :  { %1424 = vmatprep.subr.mxu0 %v350_v31  ;;  %1495 = vmatprep.subr.mxu1 %v352_v32 }
  0xd7   :  { %1425 = vmatpush1.msra.mxu0 %v349_v33  ;;  %1496 = vmatpush1.msra.mxu1 %v351_v34 }
  0xd8   :  { %1426 = vmatprep.subr.mxu0 %v322_v35  ;;  %1497 = vmatprep.subr.mxu1 %v324_v36 }
  0xd9   :  { %1427 = vmatpush1.msra.mxu0 %v321_v37  ;;  %1498 = vmatpush1.msra.mxu1 %v323_v38 }
  0xda   :  { %1428 = vmatprep.subr.mxu0 %v294_v39  ;;  %1499 = vmatprep.subr.mxu1 %v296_v40 }
  0xdb   :  { %1429 = vmatpush1.msra.mxu0 %v293_v41  ;;  %1500 = vmatpush1.msra.mxu1 %v295_v42 }
  0xdc   :  { %1430 = vmatprep.subr.mxu0 %v266_v43  ;;  %1501 = vmatprep.subr.mxu1 %v268_v44 }
  0xdd   :  { %1431 = vmatpush1.msra.mxu0 %v265_v45  ;;  %1502 = vmatpush1.msra.mxu1 %v267_v46 }
  0xde   :  { %1432 = vmatprep.subr.mxu0 %v238_v47  ;;  %1503 = vmatprep.subr.mxu1 %v240_v48 }
  0xdf   :  { %1433 = vmatpush1.msra.mxu0 %v237_v49  ;;  %1504 = vmatpush1.msra.mxu1 %v239_v50 }
  0xe0   :  { %1434 = vmatprep.subr.mxu0 %v210_v51  ;;  %1505 = vmatprep.subr.mxu1 %v212_v52 }
  0xe1   :  { %1435 = vmatpush1.msra.mxu0 %v209_v53  ;;  %1506 = vmatpush1.msra.mxu1 %v211_v54 }
  0xe2   :  { %1436 = vmatprep.subr.mxu0 %v182_v55  ;;  %1507 = vmatprep.subr.mxu1 %v184_v56  ;;  %v630_v21 = vpop.f32.mrf.mxu0  ;;  %v701_v23 = vpop.f32.mrf.mxu1 }
  0xe3   :  { %1437 = vmatpush1.msra.mxu0 %v181_v57  ;;  %1508 = vmatpush1.msra.mxu1 %v183_v58 }
  0xe4   :  { %1438 = vmatprep.subr.mxu0 %v154_v59  ;;  %1509 = vmatprep.subr.mxu1 %v156_v60  ;;  %v632_v24 = vpop.f32.mrf.mxu0  ;;  %v703_v26 = vpop.f32.mrf.mxu1  ;;  %v2130_v60 = vmov 1966171168  }
  0xe5   :  { %1439 = vmatpush1.msra.mxu0 %v153_v61  ;;  %1510 = vmatpush1.msra.mxu1 %v155_v62  ;;  %v1759_v61 = vunpack.c.l.s4 %v2130_v60 }
  0xe6   :  { %1440 = vmatprep.subr.mxu0 %v126_v63  ;;  %1511 = vmatprep.subr.mxu1 %v128_v0  ;;  %v469_v20 = vpop.permute.xlu0 %468 }
  0xe7   :  { %1441 = vmatpush1.msra.mxu0 %v125_v1  ;;  %1512 = vmatpush1.msra.mxu1 %v127_v4  ;;  %v3582_v22 = vrot.slane %v469_v20, %v473_v19  ;;  %v1760_v1 = vunpack.c.0.s8 %v1759_v61 }
  0xe8   :  { %1442 = vmatprep.subr.mxu0 %v98_v5  ;;  %1513 = vmatprep.subr.mxu1 %v100_v6 }
  0xe9   :  { %1443 = vmatpush1.msra.mxu0 %v97_v8  ;;  %1514 = vmatpush1.msra.mxu1 %v99_v9  ;;  %v631_v25 = vadd.f32 %v630_v21, %v3582_v22  ;;  %v702_v27 = vadd.f32 %v701_v23, %v3582_v22  ;;  %v633_v28 = vadd.f32 %v632_v24, %v3582_v22 }
  0xea   :  { %1444 = vmatprep.subr.mxu0 %v70_v10  ;;  %1515 = vmatprep.subr.mxu1 %v72_v11  ;;  %v3593_v5 = vsub.s32 %v1760_v1, %v3567_v16 }
  0xeb   :  { %1445 = vmatpush1.msra.mxu0 %v69_v12  ;;  %1516 = vmatpush1.msra.mxu1 %v71_v13  ;;  %v1983_v29 = vmul.f32 -1.442695, %v631_v25  ;;  %v1985_v30 = vmul.f32 -1.442695, %v702_v27  ;;  %v1984_v31 = vmul.f32 -1.442695, %v633_v28 }
  0xec   :  { %1446 = vmatprep.subr.mxu0 %v42_v14  ;;  %1517 = vmatprep.subr.mxu1 %v44_v15 }
  0xed   :  { %1447 = vmatpush1.msra.mxu0 %v41_v18  ;;  %1480 = vmatprep.mubr.f32.mxu0 %v2128_v3  ;;  %2015 = vpow2.f32 %v1983_v29 }
  0xee   :  { %1518 = vmatpush1.msra.mxu1 %v43_v2  ;;  %1551 = vmatprep.mubr.f32.mxu1 %v2128_v3  ;;  %v704_v3 = vadd.f32 %v703_v26, %v3582_v22  ;;  %2017 = vpow2.f32 %v1985_v30 }
  0xef   :  { %1979 = vmatmul.mubr.msk.f32.vlgmr.msra.gmra.mxu0 %vm475_vm1, %v3180_v17  ;;  %1982 = vmatmul.mubr.msk.f32.vlgmr.msra.gmra.mxu1 %vm475_vm1, %v3180_v17  ;;  %2019 = vpow2.f32 %v1984_v31 }
  0xf0   :  { %v1986_v32 = vmul.f32 -1.442695, %v704_v3 }
  0xf2   :  { %2021 = vpow2.f32 %v1986_v32 }
  0xfa   :  { %v2016_v44 = vpop.eup %2015 }
  0xfb   :  { %v2018_v45 = vpop.eup %2017  ;;  %v1642_v48 = vadd.f32 1.0, %v2016_v44 }
  0xfc   :  { %v2020_v46 = vpop.eup %2019  ;;  %v1644_v49 = vadd.f32 1.0, %v2018_v45 }
  0xfd   :  { %v1643_v50 = vadd.f32 1.0, %v2020_v46 }
  0xff   :  { %v2022_v47 = vpop.eup %2021 }
 0x100   :  { %v1645_v51 = vadd.f32 1.0, %v2022_v47 }
 0x104   :  { %v772_v17 = vpop.f32.mrf.mxu0  ;;  %v843_v33 = vpop.f32.mrf.mxu1 }
 0x105   :  { %v773_v34 = vadd.f32 %v772_v17, %v3582_v22  ;;  %v844_v35 = vadd.f32 %v843_v33, %v3582_v22 }
 0x106   :  { %v774_v36 = vpop.f32.mrf.mxu0  ;;  %v845_v37 = vpop.f32.mrf.mxu1 }
 0x107   :  { %v1987_v38 = vmul.f32 -1.442695, %v773_v34  ;;  %v1989_v39 = vmul.f32 -1.442695, %v844_v35  ;;  %v775_v40 = vadd.f32 %v774_v36, %v3582_v22  ;;  %v846_v41 = vadd.f32 %v845_v37, %v3582_v22 }
 0x109   :  { %2023 = vpow2.f32 %v1987_v38  ;;  %v1988_v42 = vmul.f32 -1.442695, %v775_v40  ;;  %v1990_v43 = vmul.f32 -1.442695, %v846_v41 }
 0x10a   :  { %2025 = vpow2.f32 %v1989_v39 }
 0x10b   :  { %2027 = vpow2.f32 %v1988_v42 }
 0x10c   :  { %2029 = vpow2.f32 %v1990_v43 }
 0x10d   :  { %2031 = vrcp.f32 %v1642_v48 }
 0x10e   :  { %2033 = vrcp.f32 %v1644_v49 }
 0x10f   :  { %2035 = vrcp.f32 %v1643_v50 }
 0x110   :  { %2037 = vrcp.f32 %v1645_v51 }
 0x116   :  { %v2024_v52 = vpop.eup %2023 }
 0x117   :  { %v2026_v53 = vpop.eup %2025  ;;  %v1646_v54 = vadd.f32 1.0, %v2024_v52 }
 0x118   :  { %v2028_v55 = vpop.eup %2027  ;;  %v1648_v56 = vadd.f32 1.0, %v2026_v53 }
 0x119   :  { %v2030_v57 = vpop.eup %2029  ;;  %2039 = vrcp.f32 %v1646_v54  ;;  %v1647_v58 = vadd.f32 1.0, %v2028_v55 }
 0x11a   :  { %2041 = vrcp.f32 %v1648_v56  ;;  %v1649_v59 = vadd.f32 1.0, %v2030_v57  ;;  %v2032_v62 = vpop.eup %2031 }
 0x11b   :  { %2043 = vrcp.f32 %v1647_v58  ;;  %v2034_v63 = vpop.eup %2033 }
 0x11c   :  { %2045 = vrcp.f32 %v1649_v59  ;;  %v2036_v0 = vpop.eup %2035 }
 0x11d   :  { %v2038_v4 = vpop.eup %2037  ;;  %v1754_v6 = vcombine.low %v2032_v62, %v2036_v0 }
 0x11e   :  { %v1755_v8 = vcombine.low %v2034_v63, %v2038_v4 }
 0x11f   :  { %v1764_v12 = vrot.slane %v1754_v6, %v3593_v5 }
 0x120   :  { %v1771_v13 = vrot.slane %v1755_v8, %v3593_v5 }
 0x122   :  { %v1786_v19 = vcombine.low %v1764_v12, %v1771_v13 }
 0x124   :  { %v1794_v16 = vrot.slane %v1786_v19, %v3593_v5 }
 0x126   :  { %v2040_v9 = vpop.eup %2039  ;;  %v914_v25 = vpop.f32.mrf.mxu0 }
 0x127   :  { %v2042_v10 = vpop.eup %2041  ;;  %v985_v26 = vpop.f32.mrf.mxu1  ;;  %v915_v28 = vadd.f32 %v914_v25, %v3582_v22 }
 0x128   :  { %v2044_v11 = vpop.eup %2043  ;;  %v916_v27 = vpop.f32.mrf.mxu0  ;;  %v986_v29 = vadd.f32 %v985_v26, %v3582_v22 }
 0x129   :  { %v2046_v14 = vpop.eup %2045  ;;  %v1756_v15 = vcombine.low %v2040_v9, %v2044_v11  ;;  %v987_v3 = vpop.f32.mrf.mxu1  ;;  %v917_v30 = vadd.f32 %v916_v27, %v3582_v22  ;;  %v1991_v32 = vmul.f32 -1.442695, %v915_v28 }
 0x12a   :  { %v1757_v18 = vcombine.low %v2042_v10, %v2046_v14  ;;  %v988_v31 = vadd.f32 %v987_v3, %v3582_v22  ;;  %v1993_v17 = vmul.f32 -1.442695, %v986_v29 }
 0x12b   :  { %v1778_v2 = vrot.slane %v1756_v15, %v3593_v5  ;;  %v1992_v33 = vmul.f32 -1.442695, %v917_v30  ;;  %2047 = vpow2.f32 %v1991_v32 }
 0x12c   :  { %v1785_v20 = vrot.slane %v1757_v18, %v3593_v5  ;;  %v1994_v34 = vmul.f32 -1.442695, %v988_v31  ;;  %2049 = vpow2.f32 %v1993_v17 }
 0x12d   :  { %2051 = vpow2.f32 %v1992_v33 }
 0x12e   :  { %v1787_v21 = vcombine.low %v1778_v2, %v1785_v20  ;;  %2053 = vpow2.f32 %v1994_v34 }
 0x130   :  { %v1801_v23 = vrot.slane %v1787_v21, %v3593_v5 }
 0x132   :  { %v1802_v24 = vcombine.low %v1794_v16, %v1801_v23 }
 0x134   :  { %1929 = vst [vmem:[%s3652_s3] sm:$0xff] %v1802_v24 }
 0x138   :  { %v2048_v46 = vpop.eup %2047 }
 0x139   :  { %v2050_v48 = vpop.eup %2049  ;;  %v1650_v51 = vadd.f32 1.0, %v2048_v46 }
 0x13a   :  { %v2052_v49 = vpop.eup %2051  ;;  %v1652_v52 = vadd.f32 1.0, %v2050_v48 }
 0x13b   :  { %v2054_v50 = vpop.eup %2053  ;;  %v1651_v53 = vadd.f32 1.0, %v2052_v49 }
 0x13c   :  { %v1653_v54 = vadd.f32 1.0, %v2054_v50 }
 0x149   :  { %v1056_v35 = vpop.f32.mrf.mxu0  ;;  %v1127_v36 = vpop.f32.mrf.mxu1 }
 0x14a   :  { %v1057_v37 = vadd.f32 %v1056_v35, %v3582_v22  ;;  %v1128_v38 = vadd.f32 %v1127_v36, %v3582_v22 }
 0x14b   :  { %v1058_v39 = vpop.f32.mrf.mxu0  ;;  %v1129_v40 = vpop.f32.mrf.mxu1 }
 0x14c   :  { %v1995_v41 = vmul.f32 -1.442695, %v1057_v37  ;;  %v1997_v42 = vmul.f32 -1.442695, %v1128_v38  ;;  %v1059_v43 = vadd.f32 %v1058_v39, %v3582_v22  ;;  %v1130_v44 = vadd.f32 %v1129_v40, %v3582_v22 }
 0x14e   :  { %2055 = vpow2.f32 %v1995_v41  ;;  %v1996_v45 = vmul.f32 -1.442695, %v1059_v43  ;;  %v1998_v47 = vmul.f32 -1.442695, %v1130_v44 }
 0x14f   :  { %2057 = vpow2.f32 %v1997_v42 }
 0x150   :  { %2059 = vpow2.f32 %v1996_v45 }
 0x151   :  { %2061 = vpow2.f32 %v1998_v47 }
 0x152   :  { %2063 = vrcp.f32 %v1650_v51 }
 0x153   :  { %2065 = vrcp.f32 %v1652_v52 }
 0x154   :  { %2067 = vrcp.f32 %v1651_v53 }
 0x155   :  { %2069 = vrcp.f32 %v1653_v54 }
 0x15b   :  { %v2056_v55 = vpop.eup %2055 }
 0x15c   :  { %v2058_v56 = vpop.eup %2057  ;;  %v1654_v57 = vadd.f32 1.0, %v2056_v55 }
 0x15d   :  { %v2060_v58 = vpop.eup %2059  ;;  %v1656_v59 = vadd.f32 1.0, %v2058_v56 }
 0x15e   :  { %v2062_v60 = vpop.eup %2061  ;;  %2071 = vrcp.f32 %v1654_v57  ;;  %v1655_v61 = vadd.f32 1.0, %v2060_v58 }
 0x15f   :  { %2073 = vrcp.f32 %v1656_v59  ;;  %v1657_v62 = vadd.f32 1.0, %v2062_v60  ;;  %v2064_v63 = vpop.eup %2063 }
 0x160   :  { %2075 = vrcp.f32 %v1655_v61  ;;  %v2066_v0 = vpop.eup %2065 }
 0x161   :  { %2077 = vrcp.f32 %v1657_v62  ;;  %v2068_v1 = vpop.eup %2067 }
 0x162   :  { %v2070_v4 = vpop.eup %2069  ;;  %v1803_v6 = vcombine.low %v2064_v63, %v2068_v1 }
 0x163   :  { %v1804_v8 = vcombine.low %v2066_v0, %v2070_v4 }
 0x164   :  { %v1813_v12 = vrot.slane %v1803_v6, %v3593_v5 }
 0x165   :  { %v1820_v13 = vrot.slane %v1804_v8, %v3593_v5 }
 0x167   :  { %v1835_v19 = vcombine.low %v1813_v12, %v1820_v13 }
 0x169   :  { %v1843_v16 = vrot.slane %v1835_v19, %v3593_v5 }
 0x16b   :  { %v2072_v9 = vpop.eup %2071  ;;  %v1198_v25 = vpop.f32.mrf.mxu0 }
 0x16c   :  { %v2074_v10 = vpop.eup %2073  ;;  %v1269_v26 = vpop.f32.mrf.mxu1  ;;  %v1199_v28 = vadd.f32 %v1198_v25, %v3582_v22 }
 0x16d   :  { %v2076_v11 = vpop.eup %2075  ;;  %v1200_v27 = vpop.f32.mrf.mxu0  ;;  %v1270_v29 = vadd.f32 %v1269_v26, %v3582_v22 }
 0x16e   :  { %v2078_v14 = vpop.eup %2077  ;;  %v1805_v15 = vcombine.low %v2072_v9, %v2076_v11  ;;  %v1271_v3 = vpop.f32.mrf.mxu1  ;;  %v1201_v30 = vadd.f32 %v1200_v27, %v3582_v22  ;;  %v1999_v32 = vmul.f32 -1.442695, %v1199_v28 }
 0x16f   :  { %v1806_v18 = vcombine.low %v2074_v10, %v2078_v14  ;;  %v1272_v31 = vadd.f32 %v1271_v3, %v3582_v22  ;;  %v2001_v17 = vmul.f32 -1.442695, %v1270_v29 }
 0x170   :  { %v1827_v2 = vrot.slane %v1805_v15, %v3593_v5  ;;  %v2000_v33 = vmul.f32 -1.442695, %v1201_v30  ;;  %2079 = vpow2.f32 %v1999_v32 }
 0x171   :  { %v1834_v20 = vrot.slane %v1806_v18, %v3593_v5  ;;  %v2002_v34 = vmul.f32 -1.442695, %v1272_v31  ;;  %2081 = vpow2.f32 %v2001_v17 }
 0x172   :  { %2083 = vpow2.f32 %v2000_v33 }
 0x173   :  { %v1836_v21 = vcombine.low %v1827_v2, %v1834_v20  ;;  %2085 = vpow2.f32 %v2002_v34 }
 0x175   :  { %v1850_v23 = vrot.slane %v1836_v21, %v3593_v5 }
 0x177   :  { %v1851_v24 = vcombine.low %v1843_v16, %v1850_v23 }
 0x179   :  { %1930 = vst [vmem:[%s3652_s3 + $0x8] sm:$0xff] %v1851_v24 }
 0x17d   :  { %v2080_v46 = vpop.eup %2079 }
 0x17e   :  { %v2082_v48 = vpop.eup %2081  ;;  %v1658_v51 = vadd.f32 1.0, %v2080_v46 }
 0x17f   :  { %v2084_v49 = vpop.eup %2083  ;;  %v1660_v52 = vadd.f32 1.0, %v2082_v48 }
 0x180   :  { %v2086_v50 = vpop.eup %2085  ;;  %v1659_v53 = vadd.f32 1.0, %v2084_v49 }
 0x181   :  { %v1661_v54 = vadd.f32 1.0, %v2086_v50 }
 0x18d   :  { %v1340_v35 = vpop.f32.mrf.mxu0  ;;  %v1411_v36 = vpop.f32.mrf.mxu1 }
 0x18e   :  { %v1341_v37 = vadd.f32 %v1340_v35, %v3582_v22  ;;  %v1412_v38 = vadd.f32 %v1411_v36, %v3582_v22 }
 0x18f   :  { %v1342_v39 = vpop.f32.mrf.mxu0  ;;  %v1413_v40 = vpop.f32.mrf.mxu1 }
 0x190   :  { %v2003_v41 = vmul.f32 -1.442695, %v1341_v37  ;;  %v2005_v42 = vmul.f32 -1.442695, %v1412_v38  ;;  %v1343_v43 = vadd.f32 %v1342_v39, %v3582_v22  ;;  %v1414_v44 = vadd.f32 %v1413_v40, %v3582_v22 }
 0x192   :  { %2087 = vpow2.f32 %v2003_v41  ;;  %v2004_v45 = vmul.f32 -1.442695, %v1343_v43  ;;  %v2006_v47 = vmul.f32 -1.442695, %v1414_v44 }
 0x193   :  { %2089 = vpow2.f32 %v2005_v42 }
 0x194   :  { %2091 = vpow2.f32 %v2004_v45 }
 0x195   :  { %2093 = vpow2.f32 %v2006_v47 }
 0x196   :  { %2095 = vrcp.f32 %v1658_v51 }
 0x197   :  { %2097 = vrcp.f32 %v1660_v52 }
 0x198   :  { %2099 = vrcp.f32 %v1659_v53 }
 0x199   :  { %2101 = vrcp.f32 %v1661_v54 }
 0x19f   :  { %v2088_v55 = vpop.eup %2087 }
 0x1a0   :  { %v2090_v56 = vpop.eup %2089  ;;  %v1662_v57 = vadd.f32 1.0, %v2088_v55 }
 0x1a1   :  { %v2092_v58 = vpop.eup %2091  ;;  %v1664_v59 = vadd.f32 1.0, %v2090_v56 }
 0x1a2   :  { %v2094_v60 = vpop.eup %2093  ;;  %2103 = vrcp.f32 %v1662_v57  ;;  %v1663_v61 = vadd.f32 1.0, %v2092_v58 }
 0x1a3   :  { %2105 = vrcp.f32 %v1664_v59  ;;  %v1665_v62 = vadd.f32 1.0, %v2094_v60  ;;  %v2096_v63 = vpop.eup %2095 }
 0x1a4   :  { %2107 = vrcp.f32 %v1663_v61  ;;  %v2098_v0 = vpop.eup %2097 }
 0x1a5   :  { %2109 = vrcp.f32 %v1665_v62  ;;  %v2100_v1 = vpop.eup %2099 }
 0x1a6   :  { %v2102_v4 = vpop.eup %2101  ;;  %v1852_v6 = vcombine.low %v2096_v63, %v2100_v1 }
 0x1a7   :  { %v1853_v8 = vcombine.low %v2098_v0, %v2102_v4 }
 0x1a8   :  { %v1862_v18 = vrot.slane %v1852_v6, %v3593_v5 }
 0x1a9   :  { %v1869_v2 = vrot.slane %v1853_v8, %v3593_v5 }
 0x1ab   :  { %v1884_v29 = vcombine.low %v1862_v18, %v1869_v2 }
 0x1ad   :  { %v1892_v17 = vrot.slane %v1884_v29, %v3593_v5 }
 0x1af   :  { %v2104_v9 = vpop.eup %2103  ;;  %v1482_v10 = vpop.f32.mrf.mxu0 }
 0x1b0   :  { %v1553_v11 = vpop.f32.mrf.mxu1  ;;  %v2106_v12 = vpop.eup %2105  ;;  %v1483_v13 = vadd.f32 %v1482_v10, %v3582_v22 }
 0x1b1   :  { %v1554_v14 = vadd.f32 %v1553_v11, %v3582_v22  ;;  %v2108_v15 = vpop.eup %2107  ;;  %v1484_v19 = vpop.f32.mrf.mxu0 }
 0x1b2   :  { %v1555_v20 = vpop.f32.mrf.mxu1  ;;  %v2110_v21 = vpop.eup %2109  ;;  %v1854_v16 = vcombine.low %v2104_v9, %v2108_v15  ;;  %v2007_v23 = vmul.f32 -1.442695, %v1483_v13  ;;  %v1485_v25 = vadd.f32 %v1484_v19, %v3582_v22 }
 0x1b3   :  { %v2009_v24 = vmul.f32 -1.442695, %v1554_v14  ;;  %v1855_v26 = vcombine.low %v2106_v12, %v2110_v21  ;;  %v1556_v27 = vadd.f32 %v1555_v20, %v3582_v22 }
 0x1b4   :  { %v1876_v28 = vrot.slane %v1854_v16, %v3593_v5  ;;  %2111 = vpow2.f32 %v2007_v23  ;;  %v2008_v3 = vmul.f32 -1.442695, %v1485_v25 }
 0x1b5   :  { %v1883_v30 = vrot.slane %v1855_v26, %v3593_v5  ;;  %2113 = vpow2.f32 %v2009_v24  ;;  %v2010_v31 = vmul.f32 -1.442695, %v1556_v27 }
 0x1b6   :  { %2115 = vpow2.f32 %v2008_v3 }
 0x1b7   :  { %v1885_v32 = vcombine.low %v1876_v28, %v1883_v30  ;;  %2117 = vpow2.f32 %v2010_v31 }
 0x1b9   :  { %v1899_v33 = vrot.slane %v1885_v32, %v3593_v5 }
 0x1bb   :  { %v1900_v34 = vcombine.low %v1892_v17, %v1899_v33 }
 0x1bd   :  { %1931 = vst [vmem:[%s3652_s3 + $0x10] sm:$0xff] %v1900_v34 }
 0x1c1   :  { %v2112_v22 = vpop.eup %2111 }
 0x1c2   :  { %v2114_v35 = vpop.eup %2113  ;;  %v1666_v36 = vadd.f32 1.0, %v2112_v22 }
 0x1c3   :  { %v2116_v37 = vpop.eup %2115  ;;  %v1668_v38 = vadd.f32 1.0, %v2114_v35 }
 0x1c4   :  { %v2118_v39 = vpop.eup %2117  ;;  %2119 = vrcp.f32 %v1666_v36  ;;  %v1667_v40 = vadd.f32 1.0, %v2116_v37 }
 0x1c5   :  { %2121 = vrcp.f32 %v1668_v38  ;;  %v1669_v41 = vadd.f32 1.0, %v2118_v39 }
 0x1c6   :  { %2123 = vrcp.f32 %v1667_v40 }
 0x1c7   :  { %2125 = vrcp.f32 %v1669_v41 }
 0x1d1   :  { %v2120_v42 = vpop.eup %2119 }
 0x1d2   :  { %v2122_v43 = vpop.eup %2121 }
 0x1d3   :  { %v2124_v44 = vpop.eup %2123 }
 0x1d4   :  { %v2126_v45 = vpop.eup %2125  ;;  %v1901_v46 = vcombine.low %v2120_v42, %v2124_v44 }
 0x1d5   :  { %v1902_v47 = vcombine.low %v2122_v43, %v2126_v45 }
 0x1d6   :  { %v1909_v48 = vrot.slane %v1901_v46, %v3593_v5 }
 0x1d7   :  { %v1916_v49 = vrot.slane %v1902_v47, %v3593_v5 }
 0x1d9   :  { %v1917_v50 = vcombine.low %v1909_v48, %v1916_v49 }
 0x1db   :  { %v1924_v51 = vrot.slane %v1917_v50, %v3593_v5 }
 0x1dd   :  { %1936 = vst.msk [vmem:[%s3652_s3 + $0x18] sm:$0xf] %vm1934_vm2, %v1924_v51 }

</bundles_post_ra>
